<compile_context>
chip_gen: v7x
topology: tpu7x:2x2x1
jax: 0.10.0
libtpu: 0.0.40
codegen_flags: <defaults>
</compile_context>

<pallas_src>
import functools

import jax
import jax.numpy as jnp
from jax.experimental import pallas as pl
from jax.experimental.pallas import tpu as pltpu


# ---------------------------------------------------------------------------
# Pallas kernels
# ---------------------------------------------------------------------------

def _block0_kernel(xe_ref, xo_ref, w_ref, shift_ref, o_ref, s_ref):
    """Conv2d(3->64, k=7, s=2, p=3) + BN(eval) + ReLU + MaxPool2d(2,2).

    One grid step = one batch image.
      xe_ref/xo_ref: [35*32, 21] bf16. Row a*32+j holds the 7*3 values
          xpad[2a(+1), 2j+dw, ci] (dw-major, ci-minor): a W-direction im2col at
          stride 2 of the even/odd padded rows, so the 7 kh-taps are row shifts.
      w_ref:     [7, 21, 64] bf16 (BN scale folded in).
      shift_ref: [1, 64]  f32 (conv bias + BN shift folded).
      o_ref:     [264, 64] bf16; rows hp*16+wp = pooled 16x16x64, 256..263 pad.
      s_ref:     [1024, 64] f32 scratch.
    """
    M = 1024                                    # 32*32 conv output positions
    acc = None
    for dh in range(7):
        src = xe_ref if dh % 2 == 0 else xo_ref
        lhs = src[pl.ds((dh // 2) * 32, M), :]  # kh tap == row shift
        d = jnp.dot(lhs, w_ref[dh], preferred_element_type=jnp.float32)
        acc = d if acc is None else acc + d
    y = jnp.maximum(acc + shift_ref[...], 0.0)  # BN shift + ReLU
    # horizontal (w) max of the 2x2 pooling window
    yw = jnp.maximum(y[:M - 1, :], y[1:, :])
    s_ref[pl.ds(0, M - 1), :] = yw
    # vertical max + stride-2 decimation in h and w
    for hp in range(16):
        r0 = (2 * hp) * 32
        a = s_ref[pl.ds(r0, 16, stride=2), :]
        b = s_ref[pl.ds(r0 + 32, 16, stride=2), :]
        o_ref[pl.ds(hp * 16, 16), :] = jnp.maximum(a, b).astype(o_ref.dtype)
    o_ref[pl.ds(256, 8), :] = jnp.zeros((8, 64), o_ref.dtype)


def _block1_kernel(x_ref, w_ref, shift_ref, o_ref, s_ref):
    """Conv2d(64->128, k=3) + BN(eval) + ReLU + MaxPool2d(2,2).

    One grid step = one batch image.
      x_ref: [264, 64] bf16; row h*16+w of the 16x16x64 input (rows>=256 pad).
      w_ref: [9, 64, 128] bf16; shift_ref: [1, 128] f32.
      o_ref: [56, 128] bf16; rows hp*7+wp = pooled 7x7x128, rows 49..55 pad.
      s_ref: [224, 128] f32 scratch.
    """
    M = 224
    acc = None
    for dh in range(3):
        for dw in range(3):
            lhs = x_ref[pl.ds(dh * 16 + dw, M), :]
            d = jnp.dot(lhs, w_ref[dh * 3 + dw],
                        preferred_element_type=jnp.float32)
            acc = d if acc is None else acc + d
    y = jnp.maximum(acc + shift_ref[...], 0.0)
    yw = jnp.maximum(y[:M - 1, :], y[1:, :])
    s_ref[pl.ds(0, M - 1), :] = yw
    for hp in range(7):
        r0 = (2 * hp) * 16
        a = s_ref[pl.ds(r0, 7, stride=2), :]
        b = s_ref[pl.ds(r0 + 16, 7, stride=2), :]
        o_ref[pl.ds(hp * 7, 7), :] = jnp.maximum(a, b).astype(o_ref.dtype)
    o_ref[pl.ds(49, 7), :] = jnp.zeros((7, 128), o_ref.dtype)


def _block2_head_kernel(x_ref, w_ref, shift_ref, wfc1_ref, b1_ref, wfc2_ref,
                        b2_ref, o_ref, *, batch):
    """Conv2d(128->256, k=3) + BN + ReLU, AdaptiveAvgPool2d((2,2)),
    torch.flatten (NCHW order), Linear(1024->512) + ReLU, Linear(512->10).

      x_ref:    [batch*56, 128] bf16; per image rows h*7+w of 7x7x128 (+pad).
      w_ref:    [9, 128, 256] bf16; shift_ref [1, 256] f32.
      wfc1_ref: [4, 256, 512] bf16; fc1 weight de-interleaved per pooling
                window, pre-scaled by 1/9 (averaging factor).
      b1_ref:   [1, 512] f32; wfc2_ref: [512, 10] bf16; b2_ref: [1, 10] f32.
      o_ref:    [batch, 10] f32.
    """
    M = (batch - 1) * 56 + 40                   # covers all valid 5x5 anchors
    acc = None
    for dh in range(3):
        for dw in range(3):
            lhs = x_ref[pl.ds(dh * 7 + dw, M), :]
            d = jnp.dot(lhs, w_ref[dh * 3 + dw],
                        preferred_element_type=jnp.float32)
            acc = d if acc is None else acc + d
    y = jnp.maximum(acc + shift_ref[...], 0.0)                # [M, 256]
    # overlapping 3x3 window sums of the 5x5 map (adaptive pool to 2x2)
    sw = y[:M - 2, :] + y[1:M - 1, :] + y[2:, :]
    sh = sw[:M - 16, :] + sw[7:M - 9, :] + sw[14:M - 2, :]
    # fc1 accumulated over the 4 pooled windows (1/9 folded into wfc1)
    h1 = None
    for win in range(4):
        ph, pw = win // 2, win % 2
        rows = []
        for n in range(batch):
            r = n * 56 + 14 * ph + 2 * pw
            rows.append(sh[r:r + 1, :])
        pooled = jnp.concatenate(rows, axis=0).astype(jnp.bfloat16)  # [batch,256]
        d = jnp.dot(pooled, wfc1_ref[win], preferred_element_type=jnp.float32)
        h1 = d if h1 is None else h1 + d
    h1 = jnp.maximum(h1 + b1_ref[...], 0.0).astype(jnp.bfloat16)
    out = jnp.dot(h1, wfc2_ref[...], preferred_element_type=jnp.float32)
    o_ref[...] = out + b2_ref[...]


# ---------------------------------------------------------------------------
# Forward pass (JAX glue is only: NCHW->NHWC, pad, and the tiny stem restructure)
# ---------------------------------------------------------------------------

def model_forward(x_nchw, prep):
    """Forward pass of BasicArbitraryCNNmodel (NCHW input, eval-mode BN)."""
    n, c, h, w = x_nchw.shape
    assert (c, h, w) == (3, 64, 64), "kernel constants assume 3x64x64 inputs"
    vmem = 32 * 1024 * 1024

    x = jnp.transpose(x_nchw, (0, 2, 3, 1))                   # NHWC
    xpad = jnp.pad(x, ((0, 0), (3, 3), (3, 3), (0, 0)))       # [n,70,70,3]
    # W-direction im2col at stride 2 (tiny: ~3x the 59 KB padded stem input),
    # split by padded-row parity so the 7 kh-taps become in-kernel row shifts.
    cols = [xpad[:, :, dw:dw + 63:2, :] for dw in range(7)]   # each [n,70,32,3]
    xcol = jnp.stack(cols, axis=3).reshape(n, 70, 32, 21)
    xe = xcol[:, 0::2].reshape(n * 1120, 21).astype(jnp.bfloat16)
    xo = xcol[:, 1::2].reshape(n * 1120, 21).astype(jnp.bfloat16)

    # --- block0: conv7x7/s2/p3 + BN + ReLU + maxpool(2,2) -> [n*264, 64] -----
    a0 = pl.pallas_call(
        _block0_kernel,
        out_shape=jax.ShapeDtypeStruct((n * 264, 64), jnp.bfloat16),
        grid=(n,),
        in_specs=[
            pl.BlockSpec((1120, 21), lambda i: (i, 0)),
            pl.BlockSpec((1120, 21), lambda i: (i, 0)),
            pl.BlockSpec((7, 21, 64), lambda i: (0, 0, 0)),
            pl.BlockSpec((1, 64), lambda i: (0, 0)),
        ],
        out_specs=pl.BlockSpec((264, 64), lambda i: (i, 0)),
        scratch_shapes=[pltpu.VMEM((1024, 64), jnp.float32)],
        compiler_params=pltpu.CompilerParams(
            dimension_semantics=("parallel",), vmem_limit_bytes=vmem),
    )(xe, xo, prep["w0"], prep["shift0"])

    # --- block1: conv3x3 + BN + ReLU + maxpool(2,2) -> [n*56, 128] -----------
    a1 = pl.pallas_call(
        _block1_kernel,
        out_shape=jax.ShapeDtypeStruct((n * 56, 128), jnp.bfloat16),
        grid=(n,),
        in_specs=[
            pl.BlockSpec((264, 64), lambda i: (i, 0)),
            pl.BlockSpec((9, 64, 128), lambda i: (0, 0, 0)),
            pl.BlockSpec((1, 128), lambda i: (0, 0)),
        ],
        out_specs=pl.BlockSpec((56, 128), lambda i: (i, 0)),
        scratch_shapes=[pltpu.VMEM((224, 128), jnp.float32)],
        compiler_params=pltpu.CompilerParams(
            dimension_semantics=("parallel",), vmem_limit_bytes=vmem),
    )(a0, prep["w1"], prep["shift1"])

    # --- block2 + adaptive pool + MLP head -> [n, 10] ------------------------
    out = pl.pallas_call(
        functools.partial(_block2_head_kernel, batch=n),
        out_shape=jax.ShapeDtypeStruct((n, 10), jnp.float32),
        compiler_params=pltpu.CompilerParams(vmem_limit_bytes=vmem),
    )(a1, prep["w2"], prep["shift2"], prep["wfc1"], prep["b1"],
      prep["wfc2"], prep["b2"])
    return out


# ---------------------------------------------------------------------------
# Parameters (torch-equivalent shapes) and one-time kernel-layout preparation
# ---------------------------------------------------------------------------

def init_params(key, in_channels=3, num_outputs=10):
    """Random parameters matching the torch module's shapes (conv in HWIO)."""
    hc = 64

    def conv_bn(k, cin, cout, ks):
        ks_ = jax.random.split(k, 6)
        fan_in = ks * ks * cin
        w = jax.random.normal(ks_[0], (ks, ks, cin, cout), jnp.float32) / jnp.sqrt(fan_in)
        b = 0.1 * jax.random.normal(ks_[1], (cout,), jnp.float32)
        gamma = 1.0 + 0.1 * jax.random.normal(ks_[2], (cout,), jnp.float32)
        beta = 0.1 * jax.random.normal(ks_[3], (cout,), jnp.float32)
        mean = 0.1 * jax.random.normal(ks_[4], (cout,), jnp.float32)
        var = 0.5 + jax.random.uniform(ks_[5], (cout,), jnp.float32)
        return (w, b, gamma, beta, mean, var)

    k0, k1, k2, k3, k4 = jax.random.split(key, 5)
    params = {
        "block0": conv_bn(k0, in_channels, hc, 7),
        "block1": conv_bn(k1, hc, hc * 2, 3),
        "block2": conv_bn(k2, hc * 2, hc * 4, 3),
    }
    kk = jax.random.split(k3, 2)
    params["fc1_w"] = jax.random.normal(kk[0], (1024, 512), jnp.float32) / jnp.sqrt(1024.0)
    params["fc1_b"] = 0.1 * jax.random.normal(kk[1], (512,), jnp.float32)
    kk2 = jax.random.split(k4, 2)
    params["fc2_w"] = jax.random.normal(kk2[0], (512, num_outputs), jnp.float32) / jnp.sqrt(512.0)
    params["fc2_b"] = 0.1 * jax.random.normal(kk2[1], (num_outputs,), jnp.float32)
    return params


def prepare_params(params, eps=1e-5):
    """Fold BN (eval, running stats) into conv weights/shift, cast matmul
    operands to bf16, and pre-arrange the layouts the kernels expect.
    Runs once, outside the jitted forward."""
    def fold(block):
        w, b, gamma, beta, mean, var = block
        s = gamma / jnp.sqrt(var + eps)               # [cout]
        return w * s, beta + (b - mean) * s           # scale folded into weights

    w0, sh0 = fold(params["block0"])
    w1, sh1 = fold(params["block1"])
    w2, sh2 = fold(params["block2"])
    return {
        "w0": w0.reshape(7, 7 * 3, 64).astype(jnp.bfloat16),
        "shift0": sh0.reshape(1, 64).astype(jnp.float32),
        "w1": w1.reshape(9, 64, 128).astype(jnp.bfloat16),
        "shift1": sh1.reshape(1, 128).astype(jnp.float32),
        "w2": w2.reshape(9, 128, 256).astype(jnp.bfloat16),
        "shift2": sh2.reshape(1, 256).astype(jnp.float32),
        # torch.flatten of NCHW gives feature index c*4 + (h*2 + w):
        # de-interleave fc1 per pooling window and fold in the 1/9 averaging.
        "wfc1": (params["fc1_w"].reshape(256, 4, 512).transpose(1, 0, 2) / 9.0
                 ).astype(jnp.bfloat16),
        "b1": params["fc1_b"].reshape(1, 512).astype(jnp.float32),
        "wfc2": params["fc2_w"].astype(jnp.bfloat16),
        "b2": params["fc2_b"].reshape(1, -1).astype(jnp.float32),
    }


if __name__ == "__main__":
    key = jax.random.PRNGKey(0)
    pkey, xkey = jax.random.split(key)
    params = init_params(pkey)
    prep = prepare_params(params)
    # Input matches the PyTorch NCHW convention: [batch=2, C=3, H=64, W=64]
    x = jax.random.normal(xkey, (2, 3, 64, 64), jnp.float32)

    fwd = jax.jit(model_forward)
    out = jax.block_until_ready(fwd(x, prep))

    assert out.shape == (2, 10), out.shape
    assert bool(jnp.all(jnp.isfinite(out)))
    print("KERNEL_OK")
</pallas_src>

<mosaic_0001>
module attributes {stable_mosaic.version = 11 : i64} {
  func.func @_block0_kernel(%arg0: i32, %arg1: memref<1120x21xbf16, #tpu.memory_space<vmem>>, %arg2: memref<1120x21xbf16, #tpu.memory_space<vmem>>, %arg3: memref<7x21x64xbf16, #tpu.memory_space<vmem>>, %arg4: memref<1x64xf32, #tpu.memory_space<vmem>>, %arg5: memref<264x64xbf16, #tpu.memory_space<vmem>>, %arg6: memref<1024x64xf32, #tpu.memory_space<vmem>>) attributes {dimension_semantics = [#tpu.dimension_semantics<parallel>], iteration_bounds = array<i64: 2>, scalar_prefetch = 0 : i64, scratch_operands = 1 : i64, tpu.core_type = #tpu.core_type<tc>, window_params = [{transform_indices = @transform_0, window_bounds = array<i64: 1120, 21>}, {transform_indices = @transform_1, window_bounds = array<i64: 1120, 21>}, {pipeline_mode = #tpu.pipeline_mode<synchronous>, transform_indices = @transform_2, window_bounds = array<i64: 7, 21, 64>}, {pipeline_mode = #tpu.pipeline_mode<synchronous>, transform_indices = @transform_3, window_bounds = array<i64: 1, 64>}, {transform_indices = @transform_4, window_bounds = array<i64: 264, 64>}]} {
    %c0 = arith.constant 0 : index
    %c0_0 = arith.constant 0 : index
    %0 = vector.load %arg1[%c0, %c0_0] : memref<1120x21xbf16, #tpu.memory_space<vmem>>, vector<1024x21xbf16>
    %c0_1 = arith.constant 0 : index
    %c0_2 = arith.constant 0 : index
    %c0_3 = arith.constant 0 : index
    %1 = vector.load %arg3[%c0_1, %c0_2, %c0_3] : memref<7x21x64xbf16, #tpu.memory_space<vmem>>, vector<1x21x64xbf16>
    %2 = vector.shape_cast %1 : vector<1x21x64xbf16> to vector<21x64xbf16>
    %cst = arith.constant dense<0.000000e+00> : vector<1024x64xf32>
    %3 = tpu.matmul %0, %2, %cst {dimension_numbers = #tpu.dot_dimension_numbers<[1], [0], [0], [1], [0, 0, 1, 1], [], []>} : vector<1024x21xbf16>, vector<21x64xbf16>, vector<1024x64xf32> -> vector<1024x64xf32>
    %c0_4 = arith.constant 0 : index
    %c0_5 = arith.constant 0 : index
    %4 = vector.load %arg2[%c0_4, %c0_5] : memref<1120x21xbf16, #tpu.memory_space<vmem>>, vector<1024x21xbf16>
    %c1 = arith.constant 1 : index
    %c0_6 = arith.constant 0 : index
    %c0_7 = arith.constant 0 : index
    %5 = vector.load %arg3[%c1, %c0_6, %c0_7] : memref<7x21x64xbf16, #tpu.memory_space<vmem>>, vector<1x21x64xbf16>
    %6 = vector.shape_cast %5 : vector<1x21x64xbf16> to vector<21x64xbf16>
    %cst_8 = arith.constant dense<0.000000e+00> : vector<1024x64xf32>
    %7 = tpu.matmul %4, %6, %cst_8 {dimension_numbers = #tpu.dot_dimension_numbers<[1], [0], [0], [1], [0, 0, 1, 1], [], []>} : vector<1024x21xbf16>, vector<21x64xbf16>, vector<1024x64xf32> -> vector<1024x64xf32>
    %8 = arith.addf %3, %7 : vector<1024x64xf32>
    %c32 = arith.constant 32 : index
    %c0_9 = arith.constant 0 : index
    %9 = vector.load %arg1[%c32, %c0_9] : memref<1120x21xbf16, #tpu.memory_space<vmem>>, vector<1024x21xbf16>
    %c2 = arith.constant 2 : index
    %c0_10 = arith.constant 0 : index
    %c0_11 = arith.constant 0 : index
    %10 = vector.load %arg3[%c2, %c0_10, %c0_11] : memref<7x21x64xbf16, #tpu.memory_space<vmem>>, vector<1x21x64xbf16>
    %11 = vector.shape_cast %10 : vector<1x21x64xbf16> to vector<21x64xbf16>
    %cst_12 = arith.constant dense<0.000000e+00> : vector<1024x64xf32>
    %12 = tpu.matmul %9, %11, %cst_12 {dimension_numbers = #tpu.dot_dimension_numbers<[1], [0], [0], [1], [0, 0, 1, 1], [], []>} : vector<1024x21xbf16>, vector<21x64xbf16>, vector<1024x64xf32> -> vector<1024x64xf32>
    %13 = arith.addf %8, %12 : vector<1024x64xf32>
    %c32_13 = arith.constant 32 : index
    %c0_14 = arith.constant 0 : index
    %14 = vector.load %arg2[%c32_13, %c0_14] : memref<1120x21xbf16, #tpu.memory_space<vmem>>, vector<1024x21xbf16>
    %c3 = arith.constant 3 : index
    %c0_15 = arith.constant 0 : index
    %c0_16 = arith.constant 0 : index
    %15 = vector.load %arg3[%c3, %c0_15, %c0_16] : memref<7x21x64xbf16, #tpu.memory_space<vmem>>, vector<1x21x64xbf16>
    %16 = vector.shape_cast %15 : vector<1x21x64xbf16> to vector<21x64xbf16>
    %cst_17 = arith.constant dense<0.000000e+00> : vector<1024x64xf32>
    %17 = tpu.matmul %14, %16, %cst_17 {dimension_numbers = #tpu.dot_dimension_numbers<[1], [0], [0], [1], [0, 0, 1, 1], [], []>} : vector<1024x21xbf16>, vector<21x64xbf16>, vector<1024x64xf32> -> vector<1024x64xf32>
    %18 = arith.addf %13, %17 : vector<1024x64xf32>
    %c64 = arith.constant 64 : index
    %c0_18 = arith.constant 0 : index
    %19 = vector.load %arg1[%c64, %c0_18] : memref<1120x21xbf16, #tpu.memory_space<vmem>>, vector<1024x21xbf16>
    %c4 = arith.constant 4 : index
    %c0_19 = arith.constant 0 : index
    %c0_20 = arith.constant 0 : index
    %20 = vector.load %arg3[%c4, %c0_19, %c0_20] : memref<7x21x64xbf16, #tpu.memory_space<vmem>>, vector<1x21x64xbf16>
    %21 = vector.shape_cast %20 : vector<1x21x64xbf16> to vector<21x64xbf16>
    %cst_21 = arith.constant dense<0.000000e+00> : vector<1024x64xf32>
    %22 = tpu.matmul %19, %21, %cst_21 {dimension_numbers = #tpu.dot_dimension_numbers<[1], [0], [0], [1], [0, 0, 1, 1], [], []>} : vector<1024x21xbf16>, vector<21x64xbf16>, vector<1024x64xf32> -> vector<1024x64xf32>
    %23 = arith.addf %18, %22 : vector<1024x64xf32>
    %c64_22 = arith.constant 64 : index
    %c0_23 = arith.constant 0 : index
    %24 = vector.load %arg2[%c64_22, %c0_23] : memref<1120x21xbf16, #tpu.memory_space<vmem>>, vector<1024x21xbf16>
    %c5 = arith.constant 5 : index
    %c0_24 = arith.constant 0 : index
    %c0_25 = arith.constant 0 : index
    %25 = vector.load %arg3[%c5, %c0_24, %c0_25] : memref<7x21x64xbf16, #tpu.memory_space<vmem>>, vector<1x21x64xbf16>
    %26 = vector.shape_cast %25 : vector<1x21x64xbf16> to vector<21x64xbf16>
    %cst_26 = arith.constant dense<0.000000e+00> : vector<1024x64xf32>
    %27 = tpu.matmul %24, %26, %cst_26 {dimension_numbers = #tpu.dot_dimension_numbers<[1], [0], [0], [1], [0, 0, 1, 1], [], []>} : vector<1024x21xbf16>, vector<21x64xbf16>, vector<1024x64xf32> -> vector<1024x64xf32>
    %28 = arith.addf %23, %27 : vector<1024x64xf32>
    %c96 = arith.constant 96 : index
    %c0_27 = arith.constant 0 : index
    %29 = vector.load %arg1[%c96, %c0_27] : memref<1120x21xbf16, #tpu.memory_space<vmem>>, vector<1024x21xbf16>
    %c6 = arith.constant 6 : index
    %c0_28 = arith.constant 0 : index
    %c0_29 = arith.constant 0 : index
    %30 = vector.load %arg3[%c6, %c0_28, %c0_29] : memref<7x21x64xbf16, #tpu.memory_space<vmem>>, vector<1x21x64xbf16>
    %31 = vector.shape_cast %30 : vector<1x21x64xbf16> to vector<21x64xbf16>
    %cst_30 = arith.constant dense<0.000000e+00> : vector<1024x64xf32>
    %32 = tpu.matmul %29, %31, %cst_30 {dimension_numbers = #tpu.dot_dimension_numbers<[1], [0], [0], [1], [0, 0, 1, 1], [], []>} : vector<1024x21xbf16>, vector<21x64xbf16>, vector<1024x64xf32> -> vector<1024x64xf32>
    %33 = arith.addf %28, %32 : vector<1024x64xf32>
    %c0_31 = arith.constant 0 : index
    %c0_32 = arith.constant 0 : index
    %34 = vector.load %arg4[%c0_31, %c0_32] : memref<1x64xf32, #tpu.memory_space<vmem>>, vector<1x64xf32>
    %35 = vector.broadcast %34 : vector<1x64xf32> to vector<1024x64xf32>
    %36 = arith.addf %33, %35 : vector<1024x64xf32>
    %cst_33 = arith.constant 0.000000e+00 : f32
    %37 = vector.broadcast %cst_33 : f32 to vector<1024x64xf32>
    %38 = arith.maximumf %36, %37 : vector<1024x64xf32>
    %39 = vector.extract_strided_slice %38 {offsets = [0, 0], sizes = [1023, 64], strides = [1, 1]} : vector<1024x64xf32> to vector<1023x64xf32>
    %40 = vector.extract_strided_slice %38 {offsets = [1, 0], sizes = [1023, 64], strides = [1, 1]} : vector<1024x64xf32> to vector<1023x64xf32>
    %41 = arith.maximumf %39, %40 : vector<1023x64xf32>
    %c0_34 = arith.constant 0 : index
    %c0_35 = arith.constant 0 : index
    %42 = vector.load %arg6[%c0_34, %c0_35] : memref<1024x64xf32, #tpu.memory_space<vmem>>, vector<1023x64xf32>
    tpu.vector_store %arg6[%c0_34, %c0_35], %41 {strides = array<i32>} : memref<1024x64xf32, #tpu.memory_space<vmem>>, vector<1023x64xf32>,
    %c0_36 = arith.constant 0 : index
    %c0_37 = arith.constant 0 : index
    %43 = tpu.strided_load %arg6[%c0_36, %c0_37] {strides = array<i32: 2, 1>} : memref<1024x64xf32, #tpu.memory_space<vmem>>, vector<16x64xf32>
    %c32_38 = arith.constant 32 : index
    %c0_39 = arith.constant 0 : index
    %44 = tpu.strided_load %arg6[%c32_38, %c0_39] {strides = array<i32: 2, 1>} : memref<1024x64xf32, #tpu.memory_space<vmem>>, vector<16x64xf32>
    %45 = arith.maximumf %43, %44 : vector<16x64xf32>
    %46 = arith.truncf %45 : vector<16x64xf32> to vector<16x64xbf16>
    %c0_40 = arith.constant 0 : index
    %c0_41 = arith.constant 0 : index
    %47 = vector.load %arg5[%c0_40, %c0_41] : memref<264x64xbf16, #tpu.memory_space<vmem>>, vector<16x64xbf16>
    tpu.vector_store %arg5[%c0_40, %c0_41], %46 {strides = array<i32>} : memref<264x64xbf16, #tpu.memory_space<vmem>>, vector<16x64xbf16>,
    %c64_42 = arith.constant 64 : index
    %c0_43 = arith.constant 0 : index
    %48 = tpu.strided_load %arg6[%c64_42, %c0_43] {strides = array<i32: 2, 1>} : memref<1024x64xf32, #tpu.memory_space<vmem>>, vector<16x64xf32>
    %c96_44 = arith.constant 96 : index
    %c0_45 = arith.constant 0 : index
    %49 = tpu.strided_load %arg6[%c96_44, %c0_45] {strides = array<i32: 2, 1>} : memref<1024x64xf32, #tpu.memory_space<vmem>>, vector<16x64xf32>
    %50 = arith.maximumf %48, %49 : vector<16x64xf32>
    %51 = arith.truncf %50 : vector<16x64xf32> to vector<16x64xbf16>
    %c16 = arith.constant 16 : index
    %c0_46 = arith.constant 0 : index
    %52 = vector.load %arg5[%c16, %c0_46] : memref<264x64xbf16, #tpu.memory_space<vmem>>, vector<16x64xbf16>
    tpu.vector_store %arg5[%c16, %c0_46], %51 {strides = array<i32>} : memref<264x64xbf16, #tpu.memory_space<vmem>>, vector<16x64xbf16>,
    %c128 = arith.constant 128 : index
    %c0_47 = arith.constant 0 : index
    %53 = tpu.strided_load %arg6[%c128, %c0_47] {strides = array<i32: 2, 1>} : memref<1024x64xf32, #tpu.memory_space<vmem>>, vector<16x64xf32>
    %c160 = arith.constant 160 : index
    %c0_48 = arith.constant 0 : index
    %54 = tpu.strided_load %arg6[%c160, %c0_48] {strides = array<i32: 2, 1>} : memref<1024x64xf32, #tpu.memory_space<vmem>>, vector<16x64xf32>
    %55 = arith.maximumf %53, %54 : vector<16x64xf32>
    %56 = arith.truncf %55 : vector<16x64xf32> to vector<16x64xbf16>
    %c32_49 = arith.constant 32 : index
    %c0_50 = arith.constant 0 : index
    %57 = vector.load %arg5[%c32_49, %c0_50] : memref<264x64xbf16, #tpu.memory_space<vmem>>, vector<16x64xbf16>
    tpu.vector_store %arg5[%c32_49, %c0_50], %56 {strides = array<i32>} : memref<264x64xbf16, #tpu.memory_space<vmem>>, vector<16x64xbf16>,
    %c192 = arith.constant 192 : index
    %c0_51 = arith.constant 0 : index
    %58 = tpu.strided_load %arg6[%c192, %c0_51] {strides = array<i32: 2, 1>} : memref<1024x64xf32, #tpu.memory_space<vmem>>, vector<16x64xf32>
    %c224 = arith.constant 224 : index
    %c0_52 = arith.constant 0 : index
    %59 = tpu.strided_load %arg6[%c224, %c0_52] {strides = array<i32: 2, 1>} : memref<1024x64xf32, #tpu.memory_space<vmem>>, vector<16x64xf32>
    %60 = arith.maximumf %58, %59 : vector<16x64xf32>
    %61 = arith.truncf %60 : vector<16x64xf32> to vector<16x64xbf16>
    %c48 = arith.constant 48 : index
    %c0_53 = arith.constant 0 : index
    %62 = vector.load %arg5[%c48, %c0_53] : memref<264x64xbf16, #tpu.memory_space<vmem>>, vector<16x64xbf16>
    tpu.vector_store %arg5[%c48, %c0_53], %61 {strides = array<i32>} : memref<264x64xbf16, #tpu.memory_space<vmem>>, vector<16x64xbf16>,
    %c256 = arith.constant 256 : index
    %c0_54 = arith.constant 0 : index
    %63 = tpu.strided_load %arg6[%c256, %c0_54] {strides = array<i32: 2, 1>} : memref<1024x64xf32, #tpu.memory_space<vmem>>, vector<16x64xf32>
    %c288 = arith.constant 288 : index
    %c0_55 = arith.constant 0 : index
    %64 = tpu.strided_load %arg6[%c288, %c0_55] {strides = array<i32: 2, 1>} : memref<1024x64xf32, #tpu.memory_space<vmem>>, vector<16x64xf32>
    %65 = arith.maximumf %63, %64 : vector<16x64xf32>
    %66 = arith.truncf %65 : vector<16x64xf32> to vector<16x64xbf16>
    %c64_56 = arith.constant 64 : index
    %c0_57 = arith.constant 0 : index
    %67 = vector.load %arg5[%c64_56, %c0_57] : memref<264x64xbf16, #tpu.memory_space<vmem>>, vector<16x64xbf16>
    tpu.vector_store %arg5[%c64_56, %c0_57], %66 {strides = array<i32>} : memref<264x64xbf16, #tpu.memory_space<vmem>>, vector<16x64xbf16>,
    %c320 = arith.constant 320 : index
    %c0_58 = arith.constant 0 : index
    %68 = tpu.strided_load %arg6[%c320, %c0_58] {strides = array<i32: 2, 1>} : memref<1024x64xf32, #tpu.memory_space<vmem>>, vector<16x64xf32>
    %c352 = arith.constant 352 : index
    %c0_59 = arith.constant 0 : index
    %69 = tpu.strided_load %arg6[%c352, %c0_59] {strides = array<i32: 2, 1>} : memref<1024x64xf32, #tpu.memory_space<vmem>>, vector<16x64xf32>
    %70 = arith.maximumf %68, %69 : vector<16x64xf32>
    %71 = arith.truncf %70 : vector<16x64xf32> to vector<16x64xbf16>
    %c80 = arith.constant 80 : index
    %c0_60 = arith.constant 0 : index
    %72 = vector.load %arg5[%c80, %c0_60] : memref<264x64xbf16, #tpu.memory_space<vmem>>, vector<16x64xbf16>
    tpu.vector_store %arg5[%c80, %c0_60], %71 {strides = array<i32>} : memref<264x64xbf16, #tpu.memory_space<vmem>>, vector<16x64xbf16>,
    %c384 = arith.constant 384 : index
    %c0_61 = arith.constant 0 : index
    %73 = tpu.strided_load %arg6[%c384, %c0_61] {strides = array<i32: 2, 1>} : memref<1024x64xf32, #tpu.memory_space<vmem>>, vector<16x64xf32>
    %c416 = arith.constant 416 : index
    %c0_62 = arith.constant 0 : index
    %74 = tpu.strided_load %arg6[%c416, %c0_62] {strides = array<i32: 2, 1>} : memref<1024x64xf32, #tpu.memory_space<vmem>>, vector<16x64xf32>
    %75 = arith.maximumf %73, %74 : vector<16x64xf32>
    %76 = arith.truncf %75 : vector<16x64xf32> to vector<16x64xbf16>
    %c96_63 = arith.constant 96 : index
    %c0_64 = arith.constant 0 : index
    %77 = vector.load %arg5[%c96_63, %c0_64] : memref<264x64xbf16, #tpu.memory_space<vmem>>, vector<16x64xbf16>
    tpu.vector_store %arg5[%c96_63, %c0_64], %76 {strides = array<i32>} : memref<264x64xbf16, #tpu.memory_space<vmem>>, vector<16x64xbf16>,
    %c448 = arith.constant 448 : index
    %c0_65 = arith.constant 0 : index
    %78 = tpu.strided_load %arg6[%c448, %c0_65] {strides = array<i32: 2, 1>} : memref<1024x64xf32, #tpu.memory_space<vmem>>, vector<16x64xf32>
    %c480 = arith.constant 480 : index
    %c0_66 = arith.constant 0 : index
    %79 = tpu.strided_load %arg6[%c480, %c0_66] {strides = array<i32: 2, 1>} : memref<1024x64xf32, #tpu.memory_space<vmem>>, vector<16x64xf32>
    %80 = arith.maximumf %78, %79 : vector<16x64xf32>
    %81 = arith.truncf %80 : vector<16x64xf32> to vector<16x64xbf16>
    %c112 = arith.constant 112 : index
    %c0_67 = arith.constant 0 : index
    %82 = vector.load %arg5[%c112, %c0_67] : memref<264x64xbf16, #tpu.memory_space<vmem>>, vector<16x64xbf16>
    tpu.vector_store %arg5[%c112, %c0_67], %81 {strides = array<i32>} : memref<264x64xbf16, #tpu.memory_space<vmem>>, vector<16x64xbf16>,
    %c512 = arith.constant 512 : index
    %c0_68 = arith.constant 0 : index
    %83 = tpu.strided_load %arg6[%c512, %c0_68] {strides = array<i32: 2, 1>} : memref<1024x64xf32, #tpu.memory_space<vmem>>, vector<16x64xf32>
    %c544 = arith.constant 544 : index
    %c0_69 = arith.constant 0 : index
    %84 = tpu.strided_load %arg6[%c544, %c0_69] {strides = array<i32: 2, 1>} : memref<1024x64xf32, #tpu.memory_space<vmem>>, vector<16x64xf32>
    %85 = arith.maximumf %83, %84 : vector<16x64xf32>
    %86 = arith.truncf %85 : vector<16x64xf32> to vector<16x64xbf16>
    %c128_70 = arith.constant 128 : index
    %c0_71 = arith.constant 0 : index
    %87 = vector.load %arg5[%c128_70, %c0_71] : memref<264x64xbf16, #tpu.memory_space<vmem>>, vector<16x64xbf16>
    tpu.vector_store %arg5[%c128_70, %c0_71], %86 {strides = array<i32>} : memref<264x64xbf16, #tpu.memory_space<vmem>>, vector<16x64xbf16>,
    %c576 = arith.constant 576 : index
    %c0_72 = arith.constant 0 : index
    %88 = tpu.strided_load %arg6[%c576, %c0_72] {strides = array<i32: 2, 1>} : memref<1024x64xf32, #tpu.memory_space<vmem>>, vector<16x64xf32>
    %c608 = arith.constant 608 : index
    %c0_73 = arith.constant 0 : index
    %89 = tpu.strided_load %arg6[%c608, %c0_73] {strides = array<i32: 2, 1>} : memref<1024x64xf32, #tpu.memory_space<vmem>>, vector<16x64xf32>
    %90 = arith.maximumf %88, %89 : vector<16x64xf32>
    %91 = arith.truncf %90 : vector<16x64xf32> to vector<16x64xbf16>
    %c144 = arith.constant 144 : index
    %c0_74 = arith.constant 0 : index
    %92 = vector.load %arg5[%c144, %c0_74] : memref<264x64xbf16, #tpu.memory_space<vmem>>, vector<16x64xbf16>
    tpu.vector_store %arg5[%c144, %c0_74], %91 {strides = array<i32>} : memref<264x64xbf16, #tpu.memory_space<vmem>>, vector<16x64xbf16>,
    %c640 = arith.constant 640 : index
    %c0_75 = arith.constant 0 : index
    %93 = tpu.strided_load %arg6[%c640, %c0_75] {strides = array<i32: 2, 1>} : memref<1024x64xf32, #tpu.memory_space<vmem>>, vector<16x64xf32>
    %c672 = arith.constant 672 : index
    %c0_76 = arith.constant 0 : index
    %94 = tpu.strided_load %arg6[%c672, %c0_76] {strides = array<i32: 2, 1>} : memref<1024x64xf32, #tpu.memory_space<vmem>>, vector<16x64xf32>
    %95 = arith.maximumf %93, %94 : vector<16x64xf32>
    %96 = arith.truncf %95 : vector<16x64xf32> to vector<16x64xbf16>
    %c160_77 = arith.constant 160 : index
    %c0_78 = arith.constant 0 : index
    %97 = vector.load %arg5[%c160_77, %c0_78] : memref<264x64xbf16, #tpu.memory_space<vmem>>, vector<16x64xbf16>
    tpu.vector_store %arg5[%c160_77, %c0_78], %96 {strides = array<i32>} : memref<264x64xbf16, #tpu.memory_space<vmem>>, vector<16x64xbf16>,
    %c704 = arith.constant 704 : index
    %c0_79 = arith.constant 0 : index
    %98 = tpu.strided_load %arg6[%c704, %c0_79] {strides = array<i32: 2, 1>} : memref<1024x64xf32, #tpu.memory_space<vmem>>, vector<16x64xf32>
    %c736 = arith.constant 736 : index
    %c0_80 = arith.constant 0 : index
    %99 = tpu.strided_load %arg6[%c736, %c0_80] {strides = array<i32: 2, 1>} : memref<1024x64xf32, #tpu.memory_space<vmem>>, vector<16x64xf32>
    %100 = arith.maximumf %98, %99 : vector<16x64xf32>
    %101 = arith.truncf %100 : vector<16x64xf32> to vector<16x64xbf16>
    %c176 = arith.constant 176 : index
    %c0_81 = arith.constant 0 : index
    %102 = vector.load %arg5[%c176, %c0_81] : memref<264x64xbf16, #tpu.memory_space<vmem>>, vector<16x64xbf16>
    tpu.vector_store %arg5[%c176, %c0_81], %101 {strides = array<i32>} : memref<264x64xbf16, #tpu.memory_space<vmem>>, vector<16x64xbf16>,
    %c768 = arith.constant 768 : index
    %c0_82 = arith.constant 0 : index
    %103 = tpu.strided_load %arg6[%c768, %c0_82] {strides = array<i32: 2, 1>} : memref<1024x64xf32, #tpu.memory_space<vmem>>, vector<16x64xf32>
    %c800 = arith.constant 800 : index
    %c0_83 = arith.constant 0 : index
    %104 = tpu.strided_load %arg6[%c800, %c0_83] {strides = array<i32: 2, 1>} : memref<1024x64xf32, #tpu.memory_space<vmem>>, vector<16x64xf32>
    %105 = arith.maximumf %103, %104 : vector<16x64xf32>
    %106 = arith.truncf %105 : vector<16x64xf32> to vector<16x64xbf16>
    %c192_84 = arith.constant 192 : index
    %c0_85 = arith.constant 0 : index
    %107 = vector.load %arg5[%c192_84, %c0_85] : memref<264x64xbf16, #tpu.memory_space<vmem>>, vector<16x64xbf16>
    tpu.vector_store %arg5[%c192_84, %c0_85], %106 {strides = array<i32>} : memref<264x64xbf16, #tpu.memory_space<vmem>>, vector<16x64xbf16>,
    %c832 = arith.constant 832 : index
    %c0_86 = arith.constant 0 : index
    %108 = tpu.strided_load %arg6[%c832, %c0_86] {strides = array<i32: 2, 1>} : memref<1024x64xf32, #tpu.memory_space<vmem>>, vector<16x64xf32>
    %c864 = arith.constant 864 : index
    %c0_87 = arith.constant 0 : index
    %109 = tpu.strided_load %arg6[%c864, %c0_87] {strides = array<i32: 2, 1>} : memref<1024x64xf32, #tpu.memory_space<vmem>>, vector<16x64xf32>
    %110 = arith.maximumf %108, %109 : vector<16x64xf32>
    %111 = arith.truncf %110 : vector<16x64xf32> to vector<16x64xbf16>
    %c208 = arith.constant 208 : index
    %c0_88 = arith.constant 0 : index
    %112 = vector.load %arg5[%c208, %c0_88] : memref<264x64xbf16, #tpu.memory_space<vmem>>, vector<16x64xbf16>
    tpu.vector_store %arg5[%c208, %c0_88], %111 {strides = array<i32>} : memref<264x64xbf16, #tpu.memory_space<vmem>>, vector<16x64xbf16>,
    %c896 = arith.constant 896 : index
    %c0_89 = arith.constant 0 : index
    %113 = tpu.strided_load %arg6[%c896, %c0_89] {strides = array<i32: 2, 1>} : memref<1024x64xf32, #tpu.memory_space<vmem>>, vector<16x64xf32>
    %c928 = arith.constant 928 : index
    %c0_90 = arith.constant 0 : index
    %114 = tpu.strided_load %arg6[%c928, %c0_90] {strides = array<i32: 2, 1>} : memref<1024x64xf32, #tpu.memory_space<vmem>>, vector<16x64xf32>
    %115 = arith.maximumf %113, %114 : vector<16x64xf32>
    %116 = arith.truncf %115 : vector<16x64xf32> to vector<16x64xbf16>
    %c224_91 = arith.constant 224 : index
    %c0_92 = arith.constant 0 : index
    %117 = vector.load %arg5[%c224_91, %c0_92] : memref<264x64xbf16, #tpu.memory_space<vmem>>, vector<16x64xbf16>
    tpu.vector_store %arg5[%c224_91, %c0_92], %116 {strides = array<i32>} : memref<264x64xbf16, #tpu.memory_space<vmem>>, vector<16x64xbf16>,
    %c960 = arith.constant 960 : index
    %c0_93 = arith.constant 0 : index
    %118 = tpu.strided_load %arg6[%c960, %c0_93] {strides = array<i32: 2, 1>} : memref<1024x64xf32, #tpu.memory_space<vmem>>, vector<16x64xf32>
    %c992 = arith.constant 992 : index
    %c0_94 = arith.constant 0 : index
    %119 = tpu.strided_load %arg6[%c992, %c0_94] {strides = array<i32: 2, 1>} : memref<1024x64xf32, #tpu.memory_space<vmem>>, vector<16x64xf32>
    %120 = arith.maximumf %118, %119 : vector<16x64xf32>
    %121 = arith.truncf %120 : vector<16x64xf32> to vector<16x64xbf16>
    %c240 = arith.constant 240 : index
    %c0_95 = arith.constant 0 : index
    %122 = vector.load %arg5[%c240, %c0_95] : memref<264x64xbf16, #tpu.memory_space<vmem>>, vector<16x64xbf16>
    tpu.vector_store %arg5[%c240, %c0_95], %121 {strides = array<i32>} : memref<264x64xbf16, #tpu.memory_space<vmem>>, vector<16x64xbf16>,
    %cst_96 = arith.constant 0.000000e+00 : bf16
    %123 = vector.broadcast %cst_96 : bf16 to vector<8x64xbf16>
    %c256_97 = arith.constant 256 : index
    %c0_98 = arith.constant 0 : index
    %124 = vector.load %arg5[%c256_97, %c0_98] : memref<264x64xbf16, #tpu.memory_space<vmem>>, vector<8x64xbf16>
    tpu.vector_store %arg5[%c256_97, %c0_98], %123 {strides = array<i32>} : memref<264x64xbf16, #tpu.memory_space<vmem>>, vector<8x64xbf16>,
    return
  }
  func.func @transform_0(%arg0: i32) -> (i32, i32) {
    %c0_i32 = arith.constant 0 : i32
    %c0_i32_0 = arith.constant 0 : i32
    return %arg0, %c0_i32 : i32, i32
  }
  func.func @transform_1(%arg0: i32) -> (i32, i32) {
    %c0_i32 = arith.constant 0 : i32
    %c0_i32_0 = arith.constant 0 : i32
    return %arg0, %c0_i32 : i32, i32
  }
  func.func @transform_2(%arg0: i32) -> (i32, i32, i32) {
    %c0_i32 = arith.constant 0 : i32
    %c0_i32_0 = arith.constant 0 : i32
    %c0_i32_1 = arith.constant 0 : i32
    %c0_i32_2 = arith.constant 0 : i32
    return %c0_i32, %c0_i32_0, %c0_i32_1 : i32, i32, i32
  }
  func.func @transform_3(%arg0: i32) -> (i32, i32) {
    %c0_i32 = arith.constant 0 : i32
    %c0_i32_0 = arith.constant 0 : i32
    %c0_i32_1 = arith.constant 0 : i32
    return %c0_i32, %c0_i32_0 : i32, i32
  }
  func.func @transform_4(%arg0: i32) -> (i32, i32) {
    %c0_i32 = arith.constant 0 : i32
    %c0_i32_0 = arith.constant 0 : i32
    return %arg0, %c0_i32 : i32, i32
  }
}

module attributes {stable_mosaic.version = 11 : i64} {
  func.func @_block1_kernel(%arg0: i32, %arg1: memref<264x64xbf16, #tpu.memory_space<vmem>>, %arg2: memref<9x64x128xbf16, #tpu.memory_space<vmem>>, %arg3: memref<1x128xf32, #tpu.memory_space<vmem>>, %arg4: memref<56x128xbf16, #tpu.memory_space<vmem>>, %arg5: memref<224x128xf32, #tpu.memory_space<vmem>>) attributes {dimension_semantics = [#tpu.dimension_semantics<parallel>], iteration_bounds = array<i64: 2>, scalar_prefetch = 0 : i64, scratch_operands = 1 : i64, tpu.core_type = #tpu.core_type<tc>, window_params = [{transform_indices = @transform_0, window_bounds = array<i64: 264, 64>}, {pipeline_mode = #tpu.pipeline_mode<synchronous>, transform_indices = @transform_1, window_bounds = array<i64: 9, 64, 128>}, {pipeline_mode = #tpu.pipeline_mode<synchronous>, transform_indices = @transform_2, window_bounds = array<i64: 1, 128>}, {transform_indices = @transform_3, window_bounds = array<i64: 56, 128>}]} {
    %c0 = arith.constant 0 : index
    %c0_0 = arith.constant 0 : index
    %0 = vector.load %arg1[%c0, %c0_0] : memref<264x64xbf16, #tpu.memory_space<vmem>>, vector<224x64xbf16>
    %c0_1 = arith.constant 0 : index
    %c0_2 = arith.constant 0 : index
    %c0_3 = arith.constant 0 : index
    %1 = vector.load %arg2[%c0_1, %c0_2, %c0_3] : memref<9x64x128xbf16, #tpu.memory_space<vmem>>, vector<1x64x128xbf16>
    %2 = vector.shape_cast %1 : vector<1x64x128xbf16> to vector<64x128xbf16>
    %cst = arith.constant dense<0.000000e+00> : vector<224x128xf32>
    %3 = tpu.matmul %0, %2, %cst {dimension_numbers = #tpu.dot_dimension_numbers<[1], [0], [0], [1], [0, 0, 1, 1], [], []>} : vector<224x64xbf16>, vector<64x128xbf16>, vector<224x128xf32> -> vector<224x128xf32>
    %c1 = arith.constant 1 : index
    %c0_4 = arith.constant 0 : index
    %4 = vector.load %arg1[%c1, %c0_4] : memref<264x64xbf16, #tpu.memory_space<vmem>>, vector<224x64xbf16>
    %c1_5 = arith.constant 1 : index
    %c0_6 = arith.constant 0 : index
    %c0_7 = arith.constant 0 : index
    %5 = vector.load %arg2[%c1_5, %c0_6, %c0_7] : memref<9x64x128xbf16, #tpu.memory_space<vmem>>, vector<1x64x128xbf16>
    %6 = vector.shape_cast %5 : vector<1x64x128xbf16> to vector<64x128xbf16>
    %cst_8 = arith.constant dense<0.000000e+00> : vector<224x128xf32>
    %7 = tpu.matmul %4, %6, %cst_8 {dimension_numbers = #tpu.dot_dimension_numbers<[1], [0], [0], [1], [0, 0, 1, 1], [], []>} : vector<224x64xbf16>, vector<64x128xbf16>, vector<224x128xf32> -> vector<224x128xf32>
    %8 = arith.addf %3, %7 : vector<224x128xf32>
    %c2 = arith.constant 2 : index
    %c0_9 = arith.constant 0 : index
    %9 = vector.load %arg1[%c2, %c0_9] : memref<264x64xbf16, #tpu.memory_space<vmem>>, vector<224x64xbf16>
    %c2_10 = arith.constant 2 : index
    %c0_11 = arith.constant 0 : index
    %c0_12 = arith.constant 0 : index
    %10 = vector.load %arg2[%c2_10, %c0_11, %c0_12] : memref<9x64x128xbf16, #tpu.memory_space<vmem>>, vector<1x64x128xbf16>
    %11 = vector.shape_cast %10 : vector<1x64x128xbf16> to vector<64x128xbf16>
    %cst_13 = arith.constant dense<0.000000e+00> : vector<224x128xf32>
    %12 = tpu.matmul %9, %11, %cst_13 {dimension_numbers = #tpu.dot_dimension_numbers<[1], [0], [0], [1], [0, 0, 1, 1], [], []>} : vector<224x64xbf16>, vector<64x128xbf16>, vector<224x128xf32> -> vector<224x128xf32>
    %13 = arith.addf %8, %12 : vector<224x128xf32>
    %c16 = arith.constant 16 : index
    %c0_14 = arith.constant 0 : index
    %14 = vector.load %arg1[%c16, %c0_14] : memref<264x64xbf16, #tpu.memory_space<vmem>>, vector<224x64xbf16>
    %c3 = arith.constant 3 : index
    %c0_15 = arith.constant 0 : index
    %c0_16 = arith.constant 0 : index
    %15 = vector.load %arg2[%c3, %c0_15, %c0_16] : memref<9x64x128xbf16, #tpu.memory_space<vmem>>, vector<1x64x128xbf16>
    %16 = vector.shape_cast %15 : vector<1x64x128xbf16> to vector<64x128xbf16>
    %cst_17 = arith.constant dense<0.000000e+00> : vector<224x128xf32>
    %17 = tpu.matmul %14, %16, %cst_17 {dimension_numbers = #tpu.dot_dimension_numbers<[1], [0], [0], [1], [0, 0, 1, 1], [], []>} : vector<224x64xbf16>, vector<64x128xbf16>, vector<224x128xf32> -> vector<224x128xf32>
    %18 = arith.addf %13, %17 : vector<224x128xf32>
    %c17 = arith.constant 17 : index
    %c0_18 = arith.constant 0 : index
    %19 = vector.load %arg1[%c17, %c0_18] : memref<264x64xbf16, #tpu.memory_space<vmem>>, vector<224x64xbf16>
    %c4 = arith.constant 4 : index
    %c0_19 = arith.constant 0 : index
    %c0_20 = arith.constant 0 : index
    %20 = vector.load %arg2[%c4, %c0_19, %c0_20] : memref<9x64x128xbf16, #tpu.memory_space<vmem>>, vector<1x64x128xbf16>
    %21 = vector.shape_cast %20 : vector<1x64x128xbf16> to vector<64x128xbf16>
    %cst_21 = arith.constant dense<0.000000e+00> : vector<224x128xf32>
    %22 = tpu.matmul %19, %21, %cst_21 {dimension_numbers = #tpu.dot_dimension_numbers<[1], [0], [0], [1], [0, 0, 1, 1], [], []>} : vector<224x64xbf16>, vector<64x128xbf16>, vector<224x128xf32> -> vector<224x128xf32>
    %23 = arith.addf %18, %22 : vector<224x128xf32>
    %c18 = arith.constant 18 : index
    %c0_22 = arith.constant 0 : index
    %24 = vector.load %arg1[%c18, %c0_22] : memref<264x64xbf16, #tpu.memory_space<vmem>>, vector<224x64xbf16>
    %c5 = arith.constant 5 : index
    %c0_23 = arith.constant 0 : index
    %c0_24 = arith.constant 0 : index
    %25 = vector.load %arg2[%c5, %c0_23, %c0_24] : memref<9x64x128xbf16, #tpu.memory_space<vmem>>, vector<1x64x128xbf16>
    %26 = vector.shape_cast %25 : vector<1x64x128xbf16> to vector<64x128xbf16>
    %cst_25 = arith.constant dense<0.000000e+00> : vector<224x128xf32>
    %27 = tpu.matmul %24, %26, %cst_25 {dimension_numbers = #tpu.dot_dimension_numbers<[1], [0], [0], [1], [0, 0, 1, 1], [], []>} : vector<224x64xbf16>, vector<64x128xbf16>, vector<224x128xf32> -> vector<224x128xf32>
    %28 = arith.addf %23, %27 : vector<224x128xf32>
    %c32 = arith.constant 32 : index
    %c0_26 = arith.constant 0 : index
    %29 = vector.load %arg1[%c32, %c0_26] : memref<264x64xbf16, #tpu.memory_space<vmem>>, vector<224x64xbf16>
    %c6 = arith.constant 6 : index
    %c0_27 = arith.constant 0 : index
    %c0_28 = arith.constant 0 : index
    %30 = vector.load %arg2[%c6, %c0_27, %c0_28] : memref<9x64x128xbf16, #tpu.memory_space<vmem>>, vector<1x64x128xbf16>
    %31 = vector.shape_cast %30 : vector<1x64x128xbf16> to vector<64x128xbf16>
    %cst_29 = arith.constant dense<0.000000e+00> : vector<224x128xf32>
    %32 = tpu.matmul %29, %31, %cst_29 {dimension_numbers = #tpu.dot_dimension_numbers<[1], [0], [0], [1], [0, 0, 1, 1], [], []>} : vector<224x64xbf16>, vector<64x128xbf16>, vector<224x128xf32> -> vector<224x128xf32>
    %33 = arith.addf %28, %32 : vector<224x128xf32>
    %c33 = arith.constant 33 : index
    %c0_30 = arith.constant 0 : index
    %34 = vector.load %arg1[%c33, %c0_30] : memref<264x64xbf16, #tpu.memory_space<vmem>>, vector<224x64xbf16>
    %c7 = arith.constant 7 : index
    %c0_31 = arith.constant 0 : index
    %c0_32 = arith.constant 0 : index
    %35 = vector.load %arg2[%c7, %c0_31, %c0_32] : memref<9x64x128xbf16, #tpu.memory_space<vmem>>, vector<1x64x128xbf16>
    %36 = vector.shape_cast %35 : vector<1x64x128xbf16> to vector<64x128xbf16>
    %cst_33 = arith.constant dense<0.000000e+00> : vector<224x128xf32>
    %37 = tpu.matmul %34, %36, %cst_33 {dimension_numbers = #tpu.dot_dimension_numbers<[1], [0], [0], [1], [0, 0, 1, 1], [], []>} : vector<224x64xbf16>, vector<64x128xbf16>, vector<224x128xf32> -> vector<224x128xf32>
    %38 = arith.addf %33, %37 : vector<224x128xf32>
    %c34 = arith.constant 34 : index
    %c0_34 = arith.constant 0 : index
    %39 = vector.load %arg1[%c34, %c0_34] : memref<264x64xbf16, #tpu.memory_space<vmem>>, vector<224x64xbf16>
    %c8 = arith.constant 8 : index
    %c0_35 = arith.constant 0 : index
    %c0_36 = arith.constant 0 : index
    %40 = vector.load %arg2[%c8, %c0_35, %c0_36] : memref<9x64x128xbf16, #tpu.memory_space<vmem>>, vector<1x64x128xbf16>
    %41 = vector.shape_cast %40 : vector<1x64x128xbf16> to vector<64x128xbf16>
    %cst_37 = arith.constant dense<0.000000e+00> : vector<224x128xf32>
    %42 = tpu.matmul %39, %41, %cst_37 {dimension_numbers = #tpu.dot_dimension_numbers<[1], [0], [0], [1], [0, 0, 1, 1], [], []>} : vector<224x64xbf16>, vector<64x128xbf16>, vector<224x128xf32> -> vector<224x128xf32>
    %43 = arith.addf %38, %42 : vector<224x128xf32>
    %c0_38 = arith.constant 0 : index
    %c0_39 = arith.constant 0 : index
    %44 = vector.load %arg3[%c0_38, %c0_39] : memref<1x128xf32, #tpu.memory_space<vmem>>, vector<1x128xf32>
    %45 = vector.broadcast %44 : vector<1x128xf32> to vector<224x128xf32>
    %46 = arith.addf %43, %45 : vector<224x128xf32>
    %cst_40 = arith.constant 0.000000e+00 : f32
    %47 = vector.broadcast %cst_40 : f32 to vector<224x128xf32>
    %48 = arith.maximumf %46, %47 : vector<224x128xf32>
    %49 = vector.extract_strided_slice %48 {offsets = [0, 0], sizes = [223, 128], strides = [1, 1]} : vector<224x128xf32> to vector<223x128xf32>
    %50 = vector.extract_strided_slice %48 {offsets = [1, 0], sizes = [223, 128], strides = [1, 1]} : vector<224x128xf32> to vector<223x128xf32>
    %51 = arith.maximumf %49, %50 : vector<223x128xf32>
    %c0_41 = arith.constant 0 : index
    %c0_42 = arith.constant 0 : index
    %52 = vector.load %arg5[%c0_41, %c0_42] : memref<224x128xf32, #tpu.memory_space<vmem>>, vector<223x128xf32>
    tpu.vector_store %arg5[%c0_41, %c0_42], %51 {strides = array<i32>} : memref<224x128xf32, #tpu.memory_space<vmem>>, vector<223x128xf32>,
    %c0_43 = arith.constant 0 : index
    %c0_44 = arith.constant 0 : index
    %53 = tpu.strided_load %arg5[%c0_43, %c0_44] {strides = array<i32: 2, 1>} : memref<224x128xf32, #tpu.memory_space<vmem>>, vector<7x128xf32>
    %c16_45 = arith.constant 16 : index
    %c0_46 = arith.constant 0 : index
    %54 = tpu.strided_load %arg5[%c16_45, %c0_46] {strides = array<i32: 2, 1>} : memref<224x128xf32, #tpu.memory_space<vmem>>, vector<7x128xf32>
    %55 = arith.maximumf %53, %54 : vector<7x128xf32>
    %56 = arith.truncf %55 : vector<7x128xf32> to vector<7x128xbf16>
    %c0_47 = arith.constant 0 : index
    %c0_48 = arith.constant 0 : index
    %57 = vector.load %arg4[%c0_47, %c0_48] : memref<56x128xbf16, #tpu.memory_space<vmem>>, vector<7x128xbf16>
    tpu.vector_store %arg4[%c0_47, %c0_48], %56 {strides = array<i32>} : memref<56x128xbf16, #tpu.memory_space<vmem>>, vector<7x128xbf16>,
    %c32_49 = arith.constant 32 : index
    %c0_50 = arith.constant 0 : index
    %58 = tpu.strided_load %arg5[%c32_49, %c0_50] {strides = array<i32: 2, 1>} : memref<224x128xf32, #tpu.memory_space<vmem>>, vector<7x128xf32>
    %c48 = arith.constant 48 : index
    %c0_51 = arith.constant 0 : index
    %59 = tpu.strided_load %arg5[%c48, %c0_51] {strides = array<i32: 2, 1>} : memref<224x128xf32, #tpu.memory_space<vmem>>, vector<7x128xf32>
    %60 = arith.maximumf %58, %59 : vector<7x128xf32>
    %61 = arith.truncf %60 : vector<7x128xf32> to vector<7x128xbf16>
    %c7_52 = arith.constant 7 : index
    %c0_53 = arith.constant 0 : index
    %62 = vector.load %arg4[%c7_52, %c0_53] : memref<56x128xbf16, #tpu.memory_space<vmem>>, vector<7x128xbf16>
    tpu.vector_store %arg4[%c7_52, %c0_53], %61 {strides = array<i32>} : memref<56x128xbf16, #tpu.memory_space<vmem>>, vector<7x128xbf16>,
    %c64 = arith.constant 64 : index
    %c0_54 = arith.constant 0 : index
    %63 = tpu.strided_load %arg5[%c64, %c0_54] {strides = array<i32: 2, 1>} : memref<224x128xf32, #tpu.memory_space<vmem>>, vector<7x128xf32>
    %c80 = arith.constant 80 : index
    %c0_55 = arith.constant 0 : index
    %64 = tpu.strided_load %arg5[%c80, %c0_55] {strides = array<i32: 2, 1>} : memref<224x128xf32, #tpu.memory_space<vmem>>, vector<7x128xf32>
    %65 = arith.maximumf %63, %64 : vector<7x128xf32>
    %66 = arith.truncf %65 : vector<7x128xf32> to vector<7x128xbf16>
    %c14 = arith.constant 14 : index
    %c0_56 = arith.constant 0 : index
    %67 = vector.load %arg4[%c14, %c0_56] : memref<56x128xbf16, #tpu.memory_space<vmem>>, vector<7x128xbf16>
    tpu.vector_store %arg4[%c14, %c0_56], %66 {strides = array<i32>} : memref<56x128xbf16, #tpu.memory_space<vmem>>, vector<7x128xbf16>,
    %c96 = arith.constant 96 : index
    %c0_57 = arith.constant 0 : index
    %68 = tpu.strided_load %arg5[%c96, %c0_57] {strides = array<i32: 2, 1>} : memref<224x128xf32, #tpu.memory_space<vmem>>, vector<7x128xf32>
    %c112 = arith.constant 112 : index
    %c0_58 = arith.constant 0 : index
    %69 = tpu.strided_load %arg5[%c112, %c0_58] {strides = array<i32: 2, 1>} : memref<224x128xf32, #tpu.memory_space<vmem>>, vector<7x128xf32>
    %70 = arith.maximumf %68, %69 : vector<7x128xf32>
    %71 = arith.truncf %70 : vector<7x128xf32> to vector<7x128xbf16>
    %c21 = arith.constant 21 : index
    %c0_59 = arith.constant 0 : index
    %72 = vector.load %arg4[%c21, %c0_59] : memref<56x128xbf16, #tpu.memory_space<vmem>>, vector<7x128xbf16>
    tpu.vector_store %arg4[%c21, %c0_59], %71 {strides = array<i32>} : memref<56x128xbf16, #tpu.memory_space<vmem>>, vector<7x128xbf16>,
    %c128 = arith.constant 128 : index
    %c0_60 = arith.constant 0 : index
    %73 = tpu.strided_load %arg5[%c128, %c0_60] {strides = array<i32: 2, 1>} : memref<224x128xf32, #tpu.memory_space<vmem>>, vector<7x128xf32>
    %c144 = arith.constant 144 : index
    %c0_61 = arith.constant 0 : index
    %74 = tpu.strided_load %arg5[%c144, %c0_61] {strides = array<i32: 2, 1>} : memref<224x128xf32, #tpu.memory_space<vmem>>, vector<7x128xf32>
    %75 = arith.maximumf %73, %74 : vector<7x128xf32>
    %76 = arith.truncf %75 : vector<7x128xf32> to vector<7x128xbf16>
    %c28 = arith.constant 28 : index
    %c0_62 = arith.constant 0 : index
    %77 = vector.load %arg4[%c28, %c0_62] : memref<56x128xbf16, #tpu.memory_space<vmem>>, vector<7x128xbf16>
    tpu.vector_store %arg4[%c28, %c0_62], %76 {strides = array<i32>} : memref<56x128xbf16, #tpu.memory_space<vmem>>, vector<7x128xbf16>,
    %c160 = arith.constant 160 : index
    %c0_63 = arith.constant 0 : index
    %78 = tpu.strided_load %arg5[%c160, %c0_63] {strides = array<i32: 2, 1>} : memref<224x128xf32, #tpu.memory_space<vmem>>, vector<7x128xf32>
    %c176 = arith.constant 176 : index
    %c0_64 = arith.constant 0 : index
    %79 = tpu.strided_load %arg5[%c176, %c0_64] {strides = array<i32: 2, 1>} : memref<224x128xf32, #tpu.memory_space<vmem>>, vector<7x128xf32>
    %80 = arith.maximumf %78, %79 : vector<7x128xf32>
    %81 = arith.truncf %80 : vector<7x128xf32> to vector<7x128xbf16>
    %c35 = arith.constant 35 : index
    %c0_65 = arith.constant 0 : index
    %82 = vector.load %arg4[%c35, %c0_65] : memref<56x128xbf16, #tpu.memory_space<vmem>>, vector<7x128xbf16>
    tpu.vector_store %arg4[%c35, %c0_65], %81 {strides = array<i32>} : memref<56x128xbf16, #tpu.memory_space<vmem>>, vector<7x128xbf16>,
    %c192 = arith.constant 192 : index
    %c0_66 = arith.constant 0 : index
    %83 = tpu.strided_load %arg5[%c192, %c0_66] {strides = array<i32: 2, 1>} : memref<224x128xf32, #tpu.memory_space<vmem>>, vector<7x128xf32>
    %c208 = arith.constant 208 : index
    %c0_67 = arith.constant 0 : index
    %84 = tpu.strided_load %arg5[%c208, %c0_67] {strides = array<i32: 2, 1>} : memref<224x128xf32, #tpu.memory_space<vmem>>, vector<7x128xf32>
    %85 = arith.maximumf %83, %84 : vector<7x128xf32>
    %86 = arith.truncf %85 : vector<7x128xf32> to vector<7x128xbf16>
    %c42 = arith.constant 42 : index
    %c0_68 = arith.constant 0 : index
    %87 = vector.load %arg4[%c42, %c0_68] : memref<56x128xbf16, #tpu.memory_space<vmem>>, vector<7x128xbf16>
    tpu.vector_store %arg4[%c42, %c0_68], %86 {strides = array<i32>} : memref<56x128xbf16, #tpu.memory_space<vmem>>, vector<7x128xbf16>,
    %cst_69 = arith.constant 0.000000e+00 : bf16
    %88 = vector.broadcast %cst_69 : bf16 to vector<7x128xbf16>
    %c49 = arith.constant 49 : index
    %c0_70 = arith.constant 0 : index
    %89 = vector.load %arg4[%c49, %c0_70] : memref<56x128xbf16, #tpu.memory_space<vmem>>, vector<7x128xbf16>
    tpu.vector_store %arg4[%c49, %c0_70], %88 {strides = array<i32>} : memref<56x128xbf16, #tpu.memory_space<vmem>>, vector<7x128xbf16>,
    return
  }
  func.func @transform_0(%arg0: i32) -> (i32, i32) {
    %c0_i32 = arith.constant 0 : i32
    %c0_i32_0 = arith.constant 0 : i32
    return %arg0, %c0_i32 : i32, i32
  }
  func.func @transform_1(%arg0: i32) -> (i32, i32, i32) {
    %c0_i32 = arith.constant 0 : i32
    %c0_i32_0 = arith.constant 0 : i32
    %c0_i32_1 = arith.constant 0 : i32
    %c0_i32_2 = arith.constant 0 : i32
    return %c0_i32, %c0_i32_0, %c0_i32_1 : i32, i32, i32
  }
  func.func @transform_2(%arg0: i32) -> (i32, i32) {
    %c0_i32 = arith.constant 0 : i32
    %c0_i32_0 = arith.constant 0 : i32
    %c0_i32_1 = arith.constant 0 : i32
    return %c0_i32, %c0_i32_0 : i32, i32
  }
  func.func @transform_3(%arg0: i32) -> (i32, i32) {
    %c0_i32 = arith.constant 0 : i32
    %c0_i32_0 = arith.constant 0 : i32
    return %arg0, %c0_i32 : i32, i32
  }
}

module attributes {stable_mosaic.version = 11 : i64} {
  func.func @_block2_head_kernel(%arg0: memref<112x128xbf16, #tpu.memory_space<vmem>>, %arg1: memref<9x128x256xbf16, #tpu.memory_space<vmem>>, %arg2: memref<1x256xf32, #tpu.memory_space<vmem>>, %arg3: memref<4x256x512xbf16, #tpu.memory_space<vmem>>, %arg4: memref<1x512xf32, #tpu.memory_space<vmem>>, %arg5: memref<512x10xbf16, #tpu.memory_space<vmem>>, %arg6: memref<1x10xf32, #tpu.memory_space<vmem>>, %arg7: memref<2x10xf32, #tpu.memory_space<vmem>>) attributes {dimension_semantics = [], scalar_prefetch = 0 : i64, scratch_operands = 0 : i64, tpu.core_type = #tpu.core_type<tc>} {
    %c0 = arith.constant 0 : index
    %c0_0 = arith.constant 0 : index
    %0 = vector.load %arg0[%c0, %c0_0] : memref<112x128xbf16, #tpu.memory_space<vmem>>, vector<96x128xbf16>
    %c0_1 = arith.constant 0 : index
    %c0_2 = arith.constant 0 : index
    %c0_3 = arith.constant 0 : index
    %1 = vector.load %arg1[%c0_1, %c0_2, %c0_3] : memref<9x128x256xbf16, #tpu.memory_space<vmem>>, vector<1x128x256xbf16>
    %2 = vector.shape_cast %1 : vector<1x128x256xbf16> to vector<128x256xbf16>
    %cst = arith.constant dense<0.000000e+00> : vector<96x256xf32>
    %3 = tpu.matmul %0, %2, %cst {dimension_numbers = #tpu.dot_dimension_numbers<[1], [0], [0], [1], [0, 0, 1, 1], [], []>} : vector<96x128xbf16>, vector<128x256xbf16>, vector<96x256xf32> -> vector<96x256xf32>
    %c1 = arith.constant 1 : index
    %c0_4 = arith.constant 0 : index
    %4 = vector.load %arg0[%c1, %c0_4] : memref<112x128xbf16, #tpu.memory_space<vmem>>, vector<96x128xbf16>
    %c1_5 = arith.constant 1 : index
    %c0_6 = arith.constant 0 : index
    %c0_7 = arith.constant 0 : index
    %5 = vector.load %arg1[%c1_5, %c0_6, %c0_7] : memref<9x128x256xbf16, #tpu.memory_space<vmem>>, vector<1x128x256xbf16>
    %6 = vector.shape_cast %5 : vector<1x128x256xbf16> to vector<128x256xbf16>
    %cst_8 = arith.constant dense<0.000000e+00> : vector<96x256xf32>
    %7 = tpu.matmul %4, %6, %cst_8 {dimension_numbers = #tpu.dot_dimension_numbers<[1], [0], [0], [1], [0, 0, 1, 1], [], []>} : vector<96x128xbf16>, vector<128x256xbf16>, vector<96x256xf32> -> vector<96x256xf32>
    %8 = arith.addf %3, %7 : vector<96x256xf32>
    %c2 = arith.constant 2 : index
    %c0_9 = arith.constant 0 : index
    %9 = vector.load %arg0[%c2, %c0_9] : memref<112x128xbf16, #tpu.memory_space<vmem>>, vector<96x128xbf16>
    %c2_10 = arith.constant 2 : index
    %c0_11 = arith.constant 0 : index
    %c0_12 = arith.constant 0 : index
    %10 = vector.load %arg1[%c2_10, %c0_11, %c0_12] : memref<9x128x256xbf16, #tpu.memory_space<vmem>>, vector<1x128x256xbf16>
    %11 = vector.shape_cast %10 : vector<1x128x256xbf16> to vector<128x256xbf16>
    %cst_13 = arith.constant dense<0.000000e+00> : vector<96x256xf32>
    %12 = tpu.matmul %9, %11, %cst_13 {dimension_numbers = #tpu.dot_dimension_numbers<[1], [0], [0], [1], [0, 0, 1, 1], [], []>} : vector<96x128xbf16>, vector<128x256xbf16>, vector<96x256xf32> -> vector<96x256xf32>
    %13 = arith.addf %8, %12 : vector<96x256xf32>
    %c7 = arith.constant 7 : index
    %c0_14 = arith.constant 0 : index
    %14 = vector.load %arg0[%c7, %c0_14] : memref<112x128xbf16, #tpu.memory_space<vmem>>, vector<96x128xbf16>
    %c3 = arith.constant 3 : index
    %c0_15 = arith.constant 0 : index
    %c0_16 = arith.constant 0 : index
    %15 = vector.load %arg1[%c3, %c0_15, %c0_16] : memref<9x128x256xbf16, #tpu.memory_space<vmem>>, vector<1x128x256xbf16>
    %16 = vector.shape_cast %15 : vector<1x128x256xbf16> to vector<128x256xbf16>
    %cst_17 = arith.constant dense<0.000000e+00> : vector<96x256xf32>
    %17 = tpu.matmul %14, %16, %cst_17 {dimension_numbers = #tpu.dot_dimension_numbers<[1], [0], [0], [1], [0, 0, 1, 1], [], []>} : vector<96x128xbf16>, vector<128x256xbf16>, vector<96x256xf32> -> vector<96x256xf32>
    %18 = arith.addf %13, %17 : vector<96x256xf32>
    %c8 = arith.constant 8 : index
    %c0_18 = arith.constant 0 : index
    %19 = vector.load %arg0[%c8, %c0_18] : memref<112x128xbf16, #tpu.memory_space<vmem>>, vector<96x128xbf16>
    %c4 = arith.constant 4 : index
    %c0_19 = arith.constant 0 : index
    %c0_20 = arith.constant 0 : index
    %20 = vector.load %arg1[%c4, %c0_19, %c0_20] : memref<9x128x256xbf16, #tpu.memory_space<vmem>>, vector<1x128x256xbf16>
    %21 = vector.shape_cast %20 : vector<1x128x256xbf16> to vector<128x256xbf16>
    %cst_21 = arith.constant dense<0.000000e+00> : vector<96x256xf32>
    %22 = tpu.matmul %19, %21, %cst_21 {dimension_numbers = #tpu.dot_dimension_numbers<[1], [0], [0], [1], [0, 0, 1, 1], [], []>} : vector<96x128xbf16>, vector<128x256xbf16>, vector<96x256xf32> -> vector<96x256xf32>
    %23 = arith.addf %18, %22 : vector<96x256xf32>
    %c9 = arith.constant 9 : index
    %c0_22 = arith.constant 0 : index
    %24 = vector.load %arg0[%c9, %c0_22] : memref<112x128xbf16, #tpu.memory_space<vmem>>, vector<96x128xbf16>
    %c5 = arith.constant 5 : index
    %c0_23 = arith.constant 0 : index
    %c0_24 = arith.constant 0 : index
    %25 = vector.load %arg1[%c5, %c0_23, %c0_24] : memref<9x128x256xbf16, #tpu.memory_space<vmem>>, vector<1x128x256xbf16>
    %26 = vector.shape_cast %25 : vector<1x128x256xbf16> to vector<128x256xbf16>
    %cst_25 = arith.constant dense<0.000000e+00> : vector<96x256xf32>
    %27 = tpu.matmul %24, %26, %cst_25 {dimension_numbers = #tpu.dot_dimension_numbers<[1], [0], [0], [1], [0, 0, 1, 1], [], []>} : vector<96x128xbf16>, vector<128x256xbf16>, vector<96x256xf32> -> vector<96x256xf32>
    %28 = arith.addf %23, %27 : vector<96x256xf32>
    %c14 = arith.constant 14 : index
    %c0_26 = arith.constant 0 : index
    %29 = vector.load %arg0[%c14, %c0_26] : memref<112x128xbf16, #tpu.memory_space<vmem>>, vector<96x128xbf16>
    %c6 = arith.constant 6 : index
    %c0_27 = arith.constant 0 : index
    %c0_28 = arith.constant 0 : index
    %30 = vector.load %arg1[%c6, %c0_27, %c0_28] : memref<9x128x256xbf16, #tpu.memory_space<vmem>>, vector<1x128x256xbf16>
    %31 = vector.shape_cast %30 : vector<1x128x256xbf16> to vector<128x256xbf16>
    %cst_29 = arith.constant dense<0.000000e+00> : vector<96x256xf32>
    %32 = tpu.matmul %29, %31, %cst_29 {dimension_numbers = #tpu.dot_dimension_numbers<[1], [0], [0], [1], [0, 0, 1, 1], [], []>} : vector<96x128xbf16>, vector<128x256xbf16>, vector<96x256xf32> -> vector<96x256xf32>
    %33 = arith.addf %28, %32 : vector<96x256xf32>
    %c15 = arith.constant 15 : index
    %c0_30 = arith.constant 0 : index
    %34 = vector.load %arg0[%c15, %c0_30] : memref<112x128xbf16, #tpu.memory_space<vmem>>, vector<96x128xbf16>
    %c7_31 = arith.constant 7 : index
    %c0_32 = arith.constant 0 : index
    %c0_33 = arith.constant 0 : index
    %35 = vector.load %arg1[%c7_31, %c0_32, %c0_33] : memref<9x128x256xbf16, #tpu.memory_space<vmem>>, vector<1x128x256xbf16>
    %36 = vector.shape_cast %35 : vector<1x128x256xbf16> to vector<128x256xbf16>
    %cst_34 = arith.constant dense<0.000000e+00> : vector<96x256xf32>
    %37 = tpu.matmul %34, %36, %cst_34 {dimension_numbers = #tpu.dot_dimension_numbers<[1], [0], [0], [1], [0, 0, 1, 1], [], []>} : vector<96x128xbf16>, vector<128x256xbf16>, vector<96x256xf32> -> vector<96x256xf32>
    %38 = arith.addf %33, %37 : vector<96x256xf32>
    %c16 = arith.constant 16 : index
    %c0_35 = arith.constant 0 : index
    %39 = vector.load %arg0[%c16, %c0_35] : memref<112x128xbf16, #tpu.memory_space<vmem>>, vector<96x128xbf16>
    %c8_36 = arith.constant 8 : index
    %c0_37 = arith.constant 0 : index
    %c0_38 = arith.constant 0 : index
    %40 = vector.load %arg1[%c8_36, %c0_37, %c0_38] : memref<9x128x256xbf16, #tpu.memory_space<vmem>>, vector<1x128x256xbf16>
    %41 = vector.shape_cast %40 : vector<1x128x256xbf16> to vector<128x256xbf16>
    %cst_39 = arith.constant dense<0.000000e+00> : vector<96x256xf32>
    %42 = tpu.matmul %39, %41, %cst_39 {dimension_numbers = #tpu.dot_dimension_numbers<[1], [0], [0], [1], [0, 0, 1, 1], [], []>} : vector<96x128xbf16>, vector<128x256xbf16>, vector<96x256xf32> -> vector<96x256xf32>
    %43 = arith.addf %38, %42 : vector<96x256xf32>
    %c0_40 = arith.constant 0 : index
    %c0_41 = arith.constant 0 : index
    %44 = vector.load %arg2[%c0_40, %c0_41] : memref<1x256xf32, #tpu.memory_space<vmem>>, vector<1x256xf32>
    %45 = vector.broadcast %44 : vector<1x256xf32> to vector<96x256xf32>
    %46 = arith.addf %43, %45 : vector<96x256xf32>
    %cst_42 = arith.constant 0.000000e+00 : f32
    %47 = vector.broadcast %cst_42 : f32 to vector<96x256xf32>
    %48 = arith.maximumf %46, %47 : vector<96x256xf32>
    %49 = vector.extract_strided_slice %48 {offsets = [0, 0], sizes = [94, 256], strides = [1, 1]} : vector<96x256xf32> to vector<94x256xf32>
    %50 = vector.extract_strided_slice %48 {offsets = [1, 0], sizes = [94, 256], strides = [1, 1]} : vector<96x256xf32> to vector<94x256xf32>
    %51 = arith.addf %49, %50 : vector<94x256xf32>
    %52 = vector.extract_strided_slice %48 {offsets = [2, 0], sizes = [94, 256], strides = [1, 1]} : vector<96x256xf32> to vector<94x256xf32>
    %53 = arith.addf %51, %52 : vector<94x256xf32>
    %54 = vector.extract_strided_slice %53 {offsets = [0, 0], sizes = [80, 256], strides = [1, 1]} : vector<94x256xf32> to vector<80x256xf32>
    %55 = vector.extract_strided_slice %53 {offsets = [7, 0], sizes = [80, 256], strides = [1, 1]} : vector<94x256xf32> to vector<80x256xf32>
    %56 = arith.addf %54, %55 : vector<80x256xf32>
    %57 = vector.extract_strided_slice %53 {offsets = [14, 0], sizes = [80, 256], strides = [1, 1]} : vector<94x256xf32> to vector<80x256xf32>
    %58 = arith.addf %56, %57 : vector<80x256xf32>
    %59 = vector.extract_strided_slice %58 {offsets = [0, 0], sizes = [1, 256], strides = [1, 1]} : vector<80x256xf32> to vector<1x256xf32>
    %60 = vector.extract_strided_slice %58 {offsets = [56, 0], sizes = [1, 256], strides = [1, 1]} : vector<80x256xf32> to vector<1x256xf32>
    %61 = tpu.concatenate %59, %60 in 0 : vector<1x256xf32>, vector<1x256xf32> -> vector<2x256xf32>
    %62 = arith.truncf %61 : vector<2x256xf32> to vector<2x256xbf16>
    %c0_43 = arith.constant 0 : index
    %c0_44 = arith.constant 0 : index
    %c0_45 = arith.constant 0 : index
    %63 = vector.load %arg3[%c0_43, %c0_44, %c0_45] : memref<4x256x512xbf16, #tpu.memory_space<vmem>>, vector<1x256x512xbf16>
    %64 = vector.shape_cast %63 : vector<1x256x512xbf16> to vector<256x512xbf16>
    %cst_46 = arith.constant dense<0.000000e+00> : vector<2x512xf32>
    %65 = tpu.matmul %62, %64, %cst_46 {dimension_numbers = #tpu.dot_dimension_numbers<[1], [0], [0], [1], [0, 0, 1, 1], [], []>} : vector<2x256xbf16>, vector<256x512xbf16>, vector<2x512xf32> -> vector<2x512xf32>
    %66 = vector.extract_strided_slice %58 {offsets = [2, 0], sizes = [1, 256], strides = [1, 1]} : vector<80x256xf32> to vector<1x256xf32>
    %67 = vector.extract_strided_slice %58 {offsets = [58, 0], sizes = [1, 256], strides = [1, 1]} : vector<80x256xf32> to vector<1x256xf32>
    %68 = tpu.concatenate %66, %67 in 0 : vector<1x256xf32>, vector<1x256xf32> -> vector<2x256xf32>
    %69 = arith.truncf %68 : vector<2x256xf32> to vector<2x256xbf16>
    %c1_47 = arith.constant 1 : index
    %c0_48 = arith.constant 0 : index
    %c0_49 = arith.constant 0 : index
    %70 = vector.load %arg3[%c1_47, %c0_48, %c0_49] : memref<4x256x512xbf16, #tpu.memory_space<vmem>>, vector<1x256x512xbf16>
    %71 = vector.shape_cast %70 : vector<1x256x512xbf16> to vector<256x512xbf16>
    %cst_50 = arith.constant dense<0.000000e+00> : vector<2x512xf32>
    %72 = tpu.matmul %69, %71, %cst_50 {dimension_numbers = #tpu.dot_dimension_numbers<[1], [0], [0], [1], [0, 0, 1, 1], [], []>} : vector<2x256xbf16>, vector<256x512xbf16>, vector<2x512xf32> -> vector<2x512xf32>
    %73 = arith.addf %65, %72 : vector<2x512xf32>
    %74 = vector.extract_strided_slice %58 {offsets = [14, 0], sizes = [1, 256], strides = [1, 1]} : vector<80x256xf32> to vector<1x256xf32>
    %75 = vector.extract_strided_slice %58 {offsets = [70, 0], sizes = [1, 256], strides = [1, 1]} : vector<80x256xf32> to vector<1x256xf32>
    %76 = tpu.concatenate %74, %75 in 0 : vector<1x256xf32>, vector<1x256xf32> -> vector<2x256xf32>
    %77 = arith.truncf %76 : vector<2x256xf32> to vector<2x256xbf16>
    %c2_51 = arith.constant 2 : index
    %c0_52 = arith.constant 0 : index
    %c0_53 = arith.constant 0 : index
    %78 = vector.load %arg3[%c2_51, %c0_52, %c0_53] : memref<4x256x512xbf16, #tpu.memory_space<vmem>>, vector<1x256x512xbf16>
    %79 = vector.shape_cast %78 : vector<1x256x512xbf16> to vector<256x512xbf16>
    %cst_54 = arith.constant dense<0.000000e+00> : vector<2x512xf32>
    %80 = tpu.matmul %77, %79, %cst_54 {dimension_numbers = #tpu.dot_dimension_numbers<[1], [0], [0], [1], [0, 0, 1, 1], [], []>} : vector<2x256xbf16>, vector<256x512xbf16>, vector<2x512xf32> -> vector<2x512xf32>
    %81 = arith.addf %73, %80 : vector<2x512xf32>
    %82 = vector.extract_strided_slice %58 {offsets = [16, 0], sizes = [1, 256], strides = [1, 1]} : vector<80x256xf32> to vector<1x256xf32>
    %83 = vector.extract_strided_slice %58 {offsets = [72, 0], sizes = [1, 256], strides = [1, 1]} : vector<80x256xf32> to vector<1x256xf32>
    %84 = tpu.concatenate %82, %83 in 0 : vector<1x256xf32>, vector<1x256xf32> -> vector<2x256xf32>
    %85 = arith.truncf %84 : vector<2x256xf32> to vector<2x256xbf16>
    %c3_55 = arith.constant 3 : index
    %c0_56 = arith.constant 0 : index
    %c0_57 = arith.constant 0 : index
    %86 = vector.load %arg3[%c3_55, %c0_56, %c0_57] : memref<4x256x512xbf16, #tpu.memory_space<vmem>>, vector<1x256x512xbf16>
    %87 = vector.shape_cast %86 : vector<1x256x512xbf16> to vector<256x512xbf16>
    %cst_58 = arith.constant dense<0.000000e+00> : vector<2x512xf32>
    %88 = tpu.matmul %85, %87, %cst_58 {dimension_numbers = #tpu.dot_dimension_numbers<[1], [0], [0], [1], [0, 0, 1, 1], [], []>} : vector<2x256xbf16>, vector<256x512xbf16>, vector<2x512xf32> -> vector<2x512xf32>
    %89 = arith.addf %81, %88 : vector<2x512xf32>
    %c0_59 = arith.constant 0 : index
    %c0_60 = arith.constant 0 : index
    %90 = vector.load %arg4[%c0_59, %c0_60] : memref<1x512xf32, #tpu.memory_space<vmem>>, vector<1x512xf32>
    %91 = vector.broadcast %90 : vector<1x512xf32> to vector<2x512xf32>
    %92 = arith.addf %89, %91 : vector<2x512xf32>
    %cst_61 = arith.constant 0.000000e+00 : f32
    %93 = vector.broadcast %cst_61 : f32 to vector<2x512xf32>
    %94 = arith.maximumf %92, %93 : vector<2x512xf32>
    %95 = arith.truncf %94 : vector<2x512xf32> to vector<2x512xbf16>
    %c0_62 = arith.constant 0 : index
    %c0_63 = arith.constant 0 : index
    %96 = vector.load %arg5[%c0_62, %c0_63] : memref<512x10xbf16, #tpu.memory_space<vmem>>, vector<512x10xbf16>
    %cst_64 = arith.constant dense<0.000000e+00> : vector<2x10xf32>
    %97 = tpu.matmul %95, %96, %cst_64 {dimension_numbers = #tpu.dot_dimension_numbers<[1], [0], [0], [1], [0, 0, 1, 1], [], []>} : vector<2x512xbf16>, vector<512x10xbf16>, vector<2x10xf32> -> vector<2x10xf32>
    %c0_65 = arith.constant 0 : index
    %c0_66 = arith.constant 0 : index
    %98 = vector.load %arg6[%c0_65, %c0_66] : memref<1x10xf32, #tpu.memory_space<vmem>>, vector<1x10xf32>
    %99 = vector.broadcast %98 : vector<1x10xf32> to vector<2x10xf32>
    %100 = arith.addf %97, %99 : vector<2x10xf32>
    %c0_67 = arith.constant 0 : index
    %c0_68 = arith.constant 0 : index
    %101 = vector.load %arg7[%c0_67, %c0_68] : memref<2x10xf32, #tpu.memory_space<vmem>>, vector<2x10xf32>
    tpu.vector_store %arg7[%c0_67, %c0_68], %100 {strides = array<i32>} : memref<2x10xf32, #tpu.memory_space<vmem>>, vector<2x10xf32>,
    return
  }
}

</mosaic_0001>

<bundles_post_ra>
// kernel: model_forward.4
= control target key start
LH: loop header
LB: loop body
LE: loop exit
PB: predicated region body
PF: predicated region fallthrough
CT: control target
= control target key end

     0   :  { %s4927_s12 = smov 0   ;;  %s5793_s0 = inlined_call_operand.vmem [shape: bf16[528,64], index: 0, kind: input, shape index: {}]   ;;  %s5794_s1 = inlined_call_operand.vmem [shape: bf16[9,64,128], index: 1, kind: input, shape index: {}]   ;;  %s5795_s2 = inlined_call_operand.vmem [shape: f32[1,128], index: 2, kind: input, shape index: {}]   ;;  %s5796_s3 = inlined_call_operand.vmem [shape: bf16[112,128], index: 3, kind: output, shape index: {}]  }
   0x1 LB: > { %s3732_s13 = sadd.s32 4294967295, %s4905_s12   ;;  %p3736_p0 = scmp.ge.s32.totalorder %s4905_s12, 1  ;;  %s4905_s12 = sphi %s4927_s12, %s13_s12  }
   0x2   : > { %p138_p1 = scmp.lt.s32.totalorder %s4905_s12, 3 }
   0x4   : > { %p139_p2 = pnand %p3736_p0, %p138_p1 }
   0x5   : > { %v4782_v0 = vld [vmem:[%s5794_s1 + $0x20] sm:$0xff] (!%p139_p2)   ;;  %s162_s16 = smul.u32 (!%p139_p2), 33, %s3732_s13  ;;  %v4784_v2 = vld [vmem:[%s5794_s1 + $0x28] sm:$0xff] (!%p139_p2)   ;;  %v4786_v4 = vld [vmem:[%s5794_s1 + $0x30] sm:$0xff] (!%p139_p2)   ;;  %vm435_vm0 = vcmask (!%p139_p2), 523264   ;;  %vm833_vm2 = vcmask (!%p139_p2), 1046528  }
   0x6   : > { %142 = sbr.rel (%p139_p2) target bundleno = 533 (0x215), region = 32  ;;  %v4783_v1 = vld [vmem:[%s5794_s1 + $0x80] sm:$0xff] (!%p139_p2)   ;;  %4218 = vmatprep.subr.bf16.mxu1 (!%p139_p2), %v4782_v0  ;;  %v4785_v3 = vld [vmem:[%s5794_s1 + $0x88] sm:$0xff] (!%p139_p2)   ;;  %v4787_v5 = vld [vmem:[%s5794_s1 + $0x90] sm:$0xff] (!%p139_p2)   ;;  %vm294_vm1 = vsmask.f32 (!%p139_p2), 7424 }
   0x7   : > { %p163_p3 = scmp.lt.s32.totalorder (!%p139_p2), %s162_s16, 65  ;;  %4362 = vmatprep.subr.bf16.mxu0 (!%p139_p2), %v4783_v1  ;;  %4219 = vmatpush3.bf16.msra.mxu1 (!%p139_p2), %v4782_v0  ;;  %v4788_v6 = vld [vmem:[%s5794_s1 + $0x38] sm:$0xff] (!%p139_p2)   ;;  %v4796_v29 = vld [vmem:[%s5794_s1 + $0xa0] sm:$0xff] (!%p139_p2)   ;;  %v4802_v0 = vld [vmem:[%s5794_s1 + $0xa8] sm:$0xff] (!%p139_p2)   ;;  %s168_s27 = smul.u32 (!%p139_p2), 7, %s3732_s13  ;;  %vm3524_vm3 = vcmask (!%p139_p2), 1043456  }
   0x8   : > { %4363 = vmatpush3.bf16.msra.mxu0 (!%p139_p2), %v4783_v1  ;;  %4220 = vmatprep.subr.bf16.mxu1 (!%p139_p2), %v4784_v2  ;;  %v4789_v7 = vld [vmem:[%s5794_s1 + $0x98] sm:$0xff] (!%p139_p2)   ;;  %v4800_v54 = vld [vmem:[%s5794_s1] sm:$0xff] (!%p139_p2)   ;;  %vm3525_vm4 = vsmask.f32 (!%p139_p2), 3328  ;;  %vm3550_vm6 = vcmask (!%p139_p2), 1043459   ;;  %vm3571_vm9 = vcmask (!%p139_p2), 1042432  }
   0x9   : > { %4364 = vmatprep.subr.bf16.mxu0 (!%p139_p2), %v4785_v3  ;;  %p169_p4 = scmp.lt.s32.totalorder (!%p139_p2), %s168_s27, 13  ;;  %vm3526_vm5 = vmand (!%p139_p2), %vm3524_vm3, %vm3525_vm4  ;;  %vm3551_vm7 = vsmask.f32 (!%p139_p2), 7950  ;;  %vm3572_vm8 = vsmask.f32 (!%p139_p2), 2304  ;;  %vm3597_vm12 = vcmask (!%p139_p2), 1043458  }
   0xa   : > { %vm5711_vm10 = vmand (!%p139_p2), %vm3550_vm6, %vm3551_vm7  ;;  %vm3598_vm13 = vsmask.f32 (!%p139_p2), 7946  ;;  %vm3618_vm15 = vcmask (!%p139_p2), 1041408   ;;  %vm3645_vm4 = vsmask.f32 (!%p139_p2), 7942 }
   0xb   : > { %4221 = vmatpush3.bf16.msra.mxu1 (!%p139_p2), %v4784_v2  ;;  %vm5740_vm11 = vmand (!%p139_p2), %vm3571_vm9, %vm3572_vm8  ;;  %vm3666_vm6 = vsmask.f32 (!%p139_p2), 256  ;;  %vm3671_vm9 = vsmask.f32 (!%p139_p2), 7938 }
   0xc   : > { %4365 = vmatpush3.bf16.msra.mxu0 (!%p139_p2), %v4785_v3  ;;  %4222 = vmatprep.subr.bf16.mxu1 (!%p139_p2), %v4786_v4  ;;  %vm5764_vm14 = vmand (!%p139_p2), %vm3597_vm12, %vm3598_vm13 }
   0xd   : > { %s5804_s16 = smov (!%p163_p3, %s162_s16), 65  ;;  %4366 = vmatprep.subr.bf16.mxu0 %v4787_v5  ;;  %s5806_s27 = smov (!%p169_p4, %s168_s27), 13 }
   0xe   : > { %s3737_s29 = sshll.u32 %s5804_s16, 2  ;;  %s3738_s13 = sshll.u32 %s5806_s27, 2 }
   0xf   : > { %s4964_s7 = scalar_lea.vmem %s5793_s0, %s3737_s29  ;;  %4223 = vmatpush3.bf16.msra.mxu1 %v4786_v4  ;;  %s5665_s30 = scalar_lea.vmem %s5796_s3, %s3738_s13 }
  0x10   : > { %v175_v8 = vld [vmem:[%s4964_s7] sm:$0xf]  ;;  %v4968_v9 = vld [vmem:[%s4964_s7 + $0x4] sm:$0xf]  ;;  %v4974_v11 = vld [vmem:[%s4964_s7 + $0x8] sm:$0xff]   ;;  %4367 = vmatpush3.bf16.msra.mxu0 %v4787_v5  ;;  %4224 = vmatprep.subr.bf16.mxu1 %v4788_v6 }
  0x11   : > { %v4971_v10 = vcombine.low %v175_v8, %v4968_v9  ;;  %v4977_v12 = vld [vmem:[%s4964_s7 + $0x10] sm:$0xff]   ;;  %v1448_v13 = vld [vmem:[%s4964_s7 + $0x8] sm:$0xf]  ;;  %v4981_v14 = vld [vmem:[%s4964_s7 + $0xc] sm:$0xf]  ;;  %v303_v17 = vshll.u32 %v4974_v11, 16  ;;  %4368 = vmatprep.subr.bf16.mxu0 %v4789_v7 }
  0x12   : > { %v307_v18 = vshrl.u32 %v4974_v11, 16  ;;  %v3873_v19 = vcombine.low %v1448_v13, %v4981_v14  ;;  %v1567_v20 = vshll.u32 %v4977_v12, 16  ;;  %v1571_v21 = vshrl.u32 %v4977_v12, 16  ;;  %v4991_v24 = vld [vmem:[%s4964_s7 + $0x10] sm:$0xff]   ;;  %v4994_v25 = vld [vmem:[%s4964_s7 + $0x18] sm:$0xff]   ;;  %v5007_v41 = vld [vmem:[%s4964_s7 + $0x20] sm:$0xff]  }
  0x13   : > { %v296_v15 = vshrl.u32 %v4971_v10, 16  ;;  %v298_v16 = vshll.u32 %v4971_v10, 16  ;;  %v305_v23 = vrot.slane %v303_v17, 1  ;;  %4225 = vmatpush3.bf16.msra.mxu1 %v4788_v6  ;;  %v311_v32 = vshll.u32 %v4991_v24, 16  ;;  %v5002_v36 = vld [vmem:[%s4964_s7 + $0x18] sm:$0xff]   ;;  %v5016_v49 = vld [vmem:[%s4964_s7 + $0x20] sm:$0xff]  }
  0x14   : > { %v1560_v26 = vshrl.u32 %v3873_v19, 16  ;;  %v1562_v27 = vshll.u32 %v3873_v19, 16  ;;  %v1569_v28 = vrot.slane %v1567_v20, 1  ;;  %v1575_v33 = vshll.u32 %v4994_v25, 16  ;;  %4369 = vmatpush3.bf16.msra.mxu0 %v4789_v7  ;;  %v5025_v55 = vld [vmem:[%s4964_s7 + $0x28] sm:$0xff]   ;;  %4254 = vmatprep.subr.bf16.mxu1 %v4800_v54  ;;  %v5044_v5 = vld [vmem:[%s4964_s7 + $0x30] sm:$0xff]  }
  0x15   : > { %v300_v22 = vrot.slane %v298_v16, 1  ;;  %v309_v31 = vor.u32 %v307_v18, %v305_v23  ;;  %v313_v38 = vrot.slane %v311_v32, 1  ;;  %4398 = vmatprep.subr.bf16.mxu0 %v4796_v29  ;;  %v315_v40 = vshrl.u32 %v4991_v24, 16  ;;  %v5040_v3 = vld [vmem:[%s4964_s7 + $0x28] sm:$0xff]   ;;  %v5049_v8 = vld [vmem:[%s4964_s7 + $0x30] sm:$0xff]  }
  0x16   : > { %v1564_v34 = vrot.slane %v1562_v27, 1  ;;  %v1573_v35 = vor.u32 %v1571_v21, %v1569_v28  ;;  %v1577_v39 = vrot.slane %v1575_v33, 1  ;;  %v319_v43 = vshll.u32 %v5002_v36, 16  ;;  %v5057_v21 = vld [vmem:[%s4964_s7 + $0x38] sm:$0xff]  }
  0x17   : > { %v301_v30 = vor.u32 %v300_v22, %v296_v15  ;;  %v1579_v44 = vshrl.u32 %v4994_v25, 16  ;;  %v314_v45 = vsel %vm294_vm1, %v309_v31, %v313_v38  ;;  %v317_v47 = vor.u32 %v315_v40, %v313_v38 }
  0x18   : > { %v1565_v42 = vor.u32 %v1564_v34, %v1560_v26  ;;  %v1578_v46 = vsel %vm294_vm1, %v1573_v35, %v1577_v39  ;;  %v1583_v48 = vshll.u32 %v5007_v41, 16  ;;  %v321_v51 = vrot.slane %v319_v43, 1 }
  0x19   : > { %v306_v37 = vsel %vm294_vm1, %v301_v30, %v305_v23  ;;  %v1581_v52 = vor.u32 %v1579_v44, %v1577_v39  ;;  %v323_v53 = vshrl.u32 %v5002_v36, 16  ;;  %v327_v57 = vshll.u32 %v5016_v49, 16  ;;  %v4808_v30 = vld [vmem:[%s5794_s1 + $0x8] sm:$0xff]   ;;  %v5078_v39 = vld [vmem:[%s4964_s7 + $0x40] sm:$0xff]  }
  0x1a   : > { %4226 = vmatprep.mubr.msk.bf16.mxu1 %vm435_vm0, %v306_v37  ;;  %v1570_v50 = vsel %vm294_vm1, %v1565_v42, %v1569_v28  ;;  %v1585_v56 = vrot.slane %v1583_v48, 1  ;;  %v322_v58 = vsel %vm294_vm1, %v317_v47, %v321_v51  ;;  %v1587_v60 = vshrl.u32 %v5007_v41, 16  ;;  %v5074_v37 = vld [vmem:[%s4964_s7 + $0x38] sm:$0xff]   ;;  %v5082_v42 = vld [vmem:[%s4964_s7 + $0x40] sm:$0xff]  }
  0x1b   : > { %4227 = vmatmul.mubr.msk.bf16.vlgmr.msra.gmra.mrb[0].mxu1 %vm435_vm0, %v314_v45  ;;  %4370 = vmatprep.mubr.msk.bf16.mxu0 %vm435_vm0, %v1570_v50  ;;  %v325_v59 = vor.u32 %v323_v53, %v321_v51  ;;  %v1591_v61 = vshll.u32 %v5025_v55, 16  ;;  %v329_v63 = vrot.slane %v327_v57, 1  ;;  %v331_v4 = vshrl.u32 %v5016_v49, 16  ;;  %v5090_v51 = vld [vmem:[%s4964_s7 + $0x48] sm:$0xff]  }
  0x1c   : > { %4371 = vmatmul.mubr.msk.bf16.vlgmr.msra.gmra.mrb[0].mxu0 %vm435_vm0, %v1578_v46  ;;  %4230 = vmatprep.mubr.msk.bf16.mxu1 %vm435_vm0, %v322_v58  ;;  %v1586_v62 = vsel %vm294_vm1, %v1581_v52, %v1585_v56  ;;  %v1589_v1 = vor.u32 %v1587_v60, %v1585_v56  ;;  %v1595_v7 = vshrl.u32 %v5025_v55, 16  ;;  %v335_v16 = vshll.u32 %v5040_v3, 16  ;;  %v5100_v60 = vld [vmem:[%s4964_s7 + $0x48] sm:$0xff]  }
  0x1d   : > { %4399 = vmatpush3.bf16.msra.mxu0 %v4796_v29  ;;  %4374 = vmatprep.mubr.msk.bf16.mxu0 %vm435_vm0, %v1586_v62  ;;  %v1593_v2 = vrot.slane %v1591_v61, 1  ;;  %v330_v6 = vsel %vm294_vm1, %v325_v59, %v329_v63  ;;  %v333_v15 = vor.u32 %v331_v4, %v329_v63  ;;  %v1599_v17 = vshll.u32 %v5044_v5, 16  ;;  %v4807_v29 = vld [vmem:[%s5794_s1 + $0xb0] sm:$0xff]   ;;  %v4813_v59 = vld [vmem:[%s5794_s1 + $0xb8] sm:$0xff]  }
  0x1e   : > { %4255 = vmatpush3.bf16.msra.mxu1 %v4800_v54  ;;  %4400 = vmatprep.subr.bf16.mxu0 %v4802_v0  ;;  %v339_v19 = vshrl.u32 %v5040_v3, 16  ;;  %v343_v20 = vshll.u32 %v5049_v8, 16  ;;  %v1603_v22 = vshrl.u32 %v5044_v5, 16  ;;  %v337_v23 = vrot.slane %v335_v16, 1 }
  0x1f   : > { %v1594_v13 = vsel %vm294_vm1, %v1589_v1, %v1593_v2  ;;  %v1597_v18 = vor.u32 %v1595_v7, %v1593_v2  ;;  %v1601_v26 = vrot.slane %v1599_v17, 1  ;;  %v1607_v28 = vshll.u32 %v5057_v21, 16  ;;  %4256 = vmatprep.subr.bf16.mxu1 %v4808_v30  ;;  %v4817_v17 = vld [vmem:[%s5794_s1 + $0xc0] sm:$0xff]  }
  0x20   : > { %v345_v27 = vrot.slane %v343_v20, 1  ;;  %v338_v31 = vsel %vm294_vm1, %v333_v15, %v337_v23  ;;  %v341_v33 = vor.u32 %v339_v19, %v337_v23  ;;  %v347_v38 = vshrl.u32 %v5049_v8, 16 }
  0x21   : > { %4401 = vmatpush3.bf16.msra.mxu0 %v4802_v0  ;;  %v1602_v32 = vsel %vm294_vm1, %v1597_v18, %v1601_v26  ;;  %v1605_v34 = vor.u32 %v1603_v22, %v1601_v26  ;;  %v1609_v35 = vrot.slane %v1607_v28, 1  ;;  %v1611_v40 = vshrl.u32 %v5057_v21, 16  ;;  %v1914_v0 = vld [vmem:[%s4964_s7 + $0x8] sm:$0xe]  ;;  %v5128_v26 = vld [vmem:[%s4964_s7 + $0x58] sm:$0xff]  }
  0x22   : > { %4402 = vmatprep.subr.bf16.mxu0 %v4807_v29  ;;  %v346_v43 = vsel %vm294_vm1, %v341_v33, %v345_v27  ;;  %v349_v44 = vor.u32 %v347_v38, %v345_v27  ;;  %v351_v45 = vshll.u32 %v5074_v37, 16  ;;  %4257 = vmatpush3.bf16.msra.mxu1 %v4808_v30  ;;  %v1615_v46 = vshll.u32 %v5078_v39, 16  ;;  %v5142_v38 = vld [vmem:[%s4964_s7 + $0x68] sm:$0xff]  }
  0x23   : > { %4231 = vmatmul.mubr.msk.bf16.gmra.mrb[4].mxu1 %vm435_vm0, %v330_v6  ;;  %v1613_v47 = vor.u32 %v1611_v40, %v1609_v35  ;;  %v355_v48 = vshrl.u32 %v5074_v37, 16  ;;  %v359_v50 = vshll.u32 %v5082_v42, 16  ;;  %v1619_v52 = vshrl.u32 %v5078_v39, 16  ;;  %v5111_v6 = vld [vmem:[%s4964_s7 + $0x50] sm:$0xff]  }
  0x24   : > { %4375 = vmatmul.mubr.msk.bf16.gmra.mrb[4].mxu0 %vm435_vm0, %v1594_v13  ;;  %4234 = vmatprep.mubr.msk.bf16.mxu1 %vm435_vm0, %v338_v31  ;;  %v1610_v53 = vsel %vm294_vm1, %v1605_v34, %v1609_v35  ;;  %v353_v54 = vrot.slane %v351_v45, 1  ;;  %v1617_v56 = vrot.slane %v1615_v46, 1  ;;  %v1623_v58 = vshll.u32 %v5090_v51, 16 }
  0x25   : > { %4378 = vmatprep.mubr.msk.bf16.mxu0 %vm435_vm0, %v1602_v32  ;;  %4403 = vmatpush3.bf16.msra.mxu0 %v4807_v29  ;;  %v361_v57 = vrot.slane %v359_v50, 1  ;;  %v363_v1 = vshrl.u32 %v5082_v42, 16  ;;  %v367_v2 = vshll.u32 %v5100_v60, 16  ;;  %v3914_v4 = vcombine.low %v1914_v0, %v4981_v14  ;;  %v5134_v29 = vld [vmem:[%s4964_s7 + $0x60] sm:$0xff]   ;;  %v4821_v50 = vld [vmem:[%s5794_s1 + $0xc8] sm:$0xff]   ;;  %v4825_v0 = vld [vmem:[%s5794_s1 + $0xd0] sm:$0xff]  }
  0x26   : > { %v354_v61 = vsel %vm294_vm1, %v349_v44, %v353_v54  ;;  %v1618_v62 = vsel %vm294_vm1, %v1613_v47, %v1617_v56  ;;  %v357_v63 = vor.u32 %v355_v48, %v353_v54  ;;  %v1621_v7 = vor.u32 %v1619_v52, %v1617_v56  ;;  %4404 = vmatprep.subr.bf16.mxu0 %v4813_v59  ;;  %v4824_v44 = vld [vmem:[%s5794_s1 + $0x18] sm:$0xff]   ;;  %v4827_v56 = vld [vmem:[%s5794_s1 + $0x40] sm:$0xff]  }
  0x27   : > { %v5114_v13 = vrot.slane %v1623_v58, 1  ;;  %v1928_v15 = vrot.slane %v4977_v12, 1  ;;  %v371_v16 = vshrl.u32 %v5100_v60, 16  ;;  %v365_v14 = vor.u32 %v363_v1, %v361_v57  ;;  %v4818_v12 = vld [vmem:[%s5794_s1 + $0x10] sm:$0xff]  }
  0x28   : > { %v369_v18 = vrot.slane %v367_v2, 1  ;;  %v1927_v19 = vrot.slane %v3914_v4, 1  ;;  %v362_v20 = vsel %vm294_vm1, %v357_v63, %v361_v57  ;;  %v375_v22 = vshll.u32 %v5111_v6, 16  ;;  %4258 = vmatprep.subr.bf16.mxu1 %v4818_v12 }
  0x29   : > { %4405 = vmatpush3.bf16.msra.mxu0 %v4813_v59  ;;  %v379_v27 = vshrl.u32 %v5111_v6, 16  ;;  %v1626_v28 = vsel %vm294_vm1, %v1621_v7, %v5114_v13  ;;  %v383_v32 = vshll.u32 %v5128_v26, 16  ;;  %4259 = vmatpush3.bf16.msra.mxu1 %v4818_v12  ;;  %v1930_v40 = vrot.slane %v4994_v25, 1  ;;  %v5201_v12 = vld [vmem:[%s4964_s7 + $0x50] sm:$0xff]  }
  0x2a   : > { %4434 = vmatprep.subr.bf16.mxu0 %v4817_v17  ;;  %v370_v23 = vsel %vm294_vm1, %v365_v14, %v369_v18  ;;  %v1929_v30 = vsel %vm833_vm2, %v1927_v19, %v1928_v15  ;;  %v377_v31 = vrot.slane %v375_v22, 1  ;;  %v373_v33 = vor.u32 %v371_v16, %v369_v18  ;;  %4260 = vmatprep.subr.bf16.mxu1 %v4824_v44  ;;  %v5194_v19 = vld [vmem:[%s5794_s1 + $0xe0] sm:$0xff]  }
  0x2b   : > { %4235 = vmatmul.mubr.msk.bf16.gmra.mrb[8].mxu1 %vm435_vm0, %v346_v43  ;;  %v385_v35 = vrot.slane %v383_v32, 1  ;;  %v391_v43 = vshll.u32 %v5134_v29, 16  ;;  %v1932_v45 = vrot.slane %v5007_v41, 1  ;;  %v387_v47 = vshrl.u32 %v5128_v26, 16 }
  0x2c   : > { %4379 = vmatmul.mubr.msk.bf16.gmra.mrb[8].mxu0 %vm435_vm0, %v1610_v53  ;;  %4238 = vmatprep.mubr.msk.bf16.mxu1 %vm435_vm0, %v354_v61  ;;  %v381_v34 = vor.u32 %v379_v27, %v377_v31  ;;  %v378_v46 = vsel %vm294_vm1, %v373_v33, %v377_v31  ;;  %v395_v25 = vshrl.u32 %v5134_v29, 16  ;;  %v399_v52 = vshll.u32 %v5142_v38, 16  ;;  %v5161_v41 = vld [vmem:[%s4964_s7 + $0x70] ss:$0 sps:$4 sm:$0x11]   ;;  %v4832_v27 = vld [vmem:[%s5794_s1 + $0x48] sm:$0xff]  }
  0x2d   : > { %4382 = vmatprep.mubr.msk.bf16.mxu0 %vm435_vm0, %v1618_v62  ;;  %4261 = vmatpush3.bf16.msra.mxu1 %v4824_v44  ;;  %v1931_v53 = vsel %vm833_vm2, %v1928_v15, %v1930_v40  ;;  %v393_v54 = vrot.slane %v391_v43, 1  ;;  %v1933_v57 = vsel %vm833_vm2, %v1930_v40, %v1932_v45  ;;  %v389_v58 = vor.u32 %v387_v47, %v385_v35  ;;  %v5221_v31 = vld [vmem:[%s4964_s7 + $0x60] sm:$0xff]   ;;  %v5237_v40 = vld [vmem:[%s4964_s7 + $0x68] sm:$0xff]   ;;  %v5243_v44 = vld [vmem:[%s4964_s7 + $0x70] sm:$0xff]  }
  0x2e   : > { %v386_v48 = vsel %vm294_vm1, %v381_v34, %v385_v35  ;;  %4290 = vmatprep.subr.bf16.mxu1 %v4827_v56  ;;  %v401_v61 = vrot.slane %v399_v52, 1  ;;  %v1934_v62 = vrot.slane %v5025_v55, 1  ;;  %v1936_v63 = vrot.slane %v5044_v5, 1  ;;  %v4831_v5 = vld [vmem:[%s5794_s1 + $0xd8] sm:$0xff]  }
  0x2f   : > { %v397_v59 = vor.u32 %v395_v25, %v393_v54  ;;  %v394_v1 = vsel %vm294_vm1, %v389_v58, %v393_v54  ;;  %v403_v2 = vshrl.u32 %v5142_v38, 16  ;;  %v407_v4 = vshll.u32 %v5161_v41, 16  ;;  %v4844_v34 = vld [vmem:[%s5794_s1 + $0x58] sm:$0xff]   ;;  %v4835_v54 = vld [vmem:[%s4964_s7 + $0x10] sm:$0xff]   ;;  %v4841_v58 = vld [vmem:[%s5794_s1 + $0xe8] sm:$0xff]  }
  0x30   : > { %v1935_v15 = vsel %vm833_vm2, %v1932_v45, %v1934_v62  ;;  %v1937_v55 = vsel %vm833_vm2, %v1934_v62, %v1936_v63  ;;  %v1938_v14 = vrot.slane %v5057_v21, 1  ;;  %v1940_v18 = vrot.slane %v5078_v39, 1  ;;  %v5251_v45 = vld [vmem:[%s5794_s1 + $0x60] sm:$0xff]   ;;  %v4840_v62 = vld [vmem:[%s4964_s7 + $0x28] sm:$0xff]  }
  0x31   : > { %v402_v7 = vsel %vm294_vm1, %v397_v59, %v401_v61  ;;  %v405_v16 = vor.u32 %v403_v2, %v401_v61  ;;  %v1942_v39 = vrot.slane %v5090_v51, 1  ;;  %v4838_v51 = vld [vmem:[%s5794_s1 + $0x50] sm:$0xff]   ;;  %v1948_v33 = vrot.slane %v5221_v31, 1  ;;  %v820_v59 = vld [vmem:[%s4964_s7] sm:$0xe] }
  0x32   : > { %v1939_v22 = vsel %vm833_vm2, %v1936_v63, %v1938_v14  ;;  %v1941_v21 = vsel %vm833_vm2, %v1938_v14, %v1940_v18  ;;  %v1952_v47 = vrot.slane %v5243_v44, 1  ;;  %v4848_v61 = vld [vmem:[%s5794_s1 + $0xf0] sm:$0xff]   ;;  %v3806_v63 = vcombine.low %v820_v59, %v4968_v9  ;;  %v5309_v9 = vld [vmem:[%s5794_s1 + $0x100] sm:$0xff]  }
  0x33   : > { %4239 = vmatmul.mubr.msk.bf16.gmra.mrb[12].mxu1 %vm435_vm0, %v362_v20 }
  0x34   : > { %4242 = vmatprep.mubr.msk.bf16.mxu1 %vm435_vm0, %v370_v23  ;;  %4383 = vmatmul.mubr.msk.bf16.gmra.mrb[12].mxu0 %vm435_vm0, %v1626_v28  ;;  %v1944_v23 = vrot.slane %v5201_v12, 1  ;;  %v1943_v28 = vsel %vm833_vm2, %v1940_v18, %v1942_v39  ;;  %v834_v2 = vrot.slane %v3806_v63, 1  ;;  %v4855_v18 = vld [vmem:[%s5794_s1 + $0x68] sm:$0xff]  }
  0x35   : > { %4406 = vmatprep.mubr.msk.bf16.mxu0 %vm435_vm0, %v1929_v30  ;;  %v5215_v30 = vld [vmem:[%s4964_s7 + $0x58] sm:$0xff]  }
  0x36   : > { %v1946_v32 = vrot.slane %v5215_v30, 1 }
  0x38   : > { %v1947_v35 = vsel %vm833_vm2, %v1944_v23, %v1946_v32  ;;  %v1949_v43 = vsel %vm833_vm2, %v1946_v32, %v1948_v33  ;;  %v5358_v32 = vld [vmem:[%s4964_s7 + $0x18] sm:$0xff]  }
  0x3b   : > { %4243 = vmatmul.mubr.msk.bf16.gmra.mrb[16].mxu1 %vm435_vm0, %v378_v46  ;;  %v1950_v46 = vrot.slane %v5237_v40, 1 }
  0x3c   : > { %4246 = vmatprep.mubr.msk.bf16.mxu1 %vm435_vm0, %v386_v48  ;;  %4407 = vmatmul.mubr.msk.bf16.vlgmr.msra.gmra.mrb[0].mxu0 %vm435_vm0, %v1931_v53  ;;  %v5257_v48 = vld [vmem:[%s4964_s7 + $0x78] ss:$0 sps:$4 sm:$0x11]  }
  0x3d   : > { %4435 = vmatpush3.bf16.msra.mxu0 %v4817_v17  ;;  %4410 = vmatprep.mubr.msk.bf16.mxu0 %vm435_vm0, %v1933_v57  ;;  %v409_v17 = vrot.slane %v407_v4, 1  ;;  %v1953_v25 = vsel %vm833_vm2, %v1950_v46, %v1952_v47  ;;  %v1954_v52 = vrot.slane %v5257_v48, 1  ;;  %v4839_v57 = vld [vmem:[%s4964_s7 + $0x20] sm:$0xff]   ;;  %v835_v4 = vrot.slane %v4974_v11, 1 }
  0x3e   : > { %4436 = vmatprep.subr.bf16.mxu0 %v4821_v50 }
  0x3f   : > { %v410_v20 = vsel %vm294_vm1, %v405_v16, %v409_v17  ;;  %v1955_v53 = vsel %vm833_vm2, %v1952_v47, %v1954_v52  ;;  %v4847_v17 = vld [vmem:[%s4964_s7 + $0x48] sm:$0xff]   ;;  %v2660_v47 = vshll.u32 %v5358_v32, 16  ;;  %v5377_v52 = vld [vmem:[%s4964_s7 + $0x20] sm:$0xff]  }
  0x41   : > { %4437 = vmatpush3.bf16.msra.mxu0 %v4821_v50  ;;  %v1951_v50 = vsel %vm833_vm2, %v1948_v33, %v1950_v46 }
  0x42   : > { %4438 = vmatprep.subr.bf16.mxu0 %v4825_v0 }
  0x43   : > { %4247 = vmatmul.mubr.msk.bf16.gmra.mrb[20].mxu1 %vm435_vm0, %v394_v1  ;;  %v4854_v1 = vld [vmem:[%s5794_s1 + $0xf8] sm:$0xff]  }
  0x44   : > { %4250 = vmatprep.mubr.msk.bf16.mxu1 %vm435_vm0, %v402_v7  ;;  %4411 = vmatmul.mubr.msk.bf16.gmra.mrb[4].mxu0 %vm435_vm0, %v1935_v15  ;;  %v4843_v7 = vld [vmem:[%s4964_s7 + $0x38] sm:$0xff]   ;;  %v836_v15 = vsel %vm833_vm2, %v834_v2, %v835_v4  ;;  %v855_v2 = vrot.slane %v5128_v26, 1 }
  0x45   : > { %4414 = vmatprep.mubr.msk.bf16.mxu0 %vm435_vm0, %v1937_v55  ;;  %4439 = vmatpush3.bf16.msra.mxu0 %v4825_v0  ;;  %v4842_v0 = vld [vmem:[%s4964_s7 + $0x30] sm:$0xff]   ;;  %v4846_v55 = vld [vmem:[%s4964_s7 + $0x40] sm:$0xff]  }
  0x46   : > { %4440 = vmatprep.subr.bf16.mxu0 %v4831_v5 }
  0x49   : > { %4441 = vmatpush3.bf16.msra.mxu0 %v4831_v5  ;;  %v839_v5 = vrot.slane %v5002_v36, 1 }
  0x4a   : > { %4470 = vmatprep.subr.bf16.mxu0 %v5194_v19 }
  0x4b   : > { %4251 = vmatmul.mubr.msk.bf16.gmra.mrb[24].mxu1 %vm435_vm0, %v410_v20  ;;  %v4862_v20 = vld [vmem:[%s5794_s1 + $0x70] sm:$0xff]  }
  0x4c   : > { %4262 = vmatprep.mubr.msk.bf16.mxu1 %vm435_vm0, %v4971_v10  ;;  %4415 = vmatmul.mubr.msk.bf16.gmra.mrb[8].mxu0 %vm435_vm0, %v1939_v22  ;;  %v1945_v10 = vsel %vm833_vm2, %v1942_v39, %v1944_v23  ;;  %v5342_v39 = vld [vmem:[%s4964_s7 + $0x14] sm:$0xf] }
  0x4d   : > { %4418 = vmatprep.mubr.msk.bf16.mxu0 %vm435_vm0, %v1941_v21  ;;  %v2541_v21 = vld [vmem:[%s4964_s7 + $0x10] sm:$0xf] }
  0x53   : > { %4263 = vmatmul.mubr.msk.bf16.vlgmr.msra.gmra.mrb[0].mxu1 %vm435_vm0, %v4974_v11  ;;  %v837_v11 = vrot.slane %v4991_v24, 1 }
  0x54   : > { %4266 = vmatprep.mubr.msk.bf16.mxu1 %vm435_vm0, %v4991_v24  ;;  %4291 = vmatpush3.bf16.msra.mxu1 %v4827_v56  ;;  %v4836_v56 = vld [vmem:[%s4964_s7 + $0x18] sm:$0xff]   ;;  %v841_v24 = vrot.slane %v5016_v49, 1 }
  0x55   : > { %4419 = vmatmul.mubr.msk.bf16.gmra.mrb[12].mxu0 %vm435_vm0, %v1943_v28  ;;  %4292 = vmatprep.subr.bf16.mxu1 %v4832_v27  ;;  %v838_v16 = vsel %vm833_vm2, %v835_v4, %v837_v11  ;;  %v840_v14 = vsel %vm833_vm2, %v837_v11, %v839_v5  ;;  %v3981_v28 = vcombine.low %v2541_v21, %v5342_v39  ;;  %v5397_v4 = vld [vmem:[%s4964_s7 + $0x30] sm:$0xff]   ;;  %v5401_v11 = vld [vmem:[%s4964_s7 + $0x38] sm:$0xff]   ;;  %v5420_v21 = vld [vmem:[%s4964_s7 + $0x40] sm:$0xff]  }
  0x56   : > { %4422 = vmatprep.mubr.msk.bf16.mxu0 %vm435_vm0, %v1945_v10  ;;  %v842_v22 = vsel %vm833_vm2, %v839_v5, %v841_v24  ;;  %v845_v10 = vrot.slane %v5049_v8, 1 }
  0x57   : > { %v2655_v33 = vshll.u32 %v3981_v28, 16 }
  0x58   : > { %4293 = vmatpush3.bf16.msra.mxu1 %v4832_v27  ;;  %v4852_v27 = vld [vmem:[%s4964_s7 + $0x60] sm:$0xff]  }
  0x59   : > { %4294 = vmatprep.subr.bf16.mxu1 %v4838_v51  ;;  %v2657_v46 = vrot.slane %v2655_v33, 1 }
  0x5b   : > { %4267 = vmatmul.mubr.msk.bf16.gmra.mrb[4].mxu1 %vm435_vm0, %v5002_v36  ;;  %v843_v36 = vrot.slane %v5040_v3, 1 }
  0x5c   : > { %4270 = vmatprep.mubr.msk.bf16.mxu1 %vm435_vm0, %v5016_v49  ;;  %4295 = vmatpush3.bf16.msra.mxu1 %v4838_v51  ;;  %v4851_v49 = vld [vmem:[%s4964_s7 + $0x58] sm:$0xff]   ;;  %v847_v51 = vrot.slane %v5074_v37, 1 }
  0x5d   : > { %4423 = vmatmul.mubr.msk.bf16.gmra.mrb[16].mxu0 %vm435_vm0, %v1947_v35  ;;  %4296 = vmatprep.subr.bf16.mxu1 %v4844_v34  ;;  %v844_v23 = vsel %vm833_vm2, %v841_v24, %v843_v36  ;;  %v4853_v35 = vld [vmem:[%s4964_s7 + $0x68] sm:$0xff]   ;;  %v2692_v24 = vshll.u32 %v5401_v11, 16 }
  0x5e   : > { %4426 = vmatprep.mubr.msk.bf16.mxu0 %vm435_vm0, %v1949_v43  ;;  %v848_v43 = vsel %vm833_vm2, %v845_v10, %v847_v51 }
  0x60   : > { %4297 = vmatpush3.bf16.msra.mxu1 %v4844_v34  ;;  %v846_v34 = vsel %vm833_vm2, %v843_v36, %v845_v10  ;;  %v857_v36 = vrot.slane %v5134_v29, 1  ;;  %v2700_v10 = vshll.u32 %v5420_v21, 16 }
  0x61   : > { %4326 = vmatprep.subr.bf16.mxu1 %v5251_v45 }
  0x63   : > { %4271 = vmatmul.mubr.msk.bf16.gmra.mrb[8].mxu1 %vm435_vm0, %v5040_v3  ;;  %v4868_v3 = vld [vmem:[%s5794_s1 + $0x78] sm:$0xff]  }
  0x64   : > { %4274 = vmatprep.mubr.msk.bf16.mxu1 %vm435_vm0, %v5049_v8  ;;  %v5366_v8 = vld [vmem:[%s5794_s1 + $0x80] sm:$0xff]  }
  0x65   : > { %4427 = vmatmul.mubr.msk.bf16.gmra.mrb[20].mxu0 %vm435_vm0, %v1951_v50  ;;  %v849_v50 = vrot.slane %v5082_v42, 1 }
  0x66   : > { %4430 = vmatprep.mubr.msk.bf16.mxu0 %vm435_vm0, %v1953_v25  ;;  %v851_v25 = vrot.slane %v5100_v60, 1 }
  0x68   : > { %v852_v59 = vsel %vm833_vm2, %v849_v50, %v851_v25 }
  0x6b   : > { %4275 = vmatmul.mubr.msk.bf16.gmra.mrb[12].mxu1 %vm435_vm0, %v5074_v37  ;;  %v4856_v37 = vld [vmem:[%s4964_s7 + $0x70] sm:$0xff]  }
  0x6c   : > { %4278 = vmatprep.mubr.msk.bf16.mxu1 %vm435_vm0, %v5082_v42  ;;  %v2668_v42 = vshll.u32 %v5377_v52, 16 }
  0x6d   : > { %4431 = vmatmul.mubr.msk.bf16.gmra.mrb[24].mxu0 %vm435_vm0, %v1955_v53 }
  0x6e   : > { %4442 = vmatprep.mubr.msk.bf16.mxu0 %vm435_vm0, %v4835_v54  ;;  %v2662_v54 = vrot.slane %v2660_v47, 1 }
  0x73   : > { %4279 = vmatmul.mubr.msk.bf16.gmra.mrb[16].mxu1 %vm435_vm0, %v5100_v60 }
  0x74   : > { %4282 = vmatprep.mubr.msk.bf16.mxu1 %vm435_vm0, %v5111_v6 }
  0x75   : > { %4443 = vmatmul.mubr.msk.bf16.vlgmr.msra.gmra.mrb[0].mxu0 %vm435_vm0, %v4836_v56  ;;  %v5381_v56 = vld [vmem:[%s4964_s7 + $0x28] sm:$0xff]  }
  0x76   : > { %4471 = vmatpush3.bf16.msra.mxu0 %v5194_v19  ;;  %4446 = vmatprep.mubr.msk.bf16.mxu0 %vm435_vm0, %v4839_v57  ;;  %v4849_v19 = vld [vmem:[%s4964_s7 + $0x50] sm:$0xff]   ;;  %v850_v57 = vsel %vm833_vm2, %v847_v51, %v849_v50  ;;  %v2676_v63 = vshll.u32 %v5381_v56, 16  ;;  %v2696_v51 = vshrl.u32 %v5401_v11, 16 }
  0x77   : > { %4472 = vmatprep.subr.bf16.mxu0 %v4841_v58 }
  0x7a   : > { %4473 = vmatpush3.bf16.msra.mxu0 %v4841_v58  ;;  %v4857_v58 = vld [vmem:[%s4964_s7 + $0x78] sm:$0xff]  }
  0x7b   : > { %4283 = vmatmul.mubr.msk.bf16.gmra.mrb[20].mxu1 %vm435_vm0, %v5128_v26  ;;  %4474 = vmatprep.subr.bf16.mxu0 %v4848_v61  ;;  %v2680_v26 = vshrl.u32 %v5381_v56, 16 }
  0x7c   : > { %4286 = vmatprep.mubr.msk.bf16.mxu1 %vm435_vm0, %v5134_v29  ;;  %v4873_v29 = vld [vmem:[%s5794_s1 + $0x110] sm:$0xff]  }
  0x7d   : > { %4447 = vmatmul.mubr.msk.bf16.gmra.mrb[4].mxu0 %vm435_vm0, %v4840_v62  ;;  %v2672_v62 = vshrl.u32 %v5377_v52, 16 }
  0x7e   : > { %4450 = vmatprep.mubr.msk.bf16.mxu0 %vm435_vm0, %v4842_v0  ;;  %4475 = vmatpush3.bf16.msra.mxu0 %v4848_v61  ;;  %v2664_v61 = vshrl.u32 %v5358_v32, 16  ;;  %v853_v0 = vrot.slane %v5111_v6, 1  ;;  %v2684_v6 = vshll.u32 %v5397_v4, 16 }
  0x7f   : > { %4476 = vmatprep.subr.bf16.mxu0 %v4854_v1 }
  0x80   : > { %v854_v5 = vsel %vm833_vm2, %v851_v25, %v853_v0 }
  0x82   : > { %4477 = vmatpush3.bf16.msra.mxu0 %v4854_v1  ;;  %v2670_v1 = vrot.slane %v2668_v42, 1 }
  0x83   : > { %4287 = vmatmul.mubr.msk.bf16.gmra.mrb[24].mxu1 %vm435_vm0, %v5142_v38  ;;  %4506 = vmatprep.subr.bf16.mxu0 %v5309_v9 }
  0x84   : > { %4298 = vmatprep.mubr.msk.bf16.mxu1 %vm435_vm0, %v836_v15  ;;  %v2674_v15 = vor.u32 %v2672_v62, %v2670_v1 }
  0x85   : > { %4451 = vmatmul.mubr.msk.bf16.gmra.mrb[8].mxu0 %vm435_vm0, %v4843_v7  ;;  %v2666_v7 = vor.u32 %v2664_v61, %v2662_v54 }
  0x86   : > { %4454 = vmatprep.mubr.msk.bf16.mxu0 %vm435_vm0, %v4846_v55  ;;  %v2678_v55 = vrot.slane %v2676_v63, 1  ;;  %v5464_v63 = vld [vmem:[%s4964_s7 + $0x60] sm:$0xff]  }
  0x8b   : > { %4299 = vmatmul.mubr.msk.bf16.vlgmr.msra.gmra.mrb[0].mxu1 %vm435_vm0, %v838_v16  ;;  %v856_v16 = vsel %vm833_vm2, %v853_v0, %v855_v2 }
  0x8c   : > { %4302 = vmatprep.mubr.msk.bf16.mxu1 %vm435_vm0, %v840_v14  ;;  %4327 = vmatpush3.bf16.msra.mxu1 %v5251_v45  ;;  %v2653_v45 = vshrl.u32 %v3981_v28, 16  ;;  %v2679_v14 = vsel %vm294_vm1, %v2674_v15, %v2678_v55  ;;  %v858_v28 = vsel %vm833_vm2, %v855_v2, %v857_v36  ;;  %v5469_v15 = vld [vmem:[%s4964_s7 + $0x68] sm:$0xff]  }
  0x8d   : > { %4455 = vmatmul.mubr.msk.bf16.gmra.mrb[12].mxu0 %vm435_vm0, %v4847_v17  ;;  %4328 = vmatprep.subr.bf16.mxu1 %v4855_v18  ;;  %v2671_v17 = vsel %vm294_vm1, %v2666_v7, %v2670_v1  ;;  %v4871_v1 = vld [vmem:[%s4964_s7 + $0x10] sm:$0xff]  }
  0x8e   : > { %4458 = vmatprep.mubr.msk.bf16.mxu0 %vm435_vm0, %v4849_v19  ;;  %v2658_v53 = vor.u32 %v2657_v46, %v2653_v45  ;;  %v2688_v19 = vshrl.u32 %v5397_v4, 16  ;;  %v2702_v45 = vrot.slane %v2700_v10, 1  ;;  %v5446_v46 = vld [vmem:[%s4964_s7 + $0x50] sm:$0xff]  }
  0x8f   : > { %v2720_v61 = vshrl.u32 %v5446_v46, 16 }
  0x90   : > { %4329 = vmatpush3.bf16.msra.mxu1 %v4855_v18  ;;  %v2663_v60 = vsel %vm294_vm1, %v2658_v53, %v2662_v54  ;;  %v4865_v18 = vld [vmem:[%s5794_s1 + $0x108] sm:$0xff]   ;;  %v5450_v53 = vld [vmem:[%s4964_s7 + $0x58] sm:$0xff]  }
  0x91   : > { %4330 = vmatprep.subr.bf16.mxu1 %v4862_v20 }
  0x93   : > { %4303 = vmatmul.mubr.msk.bf16.gmra.mrb[4].mxu1 %vm435_vm0, %v842_v22  ;;  %v859_v22 = vrot.slane %v5142_v38, 1 }
  0x94   : > { %4306 = vmatprep.mubr.msk.bf16.mxu1 %vm435_vm0, %v844_v23  ;;  %4331 = vmatpush3.bf16.msra.mxu1 %v4862_v20  ;;  %v2686_v20 = vrot.slane %v2684_v6, 1  ;;  %v2728_v6 = vshrl.u32 %v5450_v53, 16 }
  0x95   : > { %4459 = vmatmul.mubr.msk.bf16.gmra.mrb[16].mxu0 %vm435_vm0, %v4851_v49  ;;  %4332 = vmatprep.subr.bf16.mxu1 %v4868_v3  ;;  %v2682_v49 = vor.u32 %v2680_v26, %v2678_v55  ;;  %v860_v38 = vsel %vm833_vm2, %v857_v36, %v859_v22  ;;  %v4874_v55 = vld [vmem:[%s4964_s7 + $0x18] sm:$0xff]   ;;  %v2736_v26 = vshrl.u32 %v5464_v63, 16 }
  0x96   : > { %4462 = vmatprep.mubr.msk.bf16.mxu0 %vm435_vm0, %v4852_v27  ;;  %v2690_v23 = vor.u32 %v2688_v19, %v2686_v20  ;;  %v5425_v27 = vld [vmem:[%s4964_s7 + $0x48] sm:$0xff]   ;;  %v5483_v19 = vld [vmem:[%s4964_s7 + $0x70] sm:$0xff]  }
  0x98   : > { %4333 = vmatpush3.bf16.msra.mxu1 %v4868_v3  ;;  %v2694_v3 = vrot.slane %v2692_v24, 1  ;;  %v4895_v24 = vld [vmem:[%s5794_s1 + $0x88] sm:$0xff]  }
  0x99   : > { %4542 = vmatprep.subr.bf16.mxu1 %v5366_v8 }
  0x9a   : > { %v2695_v33 = vsel %vm294_vm1, %v2690_v23, %v2694_v3  ;;  %v2698_v47 = vor.u32 %v2696_v51, %v2694_v3  ;;  %v5491_v23 = vld [vmem:[%s4964_s7 + $0x78] sm:$0xff]   ;;  %v4878_v3 = vld [vmem:[%s4964_s7 + $0x28] sm:$0xff]  }
  0x9b   : > { %4307 = vmatmul.mubr.msk.bf16.gmra.mrb[8].mxu1 %vm435_vm0, %v846_v34  ;;  %v2704_v34 = vshrl.u32 %v5420_v21, 16  ;;  %v2756_v51 = vshll.u32 %v5491_v23, 16 }
  0x9c   : > { %4310 = vmatprep.mubr.msk.bf16.mxu1 %vm435_vm0, %v848_v43  ;;  %v4882_v43 = vld [vmem:[%s5794_s1 + $0x118] sm:$0xff]  }
  0x9d   : > { %4463 = vmatmul.mubr.msk.bf16.gmra.mrb[20].mxu0 %vm435_vm0, %v4853_v35  ;;  %v2708_v35 = vshll.u32 %v5425_v27, 16  ;;  %v2706_v50 = vor.u32 %v2704_v34, %v2702_v45  ;;  %v4897_v34 = vld [vmem:[%s5794_s1 + $0x98] sm:$0xff]  }
  0x9e   : > { %4466 = vmatprep.mubr.msk.bf16.mxu0 %vm435_vm0, %v4856_v37  ;;  %v861_v37 = vrot.slane %v5161_v41, 1  ;;  %v2716_v41 = vshll.u32 %v5446_v46, 16 }
  0x9f   : > { %v2710_v25 = vrot.slane %v2708_v35, 1 }
  0xa0   : > { %v862_v54 = vsel %vm833_vm2, %v859_v22, %v861_v37  ;;  %v2718_v62 = vrot.slane %v2716_v41, 1  ;;  %v4880_v37 = vld [vmem:[%s4964_s7 + $0x30] sm:$0xff]  }
  0xa1   : > { %v2711_v42 = vsel %vm294_vm1, %v2706_v50, %v2710_v25  ;;  %v4883_v50 = vld [vmem:[%s4964_s7 + $0x38] sm:$0xff]  }
  0xa2   : > { %v2722_v2 = vor.u32 %v2720_v61, %v2718_v62 }
  0xa3   : > { %4311 = vmatmul.mubr.msk.bf16.gmra.mrb[12].mxu1 %vm435_vm0, %v850_v57  ;;  %v4869_v57 = vld [vmem:[%s4964_s7 + $0x8] sm:$0xff]  }
  0xa4   : > { %4314 = vmatprep.mubr.msk.bf16.mxu1 %vm435_vm0, %v852_v59  ;;  %v2712_v59 = vshrl.u32 %v5425_v27, 16 }
  0xa5   : > { %4467 = vmatmul.mubr.msk.bf16.gmra.mrb[24].mxu0 %vm435_vm0, %v4857_v58  ;;  %v2703_v58 = vsel %vm294_vm1, %v2698_v47, %v2702_v45  ;;  %v2758_v47 = vrot.slane %v2756_v51, 1 }
  0xa6   : > { %4478 = vmatprep.mubr.msk.bf16.mxu0 %vm435_vm0, %v2663_v60  ;;  %v2724_v60 = vshll.u32 %v5450_v53, 16  ;;  %v2714_v0 = vor.u32 %v2712_v59, %v2710_v25  ;;  %v3007_v25 = vld [vmem:[%s4964_s7 + $0x10] sm:$0xe] }
  0xa7   : > { %v4022_v59 = vcombine.low %v3007_v25, %v5342_v39 }
  0xa8   : > { %v2726_v7 = vrot.slane %v2724_v60, 1  ;;  %v4885_v60 = vld [vmem:[%s4964_s7 + $0x40] sm:$0xff]  }
  0xaa   : > { %v2730_v36 = vor.u32 %v2728_v6, %v2726_v7 }
  0xab   : > { %4315 = vmatmul.mubr.msk.bf16.gmra.mrb[16].mxu1 %vm435_vm0, %v854_v5  ;;  %v2732_v5 = vshll.u32 %v5464_v63, 16 }
  0xac   : > { %4318 = vmatprep.mubr.msk.bf16.mxu1 %vm435_vm0, %v856_v16  ;;  %v2719_v16 = vsel %vm294_vm1, %v2714_v0, %v2718_v62  ;;  %v3020_v62 = vrot.slane %v4022_v59, 1  ;;  %v3021_v0 = vrot.slane %v5358_v32, 1  ;;  %v3025_v32 = vrot.slane %v5381_v56, 1  ;;  %v4892_v56 = vld [vmem:[%s4964_s7 + $0x68] sm:$0xff]  }
  0xad   : > { %4479 = vmatmul.mubr.msk.bf16.vlgmr.msra.gmra.mrb[0].mxu0 %vm435_vm0, %v2671_v17  ;;  %v2727_v17 = vsel %vm294_vm1, %v2722_v2, %v2726_v7  ;;  %v3023_v7 = vrot.slane %v5377_v52, 1  ;;  %v4891_v52 = vld [vmem:[%s4964_s7 + $0x60] sm:$0xff]   ;;  %v1667_v59 = vshrl.u32 %v5243_v44, 16 }
  0xae   : > { %4507 = vmatpush3.bf16.msra.mxu0 %v5309_v9  ;;  %4482 = vmatprep.mubr.msk.bf16.mxu0 %vm435_vm0, %v2679_v14  ;;  %v2687_v9 = vsel %vm294_vm1, %v2682_v49, %v2686_v20  ;;  %v2740_v14 = vshll.u32 %v5469_v15, 16  ;;  %v4876_v20 = vld [vmem:[%s4964_s7 + $0x20] sm:$0xff]   ;;  %v3022_v39 = vsel %vm833_vm2, %v3020_v62, %v3021_v0 }
  0xaf   : > { %4508 = vmatprep.subr.bf16.mxu0 %v4865_v18  ;;  %v3026_v6 = vsel %vm833_vm2, %v3023_v7, %v3025_v32 }
  0xb0   : > { %v2742_v49 = vrot.slane %v2740_v14, 1  ;;  %v4898_v14 = vld [vmem:[%s4964_s7 + $0x48] sm:$0xff]  }
  0xb2   : > { %4509 = vmatpush3.bf16.msra.mxu0 %v4865_v18  ;;  %v2734_v18 = vrot.slane %v2732_v5, 1  ;;  %v4890_v5 = vld [vmem:[%s4964_s7 + $0x58] sm:$0xff]  }
  0xb3   : > { %4319 = vmatmul.mubr.msk.bf16.gmra.mrb[20].mxu1 %vm435_vm0, %v858_v28  ;;  %4510 = vmatprep.subr.bf16.mxu0 %v4873_v29 }
  0xb4   : > { %4322 = vmatprep.mubr.msk.bf16.mxu1 %vm435_vm0, %v860_v38  ;;  %v2738_v22 = vor.u32 %v2736_v26, %v2734_v18  ;;  %v2735_v28 = vsel %vm294_vm1, %v2730_v36, %v2734_v18  ;;  %v2744_v38 = vshrl.u32 %v5469_v15, 16  ;;  %v3029_v26 = vrot.slane %v5401_v11, 1 }
  0xb5   : > { %4483 = vmatmul.mubr.msk.bf16.gmra.mrb[4].mxu0 %vm435_vm0, %v2687_v9  ;;  %v2752_v9 = vshrl.u32 %v5483_v19, 16  ;;  %v1627_v18 = vshrl.u32 %v4898_v14, 16  ;;  %v3031_v11 = vrot.slane %v5420_v21, 1 }
  0xb6   : > { %4486 = vmatprep.mubr.msk.bf16.mxu0 %vm435_vm0, %v2695_v33  ;;  %4511 = vmatpush3.bf16.msra.mxu0 %v4873_v29  ;;  %v4896_v29 = vld [vmem:[%s5794_s1 + $0x90] sm:$0xff]   ;;  %v2743_v10 = vsel %vm294_vm1, %v2738_v22, %v2742_v49  ;;  %v2746_v35 = vor.u32 %v2744_v38, %v2742_v49  ;;  %v1643_v38 = vshrl.u32 %v5215_v30, 16 }
  0xb7   : > { %4512 = vmatprep.subr.bf16.mxu0 %v4882_v43  ;;  %v4893_v49 = vld [vmem:[%s4964_s7 + $0x70] sm:$0xff]  }
  0xba   : > { %4513 = vmatpush3.bf16.msra.mxu0 %v4882_v43  ;;  %v5511_v43 = vld [vmem:[%s4964_s7 + $0x80] ss:$0 sps:$4 sm:$0x11]  }
  0xbb   : > { %4323 = vmatmul.mubr.msk.bf16.gmra.mrb[24].mxu1 %vm435_vm0, %v862_v54  ;;  %v2764_v41 = vshll.u32 %v5511_v43, 16 }
  0xbc   : > { %4334 = vmatprep.mubr.msk.bf16.mxu1 %vm435_vm0, %v4869_v57  ;;  %v2760_v57 = vshrl.u32 %v5491_v23, 16 }
  0xbd   : > { %4487 = vmatmul.mubr.msk.bf16.gmra.mrb[8].mxu0 %vm435_vm0, %v2703_v58  ;;  %v2766_v61 = vrot.slane %v2764_v41, 1  ;;  %v3041_v41 = vrot.slane %v5469_v15, 1 }
  0xbe   : > { %4490 = vmatprep.mubr.msk.bf16.mxu0 %vm435_vm0, %v2711_v42  ;;  %v2762_v42 = vor.u32 %v2760_v57, %v2758_v47 }
  0xc0   : > { %v2767_v2 = vsel %vm294_vm1, %v2762_v42, %v2766_v61  ;;  %v1671_v42 = vshll.u32 %v5257_v48, 16  ;;  %v3045_v48 = vrot.slane %v5491_v23, 1 }
  0xc3   : > { %4335 = vmatmul.mubr.msk.bf16.vlgmr.msra.gmra.mrb[0].mxu1 %vm435_vm0, %v4871_v1  ;;  %v4887_v1 = vld [vmem:[%s4964_s7 + $0x48] sm:$0xff]  }
  0xc4   : > { %4338 = vmatprep.mubr.msk.bf16.mxu1 %vm435_vm0, %v4874_v55  ;;  %4546 = vmatpush3.bf16.msra.mxu1 %v5366_v8  ;;  %v2748_v8 = vshll.u32 %v5483_v19, 16  ;;  %v4889_v55 = vld [vmem:[%s4964_s7 + $0x50] sm:$0xff]  }
  0xc5   : > { %4491 = vmatmul.mubr.msk.bf16.gmra.mrb[12].mxu0 %vm435_vm0, %v2719_v16  ;;  %4543 = vmatprep.subr.bf16.mxu1 %v4895_v24  ;;  %v3024_v16 = vsel %vm833_vm2, %v3021_v0, %v3023_v7 }
  0xc6   : > { %4494 = vmatprep.mubr.msk.bf16.mxu0 %vm435_vm0, %v2727_v17  ;;  %v2750_v33 = vrot.slane %v2748_v8, 1  ;;  %v3027_v17 = vrot.slane %v5397_v4, 1  ;;  %v1629_v4 = vor.u32 %v1627_v18, %v5114_v13  ;;  %v1639_v8 = vshll.u32 %v5215_v30, 16 }
  0xc7   : > { %v3032_v13 = vsel %vm833_vm2, %v3029_v26, %v3031_v11  ;;  %v3035_v30 = vrot.slane %v5446_v46, 1 }
  0xc8   : > { %4547 = vmatpush3.bf16.msra.mxu1 %v4895_v24  ;;  %v2754_v45 = vor.u32 %v2752_v9, %v2750_v33  ;;  %v2751_v54 = vsel %vm294_vm1, %v2746_v35, %v2750_v33  ;;  %v1631_v24 = vshll.u32 %v5201_v12, 16  ;;  %v3028_v36 = vsel %vm833_vm2, %v3025_v32, %v3027_v17 }
  0xc9   : > { %4544 = vmatprep.subr.bf16.mxu1 %v4896_v29  ;;  %v1641_v21 = vrot.slane %v1639_v8, 1  ;;  %v3037_v33 = vrot.slane %v5450_v53, 1 }
  0xca   : > { %v2759_v58 = vsel %vm294_vm1, %v2754_v45, %v2758_v47  ;;  %v1633_v22 = vrot.slane %v1631_v24, 1  ;;  %v1659_v47 = vshrl.u32 %v5237_v40, 16 }
  0xcb   : > { %4339 = vmatmul.mubr.msk.bf16.gmra.mrb[4].mxu1 %vm435_vm0, %v4876_v20  ;;  %v3030_v20 = vsel %vm833_vm2, %v3027_v17, %v3029_v26  ;;  %v3038_v46 = vsel %vm833_vm2, %v3035_v30, %v3037_v33 }
  0xcc   : > { %4342 = vmatprep.mubr.msk.bf16.mxu1 %vm435_vm0, %v4878_v3  ;;  %4548 = vmatpush3.bf16.msra.mxu1 %v4896_v29  ;;  %v3033_v3 = vrot.slane %v5425_v27, 1  ;;  %v1635_v29 = vshrl.u32 %v5201_v12, 16  ;;  %v1645_v27 = vor.u32 %v1643_v38, %v1641_v21 }
  0xcd   : > { %4495 = vmatmul.mubr.msk.bf16.gmra.mrb[16].mxu0 %vm435_vm0, %v2735_v28  ;;  %4545 = vmatprep.subr.bf16.mxu1 %v4897_v34  ;;  %v1634_v28 = vsel %vm294_vm1, %v1629_v4, %v1633_v22  ;;  %v5623_v4 = vld [vmem:[%s5795_s2] ss:$0 sm:$0xff] }
  0xce   : > { %4498 = vmatprep.mubr.msk.bf16.mxu0 %vm435_vm0, %v2743_v10  ;;  %v1647_v10 = vshll.u32 %v5221_v31, 16  ;;  %v3034_v9 = vsel %vm833_vm2, %v3031_v11, %v3033_v3  ;;  %v1637_v51 = vor.u32 %v1635_v29, %v1633_v22  ;;  %v3036_v25 = vsel %vm833_vm2, %v3033_v3, %v3035_v30 }
  0xd0   : > { %4549 = vmatpush3.bf16.msra.mxu1 %v4897_v34  ;;  %v1649_v12 = vrot.slane %v1647_v10, 1  ;;  %v1655_v34 = vshll.u32 %v5237_v40, 16  ;;  %v1642_v35 = vsel %vm294_vm1, %v1637_v51, %v1641_v21  ;;  %v3039_v40 = vrot.slane %v5464_v63, 1 }
  0xd1   : > { %v1673_v63 = vrot.slane %v1671_v42, 1 }
  0xd2   : > { %v1650_v45 = vsel %vm294_vm1, %v1645_v27, %v1649_v12  ;;  %v3042_v62 = vsel %vm833_vm2, %v3039_v40, %v3041_v41 }
  0xd3   : > { %4343 = vmatmul.mubr.msk.bf16.gmra.mrb[8].mxu1 %vm435_vm0, %v4880_v37  ;;  %v1651_v37 = vshrl.u32 %v5221_v31, 16 }
  0xd4   : > { %4346 = vmatprep.mubr.msk.bf16.mxu1 %vm435_vm0, %v4883_v50  ;;  %v1663_v50 = vshll.u32 %v5243_v44, 16  ;;  %v3043_v44 = vrot.slane %v5483_v19, 1 }
  0xd5   : > { %4499 = vmatmul.mubr.msk.bf16.gmra.mrb[20].mxu0 %vm435_vm0, %v2751_v54  ;;  %v1657_v54 = vrot.slane %v1655_v34, 1  ;;  %v1653_v53 = vor.u32 %v1651_v37, %v1649_v12 }
  0xd6   : > { %4502 = vmatprep.mubr.msk.bf16.mxu0 %vm435_vm0, %v2759_v58  ;;  %v1665_v31 = vrot.slane %v1663_v50, 1 }
  0xd7   : > { %v1661_v57 = vor.u32 %v1659_v47, %v1657_v54  ;;  %v1658_v58 = vsel %vm294_vm1, %v1653_v53, %v1657_v54 }
  0xd8   : > { %v1669_v0 = vor.u32 %v1667_v59, %v1665_v31 }
  0xd9   : > { %v1666_v61 = vsel %vm294_vm1, %v1661_v57, %v1665_v31 }
  0xda   : > { %v1674_v15 = vsel %vm294_vm1, %v1669_v0, %v1673_v63 }
  0xdb   : > { %4347 = vmatmul.mubr.msk.bf16.gmra.mrb[12].mxu1 %vm435_vm0, %v4885_v60  ;;  %v3040_v60 = vsel %vm833_vm2, %v3037_v33, %v3039_v40 }
  0xdc   : > { %4350 = vmatprep.mubr.msk.bf16.mxu1 %vm435_vm0, %v4887_v1  ;;  %v3044_v1 = vsel %vm833_vm2, %v3041_v41, %v3043_v44 }
  0xdd   : > { %4503 = vmatmul.mubr.msk.bf16.gmra.mrb[24].mxu0 %vm435_vm0, %v2767_v2  ;;  %v3046_v2 = vsel %vm833_vm2, %v3043_v44, %v3045_v48 }
  0xde   : > { %4514 = vmatprep.mubr.msk.bf16.mxu0 %vm435_vm0, %v3022_v39  ;;  %v3047_v39 = vrot.slane %v5511_v43, 1 }
  0xe0   : > { %v3048_v7 = vsel %vm833_vm2, %v3045_v48, %v3047_v39 }
  0xe3   : > { %4351 = vmatmul.mubr.msk.bf16.gmra.mrb[16].mxu1 %vm435_vm0, %v4889_v55 }
  0xe4   : > { %4354 = vmatprep.mubr.msk.bf16.mxu1 %vm435_vm0, %v4890_v5 }
  0xe5   : > { %4515 = vmatmul.mubr.msk.bf16.vlgmr.msra.gmra.mrb[0].mxu0 %vm435_vm0, %v3024_v16 }
  0xe6   : > { %4518 = vmatprep.mubr.msk.bf16.mxu0 %vm435_vm0, %v3026_v6 }
  0xeb   : > { %4355 = vmatmul.mubr.msk.bf16.gmra.mrb[20].mxu1 %vm435_vm0, %v4891_v52 }
  0xec   : > { %4358 = vmatprep.mubr.msk.bf16.mxu1 %vm435_vm0, %v4892_v56 }
  0xed   : > { %4519 = vmatmul.mubr.msk.bf16.gmra.mrb[4].mxu0 %vm435_vm0, %v3028_v36 }
  0xee   : > { %4522 = vmatprep.mubr.msk.bf16.mxu0 %vm435_vm0, %v3030_v20 }
  0xf3   : > { %4359 = vmatmul.mubr.msk.bf16.gmra.mrb[24].mxu1 %vm435_vm0, %v4893_v49 }
  0xf4   : > { %4386 = vmatprep.mubr.msk.bf16.mxu1 %vm435_vm0, %v1634_v28 }
  0xf5   : > { %4523 = vmatmul.mubr.msk.bf16.gmra.mrb[8].mxu0 %vm435_vm0, %v3032_v13 }
  0xf6   : > { %4526 = vmatprep.mubr.msk.bf16.mxu0 %vm435_vm0, %v3034_v9 }
  0xfb   : > { %4387 = vmatmul.mubr.msk.bf16.vlgmr.msra.gmra.mrb[16].mxu1 %vm435_vm0, %v1642_v35 }
  0xfc   : > { %4390 = vmatprep.mubr.msk.bf16.mxu1 %vm435_vm0, %v1650_v45 }
  0xfd   : > { %4527 = vmatmul.mubr.msk.bf16.gmra.mrb[12].mxu0 %vm435_vm0, %v3036_v25 }
  0xfe   : > { %4530 = vmatprep.mubr.msk.bf16.mxu0 %vm435_vm0, %v3038_v46 }
 0x103   : > { %4391 = vmatmul.mubr.msk.bf16.gmra.mrb[20].mxu1 %vm435_vm0, %v1658_v58 }
 0x104   : > { %4394 = vmatprep.mubr.msk.bf16.mxu1 %vm435_vm0, %v1666_v61 }
 0x105   : > { %4531 = vmatmul.mubr.msk.bf16.gmra.mrb[16].mxu0 %vm435_vm0, %v3040_v60 }
 0x106   : > { %4534 = vmatprep.mubr.msk.bf16.mxu0 %vm435_vm0, %v3042_v62 }
 0x10b   : > { %4395 = vmatmul.mubr.msk.bf16.gmra.mrb[24].mxu1 %vm435_vm0, %v1674_v15 }
 0x10d   : > { %4535 = vmatmul.mubr.msk.bf16.gmra.mrb[20].mxu0 %vm435_vm0, %v3044_v1 }
 0x10e   : > { %4538 = vmatprep.mubr.msk.bf16.mxu0 %vm435_vm0, %v3046_v2 }
 0x115   : > { %4539 = vmatmul.mubr.msk.bf16.gmra.mrb[24].mxu0 %vm435_vm0, %v3048_v7  ;;  %vm3619_vm0 = vsmask.f32 1280 }
 0x116   : > { %vm3620_vm1 = vmand %vm3618_vm15, %vm3619_vm0 }
 0x196   : > { %v4336_v19 = vpop.f32.mrb[0].mxu1 }
 0x197   : > { %v1309_v23 = vpop.f32.mrb[1].mxu1 }
 0x198   : > { %v4337_v55 = vpop.f32.mrb[2].mxu1 }
 0x199   : > { %v1312_v32 = vpop.f32.mrb[3].mxu1 }
 0x19e   : > { %v4340_v5 = vpop.f32.mrb[4].mxu1 }
 0x19f   : > { %v1325_v16 = vpop.f32.mrb[5].mxu1 }
 0x1a0   : > { %v4341_v6 = vpop.f32.mrb[6].mxu1 }
 0x1a1   : > { %v1328_v17 = vpop.f32.mrb[7].mxu1 }
 0x1a6   : > { %v4344_v52 = vpop.f32.mrb[8].mxu1 }
 0x1a7   : > { %v1341_v26 = vpop.f32.mrb[9].mxu1 }
 0x1a8   : > { %v5608_v56 = vpop.f32.mrb[10].mxu1 }
 0x1a9   : > { %v5610_v14 = vpop.f32.mrb[11].mxu1 }
 0x1ae   : > { %v5612_v18 = vpop.f32.mrb[12].mxu1 }
 0x1af   : > { %v5614_v43 = vpop.f32.mrb[13].mxu1 }
 0x1b0   : > { %v5616_v24 = vpop.f32.mrb[14].mxu1 }
 0x1b1   : > { %v5618_v36 = vpop.f32.mrb[15].mxu1 }
 0x1b8   : > { %v4516_v20 = vpop.f32.mrb[0].mxu0 }
 0x1b9   : > { %v4550_v22 = vadd.f32 %v4516_v20, %v4336_v19  ;;  %v3149_v11 = vpop.f32.mrb[1].mxu0 }
 0x1ba   : > { %v4551_v49 = vadd.f32 %v3149_v11, %v1309_v23  ;;  %v4517_v3 = vpop.f32.mrb[2].mxu0 }
 0x1bb   : > { %v3297_v8 = vadd.f32 %v4550_v22, %v5623_v4  ;;  %v4552_v29 = vadd.f32 %v4517_v3, %v4337_v55  ;;  %v3152_v28 = vpop.f32.mrb[3].mxu0 }
 0x1bc   : > { %v3295_v38 = vadd.f32 %v4551_v49, %v5623_v4  ;;  %v4553_v10 = vadd.f32 %v3152_v28, %v1312_v32 }
 0x1bd   : > { %v3325_v13 = vmax.f32 %v3297_v8, 0.0  ;;  %v3298_v9 = vadd.f32 %v4552_v29, %v5623_v4 }
 0x1be   : > { %v3323_v21 = vmax.f32 %v3295_v38, 0.0  ;;  %v3296_v51 = vadd.f32 %v4553_v10, %v5623_v4 }
 0x1bf   : > { %v3326_v27 = vmax.f32 %v3298_v9, 0.0  ;;  %v3383_v33 = vrot.slane %v3325_v13, 1 }
 0x1c0   : > { %v3324_v12 = vmax.f32 %v3296_v51, 0.0  ;;  %v4520_v30 = vpop.f32.mrb[4].mxu0  ;;  %v3380_v45 = vrot.slane %v3323_v21, 1 }
 0x1c1   : > { %v3385_v34 = vrot.slane %v3326_v27, 1  ;;  %v4554_v35 = vadd.f32 %v4520_v30, %v4340_v5  ;;  %v3165_v37 = vpop.f32.mrb[5].mxu0 }
 0x1c2   : > { %v3381_v47 = vrot.slane %v3324_v12, 1  ;;  %v4555_v50 = vadd.f32 %v3165_v37, %v1325_v16  ;;  %v4521_v25 = vpop.f32.mrb[6].mxu0 }
 0x1c3   : > { %v3386_v46 = vsel %vm833_vm2, %v3383_v33, %v3385_v34  ;;  %v3301_v54 = vadd.f32 %v4554_v35, %v5623_v4  ;;  %v4556_v53 = vadd.f32 %v4521_v25, %v4341_v6  ;;  %v3168_v57 = vpop.f32.mrb[7].mxu0 }
 0x1c4   : > { %v3465_v31 = vmax.f32 %v3325_v13, %v3386_v46  ;;  %v3382_v40 = vsel %vm833_vm2, %v3380_v45, %v3381_v47  ;;  %v3384_v41 = vsel %vm833_vm2, %v3381_v47, %v3383_v33  ;;  %v3299_v58 = vadd.f32 %v4555_v50, %v5623_v4 }
 0x1c5   : > { %v3463_v59 = vmax.f32 %v3323_v21, %v3382_v40  ;;  %v3464_v42 = vmax.f32 %v3324_v12, %v3384_v41  ;;  %v3329_v61 = vmax.f32 %v3301_v54, 0.0  ;;  %v3302_v60 = vadd.f32 %v4556_v53, %v5623_v4 }
 0x1c6   : > { %3493 = vst [vmem:[#allocation2 + $0x10] sm:$0xff] %v3465_v31  ;;  %v3327_v62 = vmax.f32 %v3299_v58, 0.0  ;;  %v4557_v0 = vadd.f32 %v3168_v57, %v1328_v17 }
 0x1c7   : > { %3491 = vst [vmem:[#allocation2] sm:$0xff] %v3463_v59  ;;  %3492 = vst [vmem:[#allocation2 + $0x8] sm:$0xff] %v3464_v42  ;;  %v3330_v63 = vmax.f32 %v3302_v60, 0.0  ;;  %v3391_v1 = vrot.slane %v3329_v61, 1 }
 0x1c8   : > { %v3387_v44 = vrot.slane %v3327_v62, 1  ;;  %v3300_v48 = vadd.f32 %v4557_v0, %v5623_v4  ;;  %v4524_v15 = vpop.f32.mrb[8].mxu0  ;;  %v3527_v0 = vld [vmem:[%s5665_s30] sm:$0xf] }
 0x1c9   : > { %v3393_v2 = vrot.slane %v3330_v63, 1  ;;  %v4558_v39 = vadd.f32 %v4524_v15, %v4344_v52  ;;  %v3181_v7 = vpop.f32.mrb[9].mxu0 }
 0x1ca   : > { %v3388_v19 = vsel %vm833_vm2, %v3385_v34, %v3387_v44  ;;  %v3328_v23 = vmax.f32 %v3300_v48, 0.0  ;;  %v4559_v55 = vadd.f32 %v3181_v7, %v1341_v26  ;;  %v4525_v32 = vpop.f32.mrb[10].mxu0 }
 0x1cb   : > { %v3466_v5 = vmax.f32 %v3326_v27, %v3388_v19  ;;  %v3394_v16 = vsel %vm833_vm2, %v3391_v1, %v3393_v2  ;;  %v3305_v6 = vadd.f32 %v4558_v39, %v5623_v4  ;;  %v4560_v17 = vadd.f32 %v4525_v32, %v5608_v56  ;;  %v3184_v20 = vpop.f32.mrb[11].mxu0 }
 0x1cc   : > { %v3469_v22 = vmax.f32 %v3329_v61, %v3394_v16  ;;  %v3389_v11 = vrot.slane %v3328_v23, 1  ;;  %v3303_v52 = vadd.f32 %v4559_v55, %v5623_v4  ;;  %v4561_v49 = vadd.f32 %v3184_v20, %v5610_v14 }
 0x1cd   : > { %3494 = vst [vmem:[#allocation2 + $0x18] sm:$0xff] %v3466_v5  ;;  %v3333_v26 = vmax.f32 %v3305_v6, 0.0  ;;  %v5648_v3 = vadd.f32 %v4560_v17, %v5623_v4 }
 0x1ce   : > { %3497 = vst [vmem:[#allocation2 + $0x30] sm:$0xff] %v3469_v22  ;;  %v3390_v8 = vsel %vm833_vm2, %v3387_v44, %v3389_v11  ;;  %v3392_v56 = vsel %vm833_vm2, %v3389_v11, %v3391_v1  ;;  %v3331_v29 = vmax.f32 %v3303_v52, 0.0  ;;  %v3304_v28 = vadd.f32 %v4561_v49, %v5623_v4  ;;  %v4388_v38 = vpop.f32.mrb[16].mxu1  ;;  %v3519_v31 = vld [vmem:[#allocation2] ss:$2 sm:$0x7f] }
 0x1cf   : > { %v3467_v10 = vmax.f32 %v3327_v62, %v3390_v8  ;;  %v3468_v13 = vmax.f32 %v3328_v23, %v3392_v56  ;;  %v3334_v9 = vmax.f32 %v5648_v3, 0.0  ;;  %v1839_v21 = vpop.f32.mrb[17].mxu1  ;;  %v3399_v30 = vrot.slane %v3333_v26, 1 }
 0x1d0   : > { %v3395_v14 = vrot.slane %v3331_v29, 1  ;;  %v3332_v51 = vmax.f32 %v3304_v28, 0.0  ;;  %v4528_v27 = vpop.f32.mrb[12].mxu0  ;;  %v5655_v12 = vpop.f32.mrb[18].mxu1 }
 0x1d1   : > { %3495 = vst [vmem:[#allocation2 + $0x20] sm:$0xff] %v3467_v10  ;;  %3496 = vst [vmem:[#allocation2 + $0x28] sm:$0xff] %v3468_v13  ;;  %v3401_v33 = vrot.slane %v3334_v9, 1  ;;  %v4562_v34 = vadd.f32 %v4528_v27, %v5612_v18  ;;  %v3197_v35 = vpop.f32.mrb[13].mxu0  ;;  %v1842_v37 = vpop.f32.mrb[19].mxu1 }
 0x1d2   : > { %v3396_v45 = vsel %vm833_vm2, %v3393_v2, %v3395_v14  ;;  %v3397_v47 = vrot.slane %v3332_v51, 1  ;;  %v4563_v50 = vadd.f32 %v3197_v35, %v5614_v43  ;;  %v4529_v25 = vpop.f32.mrb[14].mxu0 }
 0x1d3   : > { %v3470_v46 = vmax.f32 %v3330_v63, %v3396_v45  ;;  %v3402_v54 = vsel %vm833_vm2, %v3399_v30, %v3401_v33  ;;  %v3309_v18 = vadd.f32 %v4562_v34, %v5623_v4  ;;  %v4564_v53 = vadd.f32 %v4529_v25, %v5616_v24  ;;  %v3200_v57 = vpop.f32.mrb[15].mxu0 }
 0x1d4   : > { %v3521_v40 = vld [vmem:[#allocation2 + $0x10] ss:$2 sm:$0x7f]  ;;  %v3473_v41 = vmax.f32 %v3333_v26, %v3402_v54  ;;  %v3398_v43 = vsel %vm833_vm2, %v3395_v14, %v3397_v47  ;;  %v3400_v58 = vsel %vm833_vm2, %v3397_v47, %v3399_v30  ;;  %v3307_v59 = vadd.f32 %v4563_v50, %v5623_v4 }
 0x1d5   : > { %v3522_v42 = vmax.f32 %v3519_v31, %v3521_v40  ;;  %3498 = vst [vmem:[#allocation2 + $0x38] sm:$0xff] %v3470_v46  ;;  %v3471_v61 = vmax.f32 %v3331_v29, %v3398_v43  ;;  %v3472_v60 = vmax.f32 %v3332_v51, %v3400_v58  ;;  %v3337_v62 = vmax.f32 %v3309_v18, 0.0 }
 0x1d6   : > { %3501 = vst [vmem:[#allocation2 + $0x50] sm:$0xff] %v3473_v41  ;;  %v3335_v24 = vmax.f32 %v3307_v59, 0.0  ;;  %v5677_v63 = vadd.f32 %v4564_v53, %v5623_v4  ;;  %v4565_v44 = vadd.f32 %v3200_v57, %v5618_v36  ;;  %v4392_v48 = vpop.f32.mrb[20].mxu1 }
 0x1d7   : > { %v3523_v15 = vpack.c.bf16 %v3522_v42, %v3522_v42  ;;  %3499 = vst [vmem:[#allocation2 + $0x40] sm:$0xff] %v3471_v61  ;;  %3500 = vst [vmem:[#allocation2 + $0x48] sm:$0xff] %v3472_v60  ;;  %v5680_v1 = vpop.f32.mrb[21].mxu1  ;;  %v3407_v55 = vrot.slane %v3337_v62, 1 }
 0x1d8   : > { %v3403_v2 = vrot.slane %v3335_v24, 1  ;;  %v3338_v39 = vmax.f32 %v5677_v63, 0.0  ;;  %v3308_v7 = vadd.f32 %v4565_v44, %v5623_v4  ;;  %v4532_v19 = vpop.f32.mrb[16].mxu0  ;;  %v5684_v16 = vpop.f32.mrb[22].mxu1 }
 0x1d9   : > { %v3528_v23 = vsel %vm3526_vm5, %v3523_v15, %v3527_v0  ;;  %v4566_v32 = vadd.f32 %v4532_v19, %v4388_v38  ;;  %v3213_v5 = vpop.f32.mrb[17].mxu0  ;;  %v5690_v11 = vpop.f32.mrb[23].mxu1  ;;  %v3531_v52 = vld [vmem:[#allocation2 + $0x20] ss:$2 sm:$0x7f]  ;;  %vm3665_vm5 = vcmask 1040384  }
 0x1da   : > { %3529 = vst [vmem:[%s5665_s30] sm:$0xf] %v3528_v23  ;;  %v3404_v36 = vsel %vm833_vm2, %v3401_v33, %v3403_v2  ;;  %v3409_v6 = vrot.slane %v3338_v39, 1  ;;  %v3336_v17 = vmax.f32 %v3308_v7, 0.0  ;;  %v4567_v20 = vadd.f32 %v3213_v5, %v1839_v21  ;;  %v4533_v22 = vpop.f32.mrb[18].mxu0  ;;  %vm3667_vm8 = vmand %vm3665_vm5, %vm3666_vm6 }
 0x1db   : > { %v3474_v49 = vmax.f32 %v3334_v9, %v3404_v36  ;;  %v3313_v26 = vadd.f32 %v4566_v32, %v5623_v4  ;;  %v4568_v8 = vadd.f32 %v4533_v22, %v5655_v12  ;;  %v3216_v56 = vpop.f32.mrb[19].mxu0 }
 0x1dc   : > { %v3533_v29 = vld [vmem:[#allocation2 + $0x30] ss:$2 sm:$0x7f]  ;;  %v3410_v28 = vsel %vm833_vm2, %v3407_v55, %v3409_v6  ;;  %v3405_v38 = vrot.slane %v3336_v17, 1  ;;  %v3311_v10 = vadd.f32 %v4567_v20, %v5623_v4  ;;  %v4569_v13 = vadd.f32 %v3216_v56, %v1842_v37 }
 0x1dd   : > { %v3534_v21 = vmax.f32 %v3531_v52, %v3533_v29  ;;  %3502 = vst [vmem:[#allocation2 + $0x58] sm:$0xff] %v3474_v49  ;;  %v3477_v14 = vmax.f32 %v3337_v62, %v3410_v28  ;;  %v3341_v51 = vmax.f32 %v3313_v26, 0.0  ;;  %v5699_v27 = vadd.f32 %v4568_v8, %v5623_v4 }
 0x1de   : > { %v3406_v3 = vsel %vm833_vm2, %v3403_v2, %v3405_v38  ;;  %v3408_v9 = vsel %vm833_vm2, %v3405_v38, %v3407_v55  ;;  %v3339_v12 = vmax.f32 %v3311_v10, 0.0  ;;  %v3312_v30 = vadd.f32 %v4569_v13, %v5623_v4  ;;  %v4396_v33 = vpop.f32.mrb[24].mxu1 }
 0x1df   : > { %v4050_v34 = vpack.c.bf16 %v3534_v21, %v3534_v21  ;;  %3505 = vst [vmem:[#allocation2 + $0x70] sm:$0xff] %v3477_v14  ;;  %v3475_v35 = vmax.f32 %v3335_v24, %v3406_v3  ;;  %v3476_v37 = vmax.f32 %v3336_v17, %v3408_v9  ;;  %v5704_v45 = vpop.f32.mrb[25].mxu1  ;;  %v3342_v50 = vmax.f32 %v5699_v27, 0.0  ;;  %v3558_v24 = vld [vmem:[#allocation2 + $0x40] ss:$2 sm:$0x7f] }
 0x1e0   : > { %v3411_v47 = vrot.slane %v3339_v12, 1  ;;  %v3340_v25 = vmax.f32 %v3312_v30, 0.0  ;;  %v4536_v46 = vpop.f32.mrb[20].mxu0  ;;  %v5707_v54 = vpop.f32.mrb[26].mxu1  ;;  %v3415_v57 = vrot.slane %v3341_v51, 1 }
 0x1e1   : > { %v3540_v18 = vshll.u32 %v4050_v34, 16  ;;  %v3543_v53 = vshrl.u32 %v4050_v34, 16  ;;  %3503 = vst [vmem:[#allocation2 + $0x60] sm:$0xff] %v3475_v35  ;;  %3504 = vst [vmem:[#allocation2 + $0x68] sm:$0xff] %v3476_v37  ;;  %v4570_v31 = vadd.f32 %v4536_v46, %v4392_v48  ;;  %v3229_v40 = vpop.f32.mrb[21].mxu0  ;;  %v1874_v41 = vpop.f32.mrb[27].mxu1 }
 0x1e2   : > { %v3412_v58 = vsel %vm833_vm2, %v3409_v6, %v3411_v47  ;;  %v3417_v59 = vrot.slane %v3342_v50, 1  ;;  %v3413_v42 = vrot.slane %v3340_v25, 1  ;;  %v4571_v61 = vadd.f32 %v3229_v40, %v5680_v1  ;;  %v4537_v60 = vpop.f32.mrb[22].mxu0  ;;  %v3553_v2 = vld [vmem:[%s5665_s30] sm:$0x8] }
 0x1e3   : > { %v3542_v62 = vrot.slane %v3540_v18, 5  ;;  %v3545_v0 = vrot.slane %v3543_v53, 4  ;;  %v3478_v44 = vmax.f32 %v3338_v39, %v3412_v58  ;;  %v5722_v48 = vadd.f32 %v4570_v31, %v5623_v4  ;;  %v3232_v15 = vpop.f32.mrb[23].mxu0 }
 0x1e4   : > { %v3560_v7 = vld [vmem:[#allocation2 + $0x50] ss:$2 sm:$0x7f]  ;;  %v3418_v19 = vsel %vm833_vm2, %v3415_v57, %v3417_v59  ;;  %v3414_v23 = vsel %vm833_vm2, %v3411_v47, %v3413_v42  ;;  %v3416_v1 = vsel %vm833_vm2, %v3413_v42, %v3415_v57  ;;  %v3315_v55 = vadd.f32 %v4571_v61, %v5623_v4 }
 0x1e5   : > { %v3546_v32 = vor.u32 %v3545_v0, %v3542_v62  ;;  %v3554_v5 = vsel %vm5711_vm10, %v3542_v62, %v3553_v2  ;;  %v3561_v63 = vmax.f32 %v3558_v24, %v3560_v7  ;;  %3506 = vst [vmem:[#allocation2 + $0x78] sm:$0xff] %v3478_v44  ;;  %v3481_v39 = vmax.f32 %v3341_v51, %v3418_v19  ;;  %vm3672_vm10 = vmand %vm3524_vm3, %vm3671_vm9 }
 0x1e6   : > { %3555 = vst [vmem:[%s5665_s30] sm:$0x8] %v3554_v5  ;;  %v3479_v36 = vmax.f32 %v3339_v12, %v3414_v23  ;;  %v3480_v6 = vmax.f32 %v3340_v25, %v3416_v1  ;;  %v3345_v17 = vmax.f32 %v5722_v48, 0.0  ;;  %v3343_v20 = vmax.f32 %v3315_v55, 0.0 }
 0x1e7   : > { %v3547_v22 = vrot.slane %v3546_v32, 4  ;;  %v4051_v52 = vpack.c.bf16 %v3561_v63, %v3561_v63  ;;  %3509 = vst [vmem:[#allocation2 + $0x90] sm:$0xff] %v3481_v39  ;;  %v4572_v49 = vadd.f32 %v4537_v60, %v5684_v16  ;;  %v4573_v26 = vadd.f32 %v3232_v15, %v5690_v11  ;;  %v3574_v16 = vld [vmem:[%s5665_s30 + $0x8] sm:$0x7] }
 0x1e8   : > { %3507 = vst [vmem:[#allocation2 + $0x80] sm:$0xff] %v3479_v36  ;;  %3508 = vst [vmem:[#allocation2 + $0x88] sm:$0xff] %v3480_v6  ;;  %v3419_v8 = vrot.slane %v3343_v20, 1  ;;  %v4540_v56 = vpop.f32.mrb[24].mxu0  ;;  %v3423_v11 = vrot.slane %v3345_v17, 1 }
 0x1e9   : > { %3556 = vst [vmem:[%s5665_s30 + $0x4] sm:$0x7] %v3547_v22  ;;  %v3566_v29 = vrot.slane %v4051_v52, 5  ;;  %v3318_v28 = vadd.f32 %v4572_v49, %v5623_v4  ;;  %v3316_v38 = vadd.f32 %v4573_v26, %v5623_v4  ;;  %v4574_v10 = vadd.f32 %v4540_v56, %v4396_v33  ;;  %v3245_v13 = vpop.f32.mrb[25].mxu0 }
 0x1ea   : > { %v3420_v14 = vsel %vm833_vm2, %v3417_v59, %v3419_v8  ;;  %v4575_v51 = vadd.f32 %v3245_v13, %v5704_v45  ;;  %v4541_v3 = vpop.f32.mrb[26].mxu0  ;;  %v3578_v35 = vld [vmem:[#allocation2 + $0x60] ss:$2 sm:$0x7f] }
 0x1eb   : > { %v3567_v9 = vrot.slane %v3566_v29, 4  ;;  %3570 = vst [vmem:[%s5665_s30 + $0x4] sm:$0x8] %v3566_v29  ;;  %v3482_v12 = vmax.f32 %v3342_v50, %v3420_v14  ;;  %v3346_v30 = vmax.f32 %v3318_v28, 0.0  ;;  %v3344_v33 = vmax.f32 %v3316_v38, 0.0  ;;  %v3248_v34 = vpop.f32.mrb[27].mxu0 }
 0x1ec   : > { %v3580_v37 = vld [vmem:[#allocation2 + $0x70] ss:$2 sm:$0x7f]  ;;  %v3321_v47 = vadd.f32 %v4574_v10, %v5623_v4  ;;  %v3319_v25 = vadd.f32 %v4575_v51, %v5623_v4  ;;  %v4576_v46 = vadd.f32 %v4541_v3, %v5707_v54  ;;  %v4577_v18 = vadd.f32 %v3248_v34, %v1874_v41 }
 0x1ed   : > { %v3575_v45 = vsel %vm5740_vm11, %v3567_v9, %v3574_v16  ;;  %v3581_v53 = vmax.f32 %v3578_v35, %v3580_v37  ;;  %3510 = vst [vmem:[#allocation2 + $0x98] sm:$0xff] %v3482_v12  ;;  %v3425_v27 = vrot.slane %v3346_v30, 1  ;;  %v3421_v57 = vrot.slane %v3344_v33, 1  ;;  %v3621_v38 = vld [vmem:[%s5665_s30 + $0x10] sm:$0x3] }
 0x1ee   : > { %3576 = vst [vmem:[%s5665_s30 + $0x8] sm:$0x7] %v3575_v45  ;;  %v3349_v50 = vmax.f32 %v3321_v47, 0.0  ;;  %v3347_v31 = vmax.f32 %v3319_v25, 0.0  ;;  %v3322_v40 = vadd.f32 %v4576_v46, %v5623_v4  ;;  %v3320_v43 = vadd.f32 %v4577_v18, %v5623_v4  ;;  %v3668_v46 = vld [vmem:[%s5665_s30 + $0x18] sm:$0x1] }
 0x1ef   : > { %v4052_v58 = vpack.c.bf16 %v3581_v53, %v3581_v53  ;;  %v3426_v59 = vsel %vm833_vm2, %v3423_v11, %v3425_v27  ;;  %v3422_v54 = vsel %vm833_vm2, %v3419_v8, %v3421_v57  ;;  %v3424_v41 = vsel %vm833_vm2, %v3421_v57, %v3423_v11  ;;  %v3605_v7 = vld [vmem:[#allocation2 + $0x80] ss:$2 sm:$0x7f] }
 0x1f0   : > { %v3485_v42 = vmax.f32 %v3345_v17, %v3426_v59  ;;  %v3483_v61 = vmax.f32 %v3343_v20, %v3422_v54  ;;  %v3484_v60 = vmax.f32 %v3344_v33, %v3424_v41  ;;  %v3427_v24 = vrot.slane %v3347_v31, 1 }
 0x1f1   : > { %v3587_v62 = vshrl.u32 %v4052_v58, 16  ;;  %v3590_v0 = vshll.u32 %v4052_v58, 16  ;;  %v3350_v44 = vmax.f32 %v3322_v40, 0.0  ;;  %v3431_v4 = vrot.slane %v3349_v50, 1 }
 0x1f2   : > { %3513 = vst [vmem:[#allocation2 + $0xb0] sm:$0xff] %v3485_v42  ;;  %3511 = vst [vmem:[#allocation2 + $0xa0] sm:$0xff] %v3483_v61  ;;  %v3348_v48 = vmax.f32 %v3320_v43, 0.0  ;;  %v3428_v19 = vsel %vm833_vm2, %v3425_v27, %v3427_v24 }
 0x1f3   : > { %3512 = vst [vmem:[#allocation2 + $0xa8] sm:$0xff] %v3484_v60  ;;  %v3589_v15 = vrot.slane %v3587_v62, 5  ;;  %v3592_v2 = vrot.slane %v3590_v0, 6  ;;  %v3433_v23 = vrot.slane %v3350_v44, 1  ;;  %v3486_v32 = vmax.f32 %v3346_v30, %v3428_v19 }
 0x1f4   : > { %v3607_v55 = vld [vmem:[#allocation2 + $0x90] ss:$2 sm:$0x7f]  ;;  %v3429_v5 = vrot.slane %v3348_v48, 1 }
 0x1f5   : > { %v3593_v63 = vor.u32 %v3592_v2, %v3589_v15  ;;  %v3600_v39 = vld [vmem:[%s5665_s30 + $0x8] sm:$0xc]  ;;  %v3608_v36 = vmax.f32 %v3605_v7, %v3607_v55  ;;  %v3434_v6 = vsel %vm833_vm2, %v3431_v4, %v3433_v23  ;;  %v3490_v17 = vmax.f32 %v3350_v44, %v3433_v23  ;;  %3514 = vst [vmem:[#allocation2 + $0xb8] sm:$0xff] %v3486_v32 }
 0x1f6   : > { %v3489_v20 = vmax.f32 %v3349_v50, %v3434_v6  ;;  %v3430_v22 = vsel %vm833_vm2, %v3427_v24, %v3429_v5  ;;  %v3432_v52 = vsel %vm833_vm2, %v3429_v5, %v3431_v4  ;;  %vm3644_vm2 = vcmask 1043457  }
 0x1f7   : > { %v3594_v49 = vrot.slane %v3593_v63, 4  ;;  %v3601_v26 = vsel %vm5764_vm14, %v3593_v63, %v3600_v39  ;;  %v4053_v8 = vpack.c.bf16 %v3608_v36, %v3608_v36  ;;  %3518 = vst [vmem:[#allocation2 + $0xd8] sm:$0x7f] %v3490_v17  ;;  %v3487_v56 = vmax.f32 %v3347_v31, %v3430_v22  ;;  %vm3646_vm7 = vmand %vm3644_vm2, %vm3645_vm4 }
 0x1f8   : > { %3602 = vst [vmem:[%s5665_s30 + $0x8] sm:$0xc] %v3601_v26  ;;  %3517 = vst [vmem:[#allocation2 + $0xd0] sm:$0xff] %v3489_v20  ;;  %v3488_v29 = vmax.f32 %v3348_v48, %v3432_v52 }
 0x1f9   : > { %3603 = vst [vmem:[%s5665_s30 + $0xc] sm:$0x3] %v3594_v49  ;;  %v3613_v28 = vrot.slane %v4053_v8, 6  ;;  %3515 = vst [vmem:[#allocation2 + $0xc0] sm:$0xff] %v3487_v56 }
 0x1fa   : > { %3516 = vst [vmem:[#allocation2 + $0xc8] sm:$0xff] %v3488_v29  ;;  %v3625_v21 = vld [vmem:[#allocation2 + $0xa0] ss:$2 sm:$0x7f] }
 0x1fb   : > { %v3614_v10 = vrot.slane %v3613_v28, 4  ;;  %3617 = vst [vmem:[%s5665_s30 + $0xc] sm:$0xc] %v3613_v28 }
 0x1fc   : > { %v3627_v16 = vld [vmem:[#allocation2 + $0xb0] ss:$2 sm:$0x7f] }
 0x1fd   : > { %v3622_v13 = vsel %vm3620_vm1, %v3614_v10, %v3621_v38  ;;  %v3628_v11 = vmax.f32 %v3625_v21, %v3627_v16 }
 0x1fe   : > { %3623 = vst [vmem:[%s5665_s30 + $0x10] sm:$0x3] %v3622_v13 }
 0x1ff   : > { %v3654_v14 = vld [vmem:[#allocation2 + $0xd0] ss:$2 sm:$0x7f]  ;;  %v4054_v51 = vpack.c.bf16 %v3628_v11, %v3628_v11 }
 0x201   : > { %v3652_v3 = vld [vmem:[#allocation2 + $0xc0] ss:$2 sm:$0x7f]  ;;  %v3634_v9 = vshrl.u32 %v4054_v51, 16  ;;  %v3637_v12 = vshll.u32 %v4054_v51, 16 }
 0x202   : > { %v3655_v30 = vmax.f32 %v3652_v3, %v3654_v14 }
 0x203   : > { %v3636_v33 = vrot.slane %v3634_v9, 6  ;;  %v3639_v34 = vrot.slane %v3637_v12, 7 }
 0x204   : > { %v4055_v35 = vpack.c.bf16 %v3655_v30, %v3655_v30 }
 0x205   : > { %v3647_v37 = vld [vmem:[%s5665_s30 + $0x10] sm:$0xe]  ;;  %v3640_v47 = vor.u32 %v3639_v34, %v3636_v33 }
 0x206   : > { %v3660_v25 = vrot.slane %v4055_v35, 7 }
 0x207   : > { %v3641_v18 = vrot.slane %v3640_v47, 4  ;;  %v3648_v45 = vsel %vm3646_vm7, %v3640_v47, %v3647_v37 }
 0x208   : > { %v3661_v53 = vrot.slane %v3660_v25, 4  ;;  %3664 = vst [vmem:[%s5665_s30 + $0x14] sm:$0xe] %v3660_v25  ;;  %3649 = vst [vmem:[%s5665_s30 + $0x10] sm:$0xe] %v3648_v45 }
 0x209   : > { %3650 = vst [vmem:[%s5665_s30 + $0x14] sm:$0x1] %v3641_v18 }
 0x20a   : > { %v3669_v27 = vsel %vm3667_vm8, %v3661_v53, %v3668_v46 }
 0x20b   : > { %3670 = vst [vmem:[%s5665_s30 + $0x18] sm:$0x1] %v3669_v27 }
 0x212   : > { %v3673_v57 = vld [vmem:[%s5665_s30 + $0x18] sm:$0xf] }
 0x213   : > { %v3674_v50 = vsel %vm3672_vm10, 0, %v3673_v57 }
 0x214   : > { %3675 = vst [vmem:[%s5665_s30 + $0x18] sm:$0xf] %v3674_v50 }
 0x215 PF: > { %s13_s12 = sadd.s32 1, %s4905_s12  }
 0x216   : > { %p10_p5 = scmp.ge.s32.totalorder %s13_s12, 4  }
 0x218   :  { %12 = sbr.rel (!%p10_p5) target bundleno = 1 (0x1), region = 83 }

// kernel: model_forward.5
= control target key start
LH: loop header
LB: loop body
LE: loop exit
PB: predicated region body
PF: predicated region fallthrough
CT: control target
= control target key end

     0   :  { %v6637_v2 = vmov 0   ;;  %vm107_vm0 = vsmask.f32 7424  ;;  %vm773_vm1 = vsmask.f32 4352  ;;  %vm535_vm2 = vcmask 1046528   ;;  %s8743_s0 = inlined_call_operand.vmem [shape: bf16[112,128], index: 0, kind: input, shape index: {}]   ;;  %s8744_s1 = inlined_call_operand.vmem [shape: bf16[9,128,256], index: 1, kind: input, shape index: {}]   ;;  %s8745_s2 = inlined_call_operand.vmem [shape: f32[1,256], index: 2, kind: input, shape index: {}]   ;;  %s8746_s3 = inlined_call_operand.vmem [shape: bf16[4,256,512], index: 3, kind: input, shape index: {}]   ;;  %s8747_s4 = inlined_call_operand.vmem [shape: f32[1,512], index: 4, kind: input, shape index: {}]   ;;  %s8748_s5 = inlined_call_operand.vmem [shape: bf16[512,10], index: 5, kind: input, shape index: {}]   ;;  %s8749_s6 = inlined_call_operand.vmem [shape: f32[1,10], index: 6, kind: input, shape index: {}]   ;;  %s8750_s7 = inlined_call_operand.hbm [shape: f32[2,10], index: 7, kind: output, shape index: {}]  }
   0x1   :  { %v5938_v0 = vld [vmem:[%s8744_s1 + $0x84] ss:$8 sps:$4 sm:$0xff]   ;;  %v5940_v1 = vld [vmem:[%s8744_s1 + $0x80] ss:$8 sps:$4 sm:$0xff]   ;;  %278 = vmatprep.mubr.bf16.mxu0 %v6637_v2  ;;  %v5941_v3 = vld [vmem:[%s8744_s1 + $0x94] ss:$8 sps:$4 sm:$0xff]  }
   0x2   :  { %246 = vmatprep.subr.bf16.mxu0 %v5938_v0  ;;  %v5943_v4 = vld [vmem:[%s8744_s1 + $0x90] ss:$8 sps:$4 sm:$0xff]   ;;  %v5944_v5 = vld [vmem:[%s8744_s1 + $0xa4] ss:$8 sps:$4 sm:$0xff]   ;;  %v5946_v6 = vld [vmem:[%s8744_s1 + $0xa0] ss:$8 sps:$4 sm:$0xff]  }
   0x3   :  { %247 = vmatpush1.bf16.msra.mxu0 %v5940_v1  ;;  %v5947_v7 = vld [vmem:[%s8744_s1 + $0xb4] ss:$8 sps:$4 sm:$0xff]   ;;  %v5949_v8 = vld [vmem:[%s8744_s1 + $0xb0] ss:$8 sps:$4 sm:$0xff]   ;;  %v5950_v9 = vld [vmem:[%s8744_s1 + $0xc4] ss:$8 sps:$4 sm:$0xff]  }
   0x4   :  { %248 = vmatprep.subr.bf16.mxu0 %v5941_v3  ;;  %v28_v10 = vld [vmem:[%s8743_s0] sm:$0xf]  ;;  %v6713_v11 = vld [vmem:[%s8743_s0 + $0x4] sm:$0xf]  ;;  %v5953_v13 = vld [vmem:[%s8744_s1 + $0xd4] ss:$8 sps:$4 sm:$0xff]  }
   0x5   :  { %v5952_v12 = vld [vmem:[%s8744_s1 + $0xc0] ss:$8 sps:$4 sm:$0xff]   ;;  %v31_v15 = vld [vmem:[%s8743_s0 + $0xc] sm:$0xf]  ;;  %v6728_v16 = vcombine.low %v28_v10, %v6713_v11  ;;  %v5955_v17 = vld [vmem:[%s8744_s1 + $0xd0] ss:$8 sps:$4 sm:$0xff]  }
   0x6   :  { %v30_v14 = vld [vmem:[%s8743_s0 + $0x8] sm:$0xf]  ;;  %v5956_v20 = vld [vmem:[%s8744_s1 + $0xe4] ss:$8 sps:$4 sm:$0xff]   ;;  %v5959_v22 = vld [vmem:[%s8744_s1 + $0xf4] ss:$8 sps:$4 sm:$0xff]  }
   0x7   :  { %249 = vmatpush1.bf16.msra.mxu0 %v5943_v4  ;;  %v6733_v18 = vcombine.low %v30_v14, %v31_v15  ;;  %v111_v19 = vshll.u32 %v6728_v16, 16  ;;  %v5958_v21 = vld [vmem:[%s8744_s1 + $0xe0] ss:$8 sps:$4 sm:$0xff]   ;;  %v109_v23 = vshrl.u32 %v6728_v16, 16  ;;  %v32_v26 = vld [vmem:[%s8743_s0 + $0x10] sm:$0xf] }
   0x8   :  { %250 = vmatprep.subr.bf16.mxu0 %v5944_v5  ;;  %v33_v27 = vld [vmem:[%s8743_s0 + $0x14] sm:$0xf]  ;;  %v5961_v28 = vld [vmem:[%s8744_s1 + $0xf0] ss:$8 sps:$4 sm:$0xff]   ;;  %v5966_v32 = vld [vmem:[%s8744_s1 + $0x4] ss:$8 sps:$4 sm:$0xff]  }
   0x9   :  { %v113_v24 = vrot.slane %v111_v19, 1  ;;  %v116_v25 = vshll.u32 %v6733_v18, 16  ;;  %v6756_v31 = vcombine.low %v32_v26, %v33_v27  ;;  %v5964_v33 = vld [vmem:[%s8744_s1] ss:$8 sps:$4 sm:$0xff]   ;;  %v120_v34 = vshrl.u32 %v6733_v18, 16 }
   0xa   :  { %v5969_v36 = vld [vmem:[%s8744_s1 + $0x14] ss:$8 sps:$4 sm:$0xff]   ;;  %v34_v38 = vld [vmem:[%s8743_s0 + $0x18] sm:$0xf]  ;;  %v5973_v44 = vld [vmem:[%s8744_s1 + $0x24] ss:$8 sps:$4 sm:$0xff]  }
   0xb   :  { %251 = vmatpush1.bf16.msra.mxu0 %v5946_v6  ;;  %v114_v29 = vor.u32 %v113_v24, %v109_v23  ;;  %v118_v30 = vrot.slane %v116_v25, 1  ;;  %v124_v37 = vshll.u32 %v6756_v31, 16  ;;  %v35_v39 = vld [vmem:[%s8743_s0 + $0x1c] sm:$0xf]  ;;  %v5967_v40 = vld [vmem:[%s8744_s1 + $0x10] ss:$8 sps:$4 sm:$0xff]  }
   0xc   :  { %252 = vmatprep.subr.bf16.mxu0 %v5947_v7  ;;  %v6780_v43 = vcombine.low %v34_v38, %v35_v39  ;;  %v783_v45 = vrot.slane %v116_v25, 4  ;;  %v782_v46 = vrot.slane %v120_v34, 3  ;;  %v5971_v47 = vld [vmem:[%s8744_s1 + $0x20] ss:$8 sps:$4 sm:$0xff]   ;;  %v5977_v48 = vld [vmem:[%s8744_s1 + $0x34] ss:$8 sps:$4 sm:$0xff]  }
   0xd   :  { %v119_v35 = vsel %vm107_vm0, %v114_v29, %v118_v30  ;;  %v122_v41 = vor.u32 %v120_v34, %v118_v30  ;;  %v126_v42 = vrot.slane %v124_v37, 1  ;;  %v128_v50 = vshrl.u32 %v6756_v31, 16  ;;  %v36_v52 = vld [vmem:[%s8743_s0 + $0x20] sm:$0xf]  ;;  %v37_v53 = vld [vmem:[%s8743_s0 + $0x24] sm:$0xf] }
   0xe   :  { %v132_v51 = vshll.u32 %v6780_v43, 16  ;;  %v5975_v56 = vld [vmem:[%s8744_s1 + $0x30] ss:$8 sps:$4 sm:$0xff]   ;;  %v6804_v57 = vcombine.low %v36_v52, %v37_v53  ;;  %v6806_v58 = vor.u32 %v783_v45, %v782_v46  ;;  %v5981_v59 = vld [vmem:[%s8744_s1 + $0x44] ss:$8 sps:$4 sm:$0xff]   ;;  %v136_v63 = vshrl.u32 %v6780_v43, 16 }
   0xf   :  { %253 = vmatpush1.bf16.msra.mxu0 %v5949_v8  ;;  %v127_v49 = vsel %vm107_vm0, %v122_v41, %v126_v42  ;;  %v130_v54 = vor.u32 %v128_v50, %v126_v42  ;;  %v5979_v60 = vld [vmem:[%s8744_s1 + $0x40] ss:$8 sps:$4 sm:$0xff]   ;;  %v5984_v61 = vld [vmem:[%s8744_s1 + $0x54] ss:$8 sps:$4 sm:$0xff]   ;;  %v39_v3 = vld [vmem:[%s8743_s0 + $0x2c] sm:$0xf] }
  0x10   :  { %254 = vmatprep.subr.bf16.mxu0 %v5950_v9  ;;  %v134_v55 = vrot.slane %v132_v51, 1  ;;  %v140_v0 = vshll.u32 %v6804_v57, 16  ;;  %v38_v1 = vld [vmem:[%s8743_s0 + $0x28] sm:$0xf]  ;;  %v5982_v6 = vld [vmem:[%s8744_s1 + $0x50] ss:$8 sps:$4 sm:$0xff]  }
  0x11   :  { %v6830_v7 = vcombine.low %v38_v1, %v39_v3  ;;  %v5988_v8 = vld [vmem:[%s8744_s1 + $0x64] ss:$8 sps:$4 sm:$0xff]   ;;  %v5986_v9 = vld [vmem:[%s8744_s1 + $0x60] ss:$8 sps:$4 sm:$0xff]   ;;  %v786_v10 = vrot.slane %v128_v50, 3  ;;  %v144_v15 = vshrl.u32 %v6804_v57, 16 }
  0x12   :  { %v135_v62 = vsel %vm107_vm0, %v130_v54, %v134_v55  ;;  %v138_v4 = vor.u32 %v136_v63, %v134_v55  ;;  %v142_v5 = vrot.slane %v140_v0, 1  ;;  %v5995_v23 = vld [vmem:[%s8744_s1 + $0x104] ss:$8 sps:$4 sm:$0xff]   ;;  %v790_v26 = vrot.slane %v136_v63, 3  ;;  %v5999_v50 = vld [vmem:[%s8744_s1 + $0x120] ss:$8 sps:$4 sm:$0xff]  }
  0x13   :  { %255 = vmatpush1.bf16.msra.mxu0 %v5952_v12  ;;  %v787_v12 = vrot.slane %v124_v37, 4  ;;  %v791_v27 = vrot.slane %v132_v51, 4  ;;  %v152_v30 = vshrl.u32 %v6830_v7, 16  ;;  %v795_v37 = vrot.slane %v140_v0, 4  ;;  %v6002_v51 = vld [vmem:[%s8744_s1 + $0x130] ss:$8 sps:$4 sm:$0xff]  }
  0x14   :  { %256 = vmatprep.subr.bf16.mxu0 %v5953_v13  ;;  %v5992_v13 = vld [vmem:[%s8744_s1 + $0x74] ss:$8 sps:$4 sm:$0xff]   ;;  %v143_v14 = vsel %vm107_vm0, %v138_v4, %v142_v5  ;;  %v146_v24 = vor.u32 %v144_v15, %v142_v5  ;;  %v6007_v52 = vld [vmem:[%s8744_s1 + $0x144] ss:$8 sps:$4 sm:$0xff]   ;;  %v6005_v53 = vld [vmem:[%s8744_s1 + $0x140] ss:$8 sps:$4 sm:$0xff]  }
  0x15   :  { %v788_v19 = vor.u32 %v787_v12, %v786_v10  ;;  %v798_v41 = vrot.slane %v152_v30, 3  ;;  %v6010_v54 = vld [vmem:[%s8744_s1 + $0x154] ss:$8 sps:$4 sm:$0xff]   ;;  %v6008_v55 = vld [vmem:[%s8744_s1 + $0x150] ss:$8 sps:$4 sm:$0xff]   ;;  %v537_v3 = vrot.slane %v6733_v18, 1 }
  0x16   :  { %v514_v63 = vld [vmem:[%s8743_s0] sm:$0xe]  ;;  %v6023_v5 = vld [vmem:[%s8744_s1 + $0x194] ss:$8 sps:$4 sm:$0xff]  }
  0x17   :  { %257 = vmatpush1.bf16.msra.mxu0 %v5955_v17  ;;  %v148_v17 = vshll.u32 %v6830_v7, 16  ;;  %v5018_v0 = vcombine.low %v514_v63, %v6713_v11  ;;  %v6018_v4 = vld [vmem:[%s8744_s1 + $0x180] ss:$8 sps:$4 sm:$0xff]   ;;  %v6021_v11 = vld [vmem:[%s8744_s1 + $0x190] ss:$8 sps:$4 sm:$0xff]  }
  0x18   :  { %258 = vmatprep.subr.bf16.mxu0 %v5956_v20  ;;  %v6847_v20 = vld [vmem:[%s8743_s0 + $0x30] ss:$0 sps:$4 sm:$0x11]   ;;  %v6029_v12 = vld [vmem:[%s8744_s1 + $0x1b4] ss:$8 sps:$4 sm:$0xff]  }
  0x19   :  { %v150_v25 = vrot.slane %v148_v17, 1  ;;  %v799_v42 = vrot.slane %v148_v17, 4  ;;  %v536_v1 = vrot.slane %v5018_v0, 1  ;;  %v6035_v17 = vld [vmem:[%s8744_s1 + $0x1d4] ss:$8 sps:$4 sm:$0xff]  }
  0x1a   :  { %v6065_v63 = vld [vmem:[%s8744_s1 + $0x270] ss:$8 sps:$4 sm:$0xff]   ;;  %v6071_v0 = vld [vmem:[%s8744_s1 + $0x284] ss:$8 sps:$4 sm:$0xff]  }
  0x1b   :  { %259 = vmatpush1.bf16.msra.mxu0 %v5958_v21  ;;  %v6851_v21 = vsel %vm773_vm1, %v6806_v58, %v788_v19  ;;  %v151_v29 = vsel %vm107_vm0, %v146_v24, %v150_v25  ;;  %v154_v34 = vor.u32 %v152_v30, %v150_v25  ;;  %v6875_v45 = vor.u32 %v799_v42, %v798_v41  ;;  %v6036_v24 = vld [vmem:[%s8744_s1 + $0x1e0] ss:$8 sps:$4 sm:$0xff]   ;;  %v6041_v25 = vld [vmem:[%s8744_s1 + $0x1f4] ss:$8 sps:$4 sm:$0xff]  }
  0x1c   :  { %260 = vmatprep.subr.bf16.mxu0 %v5959_v22  ;;  %v5990_v22 = vld [vmem:[%s8744_s1 + $0x70] ss:$8 sps:$4 sm:$0xff]   ;;  %v6043_v42 = vld [vmem:[%s8744_s1 + $0x200] ss:$8 sps:$4 sm:$0xff]  }
  0x1f   :  { %261 = vmatpush1.bf16.msra.mxu0 %v5961_v28  ;;  %v792_v28 = vor.u32 %v791_v27, %v790_v26  ;;  %v6039_v26 = vld [vmem:[%s8744_s1 + $0x1f0] ss:$8 sps:$4 sm:$0xff]   ;;  %v545_v27 = vrot.slane %v6830_v7, 1 }
  0x20   :  { %423 = vmatprep.subr.bf16.mxu0 %v5966_v32  ;;  %v156_v32 = vshll.u32 %v6847_v20, 16 }
  0x22   :  { %279 = vmatmul.mubr.bf16.vlgmr.msra.gmra.mrb[0].mxu0 %v119_v35  ;;  %v158_v35 = vrot.slane %v156_v32, 1  ;;  %v7010_v32 = vld [vmem:[%s8743_s0 + $0x4] sm:$0xf] }
  0x23   :  { %424 = vmatpush1.bf16.msra.mxu0 %v5964_v33  ;;  %288 = vmatprep.mubr.bf16.mxu0 %v6637_v2  ;;  %v6864_v33 = vsel %vm773_vm1, %v788_v19, %v792_v28 }
  0x24   :  { %425 = vmatprep.subr.bf16.mxu0 %v5969_v36  ;;  %v794_v36 = vrot.slane %v144_v15, 3  ;;  %v159_v39 = vsel %vm107_vm0, %v154_v34, %v158_v35  ;;  %v6030_v15 = vld [vmem:[%s8744_s1 + $0x1c0] ss:$8 sps:$4 sm:$0xff]   ;;  %v547_v34 = vrot.slane %v6847_v20, 1 }
  0x26   :  { %v796_v38 = vor.u32 %v795_v37, %v794_v36  ;;  %v548_v37 = vsel %vm535_vm2, %v545_v27, %v547_v34 }
  0x27   :  { %426 = vmatpush1.bf16.msra.mxu0 %v5967_v40 }
  0x28   :  { %427 = vmatprep.subr.bf16.mxu0 %v5973_v44  ;;  %v6869_v40 = vsel %vm773_vm1, %v792_v28, %v796_v38  ;;  %v5993_v44 = vld [vmem:[%s8744_s1 + $0x100] ss:$8 sps:$4 sm:$0xff]   ;;  %v6879_v46 = vsel %vm773_vm1, %v796_v38, %v6875_v45 }
  0x29   :  { %v748_v28 = vld [vmem:[%s8743_s0] sm:$0x8] }
  0x2a   :  { %289 = vmatmul.mubr.bf16.gmra.mrb[4].mxu0 %v127_v49  ;;  %v6001_v49 = vld [vmem:[%s8744_s1 + $0x124] ss:$8 sps:$4 sm:$0xff]  }
  0x2b   :  { %428 = vmatpush1.bf16.msra.mxu0 %v5971_v47  ;;  %298 = vmatprep.mubr.bf16.mxu0 %v6637_v2  ;;  %v5998_v47 = vld [vmem:[%s8744_s1 + $0x114] ss:$8 sps:$4 sm:$0xff]  }
  0x2c   :  { %429 = vmatprep.subr.bf16.mxu0 %v5977_v48  ;;  %v5996_v48 = vld [vmem:[%s8744_s1 + $0x110] ss:$8 sps:$4 sm:$0xff]  }
  0x2f   :  { %430 = vmatpush1.bf16.msra.mxu0 %v5975_v56  ;;  %v6013_v56 = vld [vmem:[%s8744_s1 + $0x164] ss:$8 sps:$4 sm:$0xff]  }
  0x30   :  { %431 = vmatprep.subr.bf16.mxu0 %v5981_v59  ;;  %v6011_v59 = vld [vmem:[%s8744_s1 + $0x160] ss:$8 sps:$4 sm:$0xff]  }
  0x32   :  { %299 = vmatmul.mubr.bf16.gmra.mrb[8].mxu0 %v135_v62  ;;  %v6020_v62 = vld [vmem:[%s8744_s1 + $0x184] ss:$8 sps:$4 sm:$0xff]  }
  0x33   :  { %308 = vmatprep.mubr.bf16.mxu0 %v6637_v2  ;;  %432 = vmatpush1.bf16.msra.mxu0 %v5979_v60  ;;  %v6016_v60 = vld [vmem:[%s8744_s1 + $0x174] ss:$8 sps:$4 sm:$0xff]  }
  0x34   :  { %433 = vmatprep.subr.bf16.mxu0 %v5984_v61  ;;  %v6014_v61 = vld [vmem:[%s8744_s1 + $0x170] ss:$8 sps:$4 sm:$0xff]  }
  0x37   :  { %434 = vmatpush1.bf16.msra.mxu0 %v5982_v6  ;;  %v538_v6 = vsel %vm535_vm2, %v536_v1, %v537_v3 }
  0x38   :  { %435 = vmatprep.subr.bf16.mxu0 %v5988_v8  ;;  %v539_v8 = vrot.slane %v6756_v31, 1 }
  0x3a   :  { %309 = vmatmul.mubr.bf16.gmra.mrb[12].mxu0 %v143_v14  ;;  %v540_v10 = vsel %vm535_vm2, %v537_v3, %v539_v8  ;;  %v6032_v14 = vld [vmem:[%s8744_s1 + $0x1c4] ss:$8 sps:$4 sm:$0xff]  }
  0x3b   :  { %316 = vmatprep.mubr.bf16.mxu0 %v6637_v2  ;;  %436 = vmatpush1.bf16.msra.mxu0 %v5986_v9  ;;  %v6024_v9 = vld [vmem:[%s8744_s1 + $0x1a0] ss:$8 sps:$4 sm:$0xff]  }
  0x3c   :  { %437 = vmatprep.subr.bf16.mxu0 %v5992_v13  ;;  %v6027_v13 = vld [vmem:[%s8744_s1 + $0x1b0] ss:$8 sps:$4 sm:$0xff]  }
  0x3f   :  { %438 = vmatpush1.bf16.msra.mxu0 %v5990_v22  ;;  %v6033_v22 = vld [vmem:[%s8744_s1 + $0x1d0] ss:$8 sps:$4 sm:$0xff]  }
  0x40   :  { %635 = vmatprep.subr.bf16.mxu0 %v5995_v23  ;;  %v6038_v23 = vld [vmem:[%s8744_s1 + $0x1e4] ss:$8 sps:$4 sm:$0xff]  }
  0x42   :  { %317 = vmatmul.mubr.bf16.gmra.mrb[16].mxu0 %v151_v29  ;;  %v6045_v29 = vld [vmem:[%s8744_s1 + $0x204] ss:$8 sps:$4 sm:$0xff]  }
  0x43   :  { %326 = vmatprep.mubr.bf16.mxu0 %v6637_v2 }
  0x4a   :  { %327 = vmatmul.mubr.bf16.gmra.mrb[20].mxu0 %v159_v39 }
  0x4b   :  { %455 = vmatprep.mubr.bf16.mxu0 %v6637_v2 }
  0x52   :  { %456 = vmatmul.mubr.bf16.vlgmr.msra.gmra.mrb[0].mxu0 %v6728_v16  ;;  %v6004_v16 = vld [vmem:[%s8744_s1 + $0x134] ss:$8 sps:$4 sm:$0xff]  }
  0x53   :  { %636 = vmatpush1.bf16.msra.mxu0 %v5993_v44  ;;  %465 = vmatprep.mubr.bf16.mxu0 %v6637_v2  ;;  %v6048_v44 = vld [vmem:[%s8744_s1 + $0x214] ss:$8 sps:$4 sm:$0xff]  }
  0x54   :  { %637 = vmatprep.subr.bf16.mxu0 %v5998_v47  ;;  %v6046_v47 = vld [vmem:[%s8744_s1 + $0x210] ss:$8 sps:$4 sm:$0xff]  }
  0x57   :  { %638 = vmatpush1.bf16.msra.mxu0 %v5996_v48  ;;  %v6051_v48 = vld [vmem:[%s8744_s1 + $0x224] ss:$8 sps:$4 sm:$0xff]  }
  0x58   :  { %639 = vmatprep.subr.bf16.mxu0 %v6001_v49  ;;  %v6049_v49 = vld [vmem:[%s8744_s1 + $0x220] ss:$8 sps:$4 sm:$0xff]  }
  0x5a   :  { %466 = vmatmul.mubr.bf16.gmra.mrb[4].mxu0 %v6733_v18  ;;  %v6026_v18 = vld [vmem:[%s8744_s1 + $0x1a4] ss:$8 sps:$4 sm:$0xff]  }
  0x5b   :  { %640 = vmatpush1.bf16.msra.mxu0 %v5999_v50  ;;  %475 = vmatprep.mubr.bf16.mxu0 %v6637_v2  ;;  %v6052_v50 = vld [vmem:[%s8744_s1 + $0x230] ss:$8 sps:$4 sm:$0xff]  }
  0x5c   :  { %641 = vmatprep.subr.bf16.mxu0 %v6004_v16  ;;  %v6057_v16 = vld [vmem:[%s8744_s1 + $0x244] ss:$8 sps:$4 sm:$0xff]  }
  0x5f   :  { %642 = vmatpush1.bf16.msra.mxu0 %v6002_v51  ;;  %v7049_v51 = vld [vmem:[%s8743_s0 + $0x30] sm:$0xf] }
  0x60   :  { %643 = vmatprep.subr.bf16.mxu0 %v6007_v52  ;;  %v5052_v52 = vcombine.low %v7049_v51, %v7049_v51 }
  0x62   :  { %476 = vmatmul.mubr.bf16.gmra.mrb[8].mxu0 %v6756_v31  ;;  %v541_v31 = vrot.slane %v6780_v43, 1 }
  0x63   :  { %485 = vmatprep.mubr.bf16.mxu0 %v6637_v2  ;;  %644 = vmatpush1.bf16.msra.mxu0 %v6005_v53  ;;  %v6060_v53 = vld [vmem:[%s8744_s1 + $0x254] ss:$8 sps:$4 sm:$0xff]  }
  0x64   :  { %645 = vmatprep.subr.bf16.mxu0 %v6010_v54  ;;  %v542_v19 = vsel %vm535_vm2, %v539_v8, %v541_v31  ;;  %v6058_v54 = vld [vmem:[%s8744_s1 + $0x250] ss:$8 sps:$4 sm:$0xff]  }
  0x67   :  { %646 = vmatpush1.bf16.msra.mxu0 %v6008_v55  ;;  %v6063_v55 = vld [vmem:[%s8744_s1 + $0x264] ss:$8 sps:$4 sm:$0xff]  }
  0x68   :  { %647 = vmatprep.subr.bf16.mxu0 %v6013_v56  ;;  %v803_v56 = vshrl.u32 %v5052_v52, 16 }
  0x6a   :  { %486 = vmatmul.mubr.bf16.gmra.mrb[24].mxu0 %v6780_v43  ;;  %v543_v43 = vrot.slane %v6804_v57, 1 }
  0x6b   :  { %493 = vmatprep.mubr.bf16.mxu0 %v6637_v2  ;;  %648 = vmatpush1.bf16.msra.mxu0 %v6011_v59  ;;  %v806_v59 = vshll.u32 %v5052_v52, 16 }
  0x6c   :  { %649 = vmatprep.subr.bf16.mxu0 %v6016_v60  ;;  %v546_v30 = vsel %vm535_vm2, %v543_v43, %v545_v27  ;;  %v6061_v60 = vld [vmem:[%s8744_s1 + $0x260] ss:$8 sps:$4 sm:$0xff]  }
  0x6f   :  { %650 = vmatpush1.bf16.msra.mxu0 %v6014_v61  ;;  %v805_v61 = vrot.slane %v803_v56, 3 }
  0x70   :  { %897 = vmatprep.subr.bf16.mxu0 %v6020_v62  ;;  %v808_v62 = vrot.slane %v806_v59, 4 }
  0x72   :  { %494 = vmatmul.mubr.bf16.gmra.mrb[16].mxu0 %v6804_v57  ;;  %v544_v57 = vsel %vm535_vm2, %v541_v31, %v543_v43 }
  0x73   :  { %503 = vmatprep.mubr.bf16.mxu0 %v6637_v2 }
  0x7a   :  { %504 = vmatmul.mubr.bf16.gmra.mrb[20].mxu0 %v6830_v7  ;;  %v5051_v7 = vcombine.low %v748_v28, %v7010_v32 }
  0x7b   :  { %667 = vmatprep.mubr.bf16.mxu0 %v6637_v2 }
  0x7c   :  { %v775_v35 = vshrl.u32 %v5051_v7, 16  ;;  %v778_v36 = vshll.u32 %v5051_v7, 16 }
  0x7e   :  { %v777_v38 = vrot.slane %v775_v35, 3  ;;  %v780_v39 = vrot.slane %v778_v36, 4 }
  0x80   :  { %v781_v41 = vor.u32 %v780_v39, %v777_v38 }
  0x82   :  { %668 = vmatmul.mubr.bf16.vlgmr.msra.gmra.mrb[0].mxu0 %v538_v6  ;;  %v785_v20 = vsel %vm773_vm1, %v781_v41, %v6806_v58  ;;  %v6054_v58 = vld [vmem:[%s8744_s1 + $0x234] ss:$8 sps:$4 sm:$0xff]  }
  0x83   :  { %898 = vmatpush1.bf16.msra.mxu0 %v6018_v4  ;;  %677 = vmatprep.mubr.bf16.mxu0 %v6637_v2 }
  0x84   :  { %899 = vmatprep.subr.bf16.mxu0 %v6023_v5 }
  0x87   :  { %900 = vmatpush1.bf16.msra.mxu0 %v6021_v11 }
  0x88   :  { %901 = vmatprep.subr.bf16.mxu0 %v6026_v18 }
  0x8a   :  { %678 = vmatmul.mubr.bf16.gmra.mrb[4].mxu0 %v540_v10 }
  0x8b   :  { %902 = vmatpush1.bf16.msra.mxu0 %v6024_v9  ;;  %687 = vmatprep.mubr.bf16.mxu0 %v6637_v2 }
  0x8c   :  { %903 = vmatprep.subr.bf16.mxu0 %v6029_v12 }
  0x8f   :  { %904 = vmatpush1.bf16.msra.mxu0 %v6027_v13 }
  0x90   :  { %905 = vmatprep.subr.bf16.mxu0 %v6032_v14 }
  0x92   :  { %688 = vmatmul.mubr.bf16.gmra.mrb[8].mxu0 %v542_v19 }
  0x93   :  { %697 = vmatprep.mubr.bf16.mxu0 %v6637_v2  ;;  %906 = vmatpush1.bf16.msra.mxu0 %v6030_v15 }
  0x94   :  { %907 = vmatprep.subr.bf16.mxu0 %v6035_v17 }
  0x97   :  { %908 = vmatpush1.bf16.msra.mxu0 %v6033_v22 }
  0x98   :  { %909 = vmatprep.subr.bf16.mxu0 %v6038_v23 }
  0x9a   :  { %698 = vmatmul.mubr.bf16.gmra.mrb[28].mxu0 %v544_v57 }
  0x9b   :  { %705 = vmatprep.mubr.bf16.mxu0 %v6637_v2  ;;  %910 = vmatpush1.bf16.msra.mxu0 %v6036_v24 }
  0x9c   :  { %911 = vmatprep.subr.bf16.mxu0 %v6041_v25 }
  0x9f   :  { %912 = vmatpush1.bf16.msra.mxu0 %v6039_v26 }
  0xa0   :  { %1119 = vmatprep.subr.bf16.mxu0 %v6045_v29 }
  0xa2   :  { %706 = vmatmul.mubr.bf16.gmra.mrb[16].mxu0 %v546_v30 }
  0xa3   :  { %715 = vmatprep.mubr.bf16.mxu0 %v6637_v2 }
  0xaa   :  { %716 = vmatmul.mubr.bf16.gmra.mrb[20].mxu0 %v548_v37 }
  0xab   :  { %929 = vmatprep.mubr.bf16.mxu0 %v6637_v2 }
  0xb2   :  { %930 = vmatmul.mubr.bf16.vlgmr.msra.gmra.mrb[0].mxu0 %v785_v20 }
  0xb3   :  { %1120 = vmatpush1.bf16.msra.mxu0 %v6043_v42  ;;  %939 = vmatprep.mubr.bf16.mxu0 %v6637_v2 }
  0xb4   :  { %1121 = vmatprep.subr.bf16.mxu0 %v6048_v44 }
  0xb7   :  { %1122 = vmatpush1.bf16.msra.mxu0 %v6046_v47 }
  0xb8   :  { %1123 = vmatprep.subr.bf16.mxu0 %v6051_v48 }
  0xba   :  { %940 = vmatmul.mubr.bf16.gmra.mrb[4].mxu0 %v6851_v21  ;;  %v6055_v21 = vld [vmem:[%s8744_s1 + $0x240] ss:$8 sps:$4 sm:$0xff]  }
  0xbb   :  { %1124 = vmatpush1.bf16.msra.mxu0 %v6049_v49  ;;  %949 = vmatprep.mubr.bf16.mxu0 %v6637_v2 }
  0xbc   :  { %1125 = vmatprep.subr.bf16.mxu0 %v6054_v58 }
  0xbf   :  { %1126 = vmatpush1.bf16.msra.mxu0 %v6052_v50 }
  0xc0   :  { %1127 = vmatprep.subr.bf16.mxu0 %v6057_v16 }
  0xc2   :  { %950 = vmatmul.mubr.bf16.gmra.mrb[8].mxu0 %v6864_v33  ;;  %v6067_v33 = vld [vmem:[%s8744_s1 + $0x274] ss:$8 sps:$4 sm:$0xff]  }
  0xc3   :  { %959 = vmatprep.mubr.bf16.mxu0 %v6637_v2  ;;  %1128 = vmatpush1.bf16.msra.mxu0 %v6055_v21 }
  0xc4   :  { %1129 = vmatprep.subr.bf16.mxu0 %v6060_v53 }
  0xc7   :  { %1130 = vmatpush1.bf16.msra.mxu0 %v6058_v54 }
  0xc8   :  { %1131 = vmatprep.subr.bf16.mxu0 %v6063_v55 }
  0xca   :  { %960 = vmatmul.mubr.bf16.gmra.mrb[32].mxu0 %v6869_v40 }
  0xcb   :  { %967 = vmatprep.mubr.bf16.mxu0 %v6637_v2  ;;  %1132 = vmatpush1.bf16.msra.mxu0 %v6061_v60 }
  0xcc   :  { %1133 = vmatprep.subr.bf16.mxu0 %v6067_v33 }
  0xcf   :  { %1134 = vmatpush1.bf16.msra.mxu0 %v6065_v63 }
  0xd0   :  { %1433 = vmatprep.subr.bf16.mxu0 %v6071_v0 }
  0xd1   :  { %12 = vsyncpa [#allocation3], 0  ;;  %v809_v40 = vor.u32 %v808_v62, %v805_v61  ;;  %v6603_v3 = vld [vmem:[%s8743_s0 + $0x8] sm:$0xf]  ;;  %v6078_v6 = vld [vmem:[%s8744_s1 + $0x2a4] ss:$8 sps:$4 sm:$0xff]  }
  0xd2   :  { %968 = vmatmul.mubr.bf16.gmra.mrb[16].mxu0 %v6879_v46  ;;  %v5085_v4 = vcombine.low %v7010_v32, %v6603_v3  ;;  %v6069_v5 = vld [vmem:[%s8744_s1 + $0x280] ss:$8 sps:$4 sm:$0xff]   ;;  %v6074_v46 = vld [vmem:[%s8744_s1 + $0x294] ss:$8 sps:$4 sm:$0xff]   ;;  %v6604_v11 = vld [vmem:[%s8743_s0 + $0xc] sm:$0xf] }
  0xd3   :  { %977 = vmatprep.mubr.bf16.mxu0 %v6637_v2  ;;  %v810_v1 = vsel %vm773_vm1, %v6875_v45, %v809_v40  ;;  %v6072_v45 = vld [vmem:[%s8744_s1 + $0x290] ss:$8 sps:$4 sm:$0xff]   ;;  %v6076_v9 = vld [vmem:[%s8744_s1 + $0x2a0] ss:$8 sps:$4 sm:$0xff]   ;;  %v6082_v10 = vld [vmem:[%s8744_s1 + $0x2b4] ss:$8 sps:$4 sm:$0xff]  }
  0xd4   :  { %v6605_v18 = vld [vmem:[%s8743_s0 + $0x10] sm:$0xf]  ;;  %v6086_v13 = vld [vmem:[%s8744_s1 + $0x2c4] ss:$8 sps:$4 sm:$0xff]   ;;  %v6606_v31 = vld [vmem:[%s8743_s0 + $0x14] sm:$0xf] }
  0xd5   :  { %v5086_v8 = vcombine.low %v6604_v11, %v6605_v18  ;;  %v6080_v12 = vld [vmem:[%s8744_s1 + $0x2b0] ss:$8 sps:$4 sm:$0xff]   ;;  %v6084_v17 = vld [vmem:[%s8744_s1 + $0x2c0] ss:$8 sps:$4 sm:$0xff]   ;;  %v6089_v19 = vld [vmem:[%s8744_s1 + $0x2d4] ss:$8 sps:$4 sm:$0xff]  }
  0xd6   :  { %v6607_v14 = vld [vmem:[%s8743_s0 + $0x18] sm:$0xf]  ;;  %v6093_v22 = vld [vmem:[%s8744_s1 + $0x2e4] ss:$8 sps:$4 sm:$0xff]   ;;  %v6608_v23 = vld [vmem:[%s8743_s0 + $0x1c] sm:$0xf] }
  0xd7   :  { %v5087_v15 = vcombine.low %v6606_v31, %v6607_v14  ;;  %v6087_v43 = vld [vmem:[%s8744_s1 + $0x2d0] ss:$8 sps:$4 sm:$0xff]   ;;  %v6609_v24 = vld [vmem:[%s8743_s0 + $0x20] sm:$0xf]  ;;  %v6097_v26 = vld [vmem:[%s8744_s1 + $0x2f4] ss:$8 sps:$4 sm:$0xff]  }
  0xd8   :  { %v5088_v25 = vcombine.low %v6608_v23, %v6609_v24  ;;  %v6091_v57 = vld [vmem:[%s8744_s1 + $0x2e0] ss:$8 sps:$4 sm:$0xff]   ;;  %v6095_v27 = vld [vmem:[%s8744_s1 + $0x2f0] ss:$8 sps:$4 sm:$0xff]   ;;  %v1232_v28 = vld [vmem:[%s8743_s0 + $0x4] sm:$0xf] }
  0xd9   :  { %v7163_v29 = vld [vmem:[%s8743_s0 + $0x8] sm:$0xf]  ;;  %v6102_v30 = vld [vmem:[%s8744_s1 + $0x304] ss:$8 sps:$4 sm:$0xff]   ;;  %v7183_v37 = vld [vmem:[%s8743_s0 + $0x10] sm:$0xf] }
  0xda   :  { %978 = vmatmul.mubr.bf16.gmra.mrb[20].mxu0 %v810_v1  ;;  %v6610_v32 = vld [vmem:[%s8743_s0 + $0x24] sm:$0xf]  ;;  %v6611_v7 = vld [vmem:[%s8743_s0 + $0x28] sm:$0xf]  ;;  %v5123_v35 = vcombine.low %v1232_v28, %v7163_v29  ;;  %v7178_v36 = vld [vmem:[%s8743_s0 + $0xc] sm:$0xf] }
  0xdb   :  { %1151 = vmatprep.mubr.bf16.mxu0 %v6637_v2  ;;  %v5089_v34 = vcombine.low %v6610_v32, %v6611_v7  ;;  %v7188_v38 = vcombine.low %v7178_v36, %v7183_v37  ;;  %v6612_v41 = vld [vmem:[%s8743_s0 + $0x2c] sm:$0xf]  ;;  %v7198_v48 = vld [vmem:[%s8743_s0 + $0x14] sm:$0xf]  ;;  %v7203_v49 = vld [vmem:[%s8743_s0 + $0x18] sm:$0xf] }
  0xdc   :  { %v1298_v39 = vshll.u32 %v5123_v35, 16  ;;  %v5090_v42 = vcombine.low %v6612_v41, %v7049_v51  ;;  %v1296_v44 = vshrl.u32 %v5123_v35, 16  ;;  %v7210_v16 = vcombine.low %v7198_v48, %v7203_v49  ;;  %v6100_v52 = vld [vmem:[%s8744_s1 + $0x300] ss:$8 sps:$4 sm:$0xff]   ;;  %v6105_v55 = vld [vmem:[%s8744_s1 + $0x314] ss:$8 sps:$4 sm:$0xff]  }
  0xdd   :  { %v1303_v47 = vshll.u32 %v7188_v38, 16  ;;  %v1307_v56 = vshrl.u32 %v7188_v38, 16  ;;  %v7228_v33 = vld [vmem:[%s8743_s0 + $0x1c] sm:$0xf]  ;;  %v7233_v61 = vld [vmem:[%s8743_s0 + $0x20] sm:$0xf] }
  0xde   :  { %v1300_v20 = vrot.slane %v1298_v39, 1  ;;  %v1311_v59 = vshll.u32 %v7210_v16, 16  ;;  %v6103_v62 = vld [vmem:[%s8744_s1 + $0x310] ss:$8 sps:$4 sm:$0xff]   ;;  %v7245_v40 = vcombine.low %v7228_v33, %v7233_v61  ;;  %v6109_v1 = vld [vmem:[%s8744_s1 + $0x324] ss:$8 sps:$4 sm:$0xff]  }
  0xdf   :  { %v1305_v50 = vrot.slane %v1303_v47, 1  ;;  %v7267_v11 = vld [vmem:[%s8743_s0 + $0x28] sm:$0xf]  ;;  %v6118_v24 = vld [vmem:[%s8744_s1 + $0x350] ss:$8 sps:$4 sm:$0xff]   ;;  %vm1571_vm3 = vcmask 1044480  }
  0xe0   :  { %v1301_v58 = vor.u32 %v1300_v20, %v1296_v44  ;;  %v1313_v0 = vrot.slane %v1311_v59, 1  ;;  %v1323_v31 = vshrl.u32 %v7245_v40, 16  ;;  %v6128_v32 = vld [vmem:[%s8744_s1 + $0x374] ss:$8 sps:$4 sm:$0xff]   ;;  %v6126_v39 = vld [vmem:[%s8744_s1 + $0x370] ss:$8 sps:$4 sm:$0xff]  }
  0xe1   :  { %v1309_v63 = vor.u32 %v1307_v56, %v1305_v50  ;;  %v6125_v35 = vld [vmem:[%s8743_s0 + $0x34] ss:$0 sps:$4 sm:$0x11]   ;;  %v6132_v41 = vld [vmem:[%s8744_s1 + $0x384] ss:$8 sps:$4 sm:$0xff]   ;;  %vm2422_vm4 = vcmask 1045504  }
  0xe2   :  { %1152 = vmatmul.mubr.bf16.vlgmr.msra.gmra.mrb[0].mxu0 %v5085_v4  ;;  %v1306_v54 = vsel %vm107_vm0, %v1301_v58, %v1305_v50  ;;  %v6107_v4 = vld [vmem:[%s8744_s1 + $0x320] ss:$8 sps:$4 sm:$0xff]   ;;  %v1343_v20 = vshll.u32 %v6125_v35, 16  ;;  %vm2519_vm5 = vcmask 1040384   ;;  %vm2576_vm6 = vcmask 1041408   ;;  %s6638_s15 = smov [#allocation2]  }
  0xe3   :  { %1434 = vmatpush1.bf16.msra.mxu0 %v6069_v5  ;;  %1161 = vmatprep.mubr.bf16.mxu0 %v6637_v2  ;;  %v1314_v3 = vsel %vm107_vm0, %v1309_v63, %v1313_v0  ;;  %v1315_v5 = vshrl.u32 %v7210_v16, 16  ;;  %v6148_v35 = vld [vmem:[%s8744_s1 + $0x3e0] ss:$8 sps:$4 sm:$0xff]   ;;  %s4939_s16 = sshll.u32 %s6638_s15, 4  ;;  %vm4931_vm7 = vcmask 74752   ;;  %s4940_s16 = int_to_ptr.vmem [resolvable:$true] %s4939_s16 }
  0xe4   :  { %1435 = vmatprep.subr.bf16.mxu0 %v6074_v46  ;;  %v1319_v46 = vshll.u32 %v7245_v40, 16  ;;  %v1345_v50 = vrot.slane %v1343_v20, 1  ;;  %v6157_v20 = vld [vmem:[%s8744_s1 + $0x404] ss:$8 sps:$4 sm:$0xff]   ;;  %s6613_s17 = scalar_lea.vmem %s4940_s16, 32  ;;  %p6618_p1 = scmp.lt.s32.totalorder %s4940_s16, %s4940_s16 }
  0xe5   :  { %v1317_v18 = vor.u32 %v1315_v5, %v1313_v0  ;;  %p6614_p0 = scmp.ne.s32.totalorder %s4940_s16, %s6613_s17  ;;  %p6619_p2 = scmp.lt.s32.totalorder %s6613_s17, %s6613_s17 }
  0xe7   :  { %1436 = vmatpush1.bf16.msra.mxu0 %v6072_v45  ;;  %v6113_v45 = vld [vmem:[%s8744_s1 + $0x334] ss:$8 sps:$4 sm:$0xff]   ;;  %p6620_p3 = por %p6619_p2, %p6618_p1 }
  0xe8   :  { %1437 = vmatprep.subr.bf16.mxu0 %v6078_v6  ;;  %v7262_v6 = vld [vmem:[%s8743_s0 + $0x24] sm:$0xf] }
  0xe9   :  { %p6621_p4 = pnand %p6620_p3, %p6614_p0 }
  0xea   :  { %1162 = vmatmul.mubr.bf16.gmra.mrb[4].mxu0 %v5086_v8  ;;  %v1321_v8 = vrot.slane %v1319_v46, 1 }
  0xeb   :  { %1438 = vmatpush1.bf16.msra.mxu0 %v6076_v9  ;;  %1171 = vmatprep.mubr.bf16.mxu0 %v6637_v2  ;;  %v6111_v9 = vld [vmem:[%s8744_s1 + $0x330] ss:$8 sps:$4 sm:$0xff]  }
  0xec   :  { %1439 = vmatprep.subr.bf16.mxu0 %v6082_v10  ;;  %v7279_v10 = vcombine.low %v7262_v6, %v7267_v11 }
  0xee   :  { %v1327_v14 = vshll.u32 %v7279_v10, 16 }
  0xef   :  { %1440 = vmatpush1.bf16.msra.mxu0 %v6080_v12  ;;  %v6117_v12 = vld [vmem:[%s8744_s1 + $0x344] ss:$8 sps:$4 sm:$0xff]  }
  0xf0   :  { %1441 = vmatprep.subr.bf16.mxu0 %v6086_v13  ;;  %v1322_v13 = vsel %vm107_vm0, %v1317_v18, %v1321_v8  ;;  %v1329_v23 = vrot.slane %v1327_v14, 1  ;;  %v6135_v18 = vld [vmem:[%s8744_s1 + $0x394] ss:$8 sps:$4 sm:$0xff]  }
  0xf2   :  { %1172 = vmatmul.mubr.bf16.gmra.mrb[8].mxu0 %v5087_v15  ;;  %v6115_v15 = vld [vmem:[%s8744_s1 + $0x340] ss:$8 sps:$4 sm:$0xff]  }
  0xf3   :  { %1181 = vmatprep.mubr.bf16.mxu0 %v6637_v2  ;;  %1442 = vmatpush1.bf16.msra.mxu0 %v6084_v17  ;;  %v6120_v17 = vld [vmem:[%s8744_s1 + $0x354] ss:$8 sps:$4 sm:$0xff]  }
  0xf4   :  { %1443 = vmatprep.subr.bf16.mxu0 %v6089_v19  ;;  %v7296_v19 = vld [vmem:[%s8743_s0 + $0x2c] sm:$0xf] }
  0xf7   :  { %1444 = vmatpush1.bf16.msra.mxu0 %v6087_v43  ;;  %v7301_v43 = vld [vmem:[%s8743_s0 + $0x30] sm:$0xf] }
  0xf8   :  { %1445 = vmatprep.subr.bf16.mxu0 %v6093_v22  ;;  %v1325_v22 = vor.u32 %v1323_v31, %v1321_v8 }
  0xfa   :  { %1182 = vmatmul.mubr.bf16.gmra.mrb[36].mxu0 %v5088_v25  ;;  %v7313_v25 = vcombine.low %v7296_v19, %v7301_v43 }
  0xfb   :  { %1189 = vmatprep.mubr.bf16.mxu0 %v6637_v2  ;;  %1446 = vmatpush1.bf16.msra.mxu0 %v6091_v57  ;;  %v6124_v57 = vld [vmem:[%s8744_s1 + $0x364] ss:$8 sps:$4 sm:$0xff]  }
  0xfc   :  { %1447 = vmatprep.subr.bf16.mxu0 %v6097_v26  ;;  %v1330_v26 = vsel %vm107_vm0, %v1325_v22, %v1329_v23  ;;  %v1335_v28 = vshll.u32 %v7313_v25, 16  ;;  %v1339_v44 = vshrl.u32 %v7313_v25, 16  ;;  %v6139_v22 = vld [vmem:[%s8744_s1 + $0x3b0] ss:$8 sps:$4 sm:$0xff]  }
  0xff   :  { %1448 = vmatpush1.bf16.msra.mxu0 %v6095_v27  ;;  %v1331_v27 = vshrl.u32 %v7279_v10, 16 }
 0x100   :  { %1671 = vmatprep.subr.bf16.mxu0 %v6102_v30  ;;  %v6122_v30 = vld [vmem:[%s8744_s1 + $0x360] ss:$8 sps:$4 sm:$0xff]  }
 0x101   :  { %v1333_v7 = vor.u32 %v1331_v27, %v1329_v23  ;;  %v6144_v23 = vld [vmem:[%s8744_s1 + $0x3c4] ss:$8 sps:$4 sm:$0xff]  }
 0x102   :  { %1190 = vmatmul.mubr.bf16.gmra.mrb[16].mxu0 %v5089_v34  ;;  %v1337_v34 = vrot.slane %v1335_v28, 1 }
 0x103   :  { %1199 = vmatprep.mubr.bf16.mxu0 %v6637_v2 }
 0x104   :  { %v1341_v58 = vor.u32 %v1339_v44, %v1337_v34 }
 0x10a   :  { %1200 = vmatmul.mubr.bf16.gmra.mrb[20].mxu0 %v5090_v42  ;;  %v1338_v42 = vsel %vm107_vm0, %v1333_v7, %v1337_v34  ;;  %v6150_v7 = vld [vmem:[%s8744_s1 + $0x3e4] ss:$8 sps:$4 sm:$0xff]  }
 0x10b   :  { %1465 = vmatprep.mubr.bf16.mxu0 %v6637_v2 }
 0x10d   :  { %v310_v51 = vpop.f32.mrb[12].mxu0 }
 0x10e   :  { %v311_v21 = vpop.f32.mrb[13].mxu0  ;;  %v1546_v51 = vld [vmem:[%s8743_s0 + $0x4] sm:$0x8] }
 0x10f   :  { %v7215_v53 = vpop.f32.mrb[14].mxu0  ;;  %v1346_v21 = vsel %vm107_vm0, %v1341_v58, %v1345_v50  ;;  %v6151_v50 = vld [vmem:[%s8743_s0 + $0x34] ss:$0 sps:$4 sm:$0x77]  }
 0x110   :  { %v7223_v60 = vpop.f32.mrb[15].mxu0 }
 0x112   :  { %1466 = vmatmul.mubr.bf16.vlgmr.msra.gmra.mrb[0].mxu0 %v1306_v54 }
 0x113   :  { %1672 = vmatpush1.bf16.msra.mxu0 %v6100_v52  ;;  %1475 = vmatprep.mubr.bf16.mxu0 %v6637_v2  ;;  %v7351_v52 = vcombine.low %v1546_v51, %v7163_v29  ;;  %v1583_v51 = vrot.slane %v6151_v50, 3 }
 0x114   :  { %1673 = vmatprep.subr.bf16.mxu0 %v6105_v55  ;;  %v1573_v55 = vrot.slane %v7188_v38, 3  ;;  %v1818_v38 = vrot.slane %v1311_v59, 4  ;;  %v6163_v59 = vld [vmem:[%s8744_s1 + $0x424] ss:$8 sps:$4 sm:$0xff]  }
 0x115   :  { %v1572_v54 = vrot.slane %v7351_v52, 3 }
 0x117   :  { %1674 = vmatpush1.bf16.msra.mxu0 %v6103_v62 }
 0x118   :  { %1675 = vmatprep.subr.bf16.mxu0 %v6109_v1  ;;  %v1574_v1 = vsel %vm1571_vm3, %v1572_v54, %v1573_v55  ;;  %v1809_v54 = vshll.u32 %v7351_v52, 16 }
 0x11a   :  { %1476 = vmatmul.mubr.bf16.gmra.mrb[4].mxu0 %v1314_v3  ;;  %v6130_v3 = vld [vmem:[%s8744_s1 + $0x380] ss:$8 sps:$4 sm:$0xff]  }
 0x11b   :  { %1676 = vmatpush1.bf16.msra.mxu0 %v6107_v4  ;;  %1485 = vmatprep.mubr.bf16.mxu0 %v6637_v2 }
 0x11c   :  { %1677 = vmatprep.subr.bf16.mxu0 %v6113_v45 }
 0x11f   :  { %1678 = vmatpush1.bf16.msra.mxu0 %v6111_v9  ;;  %v6133_v9 = vld [vmem:[%s8744_s1 + $0x390] ss:$8 sps:$4 sm:$0xff]  }
 0x120   :  { %1679 = vmatprep.subr.bf16.mxu0 %v6117_v12  ;;  %v1575_v12 = vrot.slane %v7210_v16, 3 }
 0x122   :  { %1486 = vmatmul.mubr.bf16.gmra.mrb[8].mxu0 %v1322_v13  ;;  %v1576_v13 = vsel %vm1571_vm3, %v1573_v55, %v1575_v12  ;;  %v1813_v55 = vrot.slane %v1307_v56, 3  ;;  %v6155_v56 = vld [vmem:[%s8744_s1 + $0x400] ss:$8 sps:$4 sm:$0xff]  }
 0x123   :  { %1495 = vmatprep.mubr.bf16.mxu0 %v6637_v2  ;;  %1680 = vmatpush1.bf16.msra.mxu0 %v6115_v15  ;;  %v6141_v15 = vld [vmem:[%s8744_s1 + $0x3b4] ss:$8 sps:$4 sm:$0xff]  }
 0x124   :  { %1681 = vmatprep.subr.bf16.mxu0 %v6120_v17  ;;  %v1577_v17 = vrot.slane %v7245_v40, 3  ;;  %v6169_v40 = vld [vmem:[%s8744_s1 + $0x444] ss:$8 sps:$4 sm:$0xff]  }
 0x127   :  { %1682 = vmatpush1.bf16.msra.mxu0 %v6118_v24  ;;  %v1578_v24 = vsel %vm1571_vm3, %v1575_v12, %v1577_v17 }
 0x128   :  { %1683 = vmatprep.subr.bf16.mxu0 %v6124_v57  ;;  %v6142_v57 = vld [vmem:[%s8744_s1 + $0x3c0] ss:$8 sps:$4 sm:$0xff]  }
 0x12a   :  { %1496 = vmatmul.mubr.bf16.gmra.mrb[40].mxu0 %v1330_v26  ;;  %v6147_v26 = vld [vmem:[%s8744_s1 + $0x3d4] ss:$8 sps:$4 sm:$0xff]  }
 0x12b   :  { %1503 = vmatprep.mubr.bf16.mxu0 %v6637_v2  ;;  %1684 = vmatpush1.bf16.msra.mxu0 %v6122_v30  ;;  %v1579_v30 = vrot.slane %v7279_v10, 3  ;;  %v6175_v10 = vld [vmem:[%s8744_s1 + $0x464] ss:$8 sps:$4 sm:$0xff]  }
 0x12c   :  { %1685 = vmatprep.subr.bf16.mxu0 %v6128_v32  ;;  %v6145_v32 = vld [vmem:[%s8744_s1 + $0x3d0] ss:$8 sps:$4 sm:$0xff]  }
 0x12d   :  { %v1580_v34 = vsel %vm1571_vm3, %v1577_v17, %v1579_v30  ;;  %v1821_v17 = vrot.slane %v1323_v31, 3  ;;  %v1825_v31 = vrot.slane %v1331_v27, 3  ;;  %v6170_v27 = vld [vmem:[%s8744_s1 + $0x450] ss:$8 sps:$4 sm:$0xff]  }
 0x12f   :  { %1686 = vmatpush1.bf16.msra.mxu0 %v6126_v39  ;;  %v6154_v39 = vld [vmem:[%s8744_s1 + $0x3f4] ss:$8 sps:$4 sm:$0xff]  }
 0x130   :  { %1928 = vmatprep.subr.bf16.mxu0 %v6132_v41  ;;  %v1581_v41 = vrot.slane %v7313_v25, 3  ;;  %v6177_v25 = vld [vmem:[%s8744_s1 + $0x470] ss:$8 sps:$4 sm:$0xff]  }
 0x132   :  { %1504 = vmatmul.mubr.bf16.gmra.mrb[16].mxu0 %v1338_v42  ;;  %v6152_v42 = vld [vmem:[%s8744_s1 + $0x3f0] ss:$8 sps:$4 sm:$0xff]   ;;  %v1582_v58 = vsel %vm1571_vm3, %v1579_v30, %v1581_v41  ;;  %v6167_v30 = vld [vmem:[%s8744_s1 + $0x440] ss:$8 sps:$4 sm:$0xff]  }
 0x133   :  { %1513 = vmatprep.mubr.bf16.mxu0 %v6637_v2 }
 0x13a   :  { %1514 = vmatmul.mubr.bf16.gmra.mrb[20].mxu0 %v1346_v21  ;;  %v1806_v21 = vshrl.u32 %v7351_v52, 16 }
 0x13b   :  { %1703 = vmatprep.mubr.bf16.mxu0 %v6637_v2 }
 0x13d   :  { %v487_v62 = vpop.f32.mrb[24].mxu0 }
 0x13e   :  { %v488_v63 = vpop.f32.mrb[25].mxu0  ;;  %v1584_v62 = vsel %vm1571_vm3, %v1581_v41, %v1583_v51  ;;  %v6173_v41 = vld [vmem:[%s8744_s1 + $0x460] ss:$8 sps:$4 sm:$0xff]  }
 0x13f   :  { %v489_v0 = vpop.f32.mrb[26].mxu0  ;;  %v1808_v63 = vrot.slane %v1806_v21, 3 }
 0x140   :  { %v7361_v4 = vadd.f32 %v489_v0, %v7215_v53  ;;  %v491_v45 = vpop.f32.mrb[27].mxu0  ;;  %v6138_v53 = vld [vmem:[%s8744_s1 + $0x3a4] ss:$8 sps:$4 sm:$0xff]   ;;  %v1811_v0 = vrot.slane %v1809_v54, 4 }
 0x141   :  { %v7367_v8 = vadd.f32 %v491_v45, %v7223_v60  ;;  %v6136_v60 = vld [vmem:[%s8744_s1 + $0x3a0] ss:$8 sps:$4 sm:$0xff]  }
 0x142   :  { %1704 = vmatmul.mubr.bf16.vlgmr.msra.gmra.mrb[0].mxu0 %v1574_v1  ;;  %v1814_v1 = vrot.slane %v1303_v47, 4 }
 0x143   :  { %1929 = vmatpush1.bf16.msra.mxu0 %v6130_v3  ;;  %1713 = vmatprep.mubr.bf16.mxu0 %v6637_v2  ;;  %v1812_v3 = vor.u32 %v1811_v0, %v1808_v63  ;;  %v5229_v0 = vcombine.low %v7163_v29, %v7178_v36  ;;  %v5232_v29 = vcombine.low %v7233_v61, %v7262_v6  ;;  %v6186_v61 = vld [vmem:[%s8746_s3 + $0x204] ss:$16 sps:$4 sm:$0xff]   ;;  %v6188_v6 = vld [vmem:[%s8746_s3 + $0x200] ss:$16 sps:$4 sm:$0xff]  }
 0x144   :  { %1930 = vmatprep.subr.bf16.mxu0 %v6135_v18  ;;  %v1815_v45 = vor.u32 %v1814_v1, %v1813_v55  ;;  %v5233_v36 = vcombine.low %v7267_v11, %v7296_v19  ;;  %3102 = vmatprep.subr.bf16.mxu1 %v6186_v61  ;;  %v6191_v11 = vld [vmem:[%s8746_s3 + $0x220] ss:$16 sps:$4 sm:$0xff]   ;;  %v6194_v19 = vld [vmem:[%s8746_s3 + $0x60c] ss:$16 sps:$4 sm:$0xff]  }
 0x145   :  { %3103 = vmatpush1.bf16.msra.mxu1 %v6188_v6  ;;  %v6267_v6 = vld [vmem:[%s8746_s3 + $0x3c4] ss:$16 sps:$4 sm:$0xff]  }
 0x146   :  { %v1816_v52 = vsel %vm773_vm1, %v1812_v3, %v1815_v45 }
 0x147   :  { %1931 = vmatpush1.bf16.msra.mxu0 %v6133_v9 }
 0x148   :  { %1932 = vmatprep.subr.bf16.mxu0 %v6138_v53  ;;  %v1817_v53 = vrot.slane %v1315_v5, 3  ;;  %v6158_v5 = vld [vmem:[%s8744_s1 + $0x410] ss:$8 sps:$4 sm:$0xff]  }
 0x14a   :  { %1714 = vmatmul.mubr.bf16.gmra.mrb[4].mxu0 %v1576_v13  ;;  %v1819_v16 = vor.u32 %v1818_v38, %v1817_v53  ;;  %v6195_v38 = vld [vmem:[%s8746_s3 + $0x244] ss:$16 sps:$4 sm:$0xff]  }
 0x14b   :  { %1933 = vmatpush1.bf16.msra.mxu0 %v6136_v60  ;;  %1723 = vmatprep.mubr.bf16.mxu0 %v6637_v2  ;;  %v6160_v60 = vld [vmem:[%s8744_s1 + $0x414] ss:$8 sps:$4 sm:$0xff]  }
 0x14c   :  { %1934 = vmatprep.subr.bf16.mxu0 %v6141_v15 }
 0x14f   :  { %1935 = vmatpush1.bf16.msra.mxu0 %v6139_v22  ;;  %v1822_v22 = vrot.slane %v1319_v46, 4 }
 0x150   :  { %1936 = vmatprep.subr.bf16.mxu0 %v6144_v23  ;;  %v6166_v23 = vld [vmem:[%s8744_s1 + $0x434] ss:$8 sps:$4 sm:$0xff]  }
 0x152   :  { %1724 = vmatmul.mubr.bf16.gmra.mrb[8].mxu0 %v1578_v24  ;;  %v1823_v24 = vor.u32 %v1822_v22, %v1821_v17  ;;  %v6203_v17 = vld [vmem:[%s8746_s3 + $0x260] ss:$16 sps:$4 sm:$0xff]   ;;  %v6206_v22 = vld [vmem:[%s8746_s3 + $0x64c] ss:$16 sps:$4 sm:$0xff]  }
 0x153   :  { %1733 = vmatprep.mubr.bf16.mxu0 %v6637_v2  ;;  %1937 = vmatpush1.bf16.msra.mxu0 %v6142_v57  ;;  %v6164_v57 = vld [vmem:[%s8744_s1 + $0x430] ss:$8 sps:$4 sm:$0xff]  }
 0x154   :  { %1938 = vmatprep.subr.bf16.mxu0 %v6147_v26  ;;  %v1824_v46 = vsel %vm773_vm1, %v1819_v16, %v1823_v24  ;;  %v1826_v26 = vrot.slane %v1327_v14, 4  ;;  %v1784_v14 = vld [vmem:[%s8743_s0 + $0x34] sm:$0xf] }
 0x157   :  { %1939 = vmatpush1.bf16.msra.mxu0 %v6145_v32  ;;  %v6172_v32 = vld [vmem:[%s8744_s1 + $0x454] ss:$8 sps:$4 sm:$0xff]  }
 0x158   :  { %1940 = vmatprep.subr.bf16.mxu0 %v6150_v7  ;;  %v1827_v7 = vor.u32 %v1826_v26, %v1825_v31  ;;  %v6210_v31 = vld [vmem:[%s8746_s3 + $0x668] ss:$16 sps:$4 sm:$0xff]   ;;  %v6213_v26 = vld [vmem:[%s8746_s3 + $0x2a4] ss:$16 sps:$4 sm:$0xff]  }
 0x15a   :  { %1734 = vmatmul.mubr.bf16.gmra.mrb[44].mxu0 %v1580_v34  ;;  %v1828_v34 = vsel %vm773_vm1, %v1823_v24, %v1827_v7  ;;  %v6204_v24 = vld [vmem:[%s8746_s3 + $0x648] ss:$16 sps:$4 sm:$0xff]  }
 0x15b   :  { %1741 = vmatprep.mubr.bf16.mxu0 %v6637_v2  ;;  %1941 = vmatpush1.bf16.msra.mxu0 %v6148_v35  ;;  %v1829_v35 = vrot.slane %v1339_v44, 3 }
 0x15c   :  { %1942 = vmatprep.subr.bf16.mxu0 %v6154_v39  ;;  %v1830_v39 = vrot.slane %v1335_v28, 4 }
 0x15f   :  { %1943 = vmatpush1.bf16.msra.mxu0 %v6152_v42  ;;  %v5196_v42 = vcombine.low %v1784_v14, %v1784_v14 }
 0x160   :  { %2150 = vmatprep.subr.bf16.mxu0 %v6157_v20  ;;  %v6179_v20 = vld [vmem:[%s8744_s1 + $0x474] ss:$8 sps:$4 sm:$0xff]  }
 0x161   :  { %v1834_v50 = vshrl.u32 %v5196_v42, 16  ;;  %v1837_v44 = vshll.u32 %v5196_v42, 16  ;;  %v6228_v42 = vld [vmem:[%s8746_s3 + $0x6c8] ss:$16 sps:$4 sm:$0xff]  }
 0x162   :  { %1742 = vmatmul.mubr.bf16.gmra.mrb[16].mxu0 %v1582_v58  ;;  %v1831_v58 = vor.u32 %v1830_v39, %v1829_v35  ;;  %v6225_v35 = vld [vmem:[%s8746_s3 + $0x2e4] ss:$16 sps:$4 sm:$0xff]   ;;  %v6227_v39 = vld [vmem:[%s8746_s3 + $0x2e0] ss:$16 sps:$4 sm:$0xff]  }
 0x163   :  { %1751 = vmatprep.mubr.bf16.mxu0 %v6637_v2  ;;  %v1836_v51 = vrot.slane %v1834_v50, 3  ;;  %v1839_v21 = vrot.slane %v1837_v44, 4  ;;  %v6236_v50 = vld [vmem:[%s8746_s3 + $0x6ec] ss:$16 sps:$4 sm:$0xff]   ;;  %v6234_v44 = vld [vmem:[%s8746_s3 + $0x6e8] ss:$16 sps:$4 sm:$0xff]  }
 0x164   :  { %v1832_v28 = vsel %vm773_vm1, %v1827_v7, %v1831_v58  ;;  %v6216_v7 = vld [vmem:[%s8746_s3 + $0x688] ss:$16 sps:$4 sm:$0xff]  }
 0x165   :  { %v1840_v54 = vor.u32 %v1839_v21, %v1836_v51  ;;  %v6242_v51 = vld [vmem:[%s8746_s3 + $0x70c] ss:$16 sps:$4 sm:$0xff]   ;;  %v6240_v21 = vld [vmem:[%s8746_s3 + $0x708] ss:$16 sps:$4 sm:$0xff]  }
 0x167   :  { %v1841_v55 = vsel %vm773_vm1, %v1831_v58, %v1840_v54  ;;  %v6233_v58 = vld [vmem:[%s8746_s3 + $0x300] ss:$16 sps:$4 sm:$0xff]   ;;  %v6243_v54 = vld [vmem:[%s8746_s3 + $0x344] ss:$16 sps:$4 sm:$0xff]  }
 0x16a   :  { %1752 = vmatmul.mubr.bf16.gmra.mrb[20].mxu0 %v1584_v62 }
 0x16b   :  { %1960 = vmatprep.mubr.bf16.mxu0 %v6637_v2 }
 0x16d   :  { %v699_v18 = vpop.f32.mrb[28].mxu0 }
 0x16e   :  { %v700_v9 = vpop.f32.mrb[29].mxu0 }
 0x16f   :  { %v701_v12 = vpop.f32.mrb[30].mxu0  ;;  %v5230_v9 = vcombine.low %v7183_v37, %v7198_v48  ;;  %v5234_v37 = vcombine.low %v7301_v43, %v1784_v14  ;;  %v6192_v43 = vld [vmem:[%s8746_s3 + $0x608] ss:$16 sps:$4 sm:$0xff]   ;;  %v6224_v14 = vld [vmem:[%s8746_s3 + $0x6ac] ss:$16 sps:$4 sm:$0xff]  }
 0x170   :  { %v7444_v47 = vadd.f32 %v701_v12, %v7361_v4  ;;  %v703_v13 = vpop.f32.mrb[31].mxu0  ;;  %v1820_v4 = vsel %vm773_vm1, %v1815_v45, %v1819_v16  ;;  %v5231_v12 = vcombine.low %v7203_v49, %v7228_v33 }
 0x171   :  { %v7450_v15 = vadd.f32 %v703_v13, %v7367_v8  ;;  %v6161_v8 = vld [vmem:[%s8744_s1 + $0x420] ss:$8 sps:$4 sm:$0xff]   ;;  %v6200_v13 = vld [vmem:[%s8746_s3 + $0x62c] ss:$16 sps:$4 sm:$0xff]  }
 0x172   :  { %1961 = vmatmul.mubr.bf16.vlgmr.msra.gmra.mrb[0].mxu0 %v1816_v52 }
 0x173   :  { %2151 = vmatpush1.bf16.msra.mxu0 %v6155_v56  ;;  %1970 = vmatprep.mubr.bf16.mxu0 %v6637_v2 }
 0x174   :  { %2152 = vmatprep.subr.bf16.mxu0 %v6160_v60  ;;  %v6198_v60 = vld [vmem:[%s8746_s3 + $0x628] ss:$16 sps:$4 sm:$0xff]  }
 0x177   :  { %2153 = vmatpush1.bf16.msra.mxu0 %v6158_v5 }
 0x178   :  { %2154 = vmatprep.subr.bf16.mxu0 %v6163_v59  ;;  %v6201_v59 = vld [vmem:[%s8746_s3 + $0x264] ss:$16 sps:$4 sm:$0xff]  }
 0x17a   :  { %1971 = vmatmul.mubr.bf16.gmra.mrb[4].mxu0 %v1820_v4 }
 0x17b   :  { %2155 = vmatpush1.bf16.msra.mxu0 %v6161_v8  ;;  %1980 = vmatprep.mubr.bf16.mxu0 %v6637_v2 }
 0x17c   :  { %2156 = vmatprep.subr.bf16.mxu0 %v6166_v23 }
 0x17f   :  { %2157 = vmatpush1.bf16.msra.mxu0 %v6164_v57  ;;  %v6207_v57 = vld [vmem:[%s8746_s3 + $0x284] ss:$16 sps:$4 sm:$0xff]  }
 0x180   :  { %2158 = vmatprep.subr.bf16.mxu0 %v6169_v40  ;;  %v6209_v40 = vld [vmem:[%s8746_s3 + $0x280] ss:$16 sps:$4 sm:$0xff]  }
 0x182   :  { %1981 = vmatmul.mubr.bf16.gmra.mrb[8].mxu0 %v1824_v46  ;;  %v6212_v46 = vld [vmem:[%s8746_s3 + $0x66c] ss:$16 sps:$4 sm:$0xff]  }
 0x183   :  { %1990 = vmatprep.mubr.bf16.mxu0 %v6637_v2  ;;  %2159 = vmatpush1.bf16.msra.mxu0 %v6167_v30  ;;  %v6215_v30 = vld [vmem:[%s8746_s3 + $0x2a0] ss:$16 sps:$4 sm:$0xff]  }
 0x184   :  { %2160 = vmatprep.subr.bf16.mxu0 %v6172_v32  ;;  %v6218_v32 = vld [vmem:[%s8746_s3 + $0x68c] ss:$16 sps:$4 sm:$0xff]  }
 0x187   :  { %2161 = vmatpush1.bf16.msra.mxu0 %v6170_v27  ;;  %v6219_v27 = vld [vmem:[%s8746_s3 + $0x2c4] ss:$16 sps:$4 sm:$0xff]  }
 0x188   :  { %2162 = vmatprep.subr.bf16.mxu0 %v6175_v10  ;;  %v6221_v10 = vld [vmem:[%s8746_s3 + $0x2c0] ss:$16 sps:$4 sm:$0xff]  }
 0x18a   :  { %1991 = vmatmul.mubr.bf16.gmra.mrb[48].mxu0 %v1828_v34  ;;  %v6222_v34 = vld [vmem:[%s8746_s3 + $0x6a8] ss:$16 sps:$4 sm:$0xff]  }
 0x18b   :  { %1998 = vmatprep.mubr.bf16.mxu0 %v6637_v2  ;;  %2163 = vmatpush1.bf16.msra.mxu0 %v6173_v41  ;;  %v6230_v41 = vld [vmem:[%s8746_s3 + $0x6cc] ss:$16 sps:$4 sm:$0xff]  }
 0x18c   :  { %2164 = vmatprep.subr.bf16.mxu0 %v6179_v20  ;;  %v6231_v20 = vld [vmem:[%s8746_s3 + $0x304] ss:$16 sps:$4 sm:$0xff]  }
 0x18f   :  { %2165 = vmatpush1.bf16.msra.mxu0 %v6177_v25  ;;  %v6237_v25 = vld [vmem:[%s8746_s3 + $0x324] ss:$16 sps:$4 sm:$0xff]  }
 0x190   :  { %4509 = vmatprep.subr.bf16.mxu0 %v6194_v19  ;;  %v6272_v19 = vld [vmem:[%s8746_s3 + $0x7ac] ss:$16 sps:$4 sm:$0xff]  }
 0x192   :  { %1999 = vmatmul.mubr.bf16.gmra.mrb[16].mxu0 %v1832_v28  ;;  %v6239_v28 = vld [vmem:[%s8746_s3 + $0x320] ss:$16 sps:$4 sm:$0xff]  }
 0x193   :  { %2008 = vmatprep.mubr.bf16.mxu0 %v6637_v2 }
 0x19a   :  { %2009 = vmatmul.mubr.bf16.gmra.mrb[20].mxu0 %v1841_v55  ;;  %v6245_v55 = vld [vmem:[%s8746_s3 + $0x340] ss:$16 sps:$4 sm:$0xff]  }
 0x19b   :  { %2182 = vmatprep.mubr.bf16.mxu0 %v6637_v2 }
 0x19d   :  { %v961_v62 = vpop.f32.mrb[32].mxu0 }
 0x19e   :  { %v962_v63 = vpop.f32.mrb[33].mxu0  ;;  %v6248_v62 = vld [vmem:[%s8746_s3 + $0x72c] ss:$16 sps:$4 sm:$0xff]  }
 0x19f   :  { %v963_v1 = vpop.f32.mrb[34].mxu0  ;;  %v6246_v63 = vld [vmem:[%s8746_s3 + $0x728] ss:$16 sps:$4 sm:$0xff]  }
 0x1a0   :  { %v1000_v3 = vadd.f32 %v963_v1, %v7444_v47  ;;  %v965_v45 = vpop.f32.mrb[35].mxu0  ;;  %v6197_v47 = vld [vmem:[%s8746_s3 + $0x240] ss:$16 sps:$4 sm:$0xff]  }
 0x1a1   :  { %v1001_v18 = vadd.f32 %v965_v45, %v7450_v15  ;;  %v6251_v1 = vld [vmem:[%s8746_s3 + $0x360] ss:$16 sps:$4 sm:$0xff]   ;;  %v6252_v45 = vld [vmem:[%s8746_s3 + $0x748] ss:$16 sps:$4 sm:$0xff]  }
 0x1a2   :  { %2183 = vmatmul.mubr.bf16.vlgmr.msra.gmra.mrb[0].mxu0 %v5229_v0  ;;  %v6249_v0 = vld [vmem:[%s8746_s3 + $0x364] ss:$16 sps:$4 sm:$0xff]  }
 0x1a3   :  { %2192 = vmatprep.mubr.bf16.mxu0 %v6637_v2  ;;  %4510 = vmatpush1.bf16.msra.mxu0 %v6192_v43  ;;  %v6270_v43 = vld [vmem:[%s8746_s3 + $0x7a8] ss:$16 sps:$4 sm:$0xff]  }
 0x1a4   :  { %4511 = vmatprep.subr.bf16.mxu0 %v6200_v13  ;;  %v6276_v13 = vld [vmem:[%s8746_s3 + $0x7c8] ss:$16 sps:$4 sm:$0xff]  }
 0x1a7   :  { %4512 = vmatpush1.bf16.msra.mxu0 %v6198_v60  ;;  %v6278_v60 = vld [vmem:[%s8746_s3 + $0x7cc] ss:$16 sps:$4 sm:$0xff]  }
 0x1a8   :  { %4513 = vmatprep.subr.bf16.mxu0 %v6206_v22 }
 0x1aa   :  { %2193 = vmatmul.mubr.bf16.gmra.mrb[4].mxu0 %v5230_v9  ;;  %v6257_v9 = vld [vmem:[%s8746_s3 + $0x380] ss:$16 sps:$4 sm:$0xff]  }
 0x1ab   :  { %2202 = vmatprep.mubr.bf16.mxu0 %v6637_v2  ;;  %4514 = vmatpush1.bf16.msra.mxu0 %v6204_v24  ;;  %v2265_v24 = vlaneseq }
 0x1ac   :  { %4515 = vmatprep.subr.bf16.mxu0 %v6212_v46  ;;  %v2263_v46 = vld [vmem:[%s8745_s2] sm:$0x3] }
 0x1af   :  { %4516 = vmatpush1.bf16.msra.mxu0 %v6210_v31 }
 0x1b0   :  { %4517 = vmatprep.subr.bf16.mxu0 %v6218_v32 }
 0x1b2   :  { %2203 = vmatmul.mubr.bf16.gmra.mrb[8].mxu0 %v5231_v12  ;;  %v6260_v12 = vld [vmem:[%s8746_s3 + $0x76c] ss:$16 sps:$4 sm:$0xff]  }
 0x1b3   :  { %2212 = vmatprep.mubr.bf16.mxu0 %v6637_v2  ;;  %4518 = vmatpush1.bf16.msra.mxu0 %v6216_v7 }
 0x1b4   :  { %4519 = vmatprep.subr.bf16.mxu0 %v6224_v14 }
 0x1b7   :  { %4520 = vmatpush1.bf16.msra.mxu0 %v6222_v34 }
 0x1b8   :  { %4521 = vmatprep.subr.bf16.mxu0 %v6230_v41 }
 0x1ba   :  { %2213 = vmatmul.mubr.bf16.gmra.mrb[52].mxu0 %v5232_v29  ;;  %v6258_v29 = vld [vmem:[%s8746_s3 + $0x768] ss:$16 sps:$4 sm:$0xff]  }
 0x1bb   :  { %2220 = vmatprep.mubr.bf16.mxu0 %v6637_v2  ;;  %4522 = vmatpush1.bf16.msra.mxu0 %v6228_v42 }
 0x1bc   :  { %4523 = vmatprep.subr.bf16.mxu0 %v6236_v50 }
 0x1bf   :  { %4524 = vmatpush1.bf16.msra.mxu0 %v6234_v44 }
 0x1c0   :  { %4525 = vmatprep.subr.bf16.mxu0 %v6242_v51 }
 0x1c2   :  { %2221 = vmatmul.mubr.bf16.gmra.mrb[16].mxu0 %v5233_v36  ;;  %v6261_v36 = vld [vmem:[%s8746_s3 + $0x3a4] ss:$16 sps:$4 sm:$0xff]  }
 0x1c3   :  { %2230 = vmatprep.mubr.bf16.mxu0 %v6637_v2  ;;  %v6189_v2 = vld [vmem:[%s8746_s3 + $0x224] ss:$16 sps:$4 sm:$0xff]   ;;  %4526 = vmatpush1.bf16.msra.mxu0 %v6240_v21 }
 0x1c4   :  { %3104 = vmatprep.subr.bf16.mxu1 %v6189_v2  ;;  %4527 = vmatprep.subr.bf16.mxu0 %v6248_v62 }
 0x1c5   :  { %3105 = vmatpush1.bf16.msra.mxu1 %v6191_v11  ;;  %v6269_v11 = vld [vmem:[%s8746_s3 + $0x3c0] ss:$16 sps:$4 sm:$0xff]  }
 0x1c6   :  { %3106 = vmatprep.subr.bf16.mxu1 %v6195_v38  ;;  %v6273_v38 = vld [vmem:[%s8746_s3 + $0x3e4] ss:$16 sps:$4 sm:$0xff]  }
 0x1c7   :  { %4528 = vmatpush1.bf16.msra.mxu0 %v6246_v63 }
 0x1c9   :  { %3107 = vmatpush1.bf16.msra.mxu1 %v6197_v47  ;;  %v6275_v47 = vld [vmem:[%s8746_s3 + $0x3e0] ss:$16 sps:$4 sm:$0xff]  }
 0x1ca   :  { %2231 = vmatmul.mubr.bf16.gmra.mrb[20].mxu0 %v5234_v37  ;;  %3108 = vmatprep.subr.bf16.mxu1 %v6201_v59 }
 0x1cd   :  { %v1183_v48 = vpop.f32.mrb[36].mxu0  ;;  %3109 = vmatpush1.bf16.msra.mxu1 %v6203_v17 }
 0x1ce   :  { %v1184_v49 = vpop.f32.mrb[37].mxu0  ;;  %3110 = vmatprep.subr.bf16.mxu1 %v6207_v57  ;;  %v6263_v48 = vld [vmem:[%s8746_s3 + $0x3a0] ss:$16 sps:$4 sm:$0xff]   ;;  %v7740_v57 = vshrl.u32 %v2265_v24, 7 }
 0x1cf   :  { %v1185_v33 = vpop.f32.mrb[38].mxu0  ;;  %v6266_v49 = vld [vmem:[%s8746_s3 + $0x78c] ss:$16 sps:$4 sm:$0xff]  }
 0x1d0   :  { %v1222_v52 = vadd.f32 %v1185_v33, %v1000_v3  ;;  %v1187_v56 = vpop.f32.mrb[39].mxu0  ;;  %v6254_v3 = vld [vmem:[%s8746_s3 + $0x74c] ss:$16 sps:$4 sm:$0xff]   ;;  %v2271_v31 = vsub.s32 1, %v7740_v57 }
 0x1d1   :  { %v1223_v53 = vadd.f32 %v1187_v56, %v1001_v18  ;;  %3111 = vmatpush1.bf16.msra.mxu1 %v6209_v40  ;;  %4529 = vmatprep.subr.bf16.mxu0 %v6254_v3  ;;  %v6255_v18 = vld [vmem:[%s8746_s3 + $0x384] ss:$16 sps:$4 sm:$0xff]   ;;  %v2267_v40 = vsub.s32 0, %v7740_v57 }
 0x1d2   :  { %3112 = vmatprep.subr.bf16.mxu1 %v6213_v26  ;;  %4530 = vmatpush1.bf16.msra.mxu0 %v6252_v45 }
 0x1d3   :  { %4531 = vmatprep.subr.bf16.mxu0 %v6260_v12  ;;  %v7749_v26 = vrot.slane %v2263_v46, %v2267_v40 }
 0x1d5   :  { %3113 = vmatpush1.bf16.msra.mxu1 %v6215_v30  ;;  %v7753_v30 = vrot.slane %v2263_v46, %v2271_v31 }
 0x1d6   :  { %3114 = vmatprep.subr.bf16.mxu1 %v6219_v27  ;;  %4532 = vmatpush1.bf16.msra.mxu0 %v6258_v29 }
 0x1d7   :  { %4533 = vmatprep.subr.bf16.mxu0 %v6266_v49 }
 0x1d9   :  { %3115 = vmatpush1.bf16.msra.mxu1 %v6221_v10 }
 0x1da   :  { %3116 = vmatprep.subr.bf16.mxu1 %v6225_v35 }
 0x1dd   :  { %3117 = vmatpush1.bf16.msra.mxu1 %v6227_v39 }
 0x1de   :  { %3118 = vmatprep.subr.bf16.mxu1 %v6231_v20 }
 0x1e1   :  { %3119 = vmatpush1.bf16.msra.mxu1 %v6233_v58 }
 0x1e2   :  { %3120 = vmatprep.subr.bf16.mxu1 %v6237_v25 }
 0x1e5   :  { %3121 = vmatpush1.bf16.msra.mxu1 %v6239_v28 }
 0x1e6   :  { %3122 = vmatprep.subr.bf16.mxu1 %v6243_v54 }
 0x1e9   :  { %3123 = vmatpush1.bf16.msra.mxu1 %v6245_v55 }
 0x1ea   :  { %3124 = vmatprep.subr.bf16.mxu1 %v6249_v0 }
 0x1ed   :  { %3125 = vmatpush1.bf16.msra.mxu1 %v6251_v1 }
 0x1ee   :  { %3126 = vmatprep.subr.bf16.mxu1 %v6255_v18 }
 0x1f1   :  { %3127 = vmatpush1.bf16.msra.mxu1 %v6257_v9 }
 0x1f2   :  { %3128 = vmatprep.subr.bf16.mxu1 %v6261_v36 }
 0x1f5   :  { %3129 = vmatpush1.bf16.msra.mxu1 %v6263_v48 }
 0x1f6   :  { %3130 = vmatprep.subr.bf16.mxu1 %v6267_v6 }
 0x1f9   :  { %3131 = vmatpush1.bf16.msra.mxu1 %v6269_v11 }
 0x1fa   :  { %3132 = vmatprep.subr.bf16.mxu1 %v6273_v38 }
 0x1fd   :  { %v1497_v15 = vpop.f32.mrb[40].mxu0  ;;  %3133 = vmatpush1.bf16.msra.mxu1 %v6275_v47 }
 0x1fe   :  { %v1498_v5 = vpop.f32.mrb[41].mxu0  ;;  %v6281_v15 = vld [vmem:[%s8746_s3 + $0x20c] ss:$16 sps:$4 sm:$0xff]  }
 0x1ff   :  { %v1499_v16 = vpop.f32.mrb[42].mxu0  ;;  %3143 = vmatprep.subr.bf16.mxu1 %v6281_v15  ;;  %v6282_v5 = vld [vmem:[%s8746_s3 + $0x7e8] ss:$16 sps:$4 sm:$0xff]  }
 0x200   :  { %v7568_v4 = vadd.f32 %v1499_v16, %v1222_v52  ;;  %v1501_v8 = vpop.f32.mrb[43].mxu0  ;;  %v6264_v52 = vld [vmem:[%s8746_s3 + $0x788] ss:$16 sps:$4 sm:$0xff]   ;;  %v6284_v16 = vld [vmem:[%s8746_s3 + $0x7ec] ss:$16 sps:$4 sm:$0xff]  }
 0x201   :  { %v7576_v23 = vadd.f32 %v1501_v8, %v1223_v53  ;;  %4534 = vmatpush1.bf16.msra.mxu0 %v6264_v52 }
 0x202   :  { %4535 = vmatprep.subr.bf16.mxu0 %v6272_v19 }
 0x205   :  { %4536 = vmatpush1.bf16.msra.mxu0 %v6270_v43 }
 0x206   :  { %4537 = vmatprep.subr.bf16.mxu0 %v6278_v60 }
 0x209   :  { %4538 = vmatpush1.bf16.msra.mxu0 %v6276_v13 }
 0x20a   :  { %4539 = vmatprep.subr.bf16.mxu0 %v6284_v16 }
 0x20d   :  { %4540 = vmatpush1.bf16.msra.mxu0 %v6282_v5 }
 0x22d   :  { %v1735_v37 = vpop.f32.mrb[44].mxu0 }
 0x22e   :  { %v1736_v33 = vpop.f32.mrb[45].mxu0 }
 0x22f   :  { %v1737_v56 = vpop.f32.mrb[46].mxu0 }
 0x230   :  { %v1774_v53 = vadd.f32 %v1737_v56, %v7568_v4  ;;  %v1739_v61 = vpop.f32.mrb[47].mxu0 }
 0x231   :  { %v1775_v2 = vadd.f32 %v1739_v61, %v7576_v23 }
 0x25d   :  { %v1992_v59 = vpop.f32.mrb[48].mxu0 }
 0x25e   :  { %v1993_v4 = vpop.f32.mrb[49].mxu0 }
 0x25f   :  { %v1994_v8 = vpop.f32.mrb[50].mxu0 }
 0x260   :  { %v7736_v17 = vadd.f32 %v1994_v8, %v1774_v53  ;;  %v1996_v22 = vpop.f32.mrb[51].mxu0 }
 0x261   :  { %v7738_v23 = vadd.f32 %v1996_v22, %v1775_v2 }
 0x275   :  { %v2184_v32 = vpop.f32.mrb[0].mxu0 }
 0x276   :  { %v2275_v7 = vadd.f32 %v7749_v26, %v2184_v32  ;;  %v2186_v27 = vpop.f32.mrb[1].mxu0 }
 0x277   :  { %v2276_v10 = vadd.f32 %v7753_v30, %v2186_v27  ;;  %v2188_v14 = vpop.f32.mrb[2].mxu0 }
 0x278   :  { %v2297_v34 = vmax.f32 %v2275_v7, 0.0  ;;  %v2277_v35 = vadd.f32 %v7749_v26, %v2188_v14  ;;  %v2190_v39 = vpop.f32.mrb[3].mxu0 }
 0x279   :  { %v2298_v41 = vmax.f32 %v2276_v10, 0.0  ;;  %v2278_v42 = vadd.f32 %v7753_v30, %v2190_v39 }
 0x27a   :  { %v2299_v20 = vmax.f32 %v2277_v35, 0.0  ;;  %v2342_v50 = vrot.slane %v2297_v34, 1  ;;  %v2423_v44 = vrot.slane %v2297_v34, 2 }
 0x27b   :  { %v2300_v58 = vmax.f32 %v2278_v42, 0.0  ;;  %v2345_v51 = vrot.slane %v2298_v41, 1  ;;  %v2426_v21 = vrot.slane %v2298_v41, 2 }
 0x27c   :  { %v2343_v25 = vrot.slane %v2299_v20, 1  ;;  %v2424_v28 = vrot.slane %v2299_v20, 2 }
 0x27d   :  { %v2346_v54 = vrot.slane %v2300_v58, 1  ;;  %v2427_v55 = vrot.slane %v2300_v58, 2  ;;  %v2194_v62 = vpop.f32.mrb[4].mxu0 }
 0x27e   :  { %v2344_v63 = vsel %vm535_vm2, %v2342_v50, %v2343_v25  ;;  %v2425_v0 = vsel %vm2422_vm4, %v2423_v44, %v2424_v28  ;;  %v2279_v1 = vadd.f32 %v7749_v26, %v2194_v62  ;;  %v2196_v3 = vpop.f32.mrb[5].mxu0 }
 0x27f   :  { %v2402_v45 = vadd.f32 %v2344_v63, %v2297_v34  ;;  %v2347_v18 = vsel %vm535_vm2, %v2345_v51, %v2346_v54  ;;  %v2428_v9 = vsel %vm2422_vm4, %v2426_v21, %v2427_v55  ;;  %v2280_v12 = vadd.f32 %v7753_v30, %v2196_v3  ;;  %v2198_v29 = vpop.f32.mrb[6].mxu0 }
 0x280   :  { %v2403_v36 = vadd.f32 %v2347_v18, %v2298_v41  ;;  %v2301_v37 = vmax.f32 %v2279_v1, 0.0  ;;  %v2281_v48 = vadd.f32 %v7749_v26, %v2198_v29  ;;  %v2200_v49 = vpop.f32.mrb[7].mxu0 }
 0x281   :  { %v7766_v33 = vadd.f32 %v2425_v0, %v2402_v45  ;;  %v2302_v52 = vmax.f32 %v2280_v12, 0.0  ;;  %v2282_v56 = vadd.f32 %v7753_v30, %v2200_v49 }
 0x282   :  { %v7769_v53 = vadd.f32 %v2428_v9, %v2403_v36  ;;  %v2348_v61 = vrot.slane %v2301_v37, 1  ;;  %v2429_v6 = vrot.slane %v2301_v37, 2  ;;  %v2303_v2 = vmax.f32 %v2281_v48, 0.0 }
 0x283   :  { %v2520_v11 = vrot.slane %v7766_v33, 7  ;;  %v2350_v19 = vrot.slane %v2302_v52, 1  ;;  %v2431_v43 = vrot.slane %v2302_v52, 2  ;;  %v2304_v38 = vmax.f32 %v2282_v56, 0.0 }
 0x284   :  { %v2523_v47 = vrot.slane %v7769_v53, 7  ;;  %v2349_v13 = vsel %vm535_vm2, %v2343_v25, %v2348_v61  ;;  %v2430_v60 = vsel %vm2422_vm4, %v2424_v28, %v2429_v6  ;;  %v2352_v15 = vrot.slane %v2303_v2, 1 }
 0x285   :  { %v2404_v5 = vadd.f32 %v2349_v13, %v2299_v20  ;;  %v2351_v16 = vsel %vm535_vm2, %v2346_v54, %v2350_v19  ;;  %v2432_v59 = vsel %vm2422_vm4, %v2427_v55, %v2431_v43  ;;  %v2433_v4 = vrot.slane %v2303_v2, 2  ;;  %v2204_v8 = vpop.f32.mrb[8].mxu0 }
 0x286   :  { %v2405_v22 = vadd.f32 %v2351_v16, %v2300_v58  ;;  %v2353_v24 = vsel %vm535_vm2, %v2348_v61, %v2352_v15  ;;  %v2354_v46 = vrot.slane %v2304_v38, 1  ;;  %v2435_v32 = vrot.slane %v2304_v38, 2  ;;  %v2206_v7 = vpop.f32.mrb[9].mxu0 }
 0x287   :  { %v7778_v27 = vadd.f32 %v2430_v60, %v2404_v5  ;;  %v2406_v10 = vadd.f32 %v2353_v24, %v2301_v37  ;;  %v2434_v14 = vsel %vm2422_vm4, %v2429_v6, %v2433_v4  ;;  %v2283_v34 = vadd.f32 %v7749_v26, %v2204_v8  ;;  %v2208_v35 = vpop.f32.mrb[10].mxu0 }
 0x288   :  { %v7782_v39 = vadd.f32 %v2432_v59, %v2405_v22  ;;  %v2355_v41 = vsel %vm535_vm2, %v2350_v19, %v2354_v46  ;;  %v2436_v42 = vsel %vm2422_vm4, %v2431_v43, %v2435_v32  ;;  %v2284_v20 = vadd.f32 %v7753_v30, %v2206_v7  ;;  %v2210_v58 = vpop.f32.mrb[11].mxu0 }
 0x289   :  { %v2521_v50 = vrot.slane %v7778_v27, 7  ;;  %v2577_v44 = vrot.slane %v7778_v27, 6  ;;  %v7789_v25 = vadd.f32 %v2434_v14, %v2406_v10  ;;  %v2407_v28 = vadd.f32 %v2355_v41, %v2302_v52 }
 0x28a   :  { %v2524_v51 = vrot.slane %v7782_v39, 7  ;;  %v2305_v21 = vmax.f32 %v2283_v34, 0.0  ;;  %v2306_v54 = vmax.f32 %v2284_v20, 0.0  ;;  %v2285_v55 = vadd.f32 %v7749_v26, %v2208_v35 }
 0x28b   :  { %v2526_v62 = vrot.slane %v7789_v25, 7  ;;  %v2578_v63 = vrot.slane %v7789_v25, 6  ;;  %v7795_v0 = vadd.f32 %v2436_v42, %v2407_v28  ;;  %v2286_v1 = vadd.f32 %v7753_v30, %v2210_v58 }
 0x28c   :  { %v2356_v3 = vrot.slane %v2305_v21, 1  ;;  %v2437_v45 = vrot.slane %v2305_v21, 2  ;;  %v2358_v18 = vrot.slane %v2306_v54, 1  ;;  %v2439_v9 = vrot.slane %v2306_v54, 2 }
 0x28d   :  { %v2528_v12 = vrot.slane %v7795_v0, 7  ;;  %v2307_v29 = vmax.f32 %v2285_v55, 0.0  ;;  %v2308_v36 = vmax.f32 %v2286_v1, 0.0  ;;  %v2214_v37 = vpop.f32.mrb[52].mxu0  ;;  %v2525_v48 = vsel %vm2519_vm5, %v2523_v47, %v2524_v51 }
 0x28e   :  { %v2357_v49 = vsel %vm535_vm2, %v2352_v15, %v2356_v3  ;;  %v2438_v52 = vsel %vm2422_vm4, %v2433_v4, %v2437_v45  ;;  %v2359_v56 = vsel %vm535_vm2, %v2354_v46, %v2358_v18  ;;  %v2440_v61 = vsel %vm2422_vm4, %v2435_v32, %v2439_v9  ;;  %v2215_v6 = vpop.f32.mrb[53].mxu0 }
 0x28f   :  { %v2408_v19 = vadd.f32 %v2357_v49, %v2303_v2  ;;  %v2409_v43 = vadd.f32 %v2359_v56, %v2304_v38  ;;  %v2360_v13 = vrot.slane %v2307_v29, 1  ;;  %v2441_v60 = vrot.slane %v2307_v29, 2  ;;  %v2216_v5 = vpop.f32.mrb[54].mxu0 }
 0x290   :  { %v2362_v16 = vrot.slane %v2308_v36, 1  ;;  %v2443_v59 = vrot.slane %v2308_v36, 2  ;;  %v2253_v8 = vadd.f32 %v2216_v5, %v7736_v17  ;;  %v2218_v22 = vpop.f32.mrb[55].mxu0  ;;  %v2561_v47 = vadd.f32 %v2525_v48, %v7769_v53 }
 0x291   :  { %v7808_v15 = vadd.f32 %v2438_v52, %v2408_v19  ;;  %v7810_v4 = vadd.f32 %v2440_v61, %v2409_v43  ;;  %v2361_v24 = vsel %vm535_vm2, %v2356_v3, %v2360_v13  ;;  %v2442_v46 = vsel %vm2422_vm4, %v2437_v45, %v2441_v60 }
 0x292   :  { %v2410_v2 = vadd.f32 %v2361_v24, %v2305_v21  ;;  %v2363_v38 = vsel %vm535_vm2, %v2358_v18, %v2362_v16  ;;  %v2444_v32 = vsel %vm2422_vm4, %v2439_v9, %v2443_v59  ;;  %v2287_v7 = vadd.f32 %v7749_v26, %v2253_v8 }
 0x293   :  { %v2530_v17 = vrot.slane %v7808_v15, 7  ;;  %v2583_v10 = vrot.slane %v7808_v15, 6  ;;  %v2532_v53 = vrot.slane %v7810_v4, 7  ;;  %v2585_v14 = vrot.slane %v7810_v4, 6  ;;  %v6290_v4 = vld [vmem:[%s8746_s3 + $0x24c] ss:$16 sps:$4 sm:$0xff]  }
 0x294   :  { %v2491_v34 = vadd.f32 %v2442_v46, %v2410_v2  ;;  %v2411_v35 = vadd.f32 %v2363_v38, %v2306_v54  ;;  %v2309_v41 = vmax.f32 %v2287_v7, 0.0  ;;  %v2254_v42 = vadd.f32 %v2218_v22, %v7738_v23 }
 0x295   :  { %v2531_v20 = vsel %vm2519_vm5, %v2526_v62, %v2530_v17  ;;  %v2222_v58 = vpop.f32.mrb[16].mxu0  ;;  %v2580_v28 = vrot.slane %v7782_v39, 6  ;;  %v2581_v21 = vrot.slane %v7795_v0, 6  ;;  %v2522_v55 = vsel %vm2519_vm5, %v2520_v11, %v2521_v50 }
 0x296   :  { %v2564_v54 = vadd.f32 %v2531_v20, %v7789_v25  ;;  %v2587_v1 = vrot.slane %v2491_v34, 6  ;;  %v7833_v3 = vadd.f32 %v2444_v32, %v2411_v35  ;;  %v2364_v23 = vrot.slane %v2309_v41, 1  ;;  %v2224_v45 = vpop.f32.mrb[17].mxu0 }
 0x297   :  { %v2445_v18 = vrot.slane %v2309_v41, 2  ;;  %v2288_v9 = vadd.f32 %v7753_v30, %v2254_v42  ;;  %v2289_v29 = vadd.f32 %v7749_v26, %v2222_v58  ;;  %v2290_v36 = vadd.f32 %v7753_v30, %v2224_v45  ;;  %v2226_v37 = vpop.f32.mrb[18].mxu0 }
 0x298   :  { %v2588_v48 = vsel %vm2576_vm6, %v2583_v10, %v2587_v1  ;;  %v2589_v11 = vrot.slane %v7833_v3, 6  ;;  %v2291_v49 = vadd.f32 %v7749_v26, %v2226_v37  ;;  %v2228_v52 = vpop.f32.mrb[19].mxu0  ;;  %v2582_v56 = vsel %vm2576_vm6, %v2580_v28, %v2581_v21 }
 0x299   :  { %v7846_v61 = vadd.f32 %v2588_v48, %v2564_v54  ;;  %v2310_v6 = vmax.f32 %v2288_v9, 0.0  ;;  %v2311_v19 = vmax.f32 %v2289_v29, 0.0  ;;  %v2312_v43 = vmax.f32 %v2290_v36, 0.0 }
 0x29a   :  { %v2313_v13 = vmax.f32 %v2291_v49, 0.0  ;;  %v2292_v60 = vadd.f32 %v7753_v30, %v2228_v52  ;;  %v7849_v5 = vadd.f32 %v2582_v56, %v2561_v47  ;;  %v7852_v16 = vadd.f32 %v2522_v55, %v7766_v33 }
 0x29b   :  { %v2367_v59 = vrot.slane %v2310_v6, 1  ;;  %v2448_v8 = vrot.slane %v2310_v6, 2  ;;  %v2365_v22 = vrot.slane %v2311_v19, 1  ;;  %v2446_v24 = vrot.slane %v2311_v19, 2 }
 0x29c   :  { %v2368_v46 = vrot.slane %v2312_v43, 1  ;;  %v2449_v2 = vrot.slane %v2312_v43, 2  ;;  %v2370_v38 = vrot.slane %v2313_v13, 1  ;;  %v2451_v32 = vrot.slane %v2313_v13, 2 }
 0x29d   :  { %v2366_v7 = vsel %vm535_vm2, %v2364_v23, %v2365_v22  ;;  %v2447_v17 = vsel %vm2422_vm4, %v2445_v18, %v2446_v24  ;;  %v2314_v34 = vmax.f32 %v2292_v60, 0.0  ;;  %v2232_v35 = vpop.f32.mrb[20].mxu0  ;;  %v2706_v47 = vrot.slane %v7849_v5, 2 }
 0x29e   :  { %v2412_v42 = vadd.f32 %v2366_v7, %v2309_v41  ;;  %v2369_v33 = vsel %vm535_vm2, %v2367_v59, %v2368_v46  ;;  %v2450_v20 = vsel %vm2422_vm4, %v2448_v8, %v2449_v2  ;;  %v2371_v58 = vsel %vm535_vm2, %v2365_v22, %v2370_v38  ;;  %v2234_v28 = vpop.f32.mrb[21].mxu0 }
 0x29f   :  { %v2413_v55 = vadd.f32 %v2369_v33, %v2310_v6  ;;  %v2414_v54 = vadd.f32 %v2371_v58, %v2311_v19  ;;  %v2452_v1 = vsel %vm2422_vm4, %v2446_v24, %v2451_v32  ;;  %v2372_v45 = vrot.slane %v2314_v34, 1  ;;  %v2236_v23 = vpop.f32.mrb[22].mxu0 }
 0x2a0   :  { %v2493_v9 = vadd.f32 %v2447_v17, %v2412_v42  ;;  %v2453_v18 = vrot.slane %v2314_v34, 2  ;;  %v2293_v29 = vadd.f32 %v7749_v26, %v2232_v35  ;;  %v2294_v36 = vadd.f32 %v7753_v30, %v2234_v28  ;;  %v2238_v41 = vpop.f32.mrb[23].mxu0 }
 0x2a1   :  { %v2494_v37 = vadd.f32 %v2450_v20, %v2413_v55  ;;  %v7863_v48 = vadd.f32 %v2452_v1, %v2414_v54  ;;  %v2373_v49 = vsel %vm535_vm2, %v2368_v46, %v2372_v45  ;;  %v2295_v52 = vadd.f32 %v7749_v26, %v2236_v23 }
 0x2a2   :  { %v2534_v56 = vrot.slane %v2493_v9, 7  ;;  %v2415_v6 = vadd.f32 %v2373_v49, %v2312_v43  ;;  %v2454_v19 = vsel %vm2422_vm4, %v2449_v2, %v2453_v18  ;;  %v2315_v60 = vmax.f32 %v2293_v29, 0.0 }
 0x2a3   :  { %v2537_v59 = vrot.slane %v2494_v37, 7  ;;  %v2535_v8 = vrot.slane %v7863_v48, 7  ;;  %v2591_v22 = vrot.slane %v7863_v48, 6  ;;  %v2316_v24 = vmax.f32 %v2294_v36, 0.0 }
 0x2a4   :  { %v7870_v7 = vadd.f32 %v2454_v19, %v2415_v6  ;;  %v2374_v17 = vrot.slane %v2315_v60, 1  ;;  %v2455_v35 = vrot.slane %v2315_v60, 2  ;;  %v2317_v42 = vmax.f32 %v2295_v52, 0.0 }
 0x2a5   :  { %v2376_v33 = vrot.slane %v2316_v24, 1  ;;  %v2457_v46 = vrot.slane %v2316_v24, 2  ;;  %v2296_v26 = vadd.f32 %v7753_v30, %v2238_v41  ;;  %v2536_v43 = vsel %vm2519_vm5, %v2534_v56, %v2535_v8 }
 0x2a6   :  { %v2538_v2 = vrot.slane %v7870_v7, 7  ;;  %v2375_v20 = vsel %vm535_vm2, %v2370_v38, %v2374_v17  ;;  %v2456_v58 = vsel %vm2422_vm4, %v2451_v32, %v2455_v35  ;;  %v2378_v28 = vrot.slane %v2317_v42, 1 }
 0x2a7   :  { %v2416_v55 = vadd.f32 %v2375_v20, %v2313_v13  ;;  %v2377_v54 = vsel %vm535_vm2, %v2372_v45, %v2376_v33  ;;  %v2458_v1 = vsel %vm2422_vm4, %v2453_v18, %v2457_v46  ;;  %v2459_v23 = vrot.slane %v2317_v42, 2 }
 0x2a8   :  { %v2417_v29 = vadd.f32 %v2377_v54, %v2314_v34  ;;  %v2379_v30 = vsel %vm535_vm2, %v2374_v17, %v2378_v28  ;;  %v2420_v36 = vadd.f32 %v2378_v28, %v2317_v42  ;;  %v2318_v41 = vmax.f32 %v2296_v26, 0.0 }
 0x2a9   :  { %v7882_v49 = vadd.f32 %v2456_v58, %v2416_v55  ;;  %v2418_v52 = vadd.f32 %v2379_v30, %v2315_v60  ;;  %v2460_v56 = vsel %vm2422_vm4, %v2455_v35, %v2459_v23  ;;  %v2539_v38 = vsel %vm2519_vm5, %v2537_v59, %v2538_v2 }
 0x2aa   :  { %v7888_v13 = vadd.f32 %v2458_v1, %v2417_v29  ;;  %v2501_v32 = vadd.f32 %v2459_v23, %v2420_v36  ;;  %v2380_v45 = vrot.slane %v2318_v41, 1  ;;  %v2461_v18 = vrot.slane %v2318_v41, 2 }
 0x2ab   :  { %v2540_v34 = vrot.slane %v7882_v49, 7  ;;  %v2592_v6 = vrot.slane %v7882_v49, 6  ;;  %v7892_v19 = vadd.f32 %v2460_v56, %v2418_v52  ;;  %v2567_v17 = vadd.f32 %v2539_v38, %v2494_v37 }
 0x2ac   :  { %v2542_v60 = vrot.slane %v7888_v13, 7  ;;  %v2601_v42 = vrot.slane %v2501_v32, 6  ;;  %v2381_v35 = vsel %vm535_vm2, %v2376_v33, %v2380_v45  ;;  %v2421_v26 = vadd.f32 %v2380_v45, %v2318_v41 }
 0x2ad   :  { %v2544_v59 = vrot.slane %v7892_v19, 7  ;;  %v2597_v20 = vrot.slane %v7892_v19, 6  ;;  %v2419_v58 = vadd.f32 %v2381_v35, %v2316_v24  ;;  %v2462_v28 = vsel %vm2422_vm4, %v2457_v46, %v2461_v18 }
 0x2ae   :  { %v2502_v55 = vadd.f32 %v2461_v18, %v2421_v26  ;;  %v2594_v54 = vrot.slane %v7870_v7, 6  ;;  %v2595_v1 = vrot.slane %v7888_v13, 6  ;;  %v2566_v23 = vadd.f32 %v2536_v43, %v2493_v9 }
 0x2af   :  { %v2545_v37 = vsel %vm2519_vm5, %v2540_v34, %v2544_v59  ;;  %v2602_v33 = vsel %vm2576_vm6, %v2597_v20, %v2601_v42  ;;  %v2500_v29 = vadd.f32 %v2462_v28, %v2419_v58  ;;  %v2579_v24 = vsel %vm2576_vm6, %v2577_v44, %v2578_v63 }
 0x2b0   :  { %v2570_v46 = vadd.f32 %v2545_v37, %v7882_v49  ;;  %v2603_v30 = vrot.slane %v2502_v55, 6  ;;  %v2596_v9 = vsel %vm2576_vm6, %v2594_v54, %v2595_v1  ;;  %v2593_v43 = vsel %vm2576_vm6, %v2591_v22, %v2592_v6  ;;  %v6279_v55 = vld [vmem:[%s8746_s3 + $0x208] ss:$16 sps:$4 sm:$0xff]  }
 0x2b1   :  { %v2546_v36 = vrot.slane %v2500_v29, 7  ;;  %v2599_v41 = vrot.slane %v2500_v29, 6  ;;  %v2624_v52 = vadd.f32 %v2596_v9, %v2567_v17  ;;  %v2617_v56 = vadd.f32 %v2579_v24, %v7852_v16 }
 0x2b2   :  { %v2627_v38 = vadd.f32 %v2602_v33, %v2570_v46  ;;  %v2623_v32 = vadd.f32 %v2593_v43, %v2566_v23  ;;  %v2533_v44 = vsel %vm2519_vm5, %v2528_v12, %v2532_v53  ;;  %v2590_v45 = vsel %vm2576_vm6, %v2585_v14, %v2589_v11 }
 0x2b3   :  { %v2710_v22 = vrot.slane %v2624_v52, 1  ;;  %v2705_v18 = vrot.slane %v2617_v56, 2  ;;  %v2547_v17 = vsel %vm2519_vm5, %v2542_v60, %v2546_v36  ;;  %v2565_v16 = vadd.f32 %v2533_v44, %v7795_v0  ;;  %v6294_v36 = vld [vmem:[%s8746_s3 + $0x288] ss:$16 sps:$4 sm:$0xff]  }
 0x2b4   :  { %v4075_v42 = vrot.slane %v2627_v38, 7  ;;  %v2709_v35 = vrot.slane %v2623_v32, 1  ;;  %v2571_v26 = vadd.f32 %v2547_v17, %v7888_v13  ;;  %v2604_v59 = vsel %vm2576_vm6, %v2599_v41, %v2603_v30  ;;  %v6300_v38 = vld [vmem:[%s8746_s3 + $0x2c8] ss:$16 sps:$4 sm:$0xff]  }
 0x2b5   :  { %v2714_v53 = vsel %vm2519_vm5, %v2706_v47, %v2710_v22  ;;  %v2622_v3 = vadd.f32 %v2590_v45, %v2565_v16  ;;  %v2632_v58 = vrot.slane %v2624_v52, 7  ;;  %v2631_v28 = vrot.slane %v2623_v32, 7  ;;  %v6287_v47 = vld [vmem:[%s8746_s3 + $0x22c] ss:$16 sps:$4 sm:$0xff]   ;;  %v6297_v52 = vld [vmem:[%s8746_s3 + $0x2a8] ss:$16 sps:$4 sm:$0xff]  }
 0x2b6   :  { %v2716_v11 = vpack.c.bf16 %v2714_v53, %v2714_v53  ;;  %v2713_v54 = vsel %vm2519_vm5, %v2705_v18, %v2709_v35  ;;  %v2628_v23 = vadd.f32 %v2604_v59, %v2571_v26  ;;  %v4079_v13 = vsel %vm2519_vm5, %v7846_v61, %v4075_v42  ;;  %v6305_v32 = vld [vmem:[%s8746_s3 + $0x2ec] ss:$16 sps:$4 sm:$0xff]   ;;  %v6303_v44 = vld [vmem:[%s8746_s3 + $0x2e8] ss:$16 sps:$4 sm:$0xff]  }
 0x2b7   :  { %v7941_v37 = vpack.c.bf16 %v2713_v54, %v2713_v54  ;;  %v7948_v33 = vsel %vm2519_vm5, %v7849_v5, %v2632_v58  ;;  %v7951_v29 = vsel %vm2519_vm5, %v2617_v56, %v2631_v28  ;;  %v7953_v46 = vpack.c.bf16 %v4079_v13, %v4079_v13  ;;  %v6302_v56 = vld [vmem:[%s8746_s3 + $0x2cc] ss:$16 sps:$4 sm:$0xff]   ;;  %v6306_v22 = vld [vmem:[%s8746_s3 + $0x308] ss:$16 sps:$4 sm:$0xff]   ;;  %v6330_v13 = vld [vmem:[%s8746_s3] ss:$16 sps:$4 sm:$0xff]  }
 0x2b8   :  { %3134 = vmatprep.mubr.bf16.mxu1 %v2716_v11  ;;  %v4076_v24 = vrot.slane %v2628_v23, 7  ;;  %v2529_v61 = vsel %vm2519_vm5, %v2524_v51, %v2528_v12  ;;  %v2543_v5 = vsel %vm2519_vm5, %v2538_v2, %v2542_v60  ;;  %v2586_v9 = vsel %vm2576_vm6, %v2581_v21, %v2585_v14  ;;  %v6285_v51 = vld [vmem:[%s8746_s3 + $0x228] ss:$16 sps:$4 sm:$0xff]   ;;  %v6308_v45 = vld [vmem:[%s8746_s3 + $0x30c] ss:$16 sps:$4 sm:$0xff]  }
 0x2b9   :  { %3135 = vmatmul.mubr.bf16.vlgmr.msra.gmra.mrb[0].mxu1 %v7941_v37  ;;  %v2563_v30 = vadd.f32 %v2529_v61, %v7782_v39  ;;  %v2600_v43 = vsel %vm2576_vm6, %v2595_v1, %v2599_v41  ;;  %v2569_v2 = vadd.f32 %v2543_v5, %v7870_v7  ;;  %v2527_v39 = vsel %vm2519_vm5, %v2521_v50, %v2526_v62  ;;  %v6299_v41 = vld [vmem:[%s8746_s3 + $0x2ac] ss:$16 sps:$4 sm:$0xff]   ;;  %v6309_v17 = vld [vmem:[%s8746_s3 + $0x328] ss:$16 sps:$4 sm:$0xff]   ;;  %v6332_v23 = vld [vmem:[%s8746_s3 + $0x4] ss:$16 sps:$4 sm:$0xff]  }
 0x2ba   :  { %3144 = vmatpush1.bf16.msra.mxu1 %v6279_v55  ;;  %3175 = vmatprep.mubr.bf16.mxu1 %v2716_v11  ;;  %v4080_v12 = vsel %vm2519_vm5, %v2622_v3, %v4076_v24  ;;  %v2541_v21 = vsel %vm2519_vm5, %v2535_v8, %v2540_v34  ;;  %v2562_v7 = vadd.f32 %v2527_v39, %v7778_v27  ;;  %v6288_v27 = vld [vmem:[%s8746_s3 + $0x248] ss:$16 sps:$4 sm:$0xff]   ;;  %v6311_v18 = vld [vmem:[%s8746_s3 + $0x32c] ss:$16 sps:$4 sm:$0xff]   ;;  %v6333_v61 = vld [vmem:[%s8746_s3 + $0x20] ss:$16 sps:$4 sm:$0xff]  }
 0x2bb   :  { %3145 = vmatprep.subr.bf16.mxu1 %v6287_v47  ;;  %v7981_v0 = vpack.c.bf16 %v4080_v12, %v4080_v12  ;;  %v2620_v14 = vadd.f32 %v2586_v9, %v2563_v30  ;;  %v2626_v60 = vadd.f32 %v2600_v43, %v2569_v2  ;;  %v2568_v1 = vadd.f32 %v2541_v21, %v7863_v48  ;;  %v6314_v16 = vld [vmem:[%s8746_s3 + $0x34c] ss:$16 sps:$4 sm:$0xff]   ;;  %v6312_v42 = vld [vmem:[%s8746_s3 + $0x348] ss:$16 sps:$4 sm:$0xff]   ;;  %v6335_v47 = vld [vmem:[%s8746_s3 + $0x24] ss:$16 sps:$4 sm:$0xff]  }
 0x2bc   :  { %v2584_v50 = vsel %vm2576_vm6, %v2578_v63, %v2583_v10  ;;  %v2598_v62 = vsel %vm2576_vm6, %v2592_v6, %v2597_v20  ;;  %v6293_v63 = vld [vmem:[%s8746_s3 + $0x26c] ss:$16 sps:$4 sm:$0xff]   ;;  %v6291_v6 = vld [vmem:[%s8746_s3 + $0x268] ss:$16 sps:$4 sm:$0xff]   ;;  %v8103_v24 = vpack.c.bf16 %v7948_v33, %v7948_v33  ;;  %v6338_v5 = vld [vmem:[%s8746_s3 + $0x44] ss:$16 sps:$4 sm:$0xff]  }
 0x2bd   :  { %4541 = vmatprep.mubr.bf16.mxu0 %v7981_v0  ;;  %v2619_v8 = vadd.f32 %v2584_v50, %v2562_v7  ;;  %v3589_v15 = vrot.slane %v2620_v14, 6  ;;  %v3595_v25 = vrot.slane %v2626_v60, 5  ;;  %v2625_v48 = vadd.f32 %v2598_v62, %v2568_v1  ;;  %v6296_v20 = vld [vmem:[%s8746_s3 + $0x28c] ss:$16 sps:$4 sm:$0xff]   ;;  %v6315_v26 = vld [vmem:[%s8746_s3 + $0x368] ss:$16 sps:$4 sm:$0xff]  }
 0x2be   :  { %3146 = vmatpush1.bf16.msra.mxu1 %v6285_v51  ;;  %4542 = vmatmul.mubr.bf16.vlgmr.msra.gmra.mrb[56].mxu0 %v7953_v46  ;;  %v6317_v35 = vld [vmem:[%s8746_s3 + $0x36c] ss:$16 sps:$4 sm:$0xff]   ;;  %v6318_v53 = vld [vmem:[%s8746_s3 + $0x388] ss:$16 sps:$4 sm:$0xff]   ;;  %v6336_v33 = vld [vmem:[%s8746_s3 + $0x40] ss:$16 sps:$4 sm:$0xff]  }
 0x2bf   :  { %3147 = vmatprep.subr.bf16.mxu1 %v6290_v4  ;;  %v8012_v10 = vsel %vm2519_vm5, %v3589_v15, %v3595_v25  ;;  %v3588_v49 = vrot.slane %v2619_v8, 6  ;;  %v3594_v34 = vrot.slane %v2625_v48, 5  ;;  %v6320_v59 = vld [vmem:[%s8746_s3 + $0x38c] ss:$16 sps:$4 sm:$0xff]   ;;  %v6321_v58 = vld [vmem:[%s8746_s3 + $0x3a8] ss:$16 sps:$4 sm:$0xff]  }
 0x2c0   :  { %v6323_v3 = vld [vmem:[%s8746_s3 + $0x3ac] ss:$16 sps:$4 sm:$0xff]   ;;  %v6324_v11 = vld [vmem:[%s8746_s3 + $0x3c8] ss:$16 sps:$4 sm:$0xff]   ;;  %v6339_v30 = vld [vmem:[%s8746_s3 + $0x60] ss:$16 sps:$4 sm:$0xff]  }
 0x2c1   :  { %v8018_v19 = vsel %vm2519_vm5, %v3588_v49, %v3594_v34  ;;  %v6326_v28 = vld [vmem:[%s8746_s3 + $0x3cc] ss:$16 sps:$4 sm:$0xff]   ;;  %v6327_v54 = vld [vmem:[%s8746_s3 + $0x3e8] ss:$16 sps:$4 sm:$0xff]   ;;  %v6344_v9 = vld [vmem:[%s8746_s3 + $0x84] ss:$16 sps:$4 sm:$0xff]  }
 0x2c2   :  { %3148 = vmatpush1.bf16.msra.mxu1 %v6288_v27  ;;  %v6329_v55 = vld [vmem:[%s8746_s3 + $0x3ec] ss:$16 sps:$4 sm:$0xff]   ;;  %v6342_v43 = vld [vmem:[%s8746_s3 + $0x80] ss:$16 sps:$4 sm:$0xff]   ;;  %v6347_v51 = vld [vmem:[%s8746_s3 + $0xa4] ss:$16 sps:$4 sm:$0xff]  }
 0x2c3   :  { %3149 = vmatprep.subr.bf16.mxu1 %v6293_v63  ;;  %v6345_v12 = vld [vmem:[%s8746_s3 + $0xa0] ss:$16 sps:$4 sm:$0xff]   ;;  %v6350_v2 = vld [vmem:[%s8746_s3 + $0xc4] ss:$16 sps:$4 sm:$0xff]  }
 0x2c4   :  { %v6348_v39 = vld [vmem:[%s8746_s3 + $0xc0] ss:$16 sps:$4 sm:$0xff]   ;;  %v6353_v4 = vld [vmem:[%s8746_s3 + $0xe4] ss:$16 sps:$4 sm:$0xff]  }
 0x2c5   :  { %v6351_v14 = vld [vmem:[%s8746_s3 + $0xe0] ss:$16 sps:$4 sm:$0xff]   ;;  %v6356_v21 = vld [vmem:[%s8746_s3 + $0x104] ss:$16 sps:$4 sm:$0xff]  }
 0x2c6   :  { %3150 = vmatpush1.bf16.msra.mxu1 %v6291_v6  ;;  %v6354_v7 = vld [vmem:[%s8746_s3 + $0x100] ss:$16 sps:$4 sm:$0xff]   ;;  %v6359_v60 = vld [vmem:[%s8746_s3 + $0x124] ss:$16 sps:$4 sm:$0xff]  }
 0x2c7   :  { %3151 = vmatprep.subr.bf16.mxu1 %v6296_v20  ;;  %v6357_v1 = vld [vmem:[%s8746_s3 + $0x120] ss:$16 sps:$4 sm:$0xff]   ;;  %v6362_v50 = vld [vmem:[%s8746_s3 + $0x144] ss:$16 sps:$4 sm:$0xff]  }
 0x2c8   :  { %v6360_v62 = vld [vmem:[%s8746_s3 + $0x140] ss:$16 sps:$4 sm:$0xff]   ;;  %v6365_v8 = vld [vmem:[%s8746_s3 + $0x164] ss:$16 sps:$4 sm:$0xff]  }
 0x2c9   :  { %v6363_v27 = vld [vmem:[%s8746_s3 + $0x160] ss:$16 sps:$4 sm:$0xff]   ;;  %v6368_v15 = vld [vmem:[%s8746_s3 + $0x184] ss:$16 sps:$4 sm:$0xff]  }
 0x2ca   :  { %3152 = vmatpush1.bf16.msra.mxu1 %v6294_v36  ;;  %v6366_v25 = vld [vmem:[%s8746_s3 + $0x180] ss:$16 sps:$4 sm:$0xff]   ;;  %v6371_v48 = vld [vmem:[%s8746_s3 + $0x1a4] ss:$16 sps:$4 sm:$0xff]   ;;  %v6380_v36 = vld [vmem:[%s8746_s3 + $0xc] ss:$16 sps:$4 sm:$0xff]  }
 0x2cb   :  { %3153 = vmatprep.subr.bf16.mxu1 %v6299_v41  ;;  %v6369_v63 = vld [vmem:[%s8746_s3 + $0x1a0] ss:$16 sps:$4 sm:$0xff]   ;;  %v6374_v49 = vld [vmem:[%s8746_s3 + $0x1c4] ss:$16 sps:$4 sm:$0xff]   ;;  %v6378_v41 = vld [vmem:[%s8746_s3 + $0x8] ss:$16 sps:$4 sm:$0xff]  }
 0x2cc   :  { %v6372_v34 = vld [vmem:[%s8746_s3 + $0x1c0] ss:$16 sps:$4 sm:$0xff]   ;;  %v6377_v6 = vld [vmem:[%s8746_s3 + $0x1e4] ss:$16 sps:$4 sm:$0xff]  }
 0x2cd   :  { %v6375_v20 = vld [vmem:[%s8746_s3 + $0x1e0] ss:$16 sps:$4 sm:$0xff]  }
 0x2ce   :  { %3154 = vmatpush1.bf16.msra.mxu1 %v6297_v52  ;;  %v8202_v52 = vpack.c.bf16 %v7951_v29, %v7951_v29  ;;  %v6386_v29 = vld [vmem:[%s8746_s3 + $0x4c] ss:$16 sps:$4 sm:$0xff]  }
 0x2cf   :  { %3155 = vmatprep.subr.bf16.mxu1 %v6302_v56  ;;  %v6383_v56 = vld [vmem:[%s8746_s3 + $0x2c] ss:$16 sps:$4 sm:$0xff]  }
 0x2d2   :  { %3156 = vmatpush1.bf16.msra.mxu1 %v6300_v38  ;;  %v6381_v38 = vld [vmem:[%s8746_s3 + $0x28] ss:$16 sps:$4 sm:$0xff]  }
 0x2d3   :  { %3157 = vmatprep.subr.bf16.mxu1 %v6305_v32  ;;  %v6384_v32 = vld [vmem:[%s8746_s3 + $0x48] ss:$16 sps:$4 sm:$0xff]  }
 0x2d6   :  { %3158 = vmatpush1.bf16.msra.mxu1 %v6303_v44  ;;  %v6389_v44 = vld [vmem:[%s8746_s3 + $0x6c] ss:$16 sps:$4 sm:$0xff]  }
 0x2d7   :  { %3159 = vmatprep.subr.bf16.mxu1 %v6308_v45  ;;  %v6387_v45 = vld [vmem:[%s8746_s3 + $0x68] ss:$16 sps:$4 sm:$0xff]  }
 0x2da   :  { %3160 = vmatpush1.bf16.msra.mxu1 %v6306_v22  ;;  %v6392_v22 = vld [vmem:[%s8746_s3 + $0x8c] ss:$16 sps:$4 sm:$0xff]  }
 0x2db   :  { %3161 = vmatprep.subr.bf16.mxu1 %v6311_v18  ;;  %v6390_v18 = vld [vmem:[%s8746_s3 + $0x88] ss:$16 sps:$4 sm:$0xff]  }
 0x2de   :  { %3162 = vmatpush1.bf16.msra.mxu1 %v6309_v17  ;;  %v6395_v17 = vld [vmem:[%s8746_s3 + $0xac] ss:$16 sps:$4 sm:$0xff]  }
 0x2df   :  { %3163 = vmatprep.subr.bf16.mxu1 %v6314_v16  ;;  %v6393_v16 = vld [vmem:[%s8746_s3 + $0xa8] ss:$16 sps:$4 sm:$0xff]  }
 0x2e2   :  { %3164 = vmatpush1.bf16.msra.mxu1 %v6312_v42  ;;  %v6398_v42 = vld [vmem:[%s8746_s3 + $0xcc] ss:$16 sps:$4 sm:$0xff]  }
 0x2e3   :  { %3165 = vmatprep.subr.bf16.mxu1 %v6317_v35  ;;  %v6396_v35 = vld [vmem:[%s8746_s3 + $0xc8] ss:$16 sps:$4 sm:$0xff]  }
 0x2e6   :  { %3166 = vmatpush1.bf16.msra.mxu1 %v6315_v26  ;;  %v6401_v26 = vld [vmem:[%s8746_s3 + $0xec] ss:$16 sps:$4 sm:$0xff]  }
 0x2e7   :  { %3167 = vmatprep.subr.bf16.mxu1 %v6320_v59  ;;  %v6399_v59 = vld [vmem:[%s8746_s3 + $0xe8] ss:$16 sps:$4 sm:$0xff]  }
 0x2ea   :  { %3168 = vmatpush1.bf16.msra.mxu1 %v6318_v53  ;;  %v6404_v53 = vld [vmem:[%s8746_s3 + $0x10c] ss:$16 sps:$4 sm:$0xff]  }
 0x2eb   :  { %3169 = vmatprep.subr.bf16.mxu1 %v6323_v3  ;;  %v6402_v3 = vld [vmem:[%s8746_s3 + $0x108] ss:$16 sps:$4 sm:$0xff]  }
 0x2ee   :  { %3170 = vmatpush1.bf16.msra.mxu1 %v6321_v58  ;;  %v6407_v58 = vld [vmem:[%s8746_s3 + $0x12c] ss:$16 sps:$4 sm:$0xff]  }
 0x2ef   :  { %3171 = vmatprep.subr.bf16.mxu1 %v6326_v28  ;;  %v6405_v28 = vld [vmem:[%s8746_s3 + $0x128] ss:$16 sps:$4 sm:$0xff]  }
 0x2f2   :  { %3172 = vmatpush1.bf16.msra.mxu1 %v6324_v11  ;;  %v6410_v11 = vld [vmem:[%s8746_s3 + $0x14c] ss:$16 sps:$4 sm:$0xff]  }
 0x2f3   :  { %3173 = vmatprep.subr.bf16.mxu1 %v6329_v55  ;;  %v6408_v55 = vld [vmem:[%s8746_s3 + $0x148] ss:$16 sps:$4 sm:$0xff]  }
 0x2f6   :  { %3174 = vmatpush1.bf16.msra.mxu1 %v6327_v54  ;;  %v6413_v54 = vld [vmem:[%s8746_s3 + $0x16c] ss:$16 sps:$4 sm:$0xff]  }
 0x2f7   :  { %3504 = vmatprep.subr.bf16.mxu1 %v6332_v23  ;;  %v6411_v23 = vld [vmem:[%s8746_s3 + $0x168] ss:$16 sps:$4 sm:$0xff]  }
 0x2f9   :  { %3176 = vmatmul.mubr.bf16.vlgmr.msra.gmra.mrb[4].mxu1 %v7941_v37  ;;  %v6341_v37 = vld [vmem:[%s8746_s3 + $0x64] ss:$16 sps:$4 sm:$0xff]  }
 0x2fa   :  { %3505 = vmatpush1.bf16.msra.mxu1 %v6330_v13  ;;  %3536 = vmatprep.mubr.bf16.mxu1 %v8103_v24  ;;  %v6416_v13 = vld [vmem:[%s8746_s3 + $0x18c] ss:$16 sps:$4 sm:$0xff]  }
 0x2fb   :  { %3506 = vmatprep.subr.bf16.mxu1 %v6335_v47  ;;  %v6414_v47 = vld [vmem:[%s8746_s3 + $0x188] ss:$16 sps:$4 sm:$0xff]  }
 0x2fe   :  { %3507 = vmatpush1.bf16.msra.mxu1 %v6333_v61  ;;  %v6417_v61 = vld [vmem:[%s8746_s3 + $0x1a8] ss:$16 sps:$4 sm:$0xff]  }
 0x2ff   :  { %3508 = vmatprep.subr.bf16.mxu1 %v6338_v5  ;;  %v6422_v5 = vld [vmem:[%s8746_s3 + $0x1cc] ss:$16 sps:$4 sm:$0xff]  }
 0x302   :  { %3509 = vmatpush1.bf16.msra.mxu1 %v6336_v33  ;;  %v6420_v33 = vld [vmem:[%s8746_s3 + $0x1c8] ss:$16 sps:$4 sm:$0xff]  }
 0x303   :  { %3510 = vmatprep.subr.bf16.mxu1 %v6341_v37  ;;  %v6425_v37 = vld [vmem:[%s8746_s3 + $0x1ec] ss:$16 sps:$4 sm:$0xff]  }
 0x306   :  { %3511 = vmatpush1.bf16.msra.mxu1 %v6339_v30  ;;  %v6423_v30 = vld [vmem:[%s8746_s3 + $0x1e8] ss:$16 sps:$4 sm:$0xff]  }
 0x307   :  { %3512 = vmatprep.subr.bf16.mxu1 %v6344_v9  ;;  %v6428_v9 = vld [vmem:[%s8746_s3 + $0x404] ss:$16 sps:$4 sm:$0xff]  }
 0x30a   :  { %3513 = vmatpush1.bf16.msra.mxu1 %v6342_v43  ;;  %v6426_v43 = vld [vmem:[%s8746_s3 + $0x400] ss:$16 sps:$4 sm:$0xff]  }
 0x30b   :  { %3514 = vmatprep.subr.bf16.mxu1 %v6347_v51  ;;  %v6431_v51 = vld [vmem:[%s8746_s3 + $0x424] ss:$16 sps:$4 sm:$0xff]  }
 0x30e   :  { %3515 = vmatpush1.bf16.msra.mxu1 %v6345_v12  ;;  %v8307_v12 = vpack.c.bf16 %v8012_v10, %v8012_v10  ;;  %v6432_v10 = vld [vmem:[%s8746_s3 + $0x440] ss:$16 sps:$4 sm:$0xff]  }
 0x30f   :  { %3516 = vmatprep.subr.bf16.mxu1 %v6350_v2  ;;  %v6429_v2 = vld [vmem:[%s8746_s3 + $0x420] ss:$16 sps:$4 sm:$0xff]  }
 0x312   :  { %3517 = vmatpush1.bf16.msra.mxu1 %v6348_v39  ;;  %v6434_v39 = vld [vmem:[%s8746_s3 + $0x444] ss:$16 sps:$4 sm:$0xff]  }
 0x313   :  { %3518 = vmatprep.subr.bf16.mxu1 %v6353_v4  ;;  %v6437_v4 = vld [vmem:[%s8746_s3 + $0x464] ss:$16 sps:$4 sm:$0xff]  }
 0x316   :  { %3519 = vmatpush1.bf16.msra.mxu1 %v6351_v14  ;;  %v6435_v14 = vld [vmem:[%s8746_s3 + $0x460] ss:$16 sps:$4 sm:$0xff]  }
 0x317   :  { %3520 = vmatprep.subr.bf16.mxu1 %v6356_v21  ;;  %v6440_v21 = vld [vmem:[%s8746_s3 + $0x484] ss:$16 sps:$4 sm:$0xff]  }
 0x31a   :  { %3521 = vmatpush1.bf16.msra.mxu1 %v6354_v7  ;;  %v6438_v7 = vld [vmem:[%s8746_s3 + $0x480] ss:$16 sps:$4 sm:$0xff]  }
 0x31b   :  { %3522 = vmatprep.subr.bf16.mxu1 %v6359_v60  ;;  %v6443_v60 = vld [vmem:[%s8746_s3 + $0x4a4] ss:$16 sps:$4 sm:$0xff]  }
 0x31e   :  { %3523 = vmatpush1.bf16.msra.mxu1 %v6357_v1  ;;  %v6441_v1 = vld [vmem:[%s8746_s3 + $0x4a0] ss:$16 sps:$4 sm:$0xff]  }
 0x31f   :  { %3524 = vmatprep.subr.bf16.mxu1 %v6362_v50  ;;  %v6446_v50 = vld [vmem:[%s8746_s3 + $0x4c4] ss:$16 sps:$4 sm:$0xff]  }
 0x322   :  { %3525 = vmatpush1.bf16.msra.mxu1 %v6360_v62 }
 0x323   :  { %3526 = vmatprep.subr.bf16.mxu1 %v6365_v8 }
 0x326   :  { %3527 = vmatpush1.bf16.msra.mxu1 %v6363_v27 }
 0x327   :  { %3528 = vmatprep.subr.bf16.mxu1 %v6368_v15  ;;  %v6444_v15 = vld [vmem:[%s8746_s3 + $0x4c0] ss:$16 sps:$4 sm:$0xff]  }
 0x32a   :  { %3529 = vmatpush1.bf16.msra.mxu1 %v6366_v25 }
 0x32b   :  { %3530 = vmatprep.subr.bf16.mxu1 %v6371_v48  ;;  %v6449_v48 = vld [vmem:[%s8746_s3 + $0x4e4] ss:$16 sps:$4 sm:$0xff]  }
 0x32e   :  { %3531 = vmatpush1.bf16.msra.mxu1 %v6369_v63 }
 0x32f   :  { %3532 = vmatprep.subr.bf16.mxu1 %v6374_v49 }
 0x332   :  { %3533 = vmatpush1.bf16.msra.mxu1 %v6372_v34  ;;  %v6447_v34 = vld [vmem:[%s8746_s3 + $0x4e0] ss:$16 sps:$4 sm:$0xff]  }
 0x333   :  { %3534 = vmatprep.subr.bf16.mxu1 %v6377_v6 }
 0x336   :  { %3535 = vmatpush1.bf16.msra.mxu1 %v6375_v20  ;;  %v6452_v20 = vld [vmem:[%s8746_s3 + $0x504] ss:$16 sps:$4 sm:$0xff]  }
 0x337   :  { %3545 = vmatprep.subr.bf16.mxu1 %v6380_v36 }
 0x339   :  { %3537 = vmatmul.mubr.bf16.vlgmr.msra.gmra.mrb[8].mxu1 %v8202_v52 }
 0x33a   :  { %3546 = vmatpush1.bf16.msra.mxu1 %v6378_v41  ;;  %3577 = vmatprep.mubr.bf16.mxu1 %v8103_v24  ;;  %v6419_v24 = vld [vmem:[%s8746_s3 + $0x1ac] ss:$16 sps:$4 sm:$0xff]   ;;  %v6450_v41 = vld [vmem:[%s8746_s3 + $0x500] ss:$16 sps:$4 sm:$0xff]  }
 0x33b   :  { %3547 = vmatprep.subr.bf16.mxu1 %v6383_v56  ;;  %v6453_v56 = vld [vmem:[%s8746_s3 + $0x520] ss:$16 sps:$4 sm:$0xff]  }
 0x33e   :  { %3548 = vmatpush1.bf16.msra.mxu1 %v6381_v38  ;;  %v6458_v38 = vld [vmem:[%s8746_s3 + $0x544] ss:$16 sps:$4 sm:$0xff]  }
 0x33f   :  { %3549 = vmatprep.subr.bf16.mxu1 %v6386_v29  ;;  %v6456_v29 = vld [vmem:[%s8746_s3 + $0x540] ss:$16 sps:$4 sm:$0xff]  }
 0x342   :  { %3550 = vmatpush1.bf16.msra.mxu1 %v6384_v32  ;;  %v6461_v32 = vld [vmem:[%s8746_s3 + $0x564] ss:$16 sps:$4 sm:$0xff]  }
 0x343   :  { %3551 = vmatprep.subr.bf16.mxu1 %v6389_v44  ;;  %v6459_v44 = vld [vmem:[%s8746_s3 + $0x560] ss:$16 sps:$4 sm:$0xff]  }
 0x346   :  { %3552 = vmatpush1.bf16.msra.mxu1 %v6387_v45  ;;  %v6464_v45 = vld [vmem:[%s8746_s3 + $0x584] ss:$16 sps:$4 sm:$0xff]  }
 0x347   :  { %3553 = vmatprep.subr.bf16.mxu1 %v6392_v22  ;;  %v6462_v22 = vld [vmem:[%s8746_s3 + $0x580] ss:$16 sps:$4 sm:$0xff]  }
 0x34a   :  { %3554 = vmatpush1.bf16.msra.mxu1 %v6390_v18  ;;  %v6467_v18 = vld [vmem:[%s8746_s3 + $0x5a4] ss:$16 sps:$4 sm:$0xff]  }
 0x34b   :  { %3555 = vmatprep.subr.bf16.mxu1 %v6395_v17  ;;  %v6465_v17 = vld [vmem:[%s8746_s3 + $0x5a0] ss:$16 sps:$4 sm:$0xff]  }
 0x34e   :  { %3556 = vmatpush1.bf16.msra.mxu1 %v6393_v16  ;;  %v6470_v16 = vld [vmem:[%s8746_s3 + $0x5c4] ss:$16 sps:$4 sm:$0xff]  }
 0x34f   :  { %3557 = vmatprep.subr.bf16.mxu1 %v6398_v42  ;;  %v6468_v42 = vld [vmem:[%s8746_s3 + $0x5c0] ss:$16 sps:$4 sm:$0xff]  }
 0x352   :  { %3558 = vmatpush1.bf16.msra.mxu1 %v6396_v35  ;;  %v6473_v35 = vld [vmem:[%s8746_s3 + $0x5e4] ss:$16 sps:$4 sm:$0xff]  }
 0x353   :  { %3559 = vmatprep.subr.bf16.mxu1 %v6401_v26  ;;  %v6471_v26 = vld [vmem:[%s8746_s3 + $0x5e0] ss:$16 sps:$4 sm:$0xff]  }
 0x356   :  { %3560 = vmatpush1.bf16.msra.mxu1 %v6399_v59  ;;  %v6476_v59 = vld [vmem:[%s8746_s3 + $0x40c] ss:$16 sps:$4 sm:$0xff]  }
 0x357   :  { %3561 = vmatprep.subr.bf16.mxu1 %v6404_v53  ;;  %v6474_v53 = vld [vmem:[%s8746_s3 + $0x408] ss:$16 sps:$4 sm:$0xff]  }
 0x35a   :  { %3562 = vmatpush1.bf16.msra.mxu1 %v6402_v3  ;;  %v8414_v3 = vpack.c.bf16 %v8018_v19, %v8018_v19  ;;  %v6482_v19 = vld [vmem:[%s8746_s3 + $0x44c] ss:$16 sps:$4 sm:$0xff]  }
 0x35b   :  { %3563 = vmatprep.subr.bf16.mxu1 %v6407_v58  ;;  %v6479_v58 = vld [vmem:[%s8746_s3 + $0x42c] ss:$16 sps:$4 sm:$0xff]  }
 0x35e   :  { %3564 = vmatpush1.bf16.msra.mxu1 %v6405_v28  ;;  %v6477_v28 = vld [vmem:[%s8746_s3 + $0x428] ss:$16 sps:$4 sm:$0xff]  }
 0x35f   :  { %3565 = vmatprep.subr.bf16.mxu1 %v6410_v11  ;;  %v6480_v11 = vld [vmem:[%s8746_s3 + $0x448] ss:$16 sps:$4 sm:$0xff]  }
 0x362   :  { %3566 = vmatpush1.bf16.msra.mxu1 %v6408_v55  ;;  %v6485_v55 = vld [vmem:[%s8746_s3 + $0x46c] ss:$16 sps:$4 sm:$0xff]  }
 0x363   :  { %3567 = vmatprep.subr.bf16.mxu1 %v6413_v54  ;;  %v6483_v54 = vld [vmem:[%s8746_s3 + $0x468] ss:$16 sps:$4 sm:$0xff]  }
 0x366   :  { %3568 = vmatpush1.bf16.msra.mxu1 %v6411_v23  ;;  %v6488_v23 = vld [vmem:[%s8746_s3 + $0x48c] ss:$16 sps:$4 sm:$0xff]  }
 0x367   :  { %3569 = vmatprep.subr.bf16.mxu1 %v6416_v13  ;;  %v6486_v13 = vld [vmem:[%s8746_s3 + $0x488] ss:$16 sps:$4 sm:$0xff]  }
 0x36a   :  { %3570 = vmatpush1.bf16.msra.mxu1 %v6414_v47  ;;  %v6491_v47 = vld [vmem:[%s8746_s3 + $0x4ac] ss:$16 sps:$4 sm:$0xff]  }
 0x36b   :  { %3571 = vmatprep.subr.bf16.mxu1 %v6419_v24  ;;  %v6489_v24 = vld [vmem:[%s8746_s3 + $0x4a8] ss:$16 sps:$4 sm:$0xff]  }
 0x36e   :  { %3572 = vmatpush1.bf16.msra.mxu1 %v6417_v61  ;;  %v6494_v61 = vld [vmem:[%s8746_s3 + $0x4cc] ss:$16 sps:$4 sm:$0xff]  }
 0x36f   :  { %3573 = vmatprep.subr.bf16.mxu1 %v6422_v5 }
 0x372   :  { %3574 = vmatpush1.bf16.msra.mxu1 %v6420_v33 }
 0x373   :  { %3575 = vmatprep.subr.bf16.mxu1 %v6425_v37 }
 0x376   :  { %3576 = vmatpush1.bf16.msra.mxu1 %v6423_v30  ;;  %v6492_v30 = vld [vmem:[%s8746_s3 + $0x4c8] ss:$16 sps:$4 sm:$0xff]  }
 0x377   :  { %3987 = vmatprep.subr.bf16.mxu1 %v6428_v9 }
 0x379   :  { %3578 = vmatmul.mubr.bf16.vlgmr.msra.gmra.mrb[12].mxu1 %v8202_v52  ;;  %v6455_v52 = vld [vmem:[%s8746_s3 + $0x524] ss:$16 sps:$4 sm:$0xff]  }
 0x37a   :  { %3988 = vmatpush1.bf16.msra.mxu1 %v6426_v43  ;;  %4019 = vmatprep.mubr.bf16.mxu1 %v8307_v12  ;;  %v6497_v43 = vld [vmem:[%s8746_s3 + $0x4ec] ss:$16 sps:$4 sm:$0xff]  }
 0x37b   :  { %3989 = vmatprep.subr.bf16.mxu1 %v6431_v51  ;;  %v6495_v51 = vld [vmem:[%s8746_s3 + $0x4e8] ss:$16 sps:$4 sm:$0xff]  }
 0x37e   :  { %3990 = vmatpush1.bf16.msra.mxu1 %v6429_v2  ;;  %v6498_v2 = vld [vmem:[%s8746_s3 + $0x508] ss:$16 sps:$4 sm:$0xff]  }
 0x37f   :  { %3991 = vmatprep.subr.bf16.mxu1 %v6434_v39  ;;  %v6503_v39 = vld [vmem:[%s8746_s3 + $0x52c] ss:$16 sps:$4 sm:$0xff]  }
 0x382   :  { %3992 = vmatpush1.bf16.msra.mxu1 %v6432_v10  ;;  %v6501_v10 = vld [vmem:[%s8746_s3 + $0x528] ss:$16 sps:$4 sm:$0xff]  }
 0x383   :  { %3993 = vmatprep.subr.bf16.mxu1 %v6437_v4  ;;  %v6506_v4 = vld [vmem:[%s8746_s3 + $0x54c] ss:$16 sps:$4 sm:$0xff]  }
 0x386   :  { %3994 = vmatpush1.bf16.msra.mxu1 %v6435_v14  ;;  %v6504_v14 = vld [vmem:[%s8746_s3 + $0x548] ss:$16 sps:$4 sm:$0xff]  }
 0x387   :  { %3995 = vmatprep.subr.bf16.mxu1 %v6440_v21  ;;  %v6509_v21 = vld [vmem:[%s8746_s3 + $0x56c] ss:$16 sps:$4 sm:$0xff]  }
 0x38a   :  { %3996 = vmatpush1.bf16.msra.mxu1 %v6438_v7  ;;  %v6507_v7 = vld [vmem:[%s8746_s3 + $0x568] ss:$16 sps:$4 sm:$0xff]  }
 0x38b   :  { %3997 = vmatprep.subr.bf16.mxu1 %v6443_v60  ;;  %v6512_v60 = vld [vmem:[%s8746_s3 + $0x58c] ss:$16 sps:$4 sm:$0xff]  }
 0x38c   :  { %v8341_v62 = vpop.f32.mrb[0].mxu1 }
 0x38d   :  { %v8343_v8 = vpop.f32.mrb[1].mxu1 }
 0x38e   :  { %3998 = vmatpush1.bf16.msra.mxu1 %v6441_v1  ;;  %v3140_v27 = vpop.f32.mrb[2].mxu1  ;;  %v6510_v1 = vld [vmem:[%s8746_s3 + $0x588] ss:$16 sps:$4 sm:$0xff]  }
 0x38f   :  { %v3141_v25 = vpop.f32.mrb[3].mxu1  ;;  %3999 = vmatprep.subr.bf16.mxu1 %v6446_v50  ;;  %v6515_v50 = vld [vmem:[%s8746_s3 + $0x5ac] ss:$16 sps:$4 sm:$0xff]   ;;  %v6513_v27 = vld [vmem:[%s8746_s3 + $0x5a8] ss:$16 sps:$4 sm:$0xff]  }
 0x390   :  { %v6516_v25 = vld [vmem:[%s8746_s3 + $0x5c8] ss:$16 sps:$4 sm:$0xff]  }
 0x391   :  { %v8351_v63 = vpop.f32.mrb[56].mxu0 }
 0x392   :  { %4000 = vmatpush1.bf16.msra.mxu1 %v6444_v15  ;;  %v8353_v49 = vpop.f32.mrb[57].mxu0  ;;  %v6518_v15 = vld [vmem:[%s8746_s3 + $0x5cc] ss:$16 sps:$4 sm:$0xff]  }
 0x393   :  { %v4547_v6 = vpop.f32.mrb[58].mxu0  ;;  %4001 = vmatprep.subr.bf16.mxu1 %v6449_v48  ;;  %v6521_v48 = vld [vmem:[%s8746_s3 + $0x5ec] ss:$16 sps:$4 sm:$0xff]  }
 0x394   :  { %v4548_v36 = vpop.f32.mrb[59].mxu0  ;;  %v6524_v6 = vld [vmem:[%s8746_s3 + $0x604] ss:$16 sps:$4 sm:$0xff]  }
 0x395   :  { %v6527_v36 = vld [vmem:[%s8746_s3 + $0x624] ss:$16 sps:$4 sm:$0xff]  }
 0x396   :  { %4002 = vmatpush1.bf16.msra.mxu1 %v6447_v34  ;;  %v6519_v34 = vld [vmem:[%s8746_s3 + $0x5e8] ss:$16 sps:$4 sm:$0xff]  }
 0x397   :  { %4003 = vmatprep.subr.bf16.mxu1 %v6452_v20  ;;  %v6522_v20 = vld [vmem:[%s8746_s3 + $0x600] ss:$16 sps:$4 sm:$0xff]  }
 0x39a   :  { %4004 = vmatpush1.bf16.msra.mxu1 %v6450_v41  ;;  %v6525_v41 = vld [vmem:[%s8746_s3 + $0x620] ss:$16 sps:$4 sm:$0xff]  }
 0x39b   :  { %4005 = vmatprep.subr.bf16.mxu1 %v6455_v52  ;;  %v6530_v52 = vld [vmem:[%s8746_s3 + $0x644] ss:$16 sps:$4 sm:$0xff]  }
 0x39e   :  { %4006 = vmatpush1.bf16.msra.mxu1 %v6453_v56  ;;  %v6528_v56 = vld [vmem:[%s8746_s3 + $0x640] ss:$16 sps:$4 sm:$0xff]  }
 0x39f   :  { %4007 = vmatprep.subr.bf16.mxu1 %v6458_v38  ;;  %v6533_v38 = vld [vmem:[%s8746_s3 + $0x664] ss:$16 sps:$4 sm:$0xff]  }
 0x3a2   :  { %4008 = vmatpush1.bf16.msra.mxu1 %v6456_v29  ;;  %v6536_v29 = vld [vmem:[%s8746_s3 + $0x684] ss:$16 sps:$4 sm:$0xff]  }
 0x3a3   :  { %4009 = vmatprep.subr.bf16.mxu1 %v6461_v32  ;;  %v6534_v32 = vld [vmem:[%s8746_s3 + $0x680] ss:$16 sps:$4 sm:$0xff]  }
 0x3a6   :  { %4010 = vmatpush1.bf16.msra.mxu1 %v6459_v44  ;;  %v6539_v44 = vld [vmem:[%s8746_s3 + $0x6a4] ss:$16 sps:$4 sm:$0xff]  }
 0x3a7   :  { %4011 = vmatprep.subr.bf16.mxu1 %v6464_v45  ;;  %v6537_v45 = vld [vmem:[%s8746_s3 + $0x6a0] ss:$16 sps:$4 sm:$0xff]  }
 0x3aa   :  { %4012 = vmatpush1.bf16.msra.mxu1 %v6462_v22  ;;  %v6542_v22 = vld [vmem:[%s8746_s3 + $0x6c4] ss:$16 sps:$4 sm:$0xff]  }
 0x3ab   :  { %4013 = vmatprep.subr.bf16.mxu1 %v6467_v18 }
 0x3ae   :  { %4014 = vmatpush1.bf16.msra.mxu1 %v6465_v17 }
 0x3af   :  { %4015 = vmatprep.subr.bf16.mxu1 %v6470_v16 }
 0x3b2   :  { %4016 = vmatpush1.bf16.msra.mxu1 %v6468_v42 }
 0x3b3   :  { %4017 = vmatprep.subr.bf16.mxu1 %v6473_v35 }
 0x3b6   :  { %4018 = vmatpush1.bf16.msra.mxu1 %v6471_v26  ;;  %v6540_v26 = vld [vmem:[%s8746_s3 + $0x6c0] ss:$16 sps:$4 sm:$0xff]  }
 0x3b7   :  { %4028 = vmatprep.subr.bf16.mxu1 %v6476_v59  ;;  %v6545_v59 = vld [vmem:[%s8746_s3 + $0x6e4] ss:$16 sps:$4 sm:$0xff]  }
 0x3b9   :  { %4020 = vmatmul.mubr.bf16.vlgmr.msra.gmra.mrb[16].mxu1 %v8414_v3 }
 0x3ba   :  { %4029 = vmatpush1.bf16.msra.mxu1 %v6474_v53  ;;  %4060 = vmatprep.mubr.bf16.mxu1 %v8307_v12  ;;  %v6500_v12 = vld [vmem:[%s8746_s3 + $0x50c] ss:$16 sps:$4 sm:$0xff]  }
 0x3bb   :  { %4030 = vmatprep.subr.bf16.mxu1 %v6479_v58  ;;  %v6543_v58 = vld [vmem:[%s8746_s3 + $0x6e0] ss:$16 sps:$4 sm:$0xff]  }
 0x3be   :  { %4031 = vmatpush1.bf16.msra.mxu1 %v6477_v28  ;;  %v6573_v28 = vld [vmem:[%s8748_s5 + $0x88] sm:$0xff]  }
 0x3bf   :  { %4032 = vmatprep.subr.bf16.mxu1 %v6482_v19  ;;  %v6548_v19 = vld [vmem:[%s8746_s3 + $0x704] ss:$16 sps:$4 sm:$0xff]  }
 0x3c2   :  { %4033 = vmatpush1.bf16.msra.mxu1 %v6480_v11  ;;  %v6574_v11 = vld [vmem:[%s8748_s5 + $0xd0] sm:$0xff]  }
 0x3c3   :  { %4034 = vmatprep.subr.bf16.mxu1 %v6485_v55  ;;  %v6546_v55 = vld [vmem:[%s8746_s3 + $0x700] ss:$16 sps:$4 sm:$0xff]  }
 0x3c6   :  { %4035 = vmatpush1.bf16.msra.mxu1 %v6483_v54  ;;  %v6575_v54 = vld [vmem:[%s8748_s5 + $0x90] sm:$0xff]  }
 0x3c7   :  { %4036 = vmatprep.subr.bf16.mxu1 %v6488_v23  ;;  %v6551_v23 = vld [vmem:[%s8746_s3 + $0x724] ss:$16 sps:$4 sm:$0xff]  }
 0x3ca   :  { %4037 = vmatpush1.bf16.msra.mxu1 %v6486_v13  ;;  %v6576_v13 = vld [vmem:[%s8748_s5 + $0xd8] sm:$0xff]  }
 0x3cb   :  { %4038 = vmatprep.subr.bf16.mxu1 %v6491_v47  ;;  %v6549_v47 = vld [vmem:[%s8746_s3 + $0x720] ss:$16 sps:$4 sm:$0xff]  }
 0x3cc   :  { %v8451_v5 = vpop.f32.mrb[4].mxu1 }
 0x3cd   :  { %v8453_v33 = vpop.f32.mrb[5].mxu1 }
 0x3ce   :  { %v3181_v37 = vpop.f32.mrb[6].mxu1  ;;  %4039 = vmatpush1.bf16.msra.mxu1 %v6489_v24  ;;  %v6577_v24 = vld [vmem:[%s8748_s5 + $0x98] sm:$0xff]  }
 0x3cf   :  { %v3182_v9 = vpop.f32.mrb[7].mxu1  ;;  %4040 = vmatprep.subr.bf16.mxu1 %v6494_v61  ;;  %v6554_v61 = vld [vmem:[%s8746_s3 + $0x744] ss:$16 sps:$4 sm:$0xff]  }
 0x3d0   :  { %v6578_v37 = vld [vmem:[%s8748_s5 + $0xe0] sm:$0xff]  }
 0x3d1   :  { %v6579_v9 = vld [vmem:[%s8748_s5 + $0xa0] sm:$0xff]  }
 0x3d2   :  { %4041 = vmatpush1.bf16.msra.mxu1 %v6492_v30  ;;  %v6552_v30 = vld [vmem:[%s8746_s3 + $0x740] ss:$16 sps:$4 sm:$0xff]  }
 0x3d3   :  { %4042 = vmatprep.subr.bf16.mxu1 %v6497_v43  ;;  %v6557_v43 = vld [vmem:[%s8746_s3 + $0x764] ss:$16 sps:$4 sm:$0xff]  }
 0x3d6   :  { %4043 = vmatpush1.bf16.msra.mxu1 %v6495_v51  ;;  %v6555_v51 = vld [vmem:[%s8746_s3 + $0x760] ss:$16 sps:$4 sm:$0xff]  }
 0x3d7   :  { %4044 = vmatprep.subr.bf16.mxu1 %v6500_v12  ;;  %v6560_v12 = vld [vmem:[%s8746_s3 + $0x784] ss:$16 sps:$4 sm:$0xff]  }
 0x3da   :  { %4045 = vmatpush1.bf16.msra.mxu1 %v6498_v2  ;;  %v6558_v2 = vld [vmem:[%s8746_s3 + $0x780] ss:$16 sps:$4 sm:$0xff]  }
 0x3db   :  { %4046 = vmatprep.subr.bf16.mxu1 %v6503_v39  ;;  %v6563_v39 = vld [vmem:[%s8746_s3 + $0x7a4] ss:$16 sps:$4 sm:$0xff]  }
 0x3de   :  { %4047 = vmatpush1.bf16.msra.mxu1 %v6501_v10  ;;  %v6561_v10 = vld [vmem:[%s8746_s3 + $0x7a0] ss:$16 sps:$4 sm:$0xff]  }
 0x3df   :  { %4048 = vmatprep.subr.bf16.mxu1 %v6506_v4  ;;  %v6566_v4 = vld [vmem:[%s8746_s3 + $0x7c4] ss:$16 sps:$4 sm:$0xff]  }
 0x3e2   :  { %4049 = vmatpush1.bf16.msra.mxu1 %v6504_v14  ;;  %v6564_v14 = vld [vmem:[%s8746_s3 + $0x7c0] ss:$16 sps:$4 sm:$0xff]  }
 0x3e3   :  { %4050 = vmatprep.subr.bf16.mxu1 %v6509_v21  ;;  %v6569_v21 = vld [vmem:[%s8746_s3 + $0x7e4] ss:$16 sps:$4 sm:$0xff]  }
 0x3e6   :  { %4051 = vmatpush1.bf16.msra.mxu1 %v6507_v7  ;;  %v6567_v7 = vld [vmem:[%s8746_s3 + $0x7e0] ss:$16 sps:$4 sm:$0xff]  }
 0x3e7   :  { %4052 = vmatprep.subr.bf16.mxu1 %v6512_v60 }
 0x3ea   :  { %4053 = vmatpush1.bf16.msra.mxu1 %v6510_v1 }
 0x3eb   :  { %4054 = vmatprep.subr.bf16.mxu1 %v6515_v50 }
 0x3ee   :  { %4055 = vmatpush1.bf16.msra.mxu1 %v6513_v27 }
 0x3ef   :  { %4056 = vmatprep.subr.bf16.mxu1 %v6518_v15 }
 0x3f2   :  { %4057 = vmatpush1.bf16.msra.mxu1 %v6516_v25 }
 0x3f3   :  { %4058 = vmatprep.subr.bf16.mxu1 %v6521_v48  ;;  %v6580_v48 = vld [vmem:[%s8748_s5 + $0xe8] sm:$0xff]  }
 0x3f6   :  { %4059 = vmatpush1.bf16.msra.mxu1 %v6519_v34  ;;  %v6581_v34 = vld [vmem:[%s8748_s5 + $0xa8] sm:$0xff]  }
 0x3f7   :  { %4468 = vmatprep.subr.bf16.mxu1 %v6524_v6  ;;  %v6586_v6 = vld [vmem:[%s8748_s5 + $0x40] sm:$0xff]  }
 0x3f9   :  { %4061 = vmatmul.mubr.bf16.vlgmr.msra.gmra.mrb[20].mxu1 %v8414_v3  ;;  %v6572_v3 = vld [vmem:[%s8748_s5 + $0xc8] sm:$0xff]  }
 0x3fa   :  { %4469 = vmatpush1.bf16.msra.mxu1 %v6522_v20  ;;  %4500 = vmatprep.mubr.bf16.mxu1 %v7981_v0  ;;  %v6531_v0 = vld [vmem:[%s8746_s3 + $0x660] ss:$16 sps:$4 sm:$0xff]  }
 0x3fb   :  { %4470 = vmatprep.subr.bf16.mxu1 %v6527_v36  ;;  %v6587_v20 = vld [vmem:[%s8748_s5] sm:$0xff]   ;;  %v6588_v36 = vld [vmem:[%s8748_s5 + $0x48] sm:$0xff]  }
 0x3fe   :  { %4471 = vmatpush1.bf16.msra.mxu1 %v6525_v41  ;;  %v6585_v41 = vld [vmem:[%s8748_s5 + $0xb8] sm:$0xff]  }
 0x3ff   :  { %4472 = vmatprep.subr.bf16.mxu1 %v6530_v52  ;;  %v6589_v52 = vld [vmem:[%s8748_s5 + $0x8] sm:$0xff]  }
 0x402   :  { %4473 = vmatpush1.bf16.msra.mxu1 %v6528_v56  ;;  %v6590_v56 = vld [vmem:[%s8748_s5 + $0x50] sm:$0xff]  }
 0x403   :  { %4474 = vmatprep.subr.bf16.mxu1 %v6533_v38  ;;  %v6591_v38 = vld [vmem:[%s8748_s5 + $0x10] sm:$0xff]  }
 0x406   :  { %4475 = vmatpush1.bf16.msra.mxu1 %v6531_v0  ;;  %v6592_v0 = vld [vmem:[%s8748_s5 + $0x58] sm:$0xff]  }
 0x407   :  { %4476 = vmatprep.subr.bf16.mxu1 %v6536_v29  ;;  %v6593_v29 = vld [vmem:[%s8748_s5 + $0x18] sm:$0xff]  }
 0x40a   :  { %4477 = vmatpush1.bf16.msra.mxu1 %v6534_v32  ;;  %v6594_v32 = vld [vmem:[%s8748_s5 + $0x60] sm:$0xff]  }
 0x40b   :  { %4478 = vmatprep.subr.bf16.mxu1 %v6539_v44  ;;  %v6595_v44 = vld [vmem:[%s8748_s5 + $0x20] sm:$0xff]  }
 0x40c   :  { %v3538_v18 = vpop.f32.mrb[8].mxu1 }
 0x40d   :  { %v8554_v17 = vadd.f32 %v3538_v18, %v8341_v62  ;;  %v3540_v16 = vpop.f32.mrb[9].mxu1  ;;  %v6570_v62 = vld [vmem:[%s8748_s5 + $0xc0] sm:$0xff]  }
 0x40e   :  { %v8557_v42 = vadd.f32 %v3540_v16, %v8343_v8  ;;  %v3542_v35 = vpop.f32.mrb[10].mxu1  ;;  %4479 = vmatpush1.bf16.msra.mxu1 %v6537_v45  ;;  %v6571_v8 = vld [vmem:[%s8748_s5 + $0x80] sm:$0xff]   ;;  %5754 = vmatprep.subr.bf16.mxu0 %v6570_v62  ;;  %v6596_v45 = vld [vmem:[%s8748_s5 + $0x68] sm:$0xff]   ;;  %v6598_v62 = vld [vmem:[%s8748_s5 + $0x70] sm:$0xff]  }
 0x40f   :  { %v3543_v53 = vpop.f32.mrb[11].mxu1  ;;  %4480 = vmatprep.subr.bf16.mxu1 %v6542_v22  ;;  %5755 = vmatpush3.bf16.msra.mxu0 %v6571_v8  ;;  %v6599_v8 = vld [vmem:[%s8748_s5 + $0x30] sm:$0xff]  }
 0x410   :  { %5756 = vmatprep.subr.bf16.mxu0 %v6572_v3  ;;  %v6597_v53 = vld [vmem:[%s8748_s5 + $0x28] sm:$0xff]   ;;  %v4566_v3 = vsub.s32 2, %v7740_v57 }
 0x412   :  { %4481 = vmatpush1.bf16.msra.mxu1 %v6540_v26 }
 0x413   :  { %4482 = vmatprep.subr.bf16.mxu1 %v6545_v59  ;;  %5757 = vmatpush3.bf16.msra.mxu0 %v6573_v28  ;;  %v4570_v28 = vsub.s32 3, %v7740_v57 }
 0x414   :  { %5758 = vmatprep.subr.bf16.mxu0 %v6574_v11 }
 0x416   :  { %4483 = vmatpush1.bf16.msra.mxu1 %v6543_v58  ;;  %v4554_v58 = vld [vmem:[%s8747_s4] sm:$0xf] }
 0x417   :  { %4484 = vmatprep.subr.bf16.mxu1 %v6548_v19  ;;  %5759 = vmatpush3.bf16.msra.mxu0 %v6575_v54 }
 0x418   :  { %5760 = vmatprep.subr.bf16.mxu0 %v6576_v13  ;;  %v4571_v13 = vrot.slane %v4554_v58, %v4570_v28 }
 0x41a   :  { %4485 = vmatpush1.bf16.msra.mxu1 %v6546_v55  ;;  %v4567_v55 = vrot.slane %v4554_v58, %v4566_v3 }
 0x41b   :  { %4486 = vmatprep.subr.bf16.mxu1 %v6551_v23  ;;  %5761 = vmatpush3.bf16.msra.mxu0 %v6577_v24 }
 0x41c   :  { %5762 = vmatprep.subr.bf16.mxu0 %v6578_v37 }
 0x41e   :  { %4487 = vmatpush1.bf16.msra.mxu1 %v6549_v47 }
 0x41f   :  { %4488 = vmatprep.subr.bf16.mxu1 %v6554_v61  ;;  %5763 = vmatpush3.bf16.msra.mxu0 %v6579_v9 }
 0x420   :  { %5764 = vmatprep.subr.bf16.mxu0 %v6580_v48 }
 0x422   :  { %4489 = vmatpush1.bf16.msra.mxu1 %v6552_v30 }
 0x423   :  { %4490 = vmatprep.subr.bf16.mxu1 %v6557_v43  ;;  %5765 = vmatpush3.bf16.msra.mxu0 %v6581_v34 }
 0x426   :  { %4491 = vmatpush1.bf16.msra.mxu1 %v6555_v51 }
 0x427   :  { %4492 = vmatprep.subr.bf16.mxu1 %v6560_v12 }
 0x42a   :  { %4493 = vmatpush1.bf16.msra.mxu1 %v6558_v2 }
 0x42b   :  { %4494 = vmatprep.subr.bf16.mxu1 %v6563_v39  ;;  %v4559_v39 = vrot.slane %v4554_v58, %v2267_v40 }
 0x42e   :  { %4495 = vmatpush1.bf16.msra.mxu1 %v6561_v10 }
 0x42f   :  { %4496 = vmatprep.subr.bf16.mxu1 %v6566_v4  ;;  %v4563_v4 = vrot.slane %v4554_v58, %v2271_v31  ;;  %v5699_v31 = vld [vmem:[%s8749_s6] ss:$0 sm:$0xff] }
 0x432   :  { %4497 = vmatpush1.bf16.msra.mxu1 %v6564_v14 }
 0x433   :  { %4498 = vmatprep.subr.bf16.mxu1 %v6569_v21 }
 0x436   :  { %4499 = vmatpush1.bf16.msra.mxu1 %v6567_v7 }
 0x437   :  { %5732 = vmatprep.subr.bf16.mxu1 %v6586_v6 }
 0x439   :  { %4501 = vmatmul.mubr.bf16.vlgmr.msra.gmra.mrb[24].mxu1 %v7953_v46  ;;  %v6582_v46 = vld [vmem:[%s8748_s5 + $0xf0] sm:$0xff]  }
 0x43a   :  { %5766 = vmatprep.subr.bf16.mxu0 %v6582_v46  ;;  %5733 = vmatpush3.bf16.msra.mxu1 %v6587_v20 }
 0x43b   :  { %5734 = vmatprep.subr.bf16.mxu1 %v6588_v36 }
 0x43e   :  { %5735 = vmatpush3.bf16.msra.mxu1 %v6589_v52 }
 0x43f   :  { %5736 = vmatprep.subr.bf16.mxu1 %v6590_v56 }
 0x442   :  { %5737 = vmatpush3.bf16.msra.mxu1 %v6591_v38 }
 0x443   :  { %5738 = vmatprep.subr.bf16.mxu1 %v6592_v0 }
 0x446   :  { %5739 = vmatpush3.bf16.msra.mxu1 %v6593_v29 }
 0x447   :  { %5740 = vmatprep.subr.bf16.mxu1 %v6594_v32 }
 0x44a   :  { %5741 = vmatpush3.bf16.msra.mxu1 %v6595_v44 }
 0x44b   :  { %5742 = vmatprep.subr.bf16.mxu1 %v6596_v45 }
 0x44c   :  { %v3579_v60 = vpop.f32.mrb[12].mxu1 }
 0x44d   :  { %v3580_v1 = vadd.f32 %v3579_v60, %v8451_v5  ;;  %v3581_v50 = vpop.f32.mrb[13].mxu1  ;;  %v6583_v5 = vld [vmem:[%s8748_s5 + $0xb0] sm:$0xff]  }
 0x44e   :  { %v3582_v27 = vadd.f32 %v3581_v50, %v8453_v33  ;;  %v3583_v15 = vpop.f32.mrb[14].mxu1  ;;  %v6584_v33 = vld [vmem:[%s8748_s5 + $0xf8] sm:$0xff]   ;;  %5767 = vmatpush3.bf16.msra.mxu0 %v6583_v5  ;;  %5743 = vmatpush3.bf16.msra.mxu1 %v6597_v53 }
 0x44f   :  { %v3584_v25 = vpop.f32.mrb[15].mxu1  ;;  %5768 = vmatprep.subr.bf16.mxu0 %v6584_v33  ;;  %5744 = vmatprep.subr.bf16.mxu1 %v6598_v62 }
 0x452   :  { %5769 = vmatpush3.bf16.msra.mxu0 %v6585_v41  ;;  %5745 = vmatpush3.bf16.msra.mxu1 %v6599_v8 }
 0x48c   :  { %v4021_v22 = vpop.f32.mrb[16].mxu1 }
 0x48d   :  { %v4069_v18 = vadd.f32 %v4021_v22, %v8554_v17  ;;  %v4023_v16 = vpop.f32.mrb[17].mxu1  ;;  %v6600_v17 = vld [vmem:[%s8748_s5 + $0x78] sm:$0xff]  }
 0x48e   :  { %v4070_v35 = vadd.f32 %v4023_v16, %v8557_v42  ;;  %v4025_v26 = vpop.f32.mrb[18].mxu1  ;;  %v6601_v42 = vld [vmem:[%s8748_s5 + $0x38] sm:$0xff]   ;;  %5746 = vmatprep.subr.bf16.mxu1 %v6600_v17 }
 0x48f   :  { %v4026_v59 = vpop.f32.mrb[19].mxu1  ;;  %5747 = vmatpush3.bf16.msra.mxu1 %v6601_v42 }
 0x4cc   :  { %v4062_v19 = vpop.f32.mrb[20].mxu1 }
 0x4cd   :  { %v4071_v11 = vadd.f32 %v4062_v19, %v3580_v1  ;;  %v4064_v54 = vpop.f32.mrb[21].mxu1 }
 0x4ce   :  { %v4072_v23 = vadd.f32 %v4064_v54, %v3582_v27  ;;  %v4066_v47 = vpop.f32.mrb[22].mxu1 }
 0x4cf   :  { %v4552_v24 = vadd.f32 %v8351_v63, %v4071_v11  ;;  %v4067_v61 = vpop.f32.mrb[23].mxu1 }
 0x4d0   :  { %v4553_v37 = vadd.f32 %v8353_v49, %v4072_v23 }
 0x4d1   :  { %v4578_v30 = vadd.f32 %v4567_v55, %v4552_v24 }
 0x4d2   :  { %v4579_v9 = vadd.f32 %v4571_v13, %v4553_v37 }
 0x4d3   :  { %v4582_v43 = vmax.f32 %v4578_v30, 0.0 }
 0x4d4   :  { %v4583_v51 = vmax.f32 %v4579_v9, 0.0 }
 0x4d5   :  { %v4586_v2 = vpack.c.bf16 %v4582_v43, %v4582_v43 }
 0x4d6   :  { %v4587_v12 = vpack.c.bf16 %v4583_v51, %v4583_v51 }
 0x4d8   :  { %4923 = vmatprep.mubr.bf16.mxu0 %v4587_v12 }
 0x4d9   :  { %4924 = vmatmul.mubr.bf16.vlgmr.msra.gmra.mrb[60].mxu0 %v4586_v2 }
 0x50c   :  { %v4502_v10 = vpop.f32.mrb[24].mxu1 }
 0x50d   :  { %v4550_v14 = vadd.f32 %v4502_v10, %v4069_v18  ;;  %v4504_v63 = vpop.f32.mrb[25].mxu1 }
 0x50e   :  { %v4551_v21 = vadd.f32 %v4504_v63, %v4070_v35  ;;  %v4506_v7 = vpop.f32.mrb[26].mxu1 }
 0x50f   :  { %v4576_v49 = vadd.f32 %v4559_v39, %v4550_v14  ;;  %v4507_v60 = vpop.f32.mrb[27].mxu1 }
 0x510   :  { %v4577_v1 = vadd.f32 %v4563_v4, %v4551_v21 }
 0x511   :  { %v4580_v50 = vmax.f32 %v4576_v49, 0.0 }
 0x512   :  { %v4581_v27 = vmax.f32 %v4577_v1, 0.0 }
 0x513   :  { %v4584_v25 = vpack.c.bf16 %v4580_v50, %v4580_v50 }
 0x514   :  { %v4585_v15 = vpack.c.bf16 %v4581_v27, %v4581_v27 }
 0x516   :  { %4883 = vmatprep.mubr.bf16.mxu1 %v4585_v15 }
 0x517   :  { %4884 = vmatmul.mubr.bf16.vlgmr.msra.gmra.mrb[28].mxu1 %v4584_v25 }
 0x5ac   :  { %v5770_v48 = vpop.f32.mrb[60].mxu0 }
 0x5ad   :  { %v5771_v34 = vpop.f32.mrb[61].mxu0 }
 0x5ae   :  { %v5772_v40 = vadd.f32 %v5771_v34, %v5770_v48  ;;  %v5773_v46 = vpop.f32.mrb[62].mxu0 }
 0x5af   :  { %v5774_v5 = vpop.f32.mrb[63].mxu0 }
 0x5ea   :  { %v5748_v57 = vpop.f32.mrb[28].mxu1 }
 0x5eb   :  { %v5749_v33 = vpop.f32.mrb[29].mxu1 }
 0x5ec   :  { %v5750_v6 = vadd.f32 %v5749_v33, %v5748_v57  ;;  %v5751_v20 = vpop.f32.mrb[30].mxu1 }
 0x5ed   :  { %v5752_v36 = vpop.f32.mrb[31].mxu1 }
 0x5ee   :  { %v4886_v41 = vadd.f32 %v5750_v6, %v5699_v31 }
 0x5f0   :  { %v4926_v52 = vadd.f32 %v5772_v40, %v4886_v41 }
 0x5f2   :  { %4932 = vst.msk [vmem:[#allocation2] sm:$0x3] %vm4931_vm7, %v4926_v52 }
 0x5f3   :  { %6624 = shalt.err (!%p6621_p4)
}
 0x5f4   :  { %s6625_s19 = scalar_lea.hbm %s8750_s7, 32 }
 0x5f5   :  { %p6626_p5 = scmp.ne.s32.totalorder %s8750_s7, %s6625_s19  ;;  %p6629_p6 = scmp.lt.u32.totalorder %s6625_s19, %s8750_s7 }
 0x5f7   :  { %p6631_p7 = pnand %p6629_p6, %p6626_p5 }
 0x5f9   :  { %6634 = shalt.err (!%p6631_p7)
}
 0x5fa   :  { %4942 = dma.vmem_to_hbm [thread:$0]  %s4940_s16, 32, %s8750_s7, [#allocation3]  }
 0x5fb   :  { %6635 = dma.done.wait [#allocation3], 32  }
 0x5fc   :  { %6636 = vsyncadd [#allocation3], 4294967264 }
 0x5fd   :  { %4946 = vsyncpa [#allocation3], 1 }

// kernel: model_forward.3
= control target key start
LH: loop header
LB: loop body
LE: loop exit
PB: predicated region body
PF: predicated region fallthrough
CT: control target
= control target key end

     0   :  { %s14369_s15 = smov 0   ;;  %s16108_s0 = inlined_call_operand.vmem [shape: bf16[2240,21], index: 0, kind: input, shape index: {}]   ;;  %s16109_s1 = inlined_call_operand.vmem [shape: bf16[2240,21], index: 1, kind: input, shape index: {}]   ;;  %s16110_s2 = inlined_call_operand.vmem [shape: bf16[7,21,64], index: 2, kind: input, shape index: {}]   ;;  %s16111_s3 = inlined_call_operand.vmem [shape: f32[1,64], index: 3, kind: input, shape index: {}]   ;;  %s16112_s4 = inlined_call_operand.vmem [shape: bf16[528,64], index: 4, kind: output, shape index: {}]  }
   0x1 LB: > { %s10697_s16 = sadd.s32 4294967295, %s14340_s15   ;;  %p10701_p0 = scmp.ge.s32.totalorder %s14340_s15, 1  ;;  %s14340_s15 = sphi %s14369_s15, %s14_s15  }
   0x2   : > { %p174_p1 = scmp.lt.s32.totalorder %s14340_s15, 3 }
   0x4   : > { %p175_p2 = pnand %p10701_p0, %p174_p1 }
   0x6   : > { %178 = sbr.rel (%p175_p2) target bundleno = 1153 (0x481), region = 36 }
   0xd   : > { %v13868_v0 = vld [vmem:[%s16110_s2 + $0xc] sm:$0xff]   ;;  %vm1009_vm0 = vcmask 1041408   ;;  %v13869_v1 = vld [vmem:[%s16110_s2 + $0x24] sm:$0xff]   ;;  %vm1010_vm1 = vcmask 1042432   ;;  %v14342_v3 = vmov 65535   ;;  %s205_s25 = smul.u32 140, %s10697_s16 }
   0xe   : > { %12162 = vmatprep.subr.bf16.mxu1 %v13868_v0  ;;  %v13870_v2 = vld [vmem:[%s16110_s2 + $0x14] ss:$0 sps:$4 sm:$0x77]   ;;  %12558 = vmatprep.subr.bf16.mxu0 %v13869_v1  ;;  %v1011_v4 = vsel %vm1009_vm0, 4294967295, %v14342_v3  ;;  %v13873_v7 = vld [vmem:[%s16110_s2] sm:$0xff]   ;;  %vm816_vm2 = vcmask 171008  }
   0xf   : > { %12163 = vmatpush3.bf16.msra.mxu1 %v13868_v0  ;;  %v13871_v5 = vld [vmem:[%s16110_s2 + $0x2c] ss:$0 sps:$4 sm:$0x77]   ;;  %12559 = vmatpush3.bf16.msra.mxu0 %v13869_v1  ;;  %v14389_v6 = vsel %vm1010_vm1, %v1011_v4, 0  ;;  %p206_p3 = scmp.lt.s32.totalorder %s205_s25, 279  ;;  %v13875_v10 = vld [vmem:[%s16110_s2 + $0x30] sm:$0xff]  }
  0x10   : > { %v1014_v8 = vand.u32 %v13870_v2, %v14389_v6  ;;  %v14398_v9 = vand.u32 %v13871_v5, %v14389_v6  ;;  %v13908_v11 = vld [vmem:[%s16110_s2 + $0x38] ss:$0 sps:$4 sm:$0x77]   ;;  %v13940_v12 = vld [vmem:[%s16110_s2 + $0x8] ss:$0 sps:$4 sm:$0x77]  }
  0x11   : > { %s16158_s25 = smov (!%p206_p3, %s205_s25), 279  ;;  %v5942_v17 = vand.u32 %v13908_v11, %v14389_v6  ;;  %v2083_v19 = vand.u32 %v13940_v12, %v14389_v6  ;;  %v14437_v21 = vld [vmem:[%s16110_s2 + $0x3c] sm:$0xff]   ;;  %vm9666_vm3 = vcmask 1046528   ;;  %vm10178_vm4 = vcmask 523264   ;;  %s15515_s9 = smul.u32 33, %s10697_s16 }
  0x12   : > { %12164 = vmatprep.subr.bf16.mxu1 %v1014_v8  ;;  %12560 = vmatprep.subr.bf16.mxu0 %v14398_v9  ;;  %s10702_s6 = sshll.u32 %s16158_s25, 2  ;;  %vm10325_vm5 = vcmask 519168   ;;  %vm10306_vm6 = vcmask 522240  }
  0x13   : > { %12165 = vmatpush3.bf16.msra.mxu1 %v1014_v8  ;;  %12561 = vmatpush3.bf16.msra.mxu0 %v14398_v9  ;;  %s14419_s11 = scalar_lea.vmem %s16109_s1, %s10702_s6  ;;  %s14503_s18 = scalar_lea.vmem %s16108_s0, %s10702_s6 }
  0x14   : > { %12294 = vmatprep.subr.bf16.mxu1 %v13873_v7  ;;  %12690 = vmatprep.subr.bf16.mxu0 %v13875_v10  ;;  %v13872_v13 = vld [vmem:[%s14419_s11] sm:$0xff]   ;;  %v13874_v14 = vld [vmem:[%s14419_s11 + $0x10] sm:$0xff]   ;;  %v13876_v15 = vld [vmem:[%s14419_s11 + $0x8] sm:$0xff]   ;;  %p218_p4 = scmp.lt.s32.totalorder %s15515_s9, 65 }
  0x15   : > { %12166 = vmatprep.mubr.msk.bf16.mxu1 %vm816_vm2, %v13872_v13  ;;  %12562 = vmatprep.mubr.msk.bf16.mxu0 %vm816_vm2, %v13874_v14  ;;  %v13877_v16 = vld [vmem:[%s14419_s11 + $0x18] sm:$0xff]   ;;  %v13878_v18 = vld [vmem:[%s14419_s11 + $0x10] sm:$0xff]   ;;  %v13879_v20 = vld [vmem:[%s14419_s11 + $0x20] sm:$0xff]  }
  0x16   : > { %12167 = vmatmul.mubr.msk.bf16.vlgmr.msra.gmra.mrb[0].mxu1 %vm816_vm2, %v13876_v15  ;;  %12563 = vmatmul.mubr.msk.bf16.vlgmr.msra.gmra.mrb[0].mxu0 %vm816_vm2, %v13877_v16  ;;  %v13880_v22 = vld [vmem:[%s14419_s11 + $0x18] sm:$0xff]   ;;  %v13881_v23 = vld [vmem:[%s14419_s11 + $0x28] sm:$0xff]   ;;  %v13882_v24 = vld [vmem:[%s14419_s11 + $0x20] sm:$0xff]   ;;  %s16160_s9 = smov (!%p218_p4, %s15515_s9), 65 }
  0x17   : > { %12295 = vmatpush3.bf16.msra.mxu1 %v13873_v7  ;;  %12691 = vmatpush3.bf16.msra.mxu0 %v13875_v10  ;;  %v13883_v25 = vld [vmem:[%s14419_s11 + $0x30] sm:$0xff]   ;;  %v13884_v26 = vld [vmem:[%s14419_s11 + $0x28] sm:$0xff]   ;;  %v13885_v27 = vld [vmem:[%s14419_s11 + $0x38] sm:$0xff]   ;;  %s10704_s16 = sshll.u32 %s16160_s9, 2 }
  0x18   : > { %12170 = vmatprep.mubr.msk.bf16.mxu1 %vm816_vm2, %v13878_v18  ;;  %12566 = vmatprep.mubr.msk.bf16.mxu0 %vm816_vm2, %v13879_v20  ;;  %v13886_v28 = vld [vmem:[%s14419_s11 + $0x30] sm:$0xff]   ;;  %v13887_v29 = vld [vmem:[%s14419_s11 + $0x40] sm:$0xff]   ;;  %v13888_v30 = vld [vmem:[%s14419_s11 + $0x38] sm:$0xff]   ;;  %s15578_s13 = scalar_lea.vmem %s16112_s4, %s10704_s16 }
  0x19   : > { %12692 = vmatprep.subr.bf16.mxu0 %v5942_v17  ;;  %12296 = vmatprep.subr.bf16.mxu1 %v2083_v19  ;;  %v13889_v31 = vld [vmem:[%s14419_s11 + $0x48] sm:$0xff]   ;;  %v13890_v32 = vld [vmem:[%s14419_s11 + $0x40] sm:$0xff]   ;;  %v13891_v33 = vld [vmem:[%s14419_s11 + $0x50] sm:$0xff]  }
  0x1a   : > { %v13892_v34 = vld [vmem:[%s14419_s11 + $0x48] sm:$0xff]   ;;  %v13893_v35 = vld [vmem:[%s14419_s11 + $0x58] sm:$0xff]   ;;  %v13894_v36 = vld [vmem:[%s14419_s11 + $0x50] sm:$0xff]  }
  0x1b   : > { %12297 = vmatpush3.bf16.msra.mxu1 %v2083_v19  ;;  %12693 = vmatpush3.bf16.msra.mxu0 %v5942_v17  ;;  %v13895_v37 = vld [vmem:[%s14419_s11 + $0x60] sm:$0xff]   ;;  %v13896_v38 = vld [vmem:[%s14419_s11 + $0x58] sm:$0xff]   ;;  %v13897_v39 = vld [vmem:[%s14419_s11 + $0x68] sm:$0xff]  }
  0x1c   : > { %12822 = vmatprep.subr.bf16.mxu0 %v14437_v21  ;;  %v13898_v40 = vld [vmem:[%s14419_s11 + $0x60] sm:$0xff]   ;;  %v13899_v41 = vld [vmem:[%s14419_s11 + $0x70] sm:$0xff]   ;;  %v13900_v42 = vld [vmem:[%s14419_s11 + $0x68] sm:$0xff]  }
  0x1d   : > { %v13901_v43 = vld [vmem:[%s14419_s11 + $0x78] sm:$0xff]   ;;  %v13902_v44 = vld [vmem:[%s14419_s11 + $0x70] sm:$0xff]   ;;  %v13903_v45 = vld [vmem:[%s14419_s11 + $0x80] sm:$0xff]  }
  0x1e   : > { %12171 = vmatmul.mubr.msk.bf16.gmra.mrb[4].mxu1 %vm816_vm2, %v13880_v22  ;;  %12567 = vmatmul.mubr.msk.bf16.gmra.mrb[4].mxu0 %vm816_vm2, %v13881_v23  ;;  %v13904_v46 = vld [vmem:[%s14419_s11 + $0x78] sm:$0xff]   ;;  %v13905_v47 = vld [vmem:[%s14419_s11 + $0x88] sm:$0xff]   ;;  %v13906_v48 = vld [vmem:[%s14419_s11 + $0x80] sm:$0xff]  }
  0x1f   : > { %12174 = vmatprep.mubr.msk.bf16.mxu1 %vm816_vm2, %v13882_v24  ;;  %12570 = vmatprep.mubr.msk.bf16.mxu0 %vm816_vm2, %v13883_v25  ;;  %v13907_v49 = vld [vmem:[%s14419_s11 + $0x90] sm:$0xff]   ;;  %v13909_v50 = vld [vmem:[%s14419_s11 + $0x88] sm:$0xff]   ;;  %v13910_v51 = vld [vmem:[%s14419_s11 + $0x98] sm:$0xff]  }
  0x20   : > { %v13911_v52 = vld [vmem:[%s14419_s11 + $0x90] sm:$0xff]   ;;  %v13912_v53 = vld [vmem:[%s14419_s11 + $0xa0] sm:$0xff]   ;;  %v13913_v54 = vld [vmem:[%s14419_s11 + $0x98] sm:$0xff]  }
  0x21   : > { %v13914_v55 = vld [vmem:[%s14419_s11 + $0xa8] sm:$0xff]   ;;  %v13915_v56 = vld [vmem:[%s14419_s11 + $0xa0] sm:$0xff]   ;;  %v13916_v57 = vld [vmem:[%s14419_s11 + $0xb0] sm:$0xff]  }
  0x22   : > { %v13917_v58 = vld [vmem:[%s14419_s11 + $0xa8] sm:$0xff]   ;;  %v13918_v59 = vld [vmem:[%s14419_s11 + $0xb8] sm:$0xff]   ;;  %v13919_v60 = vld [vmem:[%s14419_s11 + $0xb0] sm:$0xff]  }
  0x23   : > { %v13920_v61 = vld [vmem:[%s14419_s11 + $0xc0] sm:$0xff]   ;;  %v13921_v62 = vld [vmem:[%s14419_s11 + $0xb8] sm:$0xff]   ;;  %v13922_v63 = vld [vmem:[%s14419_s11 + $0xc8] sm:$0xff]  }
  0x24   : > { %v13923_v0 = vld [vmem:[%s14419_s11 + $0xc0] sm:$0xff]   ;;  %v13924_v1 = vld [vmem:[%s14419_s11 + $0xd0] sm:$0xff]   ;;  %v13925_v2 = vld [vmem:[%s14419_s11 + $0xc8] sm:$0xff]  }
  0x25   : > { %v13926_v3 = vld [vmem:[%s14419_s11 + $0xd8] sm:$0xff]   ;;  %v13927_v4 = vld [vmem:[%s14419_s11 + $0xd0] sm:$0xff]   ;;  %v13928_v5 = vld [vmem:[%s14419_s11 + $0xe0] sm:$0xff]  }
  0x26   : > { %12175 = vmatmul.mubr.msk.bf16.gmra.mrb[8].mxu1 %vm816_vm2, %v13884_v26  ;;  %12571 = vmatmul.mubr.msk.bf16.gmra.mrb[8].mxu0 %vm816_vm2, %v13885_v27  ;;  %v13929_v7 = vld [vmem:[%s14419_s11 + $0xd8] sm:$0xff]   ;;  %v13930_v8 = vld [vmem:[%s14419_s11 + $0xe8] sm:$0xff]   ;;  %v13931_v10 = vld [vmem:[%s14419_s11 + $0xe0] sm:$0xff]  }
  0x27   : > { %12178 = vmatprep.mubr.msk.bf16.mxu1 %vm816_vm2, %v13886_v28  ;;  %12574 = vmatprep.mubr.msk.bf16.mxu0 %vm816_vm2, %v13887_v29  ;;  %v13932_v11 = vld [vmem:[%s14419_s11 + $0xf0] sm:$0xff]   ;;  %v13933_v12 = vld [vmem:[%s14419_s11 + $0xe8] sm:$0xff]   ;;  %v13934_v13 = vld [vmem:[%s14419_s11 + $0xf8] sm:$0xff]  }
  0x28   : > { %v13935_v14 = vld [vmem:[%s14419_s11 + $0xf0] sm:$0xff]   ;;  %v13936_v15 = vld [vmem:[%s14419_s11 + $0x100] sm:$0xff]   ;;  %v13937_v16 = vld [vmem:[%s14419_s11 + $0xf8] sm:$0xff]  }
  0x29   : > { %v13938_v17 = vld [vmem:[%s14419_s11 + $0x108] sm:$0xff]   ;;  %v13939_v18 = vld [vmem:[%s14419_s11 + $0x100] sm:$0xff]   ;;  %v13945_v23 = vld [vmem:[%s14419_s11 + $0x110] sm:$0xff]  }
  0x2a   : > { %v13941_v19 = vld [vmem:[%s14503_s18 + $0x20] sm:$0xff]   ;;  %v13943_v20 = vld [vmem:[%s14419_s11 + $0x108] sm:$0xff]   ;;  %v14574_v24 = vld [vmem:[%s16110_s2 + $0x18] sm:$0xff]  }
  0x2b   : > { %v13944_v22 = vld [vmem:[%s14503_s18 + $0x28] sm:$0xff]   ;;  %v13946_v25 = vld [vmem:[%s14503_s18 + $0x30] sm:$0xff]   ;;  %v14008_v26 = vld [vmem:[%s16110_s2 + $0x44] ss:$0 sps:$4 sm:$0x77]   ;;  %12426 = vmatprep.subr.bf16.mxu1 %v14574_v24 }
  0x2c   : > { %v7271_v27 = vand.u32 %v14008_v26, %v14389_v6  ;;  %v13947_v28 = vld [vmem:[%s14419_s11 + $0x118] sm:$0xff]   ;;  %v14007_v26 = vld [vmem:[%s14503_s18 + $0x120] sm:$0xff]  }
  0x2d   : > { %v13948_v29 = vld [vmem:[%s14503_s18 + $0x38] sm:$0xff]  }
  0x2e   : > { %12179 = vmatmul.mubr.msk.bf16.gmra.mrb[12].mxu1 %vm816_vm2, %v13888_v30  ;;  %12575 = vmatmul.mubr.msk.bf16.gmra.mrb[12].mxu0 %vm816_vm2, %v13889_v31  ;;  %v13949_v30 = vld [vmem:[%s14419_s11 + $0x120] sm:$0xff]  }
  0x2f   : > { %12182 = vmatprep.mubr.msk.bf16.mxu1 %vm816_vm2, %v13890_v32  ;;  %12578 = vmatprep.mubr.msk.bf16.mxu0 %vm816_vm2, %v13891_v33  ;;  %v13950_v31 = vld [vmem:[%s14503_s18 + $0x40] sm:$0xff]   ;;  %v13952_v32 = vld [vmem:[%s14503_s18 + $0x48] sm:$0xff]   ;;  %v13953_v33 = vld [vmem:[%s14419_s11 + $0x130] sm:$0xff]  }
  0x36   : > { %12183 = vmatmul.mubr.msk.bf16.gmra.mrb[16].mxu1 %vm816_vm2, %v13892_v34  ;;  %12579 = vmatmul.mubr.msk.bf16.gmra.mrb[16].mxu0 %vm816_vm2, %v13893_v35  ;;  %v13954_v34 = vld [vmem:[%s14503_s18 + $0x50] sm:$0xff]   ;;  %v13955_v35 = vld [vmem:[%s14419_s11 + $0x138] sm:$0xff]  }
  0x37   : > { %12186 = vmatprep.mubr.msk.bf16.mxu1 %vm816_vm2, %v13894_v36  ;;  %12582 = vmatprep.mubr.msk.bf16.mxu0 %vm816_vm2, %v13895_v37  ;;  %v13956_v36 = vld [vmem:[%s14503_s18 + $0x58] sm:$0xff]   ;;  %v13957_v37 = vld [vmem:[%s14419_s11 + $0x140] sm:$0xff]  }
  0x3e   : > { %12187 = vmatmul.mubr.msk.bf16.gmra.mrb[20].mxu1 %vm816_vm2, %v13896_v38  ;;  %12583 = vmatmul.mubr.msk.bf16.gmra.mrb[20].mxu0 %vm816_vm2, %v13897_v39  ;;  %v13958_v38 = vld [vmem:[%s14503_s18 + $0x60] sm:$0xff]   ;;  %v13959_v39 = vld [vmem:[%s14419_s11 + $0x148] sm:$0xff]  }
  0x3f   : > { %12190 = vmatprep.mubr.msk.bf16.mxu1 %vm816_vm2, %v13898_v40  ;;  %12586 = vmatprep.mubr.msk.bf16.mxu0 %vm816_vm2, %v13899_v41  ;;  %v13960_v40 = vld [vmem:[%s14503_s18 + $0x68] sm:$0xff]   ;;  %v13961_v41 = vld [vmem:[%s14419_s11 + $0x150] sm:$0xff]  }
  0x46   : > { %12191 = vmatmul.mubr.msk.bf16.gmra.mrb[24].mxu1 %vm816_vm2, %v13900_v42  ;;  %12587 = vmatmul.mubr.msk.bf16.gmra.mrb[24].mxu0 %vm816_vm2, %v13901_v43  ;;  %v13962_v42 = vld [vmem:[%s14503_s18 + $0x70] sm:$0xff]   ;;  %v13963_v43 = vld [vmem:[%s14419_s11 + $0x158] sm:$0xff]  }
  0x47   : > { %12194 = vmatprep.mubr.msk.bf16.mxu1 %vm816_vm2, %v13902_v44  ;;  %12590 = vmatprep.mubr.msk.bf16.mxu0 %vm816_vm2, %v13903_v45  ;;  %v13964_v44 = vld [vmem:[%s14503_s18 + $0x78] sm:$0xff]   ;;  %v13965_v45 = vld [vmem:[%s14419_s11 + $0x160] sm:$0xff]  }
  0x4e   : > { %12195 = vmatmul.mubr.msk.bf16.gmra.mrb[28].mxu1 %vm816_vm2, %v13904_v46  ;;  %12591 = vmatmul.mubr.msk.bf16.gmra.mrb[28].mxu0 %vm816_vm2, %v13905_v47  ;;  %v13966_v46 = vld [vmem:[%s14503_s18 + $0x80] sm:$0xff]   ;;  %v13967_v47 = vld [vmem:[%s14419_s11 + $0x168] sm:$0xff]  }
  0x4f   : > { %12198 = vmatprep.mubr.msk.bf16.mxu1 %vm816_vm2, %v13906_v48  ;;  %12594 = vmatprep.mubr.msk.bf16.mxu0 %vm816_vm2, %v13907_v49  ;;  %v13968_v48 = vld [vmem:[%s14503_s18 + $0x88] sm:$0xff]   ;;  %v13969_v49 = vld [vmem:[%s14419_s11 + $0x170] sm:$0xff]  }
  0x56   : > { %12199 = vmatmul.mubr.msk.bf16.gmra.mrb[32].mxu1 %vm816_vm2, %v13909_v50  ;;  %12595 = vmatmul.mubr.msk.bf16.gmra.mrb[32].mxu0 %vm816_vm2, %v13910_v51  ;;  %v13970_v50 = vld [vmem:[%s14503_s18 + $0x90] sm:$0xff]   ;;  %v13971_v51 = vld [vmem:[%s14419_s11 + $0x178] sm:$0xff]  }
  0x57   : > { %12202 = vmatprep.mubr.msk.bf16.mxu1 %vm816_vm2, %v13911_v52  ;;  %12598 = vmatprep.mubr.msk.bf16.mxu0 %vm816_vm2, %v13912_v53  ;;  %v13972_v52 = vld [vmem:[%s14503_s18 + $0x98] sm:$0xff]   ;;  %v13973_v53 = vld [vmem:[%s14419_s11 + $0x180] sm:$0xff]  }
  0x5e   : > { %12203 = vmatmul.mubr.msk.bf16.gmra.mrb[36].mxu1 %vm816_vm2, %v13913_v54  ;;  %12599 = vmatmul.mubr.msk.bf16.gmra.mrb[36].mxu0 %vm816_vm2, %v13914_v55  ;;  %v13974_v54 = vld [vmem:[%s14503_s18 + $0xa0] sm:$0xff]   ;;  %v13975_v55 = vld [vmem:[%s14419_s11 + $0x188] sm:$0xff]  }
  0x5f   : > { %12206 = vmatprep.mubr.msk.bf16.mxu1 %vm816_vm2, %v13915_v56  ;;  %12602 = vmatprep.mubr.msk.bf16.mxu0 %vm816_vm2, %v13916_v57  ;;  %v13976_v56 = vld [vmem:[%s14503_s18 + $0xa8] sm:$0xff]   ;;  %v13977_v57 = vld [vmem:[%s14419_s11 + $0x190] sm:$0xff]  }
  0x66   : > { %12207 = vmatmul.mubr.msk.bf16.gmra.mrb[40].mxu1 %vm816_vm2, %v13917_v58  ;;  %12603 = vmatmul.mubr.msk.bf16.gmra.mrb[40].mxu0 %vm816_vm2, %v13918_v59  ;;  %v13978_v58 = vld [vmem:[%s14503_s18 + $0xb0] sm:$0xff]   ;;  %v13979_v59 = vld [vmem:[%s14419_s11 + $0x198] sm:$0xff]  }
  0x67   : > { %12210 = vmatprep.mubr.msk.bf16.mxu1 %vm816_vm2, %v13919_v60  ;;  %12606 = vmatprep.mubr.msk.bf16.mxu0 %vm816_vm2, %v13920_v61  ;;  %v13980_v60 = vld [vmem:[%s14503_s18 + $0xb8] sm:$0xff]   ;;  %v13981_v61 = vld [vmem:[%s14419_s11 + $0x1a0] sm:$0xff]  }
  0x6e   : > { %12211 = vmatmul.mubr.msk.bf16.gmra.mrb[44].mxu1 %vm816_vm2, %v13921_v62  ;;  %12607 = vmatmul.mubr.msk.bf16.gmra.mrb[44].mxu0 %vm816_vm2, %v13922_v63  ;;  %v13982_v62 = vld [vmem:[%s14503_s18 + $0xc0] sm:$0xff]   ;;  %v13983_v63 = vld [vmem:[%s14419_s11 + $0x1a8] sm:$0xff]  }
  0x6f   : > { %12214 = vmatprep.mubr.msk.bf16.mxu1 %vm816_vm2, %v13923_v0  ;;  %12610 = vmatprep.mubr.msk.bf16.mxu0 %vm816_vm2, %v13924_v1  ;;  %v13984_v0 = vld [vmem:[%s14503_s18 + $0xc8] sm:$0xff]   ;;  %v13985_v1 = vld [vmem:[%s14419_s11 + $0x1b0] sm:$0xff]  }
  0x76   : > { %12215 = vmatmul.mubr.msk.bf16.gmra.mrb[48].mxu1 %vm816_vm2, %v13925_v2  ;;  %12611 = vmatmul.mubr.msk.bf16.gmra.mrb[48].mxu0 %vm816_vm2, %v13926_v3  ;;  %v13986_v2 = vld [vmem:[%s14503_s18 + $0xd0] sm:$0xff]   ;;  %v13987_v3 = vld [vmem:[%s14419_s11 + $0x1b8] sm:$0xff]  }
  0x77   : > { %12218 = vmatprep.mubr.msk.bf16.mxu1 %vm816_vm2, %v13927_v4  ;;  %12614 = vmatprep.mubr.msk.bf16.mxu0 %vm816_vm2, %v13928_v5  ;;  %v13988_v4 = vld [vmem:[%s14503_s18 + $0xd8] sm:$0xff]   ;;  %v13989_v5 = vld [vmem:[%s14419_s11 + $0x1c0] sm:$0xff]  }
  0x7e   : > { %12219 = vmatmul.mubr.msk.bf16.gmra.mrb[52].mxu1 %vm816_vm2, %v13929_v7  ;;  %12615 = vmatmul.mubr.msk.bf16.gmra.mrb[52].mxu0 %vm816_vm2, %v13930_v8  ;;  %v13990_v7 = vld [vmem:[%s14503_s18 + $0xe0] sm:$0xff]   ;;  %v13991_v8 = vld [vmem:[%s14419_s11 + $0x1c8] sm:$0xff]  }
  0x7f   : > { %12222 = vmatprep.mubr.msk.bf16.mxu1 %vm816_vm2, %v13931_v10  ;;  %12618 = vmatprep.mubr.msk.bf16.mxu0 %vm816_vm2, %v13932_v11  ;;  %v13992_v10 = vld [vmem:[%s14503_s18 + $0xe8] sm:$0xff]   ;;  %v13993_v11 = vld [vmem:[%s14419_s11 + $0x1d0] sm:$0xff]  }
  0x86   : > { %12223 = vmatmul.mubr.msk.bf16.gmra.mrb[56].mxu1 %vm816_vm2, %v13933_v12  ;;  %12619 = vmatmul.mubr.msk.bf16.gmra.mrb[56].mxu0 %vm816_vm2, %v13934_v13  ;;  %v13994_v12 = vld [vmem:[%s14503_s18 + $0xf0] sm:$0xff]   ;;  %v13995_v13 = vld [vmem:[%s14419_s11 + $0x1d8] sm:$0xff]  }
  0x87   : > { %12226 = vmatprep.mubr.msk.bf16.mxu1 %vm816_vm2, %v13935_v14  ;;  %12622 = vmatprep.mubr.msk.bf16.mxu0 %vm816_vm2, %v13936_v15  ;;  %v13996_v14 = vld [vmem:[%s14503_s18 + $0xf8] sm:$0xff]   ;;  %v13997_v15 = vld [vmem:[%s14419_s11 + $0x1e0] sm:$0xff]  }
  0x8e   : > { %12227 = vmatmul.mubr.msk.bf16.gmra.mrb[60].mxu1 %vm816_vm2, %v13937_v16  ;;  %12623 = vmatmul.mubr.msk.bf16.gmra.mrb[60].mxu0 %vm816_vm2, %v13938_v17  ;;  %v13998_v16 = vld [vmem:[%s14503_s18 + $0x100] sm:$0xff]   ;;  %v13999_v17 = vld [vmem:[%s14419_s11 + $0x1e8] sm:$0xff]  }
  0x8f   : > { %12230 = vmatprep.mubr.msk.bf16.mxu1 %vm816_vm2, %v13939_v18  ;;  %12694 = vmatprep.mubr.msk.bf16.mxu0 %vm816_vm2, %v13941_v19  ;;  %v14000_v18 = vld [vmem:[%s14503_s18 + $0x108] sm:$0xff]   ;;  %v14001_v19 = vld [vmem:[%s14419_s11 + $0x1f0] sm:$0xff]  }
  0x96   : > { %12231 = vmatmul.mubr.msk.bf16.gmra.mrb[64].mxu1 %vm816_vm2, %v13943_v20  ;;  %12695 = vmatmul.mubr.msk.bf16.vlgmr.msra.gmra.mrb[0].mxu0 %vm816_vm2, %v13944_v22  ;;  %v14002_v20 = vld [vmem:[%s14503_s18 + $0x110] sm:$0xff]   ;;  %v14003_v22 = vld [vmem:[%s14419_s11 + $0x1f8] sm:$0xff]  }
  0x97   : > { %12234 = vmatprep.mubr.msk.bf16.mxu1 %vm816_vm2, %v13945_v23  ;;  %12823 = vmatpush3.bf16.msra.mxu0 %v14437_v21  ;;  %v13951_v21 = vld [vmem:[%s14419_s11 + $0x128] sm:$0xff]   ;;  %v14004_v23 = vld [vmem:[%s14503_s18 + $0x118] sm:$0xff]  }
  0x98   : > { %12698 = vmatprep.mubr.msk.bf16.mxu0 %vm816_vm2, %v13946_v25  ;;  %12824 = vmatprep.subr.bf16.mxu0 %v7271_v27  ;;  %v14005_v25 = vld [vmem:[%s14503_s18] sm:$0xff]  }
  0x9b   : > { %12825 = vmatpush3.bf16.msra.mxu0 %v7271_v27  ;;  %v14009_v27 = vld [vmem:[%s14503_s18 + $0x8] sm:$0xff]  }
  0x9e   : > { %12235 = vmatmul.mubr.msk.bf16.gmra.mrb[68].mxu1 %vm816_vm2, %v13947_v28  ;;  %12699 = vmatmul.mubr.msk.bf16.gmra.mrb[4].mxu0 %vm816_vm2, %v13948_v29  ;;  %v14072_v28 = vld [vmem:[%s16110_s2 + $0x20] ss:$0 sps:$4 sm:$0x77]   ;;  %v14714_v29 = vld [vmem:[%s16110_s2 + $0x48] sm:$0xff]  }
  0x9f   : > { %12238 = vmatprep.mubr.msk.bf16.mxu1 %vm816_vm2, %v13949_v30  ;;  %12702 = vmatprep.mubr.msk.bf16.mxu0 %vm816_vm2, %v13950_v31  ;;  %v14010_v30 = vld [vmem:[%s14503_s18 + $0x128] sm:$0xff]   ;;  %v14011_v31 = vld [vmem:[%s14503_s18 + $0x10] sm:$0xff]  }
  0xa0   : > { %12954 = vmatprep.subr.bf16.mxu0 %v14714_v29 }
  0xa6   : > { %12239 = vmatmul.mubr.msk.bf16.gmra.mrb[72].mxu1 %vm816_vm2, %v13951_v21  ;;  %12703 = vmatmul.mubr.msk.bf16.gmra.mrb[8].mxu0 %vm816_vm2, %v13952_v32  ;;  %v14012_v21 = vld [vmem:[%s14503_s18 + $0x130] sm:$0xff]   ;;  %v3284_v32 = vand.u32 %v14072_v28, %v14389_v6 }
  0xa7   : > { %12242 = vmatprep.mubr.msk.bf16.mxu1 %vm816_vm2, %v13953_v33  ;;  %12706 = vmatprep.mubr.msk.bf16.mxu0 %vm816_vm2, %v13954_v34  ;;  %v14013_v33 = vld [vmem:[%s14503_s18 + $0x18] sm:$0xff]   ;;  %v14068_v28 = vld [vmem:[%s14503_s18 + $0x210] sm:$0xff]  }
  0xa8   : > { %v14014_v34 = vld [vmem:[%s14503_s18 + $0x138] sm:$0xff]  }
  0xae   : > { %12243 = vmatmul.mubr.msk.bf16.gmra.mrb[76].mxu1 %vm816_vm2, %v13955_v35  ;;  %12707 = vmatmul.mubr.msk.bf16.gmra.mrb[12].mxu0 %vm816_vm2, %v13956_v36  ;;  %v14015_v35 = vld [vmem:[%s14503_s18 + $0x20] sm:$0xff]  }
  0xaf   : > { %12246 = vmatprep.mubr.msk.bf16.mxu1 %vm816_vm2, %v13957_v37  ;;  %12710 = vmatprep.mubr.msk.bf16.mxu0 %vm816_vm2, %v13958_v38  ;;  %v14016_v36 = vld [vmem:[%s14503_s18 + $0x140] sm:$0xff]   ;;  %v14017_v37 = vld [vmem:[%s14503_s18 + $0x28] sm:$0xff]  }
  0xb0   : > { %v14018_v38 = vld [vmem:[%s14503_s18 + $0x148] sm:$0xff]  }
  0xb6   : > { %12247 = vmatmul.mubr.msk.bf16.gmra.mrb[80].mxu1 %vm816_vm2, %v13959_v39  ;;  %12711 = vmatmul.mubr.msk.bf16.gmra.mrb[16].mxu0 %vm816_vm2, %v13960_v40  ;;  %v14019_v39 = vld [vmem:[%s14503_s18 + $0x30] sm:$0xff]  }
  0xb7   : > { %12250 = vmatprep.mubr.msk.bf16.mxu1 %vm816_vm2, %v13961_v41  ;;  %12714 = vmatprep.mubr.msk.bf16.mxu0 %vm816_vm2, %v13962_v42  ;;  %v14020_v40 = vld [vmem:[%s14503_s18 + $0x150] sm:$0xff]   ;;  %v14021_v41 = vld [vmem:[%s14503_s18 + $0x38] sm:$0xff]  }
  0xb8   : > { %v14022_v42 = vld [vmem:[%s14503_s18 + $0x158] sm:$0xff]  }
  0xbe   : > { %12251 = vmatmul.mubr.msk.bf16.gmra.mrb[84].mxu1 %vm816_vm2, %v13963_v43  ;;  %12715 = vmatmul.mubr.msk.bf16.gmra.mrb[20].mxu0 %vm816_vm2, %v13964_v44  ;;  %v14023_v43 = vld [vmem:[%s14503_s18 + $0x40] sm:$0xff]  }
  0xbf   : > { %12254 = vmatprep.mubr.msk.bf16.mxu1 %vm816_vm2, %v13965_v45  ;;  %12718 = vmatprep.mubr.msk.bf16.mxu0 %vm816_vm2, %v13966_v46  ;;  %v14024_v44 = vld [vmem:[%s14503_s18 + $0x160] sm:$0xff]   ;;  %v14025_v45 = vld [vmem:[%s14503_s18 + $0x48] sm:$0xff]  }
  0xc0   : > { %v14026_v46 = vld [vmem:[%s14503_s18 + $0x168] sm:$0xff]  }
  0xc6   : > { %12255 = vmatmul.mubr.msk.bf16.gmra.mrb[88].mxu1 %vm816_vm2, %v13967_v47  ;;  %12719 = vmatmul.mubr.msk.bf16.gmra.mrb[24].mxu0 %vm816_vm2, %v13968_v48  ;;  %v14027_v47 = vld [vmem:[%s14503_s18 + $0x50] sm:$0xff]  }
  0xc7   : > { %12258 = vmatprep.mubr.msk.bf16.mxu1 %vm816_vm2, %v13969_v49  ;;  %12722 = vmatprep.mubr.msk.bf16.mxu0 %vm816_vm2, %v13970_v50  ;;  %v14028_v48 = vld [vmem:[%s14503_s18 + $0x170] sm:$0xff]   ;;  %v14029_v49 = vld [vmem:[%s14503_s18 + $0x58] sm:$0xff]  }
  0xc8   : > { %v14030_v50 = vld [vmem:[%s14503_s18 + $0x178] sm:$0xff]  }
  0xce   : > { %12259 = vmatmul.mubr.msk.bf16.gmra.mrb[92].mxu1 %vm816_vm2, %v13971_v51  ;;  %12723 = vmatmul.mubr.msk.bf16.gmra.mrb[28].mxu0 %vm816_vm2, %v13972_v52  ;;  %v14031_v51 = vld [vmem:[%s14503_s18 + $0x60] sm:$0xff]  }
  0xcf   : > { %12262 = vmatprep.mubr.msk.bf16.mxu1 %vm816_vm2, %v13973_v53  ;;  %12726 = vmatprep.mubr.msk.bf16.mxu0 %vm816_vm2, %v13974_v54  ;;  %v14032_v52 = vld [vmem:[%s14503_s18 + $0x180] sm:$0xff]   ;;  %v14033_v53 = vld [vmem:[%s14503_s18 + $0x68] sm:$0xff]  }
  0xd0   : > { %v14034_v54 = vld [vmem:[%s14503_s18 + $0x188] sm:$0xff]  }
  0xd6   : > { %12263 = vmatmul.mubr.msk.bf16.gmra.mrb[96].mxu1 %vm816_vm2, %v13975_v55  ;;  %12727 = vmatmul.mubr.msk.bf16.gmra.mrb[32].mxu0 %vm816_vm2, %v13976_v56  ;;  %v14035_v55 = vld [vmem:[%s14503_s18 + $0x70] sm:$0xff]  }
  0xd7   : > { %12266 = vmatprep.mubr.msk.bf16.mxu1 %vm816_vm2, %v13977_v57  ;;  %12730 = vmatprep.mubr.msk.bf16.mxu0 %vm816_vm2, %v13978_v58  ;;  %v14036_v56 = vld [vmem:[%s14503_s18 + $0x190] sm:$0xff]   ;;  %v14037_v57 = vld [vmem:[%s14503_s18 + $0x78] sm:$0xff]  }
  0xd8   : > { %v14038_v58 = vld [vmem:[%s14503_s18 + $0x198] sm:$0xff]  }
  0xde   : > { %12267 = vmatmul.mubr.msk.bf16.gmra.mrb[100].mxu1 %vm816_vm2, %v13979_v59  ;;  %12731 = vmatmul.mubr.msk.bf16.gmra.mrb[36].mxu0 %vm816_vm2, %v13980_v60  ;;  %v14039_v59 = vld [vmem:[%s14503_s18 + $0x80] sm:$0xff]  }
  0xdf   : > { %12270 = vmatprep.mubr.msk.bf16.mxu1 %vm816_vm2, %v13981_v61  ;;  %12734 = vmatprep.mubr.msk.bf16.mxu0 %vm816_vm2, %v13982_v62  ;;  %v14040_v60 = vld [vmem:[%s14503_s18 + $0x1a0] sm:$0xff]   ;;  %v14041_v61 = vld [vmem:[%s14503_s18 + $0x88] sm:$0xff]  }
  0xe0   : > { %v14042_v62 = vld [vmem:[%s14503_s18 + $0x1a8] sm:$0xff]  }
  0xe6   : > { %12271 = vmatmul.mubr.msk.bf16.gmra.mrb[104].mxu1 %vm816_vm2, %v13983_v63  ;;  %12735 = vmatmul.mubr.msk.bf16.gmra.mrb[40].mxu0 %vm816_vm2, %v13984_v0  ;;  %v14043_v63 = vld [vmem:[%s14503_s18 + $0x90] sm:$0xff]  }
  0xe7   : > { %12274 = vmatprep.mubr.msk.bf16.mxu1 %vm816_vm2, %v13985_v1  ;;  %12738 = vmatprep.mubr.msk.bf16.mxu0 %vm816_vm2, %v13986_v2  ;;  %v14044_v0 = vld [vmem:[%s14503_s18 + $0x1b0] sm:$0xff]   ;;  %v14045_v1 = vld [vmem:[%s14503_s18 + $0x98] sm:$0xff]  }
  0xe8   : > { %v14046_v2 = vld [vmem:[%s14503_s18 + $0x1b8] sm:$0xff]  }
  0xee   : > { %12275 = vmatmul.mubr.msk.bf16.gmra.mrb[108].mxu1 %vm816_vm2, %v13987_v3  ;;  %12739 = vmatmul.mubr.msk.bf16.gmra.mrb[44].mxu0 %vm816_vm2, %v13988_v4  ;;  %v14047_v3 = vld [vmem:[%s14503_s18 + $0xa0] sm:$0xff]  }
  0xef   : > { %12278 = vmatprep.mubr.msk.bf16.mxu1 %vm816_vm2, %v13989_v5  ;;  %12742 = vmatprep.mubr.msk.bf16.mxu0 %vm816_vm2, %v13990_v7  ;;  %v14048_v4 = vld [vmem:[%s14503_s18 + $0x1c0] sm:$0xff]   ;;  %v14049_v5 = vld [vmem:[%s14503_s18 + $0xa8] sm:$0xff]  }
  0xf0   : > { %v14050_v7 = vld [vmem:[%s14503_s18 + $0x1c8] sm:$0xff]  }
  0xf6   : > { %12279 = vmatmul.mubr.msk.bf16.gmra.mrb[112].mxu1 %vm816_vm2, %v13991_v8  ;;  %12743 = vmatmul.mubr.msk.bf16.gmra.mrb[48].mxu0 %vm816_vm2, %v13992_v10  ;;  %v14051_v8 = vld [vmem:[%s14503_s18 + $0xb0] sm:$0xff]  }
  0xf7   : > { %12282 = vmatprep.mubr.msk.bf16.mxu1 %vm816_vm2, %v13993_v11  ;;  %12746 = vmatprep.mubr.msk.bf16.mxu0 %vm816_vm2, %v13994_v12  ;;  %v14052_v10 = vld [vmem:[%s14503_s18 + $0x1d0] sm:$0xff]   ;;  %v14053_v11 = vld [vmem:[%s14503_s18 + $0xb8] sm:$0xff]  }
  0xf8   : > { %v14054_v12 = vld [vmem:[%s14503_s18 + $0x1d8] sm:$0xff]  }
  0xfe   : > { %12283 = vmatmul.mubr.msk.bf16.gmra.mrb[116].mxu1 %vm816_vm2, %v13995_v13  ;;  %12747 = vmatmul.mubr.msk.bf16.gmra.mrb[52].mxu0 %vm816_vm2, %v13996_v14  ;;  %v14055_v13 = vld [vmem:[%s14503_s18 + $0xc0] sm:$0xff]  }
  0xff   : > { %12286 = vmatprep.mubr.msk.bf16.mxu1 %vm816_vm2, %v13997_v15  ;;  %12750 = vmatprep.mubr.msk.bf16.mxu0 %vm816_vm2, %v13998_v16  ;;  %v14056_v14 = vld [vmem:[%s14503_s18 + $0x1e0] sm:$0xff]   ;;  %v14057_v15 = vld [vmem:[%s14503_s18 + $0xc8] sm:$0xff]  }
 0x100   : > { %v14058_v16 = vld [vmem:[%s14503_s18 + $0x1e8] sm:$0xff]  }
 0x106   : > { %12287 = vmatmul.mubr.msk.bf16.gmra.mrb[120].mxu1 %vm816_vm2, %v13999_v17  ;;  %12751 = vmatmul.mubr.msk.bf16.gmra.mrb[56].mxu0 %vm816_vm2, %v14000_v18  ;;  %v14059_v17 = vld [vmem:[%s14503_s18 + $0xd0] sm:$0xff]  }
 0x107   : > { %12290 = vmatprep.mubr.msk.bf16.mxu1 %vm816_vm2, %v14001_v19  ;;  %12754 = vmatprep.mubr.msk.bf16.mxu0 %vm816_vm2, %v14002_v20  ;;  %v14060_v18 = vld [vmem:[%s14503_s18 + $0x1f0] sm:$0xff]   ;;  %v14061_v19 = vld [vmem:[%s14503_s18 + $0xd8] sm:$0xff]  }
 0x108   : > { %v14062_v20 = vld [vmem:[%s14503_s18 + $0x1f8] sm:$0xff]  }
 0x10e   : > { %12291 = vmatmul.mubr.msk.bf16.gmra.mrb[124].mxu1 %vm816_vm2, %v14003_v22  ;;  %12755 = vmatmul.mubr.msk.bf16.gmra.mrb[60].mxu0 %vm816_vm2, %v14004_v23  ;;  %v14063_v22 = vld [vmem:[%s14503_s18 + $0xe0] sm:$0xff]  }
 0x10f   : > { %12298 = vmatprep.mubr.msk.bf16.mxu1 %vm816_vm2, %v14005_v25  ;;  %12758 = vmatprep.mubr.msk.bf16.mxu0 %vm816_vm2, %v14007_v26  ;;  %v14064_v23 = vld [vmem:[%s14503_s18 + $0x200] sm:$0xff]   ;;  %v14065_v25 = vld [vmem:[%s14503_s18 + $0xe8] sm:$0xff]  }
 0x110   : > { %v14066_v26 = vld [vmem:[%s14503_s18 + $0x208] sm:$0xff]  }
 0x116   : > { %12299 = vmatmul.mubr.msk.bf16.vlgmr.msra.gmra.mrb[0].mxu1 %vm816_vm2, %v14009_v27  ;;  %12759 = vmatmul.mubr.msk.bf16.gmra.mrb[64].mxu0 %vm816_vm2, %v14010_v30  ;;  %v14067_v27 = vld [vmem:[%s14503_s18 + $0xf0] sm:$0xff]   ;;  %v14069_v30 = vld [vmem:[%s14503_s18 + $0xf8] sm:$0xff]  }
 0x117   : > { %12427 = vmatpush3.bf16.msra.mxu1 %v14574_v24  ;;  %12302 = vmatprep.mubr.msk.bf16.mxu1 %vm816_vm2, %v14011_v31  ;;  %v14330_v24 = vld [vmem:[%s16110_s2 + $0x24] sm:$0xff]   ;;  %v14070_v31 = vld [vmem:[%s14503_s18 + $0x218] sm:$0xff]  }
 0x118   : > { %12762 = vmatprep.mubr.msk.bf16.mxu0 %vm816_vm2, %v14012_v21  ;;  %12428 = vmatprep.subr.bf16.mxu1 %v3284_v32  ;;  %v14071_v21 = vld [vmem:[%s14503_s18 + $0x100] sm:$0xff]  }
 0x11b   : > { %12429 = vmatpush3.bf16.msra.mxu1 %v3284_v32  ;;  %v14073_v32 = vld [vmem:[%s14419_s11 + $0x20] sm:$0xff]  }
 0x11c   : > { %13086 = vmatprep.subr.bf16.mxu1 %v14330_v24  ;;  %v14078_v24 = vld [vmem:[%s14419_s11 + $0x30] sm:$0xff]  }
 0x11e   : > { %12303 = vmatmul.mubr.msk.bf16.gmra.mrb[4].mxu1 %vm816_vm2, %v14013_v33  ;;  %12763 = vmatmul.mubr.msk.bf16.gmra.mrb[68].mxu0 %vm816_vm2, %v14014_v34  ;;  %v14075_v33 = vld [vmem:[%s14503_s18 + $0x108] sm:$0xff]   ;;  %v14139_v34 = vld [vmem:[%s16110_s2 + $0x50] ss:$0 sps:$4 sm:$0x77]  }
 0x11f   : > { %12306 = vmatprep.mubr.msk.bf16.mxu1 %vm816_vm2, %v14015_v35  ;;  %12766 = vmatprep.mubr.msk.bf16.mxu0 %vm816_vm2, %v14016_v36  ;;  %v14076_v35 = vld [vmem:[%s14419_s11 + $0x28] sm:$0xff]   ;;  %v14077_v36 = vld [vmem:[%s14503_s18 + $0x110] sm:$0xff]  }
 0x126   : > { %12307 = vmatmul.mubr.msk.bf16.gmra.mrb[8].mxu1 %vm816_vm2, %v14017_v37  ;;  %12767 = vmatmul.mubr.msk.bf16.gmra.mrb[72].mxu0 %vm816_vm2, %v14018_v38  ;;  %v8600_v37 = vand.u32 %v14139_v34, %v14389_v6  ;;  %v14079_v38 = vld [vmem:[%s14503_s18 + $0x118] sm:$0xff]   ;;  %v14082_v6 = vld [vmem:[%s14419_s11 + $0x40] sm:$0xff]   ;;  %v14137_v34 = vld [vmem:[%s14503_s18 + $0x10] sm:$0xff]  }
 0x127   : > { %12310 = vmatprep.mubr.msk.bf16.mxu1 %vm816_vm2, %v14019_v39  ;;  %12770 = vmatprep.mubr.msk.bf16.mxu0 %vm816_vm2, %v14020_v40  ;;  %v14080_v39 = vld [vmem:[%s14419_s11 + $0x38] sm:$0xff]   ;;  %v14081_v40 = vld [vmem:[%s14503_s18 + $0x120] sm:$0xff]  }
 0x12e   : > { %12311 = vmatmul.mubr.msk.bf16.gmra.mrb[12].mxu1 %vm816_vm2, %v14021_v41  ;;  %12771 = vmatmul.mubr.msk.bf16.gmra.mrb[76].mxu0 %vm816_vm2, %v14022_v42  ;;  %v14084_v41 = vld [vmem:[%s14419_s11 + $0x48] sm:$0xff]   ;;  %v14085_v42 = vld [vmem:[%s14503_s18 + $0x130] sm:$0xff]  }
 0x12f   : > { %12314 = vmatprep.mubr.msk.bf16.mxu1 %vm816_vm2, %v14023_v43  ;;  %12774 = vmatprep.mubr.msk.bf16.mxu0 %vm816_vm2, %v14024_v44  ;;  %v14086_v43 = vld [vmem:[%s14419_s11 + $0x50] sm:$0xff]   ;;  %v14087_v44 = vld [vmem:[%s14503_s18 + $0x138] sm:$0xff]  }
 0x136   : > { %12315 = vmatmul.mubr.msk.bf16.gmra.mrb[16].mxu1 %vm816_vm2, %v14025_v45  ;;  %12775 = vmatmul.mubr.msk.bf16.gmra.mrb[80].mxu0 %vm816_vm2, %v14026_v46  ;;  %v14088_v45 = vld [vmem:[%s14419_s11 + $0x58] sm:$0xff]   ;;  %v14089_v46 = vld [vmem:[%s14503_s18 + $0x140] sm:$0xff]  }
 0x137   : > { %12318 = vmatprep.mubr.msk.bf16.mxu1 %vm816_vm2, %v14027_v47  ;;  %12778 = vmatprep.mubr.msk.bf16.mxu0 %vm816_vm2, %v14028_v48  ;;  %v14090_v47 = vld [vmem:[%s14419_s11 + $0x60] sm:$0xff]   ;;  %v14091_v48 = vld [vmem:[%s14503_s18 + $0x148] sm:$0xff]  }
 0x13e   : > { %12319 = vmatmul.mubr.msk.bf16.gmra.mrb[20].mxu1 %vm816_vm2, %v14029_v49  ;;  %12779 = vmatmul.mubr.msk.bf16.gmra.mrb[84].mxu0 %vm816_vm2, %v14030_v50  ;;  %v14092_v49 = vld [vmem:[%s14419_s11 + $0x68] sm:$0xff]   ;;  %v14093_v50 = vld [vmem:[%s14503_s18 + $0x150] sm:$0xff]  }
 0x13f   : > { %12322 = vmatprep.mubr.msk.bf16.mxu1 %vm816_vm2, %v14031_v51  ;;  %12782 = vmatprep.mubr.msk.bf16.mxu0 %vm816_vm2, %v14032_v52  ;;  %v14094_v51 = vld [vmem:[%s14419_s11 + $0x70] sm:$0xff]   ;;  %v14095_v52 = vld [vmem:[%s14503_s18 + $0x158] sm:$0xff]  }
 0x146   : > { %12323 = vmatmul.mubr.msk.bf16.gmra.mrb[24].mxu1 %vm816_vm2, %v14033_v53  ;;  %12783 = vmatmul.mubr.msk.bf16.gmra.mrb[88].mxu0 %vm816_vm2, %v14034_v54  ;;  %v14096_v53 = vld [vmem:[%s14419_s11 + $0x78] sm:$0xff]   ;;  %v14097_v54 = vld [vmem:[%s14503_s18 + $0x160] sm:$0xff]  }
 0x147   : > { %12326 = vmatprep.mubr.msk.bf16.mxu1 %vm816_vm2, %v14035_v55  ;;  %12786 = vmatprep.mubr.msk.bf16.mxu0 %vm816_vm2, %v14036_v56  ;;  %v14098_v55 = vld [vmem:[%s14419_s11 + $0x80] sm:$0xff]   ;;  %v14099_v56 = vld [vmem:[%s14503_s18 + $0x168] sm:$0xff]  }
 0x14e   : > { %12327 = vmatmul.mubr.msk.bf16.gmra.mrb[28].mxu1 %vm816_vm2, %v14037_v57  ;;  %12787 = vmatmul.mubr.msk.bf16.gmra.mrb[92].mxu0 %vm816_vm2, %v14038_v58  ;;  %v14100_v57 = vld [vmem:[%s14419_s11 + $0x88] sm:$0xff]   ;;  %v14101_v58 = vld [vmem:[%s14503_s18 + $0x170] sm:$0xff]  }
 0x14f   : > { %12330 = vmatprep.mubr.msk.bf16.mxu1 %vm816_vm2, %v14039_v59  ;;  %12790 = vmatprep.mubr.msk.bf16.mxu0 %vm816_vm2, %v14040_v60  ;;  %v14102_v59 = vld [vmem:[%s14419_s11 + $0x90] sm:$0xff]   ;;  %v14103_v60 = vld [vmem:[%s14503_s18 + $0x178] sm:$0xff]  }
 0x156   : > { %12331 = vmatmul.mubr.msk.bf16.gmra.mrb[32].mxu1 %vm816_vm2, %v14041_v61  ;;  %12791 = vmatmul.mubr.msk.bf16.gmra.mrb[96].mxu0 %vm816_vm2, %v14042_v62  ;;  %v14104_v61 = vld [vmem:[%s14419_s11 + $0x98] sm:$0xff]   ;;  %v14105_v62 = vld [vmem:[%s14503_s18 + $0x180] sm:$0xff]  }
 0x157   : > { %12334 = vmatprep.mubr.msk.bf16.mxu1 %vm816_vm2, %v14043_v63  ;;  %12794 = vmatprep.mubr.msk.bf16.mxu0 %vm816_vm2, %v14044_v0  ;;  %v14106_v63 = vld [vmem:[%s14419_s11 + $0xa0] sm:$0xff]   ;;  %v14107_v0 = vld [vmem:[%s14503_s18 + $0x188] sm:$0xff]  }
 0x15e   : > { %12335 = vmatmul.mubr.msk.bf16.gmra.mrb[36].mxu1 %vm816_vm2, %v14045_v1  ;;  %12795 = vmatmul.mubr.msk.bf16.gmra.mrb[100].mxu0 %vm816_vm2, %v14046_v2  ;;  %v14108_v1 = vld [vmem:[%s14419_s11 + $0xa8] sm:$0xff]   ;;  %v14109_v2 = vld [vmem:[%s14503_s18 + $0x190] sm:$0xff]  }
 0x15f   : > { %12338 = vmatprep.mubr.msk.bf16.mxu1 %vm816_vm2, %v14047_v3  ;;  %12798 = vmatprep.mubr.msk.bf16.mxu0 %vm816_vm2, %v14048_v4  ;;  %v14110_v3 = vld [vmem:[%s14419_s11 + $0xb0] sm:$0xff]   ;;  %v14111_v4 = vld [vmem:[%s14503_s18 + $0x198] sm:$0xff]  }
 0x166   : > { %12339 = vmatmul.mubr.msk.bf16.gmra.mrb[40].mxu1 %vm816_vm2, %v14049_v5  ;;  %12799 = vmatmul.mubr.msk.bf16.gmra.mrb[104].mxu0 %vm816_vm2, %v14050_v7  ;;  %v14112_v5 = vld [vmem:[%s14419_s11 + $0xb8] sm:$0xff]   ;;  %v14113_v7 = vld [vmem:[%s14503_s18 + $0x1a0] sm:$0xff]  }
 0x167   : > { %12342 = vmatprep.mubr.msk.bf16.mxu1 %vm816_vm2, %v14051_v8  ;;  %12802 = vmatprep.mubr.msk.bf16.mxu0 %vm816_vm2, %v14052_v10  ;;  %v14114_v8 = vld [vmem:[%s14419_s11 + $0xc0] sm:$0xff]   ;;  %v14115_v10 = vld [vmem:[%s14503_s18 + $0x1a8] sm:$0xff]  }
 0x16e   : > { %12343 = vmatmul.mubr.msk.bf16.gmra.mrb[44].mxu1 %vm816_vm2, %v14053_v11  ;;  %12803 = vmatmul.mubr.msk.bf16.gmra.mrb[108].mxu0 %vm816_vm2, %v14054_v12  ;;  %v14116_v11 = vld [vmem:[%s14419_s11 + $0xc8] sm:$0xff]   ;;  %v14117_v12 = vld [vmem:[%s14503_s18 + $0x1b0] sm:$0xff]  }
 0x16f   : > { %12346 = vmatprep.mubr.msk.bf16.mxu1 %vm816_vm2, %v14055_v13  ;;  %12806 = vmatprep.mubr.msk.bf16.mxu0 %vm816_vm2, %v14056_v14  ;;  %v14118_v13 = vld [vmem:[%s14419_s11 + $0xd0] sm:$0xff]   ;;  %v14119_v14 = vld [vmem:[%s14503_s18 + $0x1b8] sm:$0xff]  }
 0x176   : > { %12347 = vmatmul.mubr.msk.bf16.gmra.mrb[48].mxu1 %vm816_vm2, %v14057_v15  ;;  %12807 = vmatmul.mubr.msk.bf16.gmra.mrb[112].mxu0 %vm816_vm2, %v14058_v16  ;;  %v14120_v15 = vld [vmem:[%s14419_s11 + $0xd8] sm:$0xff]   ;;  %v14121_v16 = vld [vmem:[%s14503_s18 + $0x1c0] sm:$0xff]  }
 0x177   : > { %12350 = vmatprep.mubr.msk.bf16.mxu1 %vm816_vm2, %v14059_v17  ;;  %12810 = vmatprep.mubr.msk.bf16.mxu0 %vm816_vm2, %v14060_v18  ;;  %v14122_v17 = vld [vmem:[%s14419_s11 + $0xe0] sm:$0xff]   ;;  %v14123_v18 = vld [vmem:[%s14503_s18 + $0x1c8] sm:$0xff]  }
 0x17e   : > { %12351 = vmatmul.mubr.msk.bf16.gmra.mrb[52].mxu1 %vm816_vm2, %v14061_v19  ;;  %12811 = vmatmul.mubr.msk.bf16.gmra.mrb[116].mxu0 %vm816_vm2, %v14062_v20  ;;  %v14124_v19 = vld [vmem:[%s14419_s11 + $0xe8] sm:$0xff]   ;;  %v14125_v20 = vld [vmem:[%s14503_s18 + $0x1d0] sm:$0xff]  }
 0x17f   : > { %12354 = vmatprep.mubr.msk.bf16.mxu1 %vm816_vm2, %v14063_v22  ;;  %12814 = vmatprep.mubr.msk.bf16.mxu0 %vm816_vm2, %v14064_v23  ;;  %v14126_v22 = vld [vmem:[%s14419_s11 + $0xf0] sm:$0xff]   ;;  %v14127_v23 = vld [vmem:[%s14503_s18 + $0x1d8] sm:$0xff]  }
 0x186   : > { %12355 = vmatmul.mubr.msk.bf16.gmra.mrb[56].mxu1 %vm816_vm2, %v14065_v25  ;;  %12815 = vmatmul.mubr.msk.bf16.gmra.mrb[120].mxu0 %vm816_vm2, %v14066_v26  ;;  %v14128_v25 = vld [vmem:[%s14419_s11 + $0xf8] sm:$0xff]   ;;  %v14129_v26 = vld [vmem:[%s14503_s18 + $0x1e0] sm:$0xff]  }
 0x187   : > { %12358 = vmatprep.mubr.msk.bf16.mxu1 %vm816_vm2, %v14067_v27  ;;  %12818 = vmatprep.mubr.msk.bf16.mxu0 %vm816_vm2, %v14068_v28  ;;  %v14130_v27 = vld [vmem:[%s14419_s11 + $0x100] sm:$0xff]   ;;  %v14131_v28 = vld [vmem:[%s14503_s18 + $0x1e8] sm:$0xff]  }
 0x18e   : > { %12359 = vmatmul.mubr.msk.bf16.gmra.mrb[60].mxu1 %vm816_vm2, %v14069_v30  ;;  %12819 = vmatmul.mubr.msk.bf16.gmra.mrb[124].mxu0 %vm816_vm2, %v14070_v31  ;;  %v14132_v30 = vld [vmem:[%s14419_s11 + $0x108] sm:$0xff]   ;;  %v14133_v31 = vld [vmem:[%s14503_s18 + $0x1f0] sm:$0xff]  }
 0x18f   : > { %12362 = vmatprep.mubr.msk.bf16.mxu1 %vm816_vm2, %v14071_v21  ;;  %12826 = vmatprep.mubr.msk.bf16.mxu0 %vm816_vm2, %v14073_v32  ;;  %v14134_v21 = vld [vmem:[%s14419_s11 + $0x110] sm:$0xff]   ;;  %v14135_v32 = vld [vmem:[%s14503_s18 + $0x1f8] sm:$0xff]  }
 0x196   : > { %12363 = vmatmul.mubr.msk.bf16.gmra.mrb[64].mxu1 %vm816_vm2, %v14075_v33  ;;  %12827 = vmatmul.mubr.msk.bf16.vlgmr.msra.gmra.mrb[0].mxu0 %vm816_vm2, %v14076_v35  ;;  %v14136_v33 = vld [vmem:[%s14419_s11 + $0x118] sm:$0xff]   ;;  %v14138_v35 = vld [vmem:[%s14419_s11 + $0x120] sm:$0xff]  }
 0x197   : > { %12366 = vmatprep.mubr.msk.bf16.mxu1 %vm816_vm2, %v14077_v36  ;;  %12955 = vmatpush3.bf16.msra.mxu0 %v14714_v29  ;;  %v14083_v29 = vld [vmem:[%s14503_s18 + $0x128] sm:$0xff]   ;;  %v14140_v36 = vld [vmem:[%s14503_s18 + $0x18] sm:$0xff]  }
 0x198   : > { %12830 = vmatprep.mubr.msk.bf16.mxu0 %vm816_vm2, %v14078_v24  ;;  %12956 = vmatprep.subr.bf16.mxu0 %v8600_v37  ;;  %v14141_v24 = vld [vmem:[%s14419_s11 + $0x128] sm:$0xff]  }
 0x19b   : > { %12957 = vmatpush3.bf16.msra.mxu0 %v8600_v37  ;;  %v14142_v37 = vld [vmem:[%s14503_s18 + $0x20] sm:$0xff]  }
 0x19e   : > { %12367 = vmatmul.mubr.msk.bf16.gmra.mrb[68].mxu1 %vm816_vm2, %v14079_v38  ;;  %12831 = vmatmul.mubr.msk.bf16.gmra.mrb[4].mxu0 %vm816_vm2, %v14080_v39  ;;  %v14143_v38 = vld [vmem:[%s14419_s11 + $0x130] sm:$0xff]   ;;  %v14331_v39 = vld [vmem:[%s16110_s2 + $0x24] sm:$0xff]  }
 0x19f   : > { %12370 = vmatprep.mubr.msk.bf16.mxu1 %vm816_vm2, %v14081_v40  ;;  %12834 = vmatprep.mubr.msk.bf16.mxu0 %vm816_vm2, %v14082_v6  ;;  %v14144_v40 = vld [vmem:[%s14503_s18 + $0x28] sm:$0xff]   ;;  %v14145_v6 = vld [vmem:[%s14419_s11 + $0x138] sm:$0xff]  }
 0x1a6   : > { %12371 = vmatmul.mubr.msk.bf16.gmra.mrb[72].mxu1 %vm816_vm2, %v14083_v29  ;;  %12835 = vmatmul.mubr.msk.bf16.gmra.mrb[8].mxu0 %vm816_vm2, %v14084_v41  ;;  %v14146_v29 = vld [vmem:[%s14503_s18 + $0x30] sm:$0xff]   ;;  %v14147_v41 = vld [vmem:[%s14419_s11 + $0x140] sm:$0xff]  }
 0x1a7   : > { %12374 = vmatprep.mubr.msk.bf16.mxu1 %vm816_vm2, %v14085_v42  ;;  %12838 = vmatprep.mubr.msk.bf16.mxu0 %vm816_vm2, %v14086_v43  ;;  %v14148_v42 = vld [vmem:[%s14503_s18 + $0x38] sm:$0xff]   ;;  %v14149_v43 = vld [vmem:[%s14419_s11 + $0x148] sm:$0xff]  }
 0x1ae   : > { %12375 = vmatmul.mubr.msk.bf16.gmra.mrb[76].mxu1 %vm816_vm2, %v14087_v44  ;;  %12839 = vmatmul.mubr.msk.bf16.gmra.mrb[12].mxu0 %vm816_vm2, %v14088_v45  ;;  %v14150_v44 = vld [vmem:[%s14503_s18 + $0x40] sm:$0xff]   ;;  %v14151_v45 = vld [vmem:[%s14419_s11 + $0x150] sm:$0xff]  }
 0x1af   : > { %12378 = vmatprep.mubr.msk.bf16.mxu1 %vm816_vm2, %v14089_v46  ;;  %12842 = vmatprep.mubr.msk.bf16.mxu0 %vm816_vm2, %v14090_v47  ;;  %v14153_v46 = vld [vmem:[%s14419_s11 + $0x158] sm:$0xff]   ;;  %v14154_v47 = vld [vmem:[%s14503_s18 + $0x50] sm:$0xff]  }
 0x1b6   : > { %12379 = vmatmul.mubr.msk.bf16.gmra.mrb[80].mxu1 %vm816_vm2, %v14091_v48  ;;  %12843 = vmatmul.mubr.msk.bf16.gmra.mrb[16].mxu0 %vm816_vm2, %v14092_v49  ;;  %v14155_v48 = vld [vmem:[%s14419_s11 + $0x160] sm:$0xff]   ;;  %v14156_v49 = vld [vmem:[%s14503_s18 + $0x58] sm:$0xff]  }
 0x1b7   : > { %12382 = vmatprep.mubr.msk.bf16.mxu1 %vm816_vm2, %v14093_v50  ;;  %12846 = vmatprep.mubr.msk.bf16.mxu0 %vm816_vm2, %v14094_v51  ;;  %v14157_v50 = vld [vmem:[%s14419_s11 + $0x168] sm:$0xff]   ;;  %v14158_v51 = vld [vmem:[%s14503_s18 + $0x60] sm:$0xff]  }
 0x1be   : > { %12383 = vmatmul.mubr.msk.bf16.gmra.mrb[84].mxu1 %vm816_vm2, %v14095_v52  ;;  %12847 = vmatmul.mubr.msk.bf16.gmra.mrb[20].mxu0 %vm816_vm2, %v14096_v53  ;;  %v14159_v52 = vld [vmem:[%s14419_s11 + $0x170] sm:$0xff]   ;;  %v14160_v53 = vld [vmem:[%s14503_s18 + $0x68] sm:$0xff]  }
 0x1bf   : > { %12386 = vmatprep.mubr.msk.bf16.mxu1 %vm816_vm2, %v14097_v54  ;;  %12850 = vmatprep.mubr.msk.bf16.mxu0 %vm816_vm2, %v14098_v55  ;;  %v14161_v54 = vld [vmem:[%s14419_s11 + $0x178] sm:$0xff]   ;;  %v14162_v55 = vld [vmem:[%s14503_s18 + $0x70] sm:$0xff]  }
 0x1c6   : > { %12387 = vmatmul.mubr.msk.bf16.gmra.mrb[88].mxu1 %vm816_vm2, %v14099_v56  ;;  %12851 = vmatmul.mubr.msk.bf16.gmra.mrb[24].mxu0 %vm816_vm2, %v14100_v57  ;;  %v14163_v56 = vld [vmem:[%s14419_s11 + $0x180] sm:$0xff]   ;;  %v14164_v57 = vld [vmem:[%s14503_s18 + $0x78] sm:$0xff]  }
 0x1c7   : > { %12390 = vmatprep.mubr.msk.bf16.mxu1 %vm816_vm2, %v14101_v58  ;;  %12854 = vmatprep.mubr.msk.bf16.mxu0 %vm816_vm2, %v14102_v59  ;;  %v14165_v58 = vld [vmem:[%s14419_s11 + $0x188] sm:$0xff]   ;;  %v14166_v59 = vld [vmem:[%s14503_s18 + $0x80] sm:$0xff]  }
 0x1ce   : > { %12391 = vmatmul.mubr.msk.bf16.gmra.mrb[92].mxu1 %vm816_vm2, %v14103_v60  ;;  %12855 = vmatmul.mubr.msk.bf16.gmra.mrb[28].mxu0 %vm816_vm2, %v14104_v61  ;;  %v14167_v60 = vld [vmem:[%s14419_s11 + $0x190] sm:$0xff]   ;;  %v14168_v61 = vld [vmem:[%s14503_s18 + $0x88] sm:$0xff]  }
 0x1cf   : > { %12394 = vmatprep.mubr.msk.bf16.mxu1 %vm816_vm2, %v14105_v62  ;;  %12858 = vmatprep.mubr.msk.bf16.mxu0 %vm816_vm2, %v14106_v63  ;;  %v14169_v62 = vld [vmem:[%s14419_s11 + $0x198] sm:$0xff]   ;;  %v14170_v63 = vld [vmem:[%s14503_s18 + $0x90] sm:$0xff]  }
 0x1d6   : > { %12395 = vmatmul.mubr.msk.bf16.gmra.mrb[96].mxu1 %vm816_vm2, %v14107_v0  ;;  %12859 = vmatmul.mubr.msk.bf16.gmra.mrb[32].mxu0 %vm816_vm2, %v14108_v1  ;;  %v14171_v0 = vld [vmem:[%s14419_s11 + $0x1a0] sm:$0xff]   ;;  %v14172_v1 = vld [vmem:[%s14503_s18 + $0x98] sm:$0xff]  }
 0x1d7   : > { %12398 = vmatprep.mubr.msk.bf16.mxu1 %vm816_vm2, %v14109_v2  ;;  %12862 = vmatprep.mubr.msk.bf16.mxu0 %vm816_vm2, %v14110_v3  ;;  %v14173_v2 = vld [vmem:[%s14419_s11 + $0x1a8] sm:$0xff]   ;;  %v14174_v3 = vld [vmem:[%s14503_s18 + $0xa0] sm:$0xff]  }
 0x1de   : > { %12399 = vmatmul.mubr.msk.bf16.gmra.mrb[100].mxu1 %vm816_vm2, %v14111_v4  ;;  %12863 = vmatmul.mubr.msk.bf16.gmra.mrb[36].mxu0 %vm816_vm2, %v14112_v5  ;;  %v14175_v4 = vld [vmem:[%s14419_s11 + $0x1b0] sm:$0xff]   ;;  %v14176_v5 = vld [vmem:[%s14503_s18 + $0xa8] sm:$0xff]  }
 0x1df   : > { %12402 = vmatprep.mubr.msk.bf16.mxu1 %vm816_vm2, %v14113_v7  ;;  %12866 = vmatprep.mubr.msk.bf16.mxu0 %vm816_vm2, %v14114_v8  ;;  %v14177_v7 = vld [vmem:[%s14419_s11 + $0x1b8] sm:$0xff]   ;;  %v14178_v8 = vld [vmem:[%s14503_s18 + $0xb0] sm:$0xff]  }
 0x1e6   : > { %12403 = vmatmul.mubr.msk.bf16.gmra.mrb[104].mxu1 %vm816_vm2, %v14115_v10  ;;  %12867 = vmatmul.mubr.msk.bf16.gmra.mrb[40].mxu0 %vm816_vm2, %v14116_v11  ;;  %v14179_v10 = vld [vmem:[%s14419_s11 + $0x1c0] sm:$0xff]   ;;  %v14180_v11 = vld [vmem:[%s14503_s18 + $0xb8] sm:$0xff]  }
 0x1e7   : > { %12406 = vmatprep.mubr.msk.bf16.mxu1 %vm816_vm2, %v14117_v12  ;;  %12870 = vmatprep.mubr.msk.bf16.mxu0 %vm816_vm2, %v14118_v13  ;;  %v14181_v12 = vld [vmem:[%s14419_s11 + $0x1c8] sm:$0xff]   ;;  %v14182_v13 = vld [vmem:[%s14503_s18 + $0xc0] sm:$0xff]  }
 0x1ee   : > { %12407 = vmatmul.mubr.msk.bf16.gmra.mrb[108].mxu1 %vm816_vm2, %v14119_v14  ;;  %12871 = vmatmul.mubr.msk.bf16.gmra.mrb[44].mxu0 %vm816_vm2, %v14120_v15  ;;  %v14183_v14 = vld [vmem:[%s14419_s11 + $0x1d0] sm:$0xff]   ;;  %v14184_v15 = vld [vmem:[%s14503_s18 + $0xc8] sm:$0xff]  }
 0x1ef   : > { %12410 = vmatprep.mubr.msk.bf16.mxu1 %vm816_vm2, %v14121_v16  ;;  %12874 = vmatprep.mubr.msk.bf16.mxu0 %vm816_vm2, %v14122_v17  ;;  %v14185_v16 = vld [vmem:[%s14419_s11 + $0x1d8] sm:$0xff]   ;;  %v14186_v17 = vld [vmem:[%s14503_s18 + $0xd0] sm:$0xff]  }
 0x1f6   : > { %12411 = vmatmul.mubr.msk.bf16.gmra.mrb[112].mxu1 %vm816_vm2, %v14123_v18  ;;  %12875 = vmatmul.mubr.msk.bf16.gmra.mrb[48].mxu0 %vm816_vm2, %v14124_v19  ;;  %v14187_v18 = vld [vmem:[%s14419_s11 + $0x1e0] sm:$0xff]   ;;  %v14188_v19 = vld [vmem:[%s14503_s18 + $0xd8] sm:$0xff]  }
 0x1f7   : > { %12414 = vmatprep.mubr.msk.bf16.mxu1 %vm816_vm2, %v14125_v20  ;;  %12878 = vmatprep.mubr.msk.bf16.mxu0 %vm816_vm2, %v14126_v22  ;;  %v14189_v20 = vld [vmem:[%s14419_s11 + $0x1e8] sm:$0xff]   ;;  %v14190_v22 = vld [vmem:[%s14503_s18 + $0xe0] sm:$0xff]  }
 0x1fe   : > { %12415 = vmatmul.mubr.msk.bf16.gmra.mrb[116].mxu1 %vm816_vm2, %v14127_v23  ;;  %12879 = vmatmul.mubr.msk.bf16.gmra.mrb[52].mxu0 %vm816_vm2, %v14128_v25  ;;  %v14191_v23 = vld [vmem:[%s14419_s11 + $0x1f0] sm:$0xff]   ;;  %v14192_v25 = vld [vmem:[%s14503_s18 + $0xe8] sm:$0xff]  }
 0x1ff   : > { %12418 = vmatprep.mubr.msk.bf16.mxu1 %vm816_vm2, %v14129_v26  ;;  %12882 = vmatprep.mubr.msk.bf16.mxu0 %vm816_vm2, %v14130_v27  ;;  %v14193_v26 = vld [vmem:[%s14419_s11 + $0x1f8] sm:$0xff]   ;;  %v14194_v27 = vld [vmem:[%s14503_s18 + $0xf0] sm:$0xff]  }
 0x206   : > { %12419 = vmatmul.mubr.msk.bf16.gmra.mrb[120].mxu1 %vm816_vm2, %v14131_v28  ;;  %12883 = vmatmul.mubr.msk.bf16.gmra.mrb[56].mxu0 %vm816_vm2, %v14132_v30  ;;  %v14195_v28 = vld [vmem:[%s14419_s11 + $0x200] sm:$0xff]   ;;  %v14196_v30 = vld [vmem:[%s14503_s18 + $0xf8] sm:$0xff]  }
 0x207   : > { %12422 = vmatprep.mubr.msk.bf16.mxu1 %vm816_vm2, %v14133_v31  ;;  %12886 = vmatprep.mubr.msk.bf16.mxu0 %vm816_vm2, %v14134_v21  ;;  %v14197_v31 = vld [vmem:[%s14419_s11 + $0x208] sm:$0xff]   ;;  %v14198_v21 = vld [vmem:[%s14503_s18 + $0x100] sm:$0xff]  }
 0x20e   : > { %12423 = vmatmul.mubr.msk.bf16.gmra.mrb[124].mxu1 %vm816_vm2, %v14135_v32  ;;  %12887 = vmatmul.mubr.msk.bf16.gmra.mrb[60].mxu0 %vm816_vm2, %v14136_v33  ;;  %v14199_v32 = vld [vmem:[%s14419_s11 + $0x210] sm:$0xff]   ;;  %v14200_v33 = vld [vmem:[%s14503_s18 + $0x108] sm:$0xff]  }
 0x20f   : > { %12430 = vmatprep.mubr.msk.bf16.mxu1 %vm816_vm2, %v14137_v34  ;;  %12890 = vmatprep.mubr.msk.bf16.mxu0 %vm816_vm2, %v14138_v35  ;;  %v14201_v34 = vld [vmem:[%s14419_s11 + $0x218] sm:$0xff]   ;;  %v14202_v35 = vld [vmem:[%s14503_s18 + $0x110] sm:$0xff]  }
 0x216   : > { %12431 = vmatmul.mubr.msk.bf16.vlgmr.msra.gmra.mrb[0].mxu1 %vm816_vm2, %v14140_v36  ;;  %12891 = vmatmul.mubr.msk.bf16.gmra.mrb[64].mxu0 %vm816_vm2, %v14141_v24  ;;  %v14203_v36 = vld [vmem:[%s14503_s18 + $0x30] sm:$0xff]   ;;  %v14204_v24 = vld [vmem:[%s14503_s18 + $0x118] sm:$0xff]  }
 0x217   : > { %13088 = vmatpush3.bf16.msra.mxu1 %v14331_v39  ;;  %12434 = vmatprep.mubr.msk.bf16.mxu1 %vm816_vm2, %v14142_v37  ;;  %v14205_v37 = vld [vmem:[%s14503_s18 + $0x38] sm:$0xff]   ;;  %v14207_v39 = vld [vmem:[%s14503_s18 + $0x40] sm:$0xff]  }
 0x218   : > { %12894 = vmatprep.mubr.msk.bf16.mxu0 %vm816_vm2, %v14143_v38  ;;  %13087 = vmatprep.subr.bf16.mxu1 %v14398_v9  ;;  %v14206_v38 = vld [vmem:[%s14503_s18 + $0x120] sm:$0xff]  }
 0x21b   : > { %13089 = vmatpush3.bf16.msra.mxu1 %v14398_v9  ;;  %v14152_v9 = vld [vmem:[%s14503_s18 + $0x48] sm:$0xff]  }
 0x21e   : > { %12435 = vmatmul.mubr.msk.bf16.gmra.mrb[4].mxu1 %vm816_vm2, %v14144_v40  ;;  %12895 = vmatmul.mubr.msk.bf16.gmra.mrb[68].mxu0 %vm816_vm2, %v14145_v6  ;;  %v14208_v40 = vld [vmem:[%s14503_s18 + $0x128] sm:$0xff]  }
 0x21f   : > { %12438 = vmatprep.mubr.msk.bf16.mxu1 %vm816_vm2, %v14146_v29  ;;  %12898 = vmatprep.mubr.msk.bf16.mxu0 %vm816_vm2, %v14147_v41  ;;  %v14209_v6 = vld [vmem:[%s14503_s18 + $0x48] sm:$0xff]   ;;  %v14210_v29 = vld [vmem:[%s14503_s18 + $0x130] sm:$0xff]  }
 0x220   : > { %v14211_v41 = vld [vmem:[%s14503_s18 + $0x50] sm:$0xff]  }
 0x226   : > { %12439 = vmatmul.mubr.msk.bf16.gmra.mrb[8].mxu1 %vm816_vm2, %v14148_v42  ;;  %12899 = vmatmul.mubr.msk.bf16.gmra.mrb[72].mxu0 %vm816_vm2, %v14149_v43  ;;  %v14212_v42 = vld [vmem:[%s14503_s18 + $0x138] sm:$0xff]  }
 0x227   : > { %12442 = vmatprep.mubr.msk.bf16.mxu1 %vm816_vm2, %v14150_v44  ;;  %12902 = vmatprep.mubr.msk.bf16.mxu0 %vm816_vm2, %v14151_v45  ;;  %v14213_v43 = vld [vmem:[%s14503_s18 + $0x58] sm:$0xff]   ;;  %v14214_v44 = vld [vmem:[%s14503_s18 + $0x140] sm:$0xff]  }
 0x228   : > { %v14215_v45 = vld [vmem:[%s14503_s18 + $0x60] sm:$0xff]  }
 0x22e   : > { %12443 = vmatmul.mubr.msk.bf16.gmra.mrb[12].mxu1 %vm816_vm2, %v14152_v9  ;;  %12903 = vmatmul.mubr.msk.bf16.gmra.mrb[76].mxu0 %vm816_vm2, %v14153_v46  ;;  %v14216_v9 = vld [vmem:[%s14503_s18 + $0x148] sm:$0xff]  }
 0x22f   : > { %12446 = vmatprep.mubr.msk.bf16.mxu1 %vm816_vm2, %v14154_v47  ;;  %12906 = vmatprep.mubr.msk.bf16.mxu0 %vm816_vm2, %v14155_v48  ;;  %v14217_v46 = vld [vmem:[%s14503_s18 + $0x68] sm:$0xff]   ;;  %v14218_v47 = vld [vmem:[%s14503_s18 + $0x150] sm:$0xff]  }
 0x230   : > { %v14219_v48 = vld [vmem:[%s14503_s18 + $0x70] sm:$0xff]  }
 0x236   : > { %12447 = vmatmul.mubr.msk.bf16.gmra.mrb[16].mxu1 %vm816_vm2, %v14156_v49  ;;  %12907 = vmatmul.mubr.msk.bf16.gmra.mrb[80].mxu0 %vm816_vm2, %v14157_v50  ;;  %v14220_v49 = vld [vmem:[%s14503_s18 + $0x158] sm:$0xff]  }
 0x237   : > { %12450 = vmatprep.mubr.msk.bf16.mxu1 %vm816_vm2, %v14158_v51  ;;  %12910 = vmatprep.mubr.msk.bf16.mxu0 %vm816_vm2, %v14159_v52  ;;  %v14221_v50 = vld [vmem:[%s14503_s18 + $0x78] sm:$0xff]   ;;  %v14222_v51 = vld [vmem:[%s14503_s18 + $0x160] sm:$0xff]  }
 0x238   : > { %v14223_v52 = vld [vmem:[%s14503_s18 + $0x80] sm:$0xff]  }
 0x23e   : > { %12451 = vmatmul.mubr.msk.bf16.gmra.mrb[20].mxu1 %vm816_vm2, %v14160_v53  ;;  %12911 = vmatmul.mubr.msk.bf16.gmra.mrb[84].mxu0 %vm816_vm2, %v14161_v54  ;;  %v14224_v53 = vld [vmem:[%s14503_s18 + $0x168] sm:$0xff]  }
 0x23f   : > { %12454 = vmatprep.mubr.msk.bf16.mxu1 %vm816_vm2, %v14162_v55  ;;  %12914 = vmatprep.mubr.msk.bf16.mxu0 %vm816_vm2, %v14163_v56  ;;  %v14225_v54 = vld [vmem:[%s14503_s18 + $0x88] sm:$0xff]   ;;  %v14226_v55 = vld [vmem:[%s14503_s18 + $0x170] sm:$0xff]  }
 0x240   : > { %v14227_v56 = vld [vmem:[%s14503_s18 + $0x90] sm:$0xff]  }
 0x246   : > { %12455 = vmatmul.mubr.msk.bf16.gmra.mrb[24].mxu1 %vm816_vm2, %v14164_v57  ;;  %12915 = vmatmul.mubr.msk.bf16.gmra.mrb[88].mxu0 %vm816_vm2, %v14165_v58  ;;  %v14228_v57 = vld [vmem:[%s14503_s18 + $0x178] sm:$0xff]  }
 0x247   : > { %12458 = vmatprep.mubr.msk.bf16.mxu1 %vm816_vm2, %v14166_v59  ;;  %12918 = vmatprep.mubr.msk.bf16.mxu0 %vm816_vm2, %v14167_v60  ;;  %v14229_v58 = vld [vmem:[%s14503_s18 + $0x98] sm:$0xff]   ;;  %v14230_v59 = vld [vmem:[%s14503_s18 + $0x180] sm:$0xff]  }
 0x248   : > { %v14231_v60 = vld [vmem:[%s14503_s18 + $0xa0] sm:$0xff]  }
 0x24e   : > { %12459 = vmatmul.mubr.msk.bf16.gmra.mrb[28].mxu1 %vm816_vm2, %v14168_v61  ;;  %12919 = vmatmul.mubr.msk.bf16.gmra.mrb[92].mxu0 %vm816_vm2, %v14169_v62  ;;  %v14232_v61 = vld [vmem:[%s14503_s18 + $0x188] sm:$0xff]  }
 0x24f   : > { %12462 = vmatprep.mubr.msk.bf16.mxu1 %vm816_vm2, %v14170_v63  ;;  %12922 = vmatprep.mubr.msk.bf16.mxu0 %vm816_vm2, %v14171_v0  ;;  %v14233_v62 = vld [vmem:[%s14503_s18 + $0xa8] sm:$0xff]   ;;  %v14234_v63 = vld [vmem:[%s14503_s18 + $0x190] sm:$0xff]  }
 0x250   : > { %v14235_v0 = vld [vmem:[%s14503_s18 + $0xb0] sm:$0xff]  }
 0x256   : > { %12463 = vmatmul.mubr.msk.bf16.gmra.mrb[32].mxu1 %vm816_vm2, %v14172_v1  ;;  %12923 = vmatmul.mubr.msk.bf16.gmra.mrb[96].mxu0 %vm816_vm2, %v14173_v2  ;;  %v14236_v1 = vld [vmem:[%s14503_s18 + $0x198] sm:$0xff]  }
 0x257   : > { %12466 = vmatprep.mubr.msk.bf16.mxu1 %vm816_vm2, %v14174_v3  ;;  %12926 = vmatprep.mubr.msk.bf16.mxu0 %vm816_vm2, %v14175_v4  ;;  %v14237_v2 = vld [vmem:[%s14503_s18 + $0xb8] sm:$0xff]   ;;  %v14238_v3 = vld [vmem:[%s14503_s18 + $0x1a0] sm:$0xff]  }
 0x258   : > { %v14239_v4 = vld [vmem:[%s14503_s18 + $0xc0] sm:$0xff]  }
 0x25e   : > { %12467 = vmatmul.mubr.msk.bf16.gmra.mrb[36].mxu1 %vm816_vm2, %v14176_v5  ;;  %12927 = vmatmul.mubr.msk.bf16.gmra.mrb[100].mxu0 %vm816_vm2, %v14177_v7  ;;  %v14240_v5 = vld [vmem:[%s14503_s18 + $0x1a8] sm:$0xff]  }
 0x25f   : > { %12470 = vmatprep.mubr.msk.bf16.mxu1 %vm816_vm2, %v14178_v8  ;;  %12930 = vmatprep.mubr.msk.bf16.mxu0 %vm816_vm2, %v14179_v10  ;;  %v14241_v7 = vld [vmem:[%s14503_s18 + $0xc8] sm:$0xff]   ;;  %v14242_v8 = vld [vmem:[%s14503_s18 + $0x1b0] sm:$0xff]  }
 0x260   : > { %v14243_v10 = vld [vmem:[%s14503_s18 + $0xd0] sm:$0xff]  }
 0x266   : > { %12471 = vmatmul.mubr.msk.bf16.gmra.mrb[40].mxu1 %vm816_vm2, %v14180_v11  ;;  %12931 = vmatmul.mubr.msk.bf16.gmra.mrb[104].mxu0 %vm816_vm2, %v14181_v12  ;;  %v14244_v11 = vld [vmem:[%s14503_s18 + $0x1b8] sm:$0xff]  }
 0x267   : > { %12474 = vmatprep.mubr.msk.bf16.mxu1 %vm816_vm2, %v14182_v13  ;;  %12934 = vmatprep.mubr.msk.bf16.mxu0 %vm816_vm2, %v14183_v14  ;;  %v14245_v12 = vld [vmem:[%s14503_s18 + $0xd8] sm:$0xff]   ;;  %v14246_v13 = vld [vmem:[%s14503_s18 + $0x1c0] sm:$0xff]  }
 0x268   : > { %v14247_v14 = vld [vmem:[%s14503_s18 + $0xe0] sm:$0xff]  }
 0x26e   : > { %12475 = vmatmul.mubr.msk.bf16.gmra.mrb[44].mxu1 %vm816_vm2, %v14184_v15  ;;  %12935 = vmatmul.mubr.msk.bf16.gmra.mrb[108].mxu0 %vm816_vm2, %v14185_v16 }
 0x26f   : > { %12478 = vmatprep.mubr.msk.bf16.mxu1 %vm816_vm2, %v14186_v17  ;;  %12938 = vmatprep.mubr.msk.bf16.mxu0 %vm816_vm2, %v14187_v18  ;;  %v14248_v17 = vld [vmem:[%s14503_s18 + $0x1c8] sm:$0xff]  }
 0x276   : > { %12479 = vmatmul.mubr.msk.bf16.gmra.mrb[48].mxu1 %vm816_vm2, %v14188_v19  ;;  %12939 = vmatmul.mubr.msk.bf16.gmra.mrb[112].mxu0 %vm816_vm2, %v14189_v20  ;;  %v14249_v19 = vld [vmem:[%s14503_s18 + $0xe8] sm:$0xff]   ;;  %v14250_v20 = vld [vmem:[%s14503_s18 + $0x1d0] sm:$0xff]  }
 0x277   : > { %12482 = vmatprep.mubr.msk.bf16.mxu1 %vm816_vm2, %v14190_v22  ;;  %12942 = vmatprep.mubr.msk.bf16.mxu0 %vm816_vm2, %v14191_v23  ;;  %v14251_v23 = vld [vmem:[%s14503_s18 + $0xf0] sm:$0xff]  }
 0x27e   : > { %12483 = vmatmul.mubr.msk.bf16.gmra.mrb[52].mxu1 %vm816_vm2, %v14192_v25  ;;  %12943 = vmatmul.mubr.msk.bf16.gmra.mrb[116].mxu0 %vm816_vm2, %v14193_v26 }
 0x27f   : > { %12486 = vmatprep.mubr.msk.bf16.mxu1 %vm816_vm2, %v14194_v27  ;;  %12946 = vmatprep.mubr.msk.bf16.mxu0 %vm816_vm2, %v14195_v28  ;;  %v14252_v27 = vld [vmem:[%s14503_s18 + $0x1d8] sm:$0xff]  }
 0x286   : > { %12487 = vmatmul.mubr.msk.bf16.gmra.mrb[56].mxu1 %vm816_vm2, %v14196_v30  ;;  %12947 = vmatmul.mubr.msk.bf16.gmra.mrb[120].mxu0 %vm816_vm2, %v14197_v31  ;;  %v14253_v30 = vld [vmem:[%s14503_s18 + $0xf8] sm:$0xff]   ;;  %v14254_v31 = vld [vmem:[%s14503_s18 + $0x1e0] sm:$0xff]  }
 0x287   : > { %12490 = vmatprep.mubr.msk.bf16.mxu1 %vm816_vm2, %v14198_v21  ;;  %12950 = vmatprep.mubr.msk.bf16.mxu0 %vm816_vm2, %v14199_v32  ;;  %v14255_v32 = vld [vmem:[%s14503_s18 + $0x100] sm:$0xff]  }
 0x28e   : > { %12491 = vmatmul.mubr.msk.bf16.gmra.mrb[60].mxu1 %vm816_vm2, %v14200_v33  ;;  %12951 = vmatmul.mubr.msk.bf16.gmra.mrb[124].mxu0 %vm816_vm2, %v14201_v34 }
 0x28f   : > { %12494 = vmatprep.mubr.msk.bf16.mxu1 %vm816_vm2, %v14202_v35  ;;  %12958 = vmatprep.mubr.msk.bf16.mxu0 %vm816_vm2, %v14203_v36  ;;  %v14256_v35 = vld [vmem:[%s14503_s18 + $0x1e8] sm:$0xff]  }
 0x296   : > { %12495 = vmatmul.mubr.msk.bf16.gmra.mrb[64].mxu1 %vm816_vm2, %v14204_v24  ;;  %12959 = vmatmul.mubr.msk.bf16.vlgmr.msra.gmra.mrb[0].mxu0 %vm816_vm2, %v14205_v37  ;;  %v14257_v24 = vld [vmem:[%s14503_s18 + $0x108] sm:$0xff]   ;;  %v14258_v37 = vld [vmem:[%s14503_s18 + $0x1f0] sm:$0xff]  }
 0x297   : > { %12498 = vmatprep.mubr.msk.bf16.mxu1 %vm816_vm2, %v14206_v38  ;;  %12962 = vmatprep.mubr.msk.bf16.mxu0 %vm816_vm2, %v14207_v39  ;;  %v14259_v39 = vld [vmem:[%s14503_s18 + $0x110] sm:$0xff]  }
 0x29e   : > { %12499 = vmatmul.mubr.msk.bf16.gmra.mrb[68].mxu1 %vm816_vm2, %v14208_v40  ;;  %12963 = vmatmul.mubr.msk.bf16.gmra.mrb[4].mxu0 %vm816_vm2, %v14209_v6 }
 0x29f   : > { %12502 = vmatprep.mubr.msk.bf16.mxu1 %vm816_vm2, %v14210_v29  ;;  %12966 = vmatprep.mubr.msk.bf16.mxu0 %vm816_vm2, %v14211_v41  ;;  %v14260_v29 = vld [vmem:[%s14503_s18 + $0x1f8] sm:$0xff]  }
 0x2a6   : > { %12503 = vmatmul.mubr.msk.bf16.gmra.mrb[72].mxu1 %vm816_vm2, %v14212_v42  ;;  %12967 = vmatmul.mubr.msk.bf16.gmra.mrb[8].mxu0 %vm816_vm2, %v14213_v43  ;;  %v14261_v42 = vld [vmem:[%s14503_s18 + $0x118] sm:$0xff]   ;;  %v14262_v43 = vld [vmem:[%s14503_s18 + $0x200] sm:$0xff]  }
 0x2a7   : > { %12506 = vmatprep.mubr.msk.bf16.mxu1 %vm816_vm2, %v14214_v44  ;;  %12970 = vmatprep.mubr.msk.bf16.mxu0 %vm816_vm2, %v14215_v45  ;;  %v14263_v45 = vld [vmem:[%s14503_s18 + $0x120] sm:$0xff]  }
 0x2ae   : > { %12507 = vmatmul.mubr.msk.bf16.gmra.mrb[76].mxu1 %vm816_vm2, %v14216_v9  ;;  %12971 = vmatmul.mubr.msk.bf16.gmra.mrb[12].mxu0 %vm816_vm2, %v14217_v46 }
 0x2af   : > { %12510 = vmatprep.mubr.msk.bf16.mxu1 %vm816_vm2, %v14218_v47  ;;  %12974 = vmatprep.mubr.msk.bf16.mxu0 %vm816_vm2, %v14219_v48  ;;  %v14264_v47 = vld [vmem:[%s14503_s18 + $0x208] sm:$0xff]  }
 0x2b6   : > { %12511 = vmatmul.mubr.msk.bf16.gmra.mrb[80].mxu1 %vm816_vm2, %v14220_v49  ;;  %12975 = vmatmul.mubr.msk.bf16.gmra.mrb[16].mxu0 %vm816_vm2, %v14221_v50  ;;  %v14265_v49 = vld [vmem:[%s14503_s18 + $0x128] sm:$0xff]   ;;  %v14266_v50 = vld [vmem:[%s14419_s11 + $0x110] sm:$0xff]  }
 0x2b7   : > { %12514 = vmatprep.mubr.msk.bf16.mxu1 %vm816_vm2, %v14222_v51  ;;  %12978 = vmatprep.mubr.msk.bf16.mxu0 %vm816_vm2, %v14223_v52  ;;  %v14267_v52 = vld [vmem:[%s14503_s18 + $0x130] sm:$0xff]  }
 0x2be   : > { %12515 = vmatmul.mubr.msk.bf16.gmra.mrb[84].mxu1 %vm816_vm2, %v14224_v53  ;;  %12979 = vmatmul.mubr.msk.bf16.gmra.mrb[20].mxu0 %vm816_vm2, %v14225_v54 }
 0x2bf   : > { %12518 = vmatprep.mubr.msk.bf16.mxu1 %vm816_vm2, %v14226_v55  ;;  %12982 = vmatprep.mubr.msk.bf16.mxu0 %vm816_vm2, %v14227_v56  ;;  %v14268_v55 = vld [vmem:[%s14419_s11 + $0x118] sm:$0xff]  }
 0x2c6   : > { %12519 = vmatmul.mubr.msk.bf16.gmra.mrb[88].mxu1 %vm816_vm2, %v14228_v57  ;;  %12983 = vmatmul.mubr.msk.bf16.gmra.mrb[24].mxu0 %vm816_vm2, %v14229_v58  ;;  %v14269_v57 = vld [vmem:[%s14503_s18 + $0x138] sm:$0xff]   ;;  %v14270_v58 = vld [vmem:[%s14419_s11 + $0x120] sm:$0xff]  }
 0x2c7   : > { %12522 = vmatprep.mubr.msk.bf16.mxu1 %vm816_vm2, %v14230_v59  ;;  %12986 = vmatprep.mubr.msk.bf16.mxu0 %vm816_vm2, %v14231_v60  ;;  %v14271_v60 = vld [vmem:[%s14503_s18 + $0x140] sm:$0xff]  }
 0x2ce   : > { %12523 = vmatmul.mubr.msk.bf16.gmra.mrb[92].mxu1 %vm816_vm2, %v14232_v61  ;;  %12987 = vmatmul.mubr.msk.bf16.gmra.mrb[28].mxu0 %vm816_vm2, %v14233_v62 }
 0x2cf   : > { %12526 = vmatprep.mubr.msk.bf16.mxu1 %vm816_vm2, %v14234_v63  ;;  %12990 = vmatprep.mubr.msk.bf16.mxu0 %vm816_vm2, %v14235_v0  ;;  %v14272_v63 = vld [vmem:[%s14419_s11 + $0x128] sm:$0xff]  }
 0x2d6   : > { %12527 = vmatmul.mubr.msk.bf16.gmra.mrb[96].mxu1 %vm816_vm2, %v14236_v1  ;;  %12991 = vmatmul.mubr.msk.bf16.gmra.mrb[32].mxu0 %vm816_vm2, %v14237_v2  ;;  %v14273_v1 = vld [vmem:[%s14503_s18 + $0x148] sm:$0xff]   ;;  %v14274_v2 = vld [vmem:[%s14419_s11 + $0x130] sm:$0xff]  }
 0x2d7   : > { %12530 = vmatprep.mubr.msk.bf16.mxu1 %vm816_vm2, %v14238_v3  ;;  %12994 = vmatprep.mubr.msk.bf16.mxu0 %vm816_vm2, %v14239_v4  ;;  %v14275_v4 = vld [vmem:[%s14503_s18 + $0x150] sm:$0xff]  }
 0x2de   : > { %12531 = vmatmul.mubr.msk.bf16.gmra.mrb[100].mxu1 %vm816_vm2, %v14240_v5  ;;  %12995 = vmatmul.mubr.msk.bf16.gmra.mrb[36].mxu0 %vm816_vm2, %v14241_v7 }
 0x2df   : > { %12534 = vmatprep.mubr.msk.bf16.mxu1 %vm816_vm2, %v14242_v8  ;;  %12998 = vmatprep.mubr.msk.bf16.mxu0 %vm816_vm2, %v14243_v10  ;;  %v14276_v8 = vld [vmem:[%s14419_s11 + $0x138] sm:$0xff]  }
 0x2e6   : > { %12535 = vmatmul.mubr.msk.bf16.gmra.mrb[104].mxu1 %vm816_vm2, %v14244_v11  ;;  %12999 = vmatmul.mubr.msk.bf16.gmra.mrb[40].mxu0 %vm816_vm2, %v14245_v12  ;;  %v14277_v11 = vld [vmem:[%s14503_s18 + $0x158] sm:$0xff]   ;;  %v14278_v12 = vld [vmem:[%s14419_s11 + $0x140] sm:$0xff]  }
 0x2e7   : > { %12538 = vmatprep.mubr.msk.bf16.mxu1 %vm816_vm2, %v14246_v13  ;;  %13002 = vmatprep.mubr.msk.bf16.mxu0 %vm816_vm2, %v14247_v14  ;;  %v14279_v14 = vld [vmem:[%s14503_s18 + $0x160] sm:$0xff]  }
 0x2e9   : > { %v15203_v15 = vpop.f32.mrb[0].mxu1 }
 0x2ea   : > { %v15205_v16 = vpop.f32.mrb[1].mxu1 }
 0x2eb   : > { %v15208_v18 = vpop.f32.mrb[2].mxu1 }
 0x2ec   : > { %v15212_v22 = vpop.f32.mrb[3].mxu1 }
 0x2ee   : > { %12539 = vmatmul.mubr.msk.bf16.gmra.mrb[108].mxu1 %vm816_vm2, %v14248_v17  ;;  %13003 = vmatmul.mubr.msk.bf16.gmra.mrb[44].mxu0 %vm816_vm2, %v14249_v19 }
 0x2ef   : > { %12542 = vmatprep.mubr.msk.bf16.mxu1 %vm816_vm2, %v14250_v20  ;;  %13006 = vmatprep.mubr.msk.bf16.mxu0 %vm816_vm2, %v14251_v23  ;;  %v14280_v20 = vld [vmem:[%s14419_s11 + $0x148] sm:$0xff]  }
 0x2f1   : > { %v15219_v25 = vpop.f32.mrb[4].mxu1 }
 0x2f2   : > { %v15221_v26 = vpop.f32.mrb[5].mxu1 }
 0x2f3   : > { %v15224_v28 = vpop.f32.mrb[6].mxu1 }
 0x2f4   : > { %v15228_v21 = vpop.f32.mrb[7].mxu1 }
 0x2f6   : > { %12543 = vmatmul.mubr.msk.bf16.gmra.mrb[112].mxu1 %vm816_vm2, %v14252_v27  ;;  %13007 = vmatmul.mubr.msk.bf16.gmra.mrb[48].mxu0 %vm816_vm2, %v14253_v30  ;;  %v14281_v27 = vld [vmem:[%s14503_s18 + $0x168] sm:$0xff]   ;;  %v14282_v30 = vld [vmem:[%s14419_s11 + $0x150] sm:$0xff]  }
 0x2f7   : > { %12546 = vmatprep.mubr.msk.bf16.mxu1 %vm816_vm2, %v14254_v31  ;;  %13010 = vmatprep.mubr.msk.bf16.mxu0 %vm816_vm2, %v14255_v32  ;;  %v14283_v32 = vld [vmem:[%s14503_s18 + $0x170] sm:$0xff]  }
 0x2f9   : > { %v15235_v33 = vpop.f32.mrb[8].mxu1 }
 0x2fa   : > { %v15237_v34 = vpop.f32.mrb[9].mxu1 }
 0x2fb   : > { %v15240_v36 = vpop.f32.mrb[10].mxu1 }
 0x2fc   : > { %v15244_v38 = vpop.f32.mrb[11].mxu1 }
 0x2fe   : > { %12547 = vmatmul.mubr.msk.bf16.gmra.mrb[116].mxu1 %vm816_vm2, %v14256_v35  ;;  %13011 = vmatmul.mubr.msk.bf16.gmra.mrb[52].mxu0 %vm816_vm2, %v14257_v24 }
 0x2ff   : > { %12550 = vmatprep.mubr.msk.bf16.mxu1 %vm816_vm2, %v14258_v37  ;;  %13014 = vmatprep.mubr.msk.bf16.mxu0 %vm816_vm2, %v14259_v39  ;;  %v14284_v37 = vld [vmem:[%s14419_s11 + $0x158] sm:$0xff]  }
 0x301   : > { %v15251_v40 = vpop.f32.mrb[12].mxu1 }
 0x302   : > { %v15253_v6 = vpop.f32.mrb[13].mxu1 }
 0x303   : > { %v15256_v41 = vpop.f32.mrb[14].mxu1 }
 0x304   : > { %v15260_v44 = vpop.f32.mrb[15].mxu1 }
 0x306   : > { %12551 = vmatmul.mubr.msk.bf16.gmra.mrb[120].mxu1 %vm816_vm2, %v14260_v29  ;;  %13015 = vmatmul.mubr.msk.bf16.gmra.mrb[56].mxu0 %vm816_vm2, %v14261_v42  ;;  %v14285_v29 = vld [vmem:[%s14503_s18 + $0x178] sm:$0xff]   ;;  %v14286_v42 = vld [vmem:[%s14419_s11 + $0x160] sm:$0xff]  }
 0x307   : > { %12554 = vmatprep.mubr.msk.bf16.mxu1 %vm816_vm2, %v14262_v43  ;;  %13018 = vmatprep.mubr.msk.bf16.mxu0 %vm816_vm2, %v14263_v45  ;;  %v14287_v45 = vld [vmem:[%s14503_s18 + $0x180] sm:$0xff]  }
 0x309   : > { %v15267_v9 = vpop.f32.mrb[16].mxu1 }
 0x30a   : > { %v15269_v46 = vpop.f32.mrb[17].mxu1 }
 0x30b   : > { %v15272_v48 = vpop.f32.mrb[18].mxu1 }
 0x30c   : > { %v15276_v51 = vpop.f32.mrb[19].mxu1 }
 0x30e   : > { %12555 = vmatmul.mubr.msk.bf16.gmra.mrb[124].mxu1 %vm816_vm2, %v14264_v47  ;;  %13019 = vmatmul.mubr.msk.bf16.gmra.mrb[60].mxu0 %vm816_vm2, %v14265_v49 }
 0x30f   : > { %12626 = vmatprep.mubr.msk.bf16.mxu1 %vm816_vm2, %v14266_v50  ;;  %13022 = vmatprep.mubr.msk.bf16.mxu0 %vm816_vm2, %v14267_v52  ;;  %v14288_v50 = vld [vmem:[%s14419_s11 + $0x168] sm:$0xff]  }
 0x311   : > { %v15283_v53 = vpop.f32.mrb[20].mxu1 }
 0x312   : > { %v15285_v54 = vpop.f32.mrb[21].mxu1 }
 0x313   : > { %v15288_v56 = vpop.f32.mrb[22].mxu1 }
 0x314   : > { %v15292_v59 = vpop.f32.mrb[23].mxu1 }
 0x316   : > { %12627 = vmatmul.mubr.msk.bf16.vlgmr.msra.gmra.mrb[64].mxu1 %vm816_vm2, %v14268_v55  ;;  %13023 = vmatmul.mubr.msk.bf16.gmra.mrb[64].mxu0 %vm816_vm2, %v14269_v57  ;;  %v14289_v55 = vld [vmem:[%s14503_s18 + $0x188] sm:$0xff]   ;;  %v14290_v57 = vld [vmem:[%s14419_s11 + $0x170] sm:$0xff]  }
 0x317   : > { %12630 = vmatprep.mubr.msk.bf16.mxu1 %vm816_vm2, %v14270_v58  ;;  %13026 = vmatprep.mubr.msk.bf16.mxu0 %vm816_vm2, %v14271_v60  ;;  %v14291_v60 = vld [vmem:[%s14503_s18 + $0x190] sm:$0xff]  }
 0x319   : > { %v15299_v61 = vpop.f32.mrb[24].mxu1 }
 0x31a   : > { %v15301_v62 = vpop.f32.mrb[25].mxu1 }
 0x31b   : > { %v15304_v0 = vpop.f32.mrb[26].mxu1 }
 0x31c   : > { %v15308_v3 = vpop.f32.mrb[27].mxu1 }
 0x31e   : > { %12631 = vmatmul.mubr.msk.bf16.gmra.mrb[68].mxu1 %vm816_vm2, %v14272_v63  ;;  %13027 = vmatmul.mubr.msk.bf16.gmra.mrb[68].mxu0 %vm816_vm2, %v14273_v1 }
 0x31f   : > { %12634 = vmatprep.mubr.msk.bf16.mxu1 %vm816_vm2, %v14274_v2  ;;  %13030 = vmatprep.mubr.msk.bf16.mxu0 %vm816_vm2, %v14275_v4  ;;  %v14292_v2 = vld [vmem:[%s14419_s11 + $0x178] sm:$0xff]  }
 0x321   : > { %v15315_v5 = vpop.f32.mrb[28].mxu1 }
 0x322   : > { %v15317_v7 = vpop.f32.mrb[29].mxu1 }
 0x323   : > { %v15320_v10 = vpop.f32.mrb[30].mxu1 }
 0x324   : > { %v15324_v13 = vpop.f32.mrb[31].mxu1 }
 0x326   : > { %12635 = vmatmul.mubr.msk.bf16.gmra.mrb[72].mxu1 %vm816_vm2, %v14276_v8  ;;  %13031 = vmatmul.mubr.msk.bf16.gmra.mrb[72].mxu0 %vm816_vm2, %v14277_v11  ;;  %v14293_v8 = vld [vmem:[%s14503_s18 + $0x198] sm:$0xff]   ;;  %v14294_v11 = vld [vmem:[%s14419_s11 + $0x180] sm:$0xff]  }
 0x327   : > { %12638 = vmatprep.mubr.msk.bf16.mxu1 %vm816_vm2, %v14278_v12  ;;  %13034 = vmatprep.mubr.msk.bf16.mxu0 %vm816_vm2, %v14279_v14  ;;  %v14295_v14 = vld [vmem:[%s14503_s18 + $0x1a0] sm:$0xff]  }
 0x329   : > { %v15331_v17 = vpop.f32.mrb[32].mxu1 }
 0x32a   : > { %v15333_v19 = vpop.f32.mrb[33].mxu1 }
 0x32b   : > { %v15336_v23 = vpop.f32.mrb[34].mxu1 }
 0x32c   : > { %v15340_v31 = vpop.f32.mrb[35].mxu1 }
 0x32e   : > { %12639 = vmatmul.mubr.msk.bf16.gmra.mrb[76].mxu1 %vm816_vm2, %v14280_v20  ;;  %13035 = vmatmul.mubr.msk.bf16.gmra.mrb[76].mxu0 %vm816_vm2, %v14281_v27 }
 0x32f   : > { %12642 = vmatprep.mubr.msk.bf16.mxu1 %vm816_vm2, %v14282_v30  ;;  %13038 = vmatprep.mubr.msk.bf16.mxu0 %vm816_vm2, %v14283_v32  ;;  %v14296_v30 = vld [vmem:[%s14419_s11 + $0x188] sm:$0xff]  }
 0x331   : > { %v15347_v35 = vpop.f32.mrb[36].mxu1 }
 0x332   : > { %v15349_v24 = vpop.f32.mrb[37].mxu1 }
 0x333   : > { %v15352_v39 = vpop.f32.mrb[38].mxu1 }
 0x334   : > { %v15356_v43 = vpop.f32.mrb[39].mxu1 }
 0x336   : > { %12643 = vmatmul.mubr.msk.bf16.gmra.mrb[80].mxu1 %vm816_vm2, %v14284_v37  ;;  %13039 = vmatmul.mubr.msk.bf16.gmra.mrb[80].mxu0 %vm816_vm2, %v14285_v29  ;;  %v14297_v37 = vld [vmem:[%s14503_s18 + $0x1a8] sm:$0xff]   ;;  %v14298_v29 = vld [vmem:[%s14419_s11 + $0x190] sm:$0xff]  }
 0x337   : > { %12646 = vmatprep.mubr.msk.bf16.mxu1 %vm816_vm2, %v14286_v42  ;;  %13042 = vmatprep.mubr.msk.bf16.mxu0 %vm816_vm2, %v14287_v45  ;;  %v14299_v45 = vld [vmem:[%s14503_s18 + $0x1b0] sm:$0xff]  }
 0x339   : > { %v15363_v47 = vpop.f32.mrb[40].mxu1 }
 0x33a   : > { %v15365_v49 = vpop.f32.mrb[41].mxu1 }
 0x33b   : > { %v15368_v52 = vpop.f32.mrb[42].mxu1 }
 0x33c   : > { %16113 = vst [vmem:[#allocation3_spill] sm:$0xff] %v15368_v52  ;;  %v15372_v58 = vpop.f32.mrb[43].mxu1 }
 0x33d   : > { %16114 = vst [vmem:[#allocation4_spill] sm:$0xff] %v15372_v58 }
 0x33e   : > { %12647 = vmatmul.mubr.msk.bf16.gmra.mrb[84].mxu1 %vm816_vm2, %v14288_v50  ;;  %13043 = vmatmul.mubr.msk.bf16.gmra.mrb[84].mxu0 %vm816_vm2, %v14289_v55 }
 0x33f   : > { %12650 = vmatprep.mubr.msk.bf16.mxu1 %vm816_vm2, %v14290_v57  ;;  %13046 = vmatprep.mubr.msk.bf16.mxu0 %vm816_vm2, %v14291_v60  ;;  %v14300_v57 = vld [vmem:[%s14419_s11 + $0x198] sm:$0xff]  }
 0x341   : > { %v15379_v63 = vpop.f32.mrb[44].mxu1 }
 0x342   : > { %16115 = vst [vmem:[#allocation5_spill] sm:$0xff] %v15379_v63  ;;  %v15381_v1 = vpop.f32.mrb[45].mxu1 }
 0x343   : > { %16116 = vst [vmem:[#allocation6_spill] sm:$0xff] %v15381_v1  ;;  %v15384_v4 = vpop.f32.mrb[46].mxu1 }
 0x344   : > { %16117 = vst [vmem:[#allocation7_spill] sm:$0xff] %v15384_v4  ;;  %v15388_v12 = vpop.f32.mrb[47].mxu1 }
 0x345   : > { %16118 = vst [vmem:[#allocation8_spill] sm:$0xff] %v15388_v12  ;;  %v14319_v12 = vld [vmem:[%s14503_s18 + $0x200] sm:$0xff]  }
 0x346   : > { %12651 = vmatmul.mubr.msk.bf16.gmra.mrb[88].mxu1 %vm816_vm2, %v14292_v2  ;;  %13047 = vmatmul.mubr.msk.bf16.gmra.mrb[88].mxu0 %vm816_vm2, %v14293_v8  ;;  %v14301_v2 = vld [vmem:[%s14503_s18 + $0x1b8] sm:$0xff]   ;;  %v14302_v8 = vld [vmem:[%s14419_s11 + $0x1a0] sm:$0xff]  }
 0x347   : > { %12654 = vmatprep.mubr.msk.bf16.mxu1 %vm816_vm2, %v14294_v11  ;;  %13050 = vmatprep.mubr.msk.bf16.mxu0 %vm816_vm2, %v14295_v14  ;;  %v14303_v14 = vld [vmem:[%s14503_s18 + $0x1c0] sm:$0xff]  }
 0x349   : > { %v15395_v20 = vpop.f32.mrb[48].mxu1 }
 0x34a   : > { %16119 = vst [vmem:[#allocation9_spill] sm:$0xff] %v15395_v20  ;;  %v15397_v27 = vpop.f32.mrb[49].mxu1 }
 0x34b   : > { %16120 = vst [vmem:[#allocation10_spill] sm:$0xff] %v15397_v27  ;;  %v15400_v32 = vpop.f32.mrb[50].mxu1 }
 0x34c   : > { %16121 = vst [vmem:[#allocation11_spill] sm:$0xff] %v15400_v32  ;;  %v15404_v42 = vpop.f32.mrb[51].mxu1 }
 0x34d   : > { %16122 = vst [vmem:[#allocation12_spill] sm:$0xff] %v15404_v42 }
 0x34e   : > { %12655 = vmatmul.mubr.msk.bf16.gmra.mrb[92].mxu1 %vm816_vm2, %v14296_v30  ;;  %13051 = vmatmul.mubr.msk.bf16.gmra.mrb[92].mxu0 %vm816_vm2, %v14297_v37 }
 0x34f   : > { %12658 = vmatprep.mubr.msk.bf16.mxu1 %vm816_vm2, %v14298_v29  ;;  %13054 = vmatprep.mubr.msk.bf16.mxu0 %vm816_vm2, %v14299_v45  ;;  %v14304_v29 = vld [vmem:[%s14419_s11 + $0x1a8] sm:$0xff]  }
 0x351   : > { %v15411_v50 = vpop.f32.mrb[52].mxu1 }
 0x352   : > { %16123 = vst [vmem:[#allocation13_spill] sm:$0xff] %v15411_v50  ;;  %v15413_v55 = vpop.f32.mrb[53].mxu1 }
 0x353   : > { %16124 = vst [vmem:[#allocation14_spill] sm:$0xff] %v15413_v55  ;;  %v15416_v60 = vpop.f32.mrb[54].mxu1  ;;  %v14314_v55 = vld [vmem:[%s14419_s11 + $0x1d0] sm:$0xff]  }
 0x354   : > { %16125 = vst [vmem:[#allocation15_spill] sm:$0xff] %v15416_v60  ;;  %v15420_v11 = vpop.f32.mrb[55].mxu1  ;;  %v14306_v60 = vld [vmem:[%s14419_s11 + $0x1b0] sm:$0xff]  }
 0x355   : > { %16126 = vst [vmem:[#allocation16_spill] sm:$0xff] %v15420_v11  ;;  %v14305_v11 = vld [vmem:[%s14503_s18 + $0x1c8] sm:$0xff]  }
 0x356   : > { %12659 = vmatmul.mubr.msk.bf16.gmra.mrb[96].mxu1 %vm816_vm2, %v14300_v57  ;;  %13055 = vmatmul.mubr.msk.bf16.gmra.mrb[96].mxu0 %vm816_vm2, %v14301_v2  ;;  %v14307_v2 = vld [vmem:[%s14503_s18 + $0x1d0] sm:$0xff]  }
 0x357   : > { %12662 = vmatprep.mubr.msk.bf16.mxu1 %vm816_vm2, %v14302_v8  ;;  %13058 = vmatprep.mubr.msk.bf16.mxu0 %vm816_vm2, %v14303_v14 }
 0x359   : > { %v15427_v30 = vpop.f32.mrb[56].mxu1 }
 0x35a   : > { %16127 = vst [vmem:[#allocation17_spill] sm:$0xff] %v15427_v30  ;;  %v15429_v37 = vpop.f32.mrb[57].mxu1  ;;  %v14310_v30 = vld [vmem:[%s14419_s11 + $0x1c0] sm:$0xff]  }
 0x35b   : > { %16128 = vst [vmem:[#allocation18_spill] sm:$0xff] %v15429_v37  ;;  %v15432_v45 = vpop.f32.mrb[58].mxu1 }
 0x35c   : > { %16129 = vst [vmem:[#allocation19_spill] sm:$0xff] %v15432_v45  ;;  %v15436_v57 = vpop.f32.mrb[59].mxu1  ;;  %v14308_v45 = vld [vmem:[%s14419_s11 + $0x1b8] sm:$0xff]  }
 0x35d   : > { %16130 = vst [vmem:[#allocation20_spill] sm:$0xff] %v15436_v57  ;;  %v14309_v57 = vld [vmem:[%s14503_s18 + $0x1d8] sm:$0xff]  }
 0x35e   : > { %12663 = vmatmul.mubr.msk.bf16.gmra.mrb[100].mxu1 %vm816_vm2, %v14304_v29  ;;  %13059 = vmatmul.mubr.msk.bf16.gmra.mrb[100].mxu0 %vm816_vm2, %v14305_v11  ;;  %v14311_v11 = vld [vmem:[%s14503_s18 + $0x1e0] sm:$0xff]  }
 0x35f   : > { %12666 = vmatprep.mubr.msk.bf16.mxu1 %vm816_vm2, %v14306_v60  ;;  %13062 = vmatprep.mubr.msk.bf16.mxu0 %vm816_vm2, %v14307_v2  ;;  %v15462_v2 = vld [vmem:[%s16111_s3] ss:$0 sm:$0xff] }
 0x361   : > { %v15443_v8 = vpop.f32.mrb[60].mxu1 }
 0x362   : > { %16131 = vst [vmem:[#allocation21_spill] sm:$0xff] %v15443_v8  ;;  %v15445_v14 = vpop.f32.mrb[61].mxu1 }
 0x363   : > { %16132 = vst [vmem:[#allocation22_spill] sm:$0xff] %v15445_v14  ;;  %v15448_v37 = vpop.f32.mrb[62].mxu1 }
 0x364   : > { %16133 = vst [vmem:[#allocation23_spill] sm:$0xff] %v15448_v37  ;;  %v15452_v29 = vpop.f32.mrb[63].mxu1  ;;  %v14312_v37 = vld [vmem:[%s14419_s11 + $0x1c8] sm:$0xff]  }
 0x365   : > { %16134 = vst [vmem:[#allocation24_spill] sm:$0xff] %v15452_v29  ;;  %v14313_v29 = vld [vmem:[%s14503_s18 + $0x1e8] sm:$0xff]  }
 0x366   : > { %12667 = vmatmul.mubr.msk.bf16.gmra.mrb[104].mxu1 %vm816_vm2, %v14308_v45  ;;  %13063 = vmatmul.mubr.msk.bf16.gmra.mrb[104].mxu0 %vm816_vm2, %v14309_v57  ;;  %v14315_v57 = vld [vmem:[%s14503_s18 + $0x1f0] sm:$0xff]  }
 0x367   : > { %12670 = vmatprep.mubr.msk.bf16.mxu1 %vm816_vm2, %v14310_v30  ;;  %13066 = vmatprep.mubr.msk.bf16.mxu0 %vm816_vm2, %v14311_v11 }
 0x369   : > { %v12960_v60 = vpop.f32.mrb[0].mxu0 }
 0x36a   : > { %v13090_v14 = vadd.f32 %v12960_v60, %v15203_v15  ;;  %v8636_v8 = vpop.f32.mrb[1].mxu0 }
 0x36b   : > { %v13091_v45 = vadd.f32 %v8636_v8, %v15205_v16  ;;  %v12961_v50 = vpop.f32.mrb[2].mxu0 }
 0x36c   : > { %v9284_v30 = vadd.f32 %v13090_v14, %v15462_v2  ;;  %v13092_v11 = vadd.f32 %v12961_v50, %v15208_v18  ;;  %v8639_v42 = vpop.f32.mrb[3].mxu0 }
 0x36d   : > { %v9282_v32 = vadd.f32 %v13091_v45, %v15462_v2  ;;  %v13093_v27 = vadd.f32 %v8639_v42, %v15212_v22 }
 0x36e   : > { %12671 = vmatmul.mubr.msk.bf16.gmra.mrb[108].mxu1 %vm816_vm2, %v14312_v37  ;;  %v9412_v15 = vmax.f32 %v9284_v30, 0.0  ;;  %v9285_v60 = vadd.f32 %v13092_v11, %v15462_v2  ;;  %13067 = vmatmul.mubr.msk.bf16.gmra.mrb[108].mxu0 %vm816_vm2, %v14313_v29  ;;  %v14316_v37 = vld [vmem:[%s14419_s11 + $0x1d8] sm:$0xff]   ;;  %v14318_v29 = vld [vmem:[%s14419_s11 + $0x1e0] sm:$0xff]  }
 0x36f   : > { %12674 = vmatprep.mubr.msk.bf16.mxu1 %vm816_vm2, %v14314_v55  ;;  %v9410_v16 = vmax.f32 %v9282_v32, 0.0  ;;  %v9283_v18 = vadd.f32 %v13093_v27, %v15462_v2  ;;  %13070 = vmatprep.mubr.msk.bf16.mxu0 %vm816_vm2, %v14315_v57  ;;  %v14317_v11 = vld [vmem:[%s14503_s18 + $0x1f8] sm:$0xff]  }
 0x370   : > { %v9413_v50 = vmax.f32 %v9285_v60, 0.0  ;;  %v9670_v8 = vrot.slane %v9412_v15, 1 }
 0x371   : > { %v9411_v22 = vmax.f32 %v9283_v18, 0.0  ;;  %v12964_v42 = vpop.f32.mrb[4].mxu0  ;;  %v9667_v20 = vrot.slane %v9410_v16, 1 }
 0x372   : > { %v9672_v14 = vrot.slane %v9413_v50, 1  ;;  %v13094_v45 = vadd.f32 %v12964_v42, %v15219_v25  ;;  %v8652_v30 = vpop.f32.mrb[5].mxu0 }
 0x373   : > { %v9668_v55 = vrot.slane %v9411_v22, 1  ;;  %v13095_v32 = vadd.f32 %v8652_v30, %v15221_v26  ;;  %v12965_v27 = vpop.f32.mrb[6].mxu0 }
 0x374   : > { %v9673_v57 = vsel %vm9666_vm3, %v9670_v8, %v9672_v14  ;;  %v9288_v60 = vadd.f32 %v13094_v45, %v15462_v2  ;;  %v13096_v18 = vadd.f32 %v12965_v27, %v15224_v28  ;;  %v8655_v4 = vpop.f32.mrb[7].mxu0 }
 0x375   : > { %v10052_v1 = vmax.f32 %v9412_v15, %v9673_v57  ;;  %v9669_v25 = vsel %vm9666_vm3, %v9667_v20, %v9668_v55  ;;  %v9671_v42 = vsel %vm9666_vm3, %v9668_v55, %v9670_v8  ;;  %v9286_v63 = vadd.f32 %v13095_v32, %v15462_v2  ;;  %v14320_v8 = vld [vmem:[%s14419_s11 + $0x1e8] sm:$0xff]  }
 0x376   : > { %12675 = vmatmul.mubr.msk.bf16.gmra.mrb[112].mxu1 %vm816_vm2, %v14316_v37  ;;  %v10050_v26 = vmax.f32 %v9410_v16, %v9669_v25  ;;  %v10051_v30 = vmax.f32 %v9411_v22, %v9671_v42  ;;  %v9416_v58 = vmax.f32 %v9288_v60, 0.0  ;;  %v15494_v52 = vadd.f32 %v13096_v18, %v15462_v2  ;;  %13071 = vmatmul.mubr.msk.bf16.gmra.mrb[112].mxu0 %vm816_vm2, %v14317_v11 }
 0x377   : > { %12678 = vmatprep.mubr.msk.bf16.mxu1 %vm816_vm2, %v14318_v29  ;;  %10181 = vst.msk [vmem:[#allocation2 + $0x10] sm:$0xff] %vm10178_vm4, %v10052_v1  ;;  %v9414_v28 = vmax.f32 %v9286_v63, 0.0  ;;  %v13097_v20 = vadd.f32 %v8655_v4, %v15228_v21  ;;  %13074 = vmatprep.mubr.msk.bf16.mxu0 %vm816_vm2, %v14319_v12  ;;  %v14321_v4 = vld [vmem:[%s14503_s18 + $0x208] sm:$0xff]   ;;  %v14322_v12 = vld [vmem:[%s14419_s11 + $0x1f0] sm:$0xff]  }
 0x378   : > { %10179 = vst.msk [vmem:[#allocation2] sm:$0xff] %vm10178_vm4, %v10050_v26  ;;  %10180 = vst.msk [vmem:[#allocation2 + $0x8] sm:$0xff] %vm10178_vm4, %v10051_v30  ;;  %v9417_v15 = vmax.f32 %v15494_v52, 0.0  ;;  %v9678_v1 = vrot.slane %v9416_v58, 1  ;;  %v14323_v52 = vld [vmem:[%s14503_s18 + $0x210] sm:$0xff]  }
 0x379   : > { %v9674_v16 = vrot.slane %v9414_v28, 1  ;;  %v9287_v22 = vadd.f32 %v13097_v20, %v15462_v2  ;;  %v12968_v37 = vpop.f32.mrb[8].mxu0 }
 0x37a   : > { %v9680_v45 = vrot.slane %v9417_v15, 1  ;;  %v13098_v63 = vadd.f32 %v12968_v37, %v15235_v33  ;;  %v8668_v21 = vpop.f32.mrb[9].mxu0 }
 0x37b   : > { %v9675_v11 = vsel %vm9666_vm3, %v9672_v14, %v9674_v16  ;;  %v9415_v29 = vmax.f32 %v9287_v22, 0.0  ;;  %v13099_v55 = vadd.f32 %v8668_v21, %v15237_v34  ;;  %v12969_v32 = vpop.f32.mrb[10].mxu0  ;;  %v14324_v21 = vld [vmem:[%s14419_s11 + $0x1f8] sm:$0xff]  }
 0x37c   : > { %v10053_v27 = vmax.f32 %v9413_v50, %v9675_v11  ;;  %v9681_v57 = vsel %vm9666_vm3, %v9678_v1, %v9680_v45  ;;  %v9292_v60 = vadd.f32 %v13098_v63, %v15462_v2  ;;  %v13100_v33 = vadd.f32 %v12969_v32, %v15240_v36  ;;  %v8671_v18 = vpop.f32.mrb[11].mxu0  ;;  %v14325_v11 = vld [vmem:[%s14503_s18 + $0x218] sm:$0xff]  }
 0x37d   : > { %v10056_v25 = vmax.f32 %v9416_v58, %v9681_v57  ;;  %v9676_v42 = vrot.slane %v9415_v29, 1  ;;  %v9290_v14 = vadd.f32 %v13099_v55, %v15462_v2  ;;  %v13101_v34 = vadd.f32 %v8671_v18, %v15244_v38  ;;  %v14327_v57 = vld [vmem:[%s14503_s18 + $0x220] sm:$0xff]  }
 0x37e   : > { %12679 = vmatmul.mubr.msk.bf16.gmra.mrb[116].mxu1 %vm816_vm2, %v14320_v8  ;;  %10182 = vst.msk [vmem:[#allocation2 + $0x18] sm:$0xff] %vm10178_vm4, %v10053_v27  ;;  %v9420_v50 = vmax.f32 %v9292_v60, 0.0  ;;  %v15524_v26 = vadd.f32 %v13100_v33, %v15462_v2  ;;  %13075 = vmatmul.mubr.msk.bf16.gmra.mrb[116].mxu0 %vm816_vm2, %v14321_v4 }
 0x37f   : > { %12682 = vmatprep.mubr.msk.bf16.mxu1 %vm816_vm2, %v14322_v12  ;;  %10185 = vst.msk [vmem:[#allocation2 + $0x30] sm:$0xff] %vm10178_vm4, %v10056_v25  ;;  %v9677_v36 = vsel %vm9666_vm3, %v9674_v16, %v9676_v42  ;;  %v9679_v58 = vsel %vm9666_vm3, %v9676_v42, %v9678_v1  ;;  %v9418_v38 = vmax.f32 %v9290_v14, 0.0  ;;  %v9291_v30 = vadd.f32 %v13101_v34, %v15462_v2 }
 0x380   : > { %13078 = vmatprep.mubr.msk.bf16.mxu0 %vm816_vm2, %v14323_v52  ;;  %v10054_v20 = vmax.f32 %v9414_v28, %v9677_v36  ;;  %v10055_v22 = vmax.f32 %v9415_v29, %v9679_v58  ;;  %v9421_v37 = vmax.f32 %v15524_v26, 0.0  ;;  %v9686_v1 = vrot.slane %v9420_v50, 1  ;;  %v14326_v29 = vld [vmem:[%s14419_s11 + $0x200] sm:$0xff]  }
 0x381   : > { %v9682_v8 = vrot.slane %v9418_v38, 1  ;;  %v9419_v63 = vmax.f32 %v9291_v30, 0.0  ;;  %v12972_v16 = vpop.f32.mrb[12].mxu0  ;;  %v14328_v30 = vld [vmem:[%s14419_s11 + $0x208] sm:$0xff]  }
 0x382   : > { %10183 = vst.msk [vmem:[#allocation2 + $0x20] sm:$0xff] %vm10178_vm4, %v10054_v20  ;;  %10184 = vst.msk [vmem:[#allocation2 + $0x28] sm:$0xff] %vm10178_vm4, %v10055_v22  ;;  %v9688_v4 = vrot.slane %v9421_v37, 1  ;;  %v13102_v28 = vadd.f32 %v12972_v16, %v15251_v40  ;;  %v8684_v12 = vpop.f32.mrb[13].mxu0  ;;  %v10308_v20 = vld [vmem:[#allocation2] ss:$2 sm:$0xff] }
 0x383   : > { %v9683_v55 = vsel %vm9666_vm3, %v9680_v45, %v9682_v8  ;;  %v9684_v32 = vrot.slane %v9419_v63, 1  ;;  %v13103_v52 = vadd.f32 %v8684_v12, %v15253_v6  ;;  %v12973_v27 = vpop.f32.mrb[14].mxu0 }
 0x384   : > { %v10057_v60 = vmax.f32 %v9417_v15, %v9683_v55  ;;  %v9689_v33 = vsel %vm9666_vm3, %v9686_v1, %v9688_v4  ;;  %v9296_v18 = vadd.f32 %v13102_v28, %v15462_v2  ;;  %v13104_v40 = vadd.f32 %v12973_v27, %v15256_v41  ;;  %v8687_v25 = vpop.f32.mrb[15].mxu0 }
 0x385   : > { %v10060_v42 = vmax.f32 %v9420_v50, %v9689_v33  ;;  %v9685_v45 = vsel %vm9666_vm3, %v9682_v8, %v9684_v32  ;;  %v9687_v14 = vsel %vm9666_vm3, %v9684_v32, %v9686_v1  ;;  %v9294_v6 = vadd.f32 %v13103_v52, %v15462_v2 }
 0x386   : > { %12683 = vmatmul.mubr.msk.bf16.gmra.mrb[120].mxu1 %vm816_vm2, %v14324_v21  ;;  %10186 = vst.msk [vmem:[#allocation2 + $0x38] sm:$0xff] %vm10178_vm4, %v10057_v60  ;;  %v10058_v15 = vmax.f32 %v9418_v38, %v9685_v45  ;;  %v10059_v34 = vmax.f32 %v9419_v63, %v9687_v14  ;;  %v9424_v36 = vmax.f32 %v9296_v18, 0.0  ;;  %v15560_v58 = vadd.f32 %v13104_v40, %v15462_v2  ;;  %v10310_v18 = vld [vmem:[#allocation2 + $0x10] ss:$2 sm:$0xff] }
 0x387   : > { %13079 = vmatmul.mubr.msk.bf16.gmra.mrb[120].mxu0 %vm816_vm2, %v14325_v11  ;;  %12686 = vmatprep.mubr.msk.bf16.mxu1 %vm816_vm2, %v14326_v29  ;;  %10189 = vst.msk [vmem:[#allocation2 + $0x50] sm:$0xff] %vm10178_vm4, %v10060_v42  ;;  %v9422_v41 = vmax.f32 %v9294_v6, 0.0  ;;  %v13105_v50 = vadd.f32 %v8687_v25, %v15260_v44  ;;  %v14329_v11 = vld [vmem:[%s14503_s18 + $0x228] sm:$0xff]  }
 0x388   : > { %13082 = vmatprep.mubr.msk.bf16.mxu0 %vm816_vm2, %v14327_v57  ;;  %10187 = vst.msk [vmem:[#allocation2 + $0x40] sm:$0xff] %vm10178_vm4, %v10058_v15  ;;  %10188 = vst.msk [vmem:[#allocation2 + $0x48] sm:$0xff] %vm10178_vm4, %v10059_v34  ;;  %v9425_v38 = vmax.f32 %v15560_v58, 0.0  ;;  %v9694_v1 = vrot.slane %v9424_v36, 1 }
 0x389   : > { %v10312_v22 = vld [vmem:[#allocation2 + $0x20] ss:$2 sm:$0xff]  ;;  %v9690_v8 = vrot.slane %v9422_v41, 1  ;;  %v9295_v63 = vadd.f32 %v13105_v50, %v15462_v2  ;;  %v12976_v16 = vpop.f32.mrb[16].mxu0 }
 0x38a   : > { %v10315_v21 = vmax.f32 %v10308_v20, %v10312_v22  ;;  %v9696_v44 = vrot.slane %v9425_v38, 1  ;;  %v13106_v28 = vadd.f32 %v12976_v16, %v15267_v9  ;;  %v8700_v12 = vpop.f32.mrb[17].mxu0 }
 0x38b   : > { %v9691_v29 = vsel %vm9666_vm3, %v9688_v4, %v9690_v8  ;;  %v9423_v55 = vmax.f32 %v9295_v63, 0.0  ;;  %v13107_v32 = vadd.f32 %v8700_v12, %v15269_v46  ;;  %v12977_v52 = vpop.f32.mrb[18].mxu0 }
 0x38c   : > { %v11668_v27 = vpack.c.bf16 %v10315_v21, %v10315_v21  ;;  %v10061_v57 = vmax.f32 %v9421_v37, %v9691_v29  ;;  %v9697_v9 = vsel %vm9666_vm3, %v9694_v1, %v9696_v44  ;;  %v9300_v60 = vadd.f32 %v13106_v28, %v15462_v2  ;;  %v8703_v33 = vpop.f32.mrb[19].mxu0 }
 0x38d   : > { %v10314_v40 = vld [vmem:[#allocation2 + $0x30] ss:$2 sm:$0xff]  ;;  %v10064_v25 = vmax.f32 %v9424_v36, %v9697_v9  ;;  %v9692_v42 = vrot.slane %v9423_v55, 1  ;;  %v9298_v4 = vadd.f32 %v13107_v32, %v15462_v2  ;;  %v13108_v45 = vadd.f32 %v12977_v52, %v15272_v48 }
 0x38e   : > { %12687 = vmatmul.mubr.msk.bf16.gmra.mrb[124].mxu1 %vm816_vm2, %v14328_v30  ;;  %10326 = vst.msk [vmem:[%s15578_s13] sm:$0xf] %vm10325_vm5, %v11668_v27  ;;  %v10316_v46 = vmax.f32 %v10310_v18, %v10314_v40  ;;  %v9428_v26 = vmax.f32 %v9300_v60, 0.0  ;;  %v13109_v37 = vadd.f32 %v8703_v33, %v15276_v51 }
 0x38f   : > { %10190 = vst.msk [vmem:[#allocation2 + $0x58] sm:$0xff] %vm10178_vm4, %v10061_v57  ;;  %13083 = vmatmul.mubr.msk.bf16.gmra.mrb[124].mxu0 %vm816_vm2, %v14329_v11  ;;  %10193 = vst.msk [vmem:[#allocation2 + $0x70] sm:$0xff] %vm10178_vm4, %v10064_v25  ;;  %v9693_v14 = vsel %vm9666_vm3, %v9690_v8, %v9692_v42  ;;  %v9695_v6 = vsel %vm9666_vm3, %v9692_v42, %v9694_v1  ;;  %v9426_v48 = vmax.f32 %v9298_v4, 0.0  ;;  %v10329_v33 = vld [vmem:[#allocation2 + $0x40] ss:$2 sm:$0xff] }
 0x390   : > { %v9301_v15 = vadd.f32 %v13108_v45, %v15462_v2  ;;  %v11669_v34 = vpack.c.bf16 %v10316_v46, %v10316_v46  ;;  %v10062_v36 = vmax.f32 %v9422_v41, %v9693_v14  ;;  %v10063_v58 = vmax.f32 %v9423_v55, %v9695_v6 }
 0x391   : > { %v9698_v50 = vrot.slane %v9426_v48, 1  ;;  %v9299_v20 = vadd.f32 %v13109_v37, %v15462_v2  ;;  %v12980_v22 = vpop.f32.mrb[20].mxu0  ;;  %v9702_v51 = vrot.slane %v9428_v26, 1 }
 0x392   : > { %v9429_v30 = vmax.f32 %v9301_v15, 0.0  ;;  %10327 = vst.msk [vmem:[%s15578_s13 + $0x4] sm:$0xf] %vm10325_vm5, %v11669_v34  ;;  %v13110_v8 = vadd.f32 %v12980_v22, %v15283_v53  ;;  %v8716_v63 = vpop.f32.mrb[21].mxu0 }
 0x393   : > { %10191 = vst.msk [vmem:[#allocation2 + $0x60] sm:$0xff] %vm10178_vm4, %v10062_v36  ;;  %10192 = vst.msk [vmem:[#allocation2 + $0x68] sm:$0xff] %vm10178_vm4, %v10063_v58  ;;  %v9699_v16 = vsel %vm9666_vm3, %v9696_v44, %v9698_v50  ;;  %v9427_v41 = vmax.f32 %v9299_v20, 0.0  ;;  %v13111_v1 = vadd.f32 %v8716_v63, %v15285_v54  ;;  %v12981_v28 = vpop.f32.mrb[22].mxu0 }
 0x394   : > { %v9704_v21 = vrot.slane %v9429_v30, 1  ;;  %v10065_v12 = vmax.f32 %v9425_v38, %v9699_v16  ;;  %v9304_v11 = vadd.f32 %v13110_v8, %v15462_v2  ;;  %v13112_v29 = vadd.f32 %v12981_v28, %v15288_v56  ;;  %v8719_v55 = vpop.f32.mrb[23].mxu0 }
 0x395   : > { %v9700_v52 = vrot.slane %v9427_v41, 1  ;;  %v9302_v27 = vadd.f32 %v13111_v1, %v15462_v2  ;;  %v13113_v53 = vadd.f32 %v8719_v55, %v15292_v59 }
 0x396   : > { %v9705_v32 = vsel %vm9666_vm3, %v9702_v51, %v9704_v21  ;;  %10194 = vst.msk [vmem:[#allocation2 + $0x78] sm:$0xff] %vm10178_vm4, %v10065_v12  ;;  %v9432_v57 = vmax.f32 %v9304_v11, 0.0  ;;  %v15613_v54 = vadd.f32 %v13112_v29, %v15462_v2  ;;  %v10331_v8 = vld [vmem:[#allocation2 + $0x50] ss:$2 sm:$0xff] }
 0x397   : > { %v10068_v44 = vmax.f32 %v9428_v26, %v9705_v32  ;;  %v9701_v38 = vsel %vm9666_vm3, %v9698_v50, %v9700_v52  ;;  %v9703_v9 = vsel %vm9666_vm3, %v9700_v52, %v9702_v51  ;;  %v9430_v56 = vmax.f32 %v9302_v27, 0.0 }
 0x398   : > { %v9303_v60 = vadd.f32 %v13113_v53, %v15462_v2  ;;  %v10066_v18 = vmax.f32 %v9426_v48, %v9701_v38  ;;  %v10067_v40 = vmax.f32 %v9427_v41, %v9703_v9  ;;  %v9433_v59 = vmax.f32 %v15613_v54, 0.0 }
 0x399   : > { %10197 = vst.msk [vmem:[#allocation2 + $0x90] sm:$0xff] %vm10178_vm4, %v10068_v44  ;;  %v9706_v42 = vrot.slane %v9430_v56, 1  ;;  %v12984_v45 = vpop.f32.mrb[24].mxu0  ;;  %v9710_v26 = vrot.slane %v9432_v57, 1 }
 0x39a   : > { %v10333_v25 = vld [vmem:[#allocation2 + $0x60] ss:$2 sm:$0xff]  ;;  %v9431_v4 = vmax.f32 %v9303_v60, 0.0  ;;  %10195 = vst.msk [vmem:[#allocation2 + $0x80] sm:$0xff] %vm10178_vm4, %v10066_v18  ;;  %10196 = vst.msk [vmem:[#allocation2 + $0x88] sm:$0xff] %vm10178_vm4, %v10067_v40  ;;  %v9712_v37 = vrot.slane %v9433_v59, 1  ;;  %v13114_v14 = vadd.f32 %v12984_v45, %v15299_v61 }
 0x39b   : > { %v10336_v46 = vmax.f32 %v10329_v33, %v10333_v25  ;;  %v8732_v6 = vpop.f32.mrb[25].mxu0  ;;  %v9707_v48 = vsel %vm9666_vm3, %v9704_v21, %v9706_v42 }
 0x39c   : > { %v9708_v15 = vrot.slane %v9431_v4, 1  ;;  %v13115_v34 = vadd.f32 %v8732_v6, %v15301_v62  ;;  %v12985_v36 = vpop.f32.mrb[26].mxu0  ;;  %v10069_v50 = vmax.f32 %v9429_v30, %v9707_v48  ;;  %v9713_v20 = vsel %vm9666_vm3, %v9710_v26, %v9712_v37 }
 0x39d   : > { %v11670_v58 = vpack.c.bf16 %v10336_v46, %v10336_v46  ;;  %v9308_v22 = vadd.f32 %v13114_v14, %v15462_v2  ;;  %v8735_v51 = vpop.f32.mrb[27].mxu0  ;;  %v10335_v63 = vld [vmem:[#allocation2 + $0x70] ss:$2 sm:$0xff]  ;;  %v10072_v16 = vmax.f32 %v9432_v57, %v9713_v20  ;;  %v13116_v12 = vadd.f32 %v12985_v36, %v15304_v0 }
 0x39e   : > { %v9709_v61 = vsel %vm9666_vm3, %v9706_v42, %v9708_v15  ;;  %v9711_v41 = vsel %vm9666_vm3, %v9708_v15, %v9710_v26  ;;  %v9306_v21 = vadd.f32 %v13115_v34, %v15462_v2  ;;  %v10337_v62 = vmax.f32 %v10331_v8, %v10335_v63  ;;  %10198 = vst.msk [vmem:[#allocation2 + $0x98] sm:$0xff] %vm10178_vm4, %v10069_v50 }
 0x39f   : > { %10346 = vst.msk [vmem:[%s15578_s13 + $0x8] sm:$0xf] %vm10325_vm5, %v11670_v58  ;;  %v10070_v30 = vmax.f32 %v9430_v56, %v9709_v61  ;;  %v10071_v1 = vmax.f32 %v9431_v4, %v9711_v41  ;;  %v13117_v11 = vadd.f32 %v8735_v51, %v15308_v3  ;;  %v9436_v55 = vmax.f32 %v9308_v22, 0.0 }
 0x3a0   : > { %10201 = vst.msk [vmem:[#allocation2 + $0xb0] sm:$0xff] %vm10178_vm4, %v10072_v16  ;;  %v9434_v28 = vmax.f32 %v9306_v21, 0.0  ;;  %v11671_v29 = vpack.c.bf16 %v10337_v62, %v10337_v62  ;;  %v9309_v52 = vadd.f32 %v13116_v12, %v15462_v2 }
 0x3a1   : > { %10199 = vst.msk [vmem:[#allocation2 + $0xa0] sm:$0xff] %vm10178_vm4, %v10070_v30  ;;  %10200 = vst.msk [vmem:[#allocation2 + $0xa8] sm:$0xff] %vm10178_vm4, %v10071_v1  ;;  %v9307_v27 = vadd.f32 %v13117_v11, %v15462_v2  ;;  %v12988_v53 = vpop.f32.mrb[28].mxu0  ;;  %v9718_v56 = vrot.slane %v9436_v55, 1 }
 0x3a2   : > { %v9714_v32 = vrot.slane %v9434_v28, 1  ;;  %10347 = vst.msk [vmem:[%s15578_s13 + $0xc] sm:$0xf] %vm10325_vm5, %v11671_v29  ;;  %v13118_v44 = vadd.f32 %v12988_v53, %v15315_v5  ;;  %v8748_v57 = vpop.f32.mrb[29].mxu0  ;;  %v9437_v3 = vmax.f32 %v9309_v52, 0.0 }
 0x3a3   : > { %v9435_v54 = vmax.f32 %v9307_v27, 0.0  ;;  %v13119_v38 = vadd.f32 %v8748_v57, %v15317_v7  ;;  %v12989_v9 = vpop.f32.mrb[30].mxu0  ;;  %v10349_v7 = vld [vmem:[#allocation2 + $0x80] ss:$2 sm:$0xff] }
 0x3a4   : > { %v9715_v0 = vsel %vm9666_vm3, %v9712_v37, %v9714_v32  ;;  %v9312_v33 = vadd.f32 %v13118_v44, %v15462_v2  ;;  %v13120_v18 = vadd.f32 %v12989_v9, %v15320_v10  ;;  %v8751_v40 = vpop.f32.mrb[31].mxu0  ;;  %v9720_v25 = vrot.slane %v9437_v3, 1 }
 0x3a5   : > { %v10073_v60 = vmax.f32 %v9433_v59, %v9715_v0  ;;  %v9716_v42 = vrot.slane %v9435_v54, 1  ;;  %v9310_v4 = vadd.f32 %v13119_v38, %v15462_v2  ;;  %v13121_v5 = vadd.f32 %v8751_v40, %v15324_v13  ;;  %v10351_v12 = vld [vmem:[#allocation2 + $0x90] ss:$2 sm:$0xff] }
 0x3a6   : > { %v9440_v45 = vmax.f32 %v9312_v33, 0.0  ;;  %v15651_v46 = vadd.f32 %v13120_v18, %v15462_v2  ;;  %v9721_v59 = vsel %vm9666_vm3, %v9718_v56, %v9720_v25 }
 0x3a7   : > { %10202 = vst.msk [vmem:[#allocation2 + $0xb8] sm:$0xff] %vm10178_vm4, %v10073_v60  ;;  %v9717_v37 = vsel %vm9666_vm3, %v9714_v32, %v9716_v42  ;;  %v9719_v10 = vsel %vm9666_vm3, %v9716_v42, %v9718_v56  ;;  %v9438_v14 = vmax.f32 %v9310_v4, 0.0  ;;  %v10076_v48 = vmax.f32 %v9436_v55, %v9721_v59 }
 0x3a8   : > { %v10353_v26 = vld [vmem:[#allocation2 + $0xa0] ss:$2 sm:$0xff]  ;;  %v10074_v15 = vmax.f32 %v9434_v28, %v9717_v37  ;;  %v10075_v34 = vmax.f32 %v9435_v54, %v9719_v10  ;;  %v9441_v36 = vmax.f32 %v15651_v46, 0.0  ;;  %v9311_v58 = vadd.f32 %v13121_v5, %v15462_v2 }
 0x3a9   : > { %v10356_v6 = vmax.f32 %v10349_v7, %v10353_v26  ;;  %v9722_v13 = vrot.slane %v9438_v14, 1  ;;  %v12992_v50 = vpop.f32.mrb[32].mxu0  ;;  %10205 = vst.msk [vmem:[#allocation2 + $0xd0] sm:$0xff] %vm10178_vm4, %v10076_v48  ;;  %v9726_v22 = vrot.slane %v9440_v45, 1 }
 0x3aa   : > { %10203 = vst.msk [vmem:[#allocation2 + $0xc0] sm:$0xff] %vm10178_vm4, %v10074_v15  ;;  %10204 = vst.msk [vmem:[#allocation2 + $0xc8] sm:$0xff] %vm10178_vm4, %v10075_v34  ;;  %v13122_v51 = vadd.f32 %v12992_v50, %v15331_v17  ;;  %v8764_v8 = vpop.f32.mrb[33].mxu0  ;;  %v9728_v16 = vrot.slane %v9441_v36, 1  ;;  %v9439_v61 = vmax.f32 %v9311_v58, 0.0 }
 0x3ab   : > { %v11672_v20 = vpack.c.bf16 %v10356_v6, %v10356_v6  ;;  %v9723_v63 = vsel %vm9666_vm3, %v9720_v25, %v9722_v13  ;;  %v13123_v41 = vadd.f32 %v8764_v8, %v15333_v19  ;;  %v12993_v21 = vpop.f32.mrb[34].mxu0 }
 0x3ac   : > { %v10077_v62 = vmax.f32 %v9437_v3, %v9723_v63  ;;  %v9316_v30 = vadd.f32 %v13122_v51, %v15462_v2  ;;  %v13124_v1 = vadd.f32 %v12993_v21, %v15336_v23  ;;  %v8767_v28 = vpop.f32.mrb[35].mxu0  ;;  %v9729_v17 = vsel %vm9666_vm3, %v9726_v22, %v9728_v16 }
 0x3ad   : > { %10366 = vst.msk [vmem:[%s15578_s13 + $0x10] sm:$0xf] %vm10325_vm5, %v11672_v20  ;;  %v9724_v29 = vrot.slane %v9439_v61, 1  ;;  %v9314_v55 = vadd.f32 %v13123_v41, %v15462_v2  ;;  %v13125_v32 = vadd.f32 %v8767_v28, %v15340_v31  ;;  %v10080_v19 = vmax.f32 %v9440_v45, %v9729_v17 }
 0x3ae   : > { %v10355_v11 = vld [vmem:[#allocation2 + $0xb0] ss:$2 sm:$0xff]  ;;  %10206 = vst.msk [vmem:[#allocation2 + $0xd8] sm:$0xff] %vm10178_vm4, %v10077_v62  ;;  %v9444_v27 = vmax.f32 %v9316_v30, 0.0  ;;  %v9317_v53 = vadd.f32 %v13124_v1, %v15462_v2 }
 0x3af   : > { %v10357_v52 = vmax.f32 %v10351_v12, %v10355_v11  ;;  %v9725_v23 = vsel %vm9666_vm3, %v9722_v13, %v9724_v29  ;;  %v9727_v44 = vsel %vm9666_vm3, %v9724_v29, %v9726_v22  ;;  %v9442_v57 = vmax.f32 %v9314_v55, 0.0  ;;  %10209 = vst.msk [vmem:[#allocation2 + $0xf0] sm:$0xff] %vm10178_vm4, %v10080_v19  ;;  %v16135_v11 = vld [vmem:[#allocation3_spill] sm:$0xff] }
 0x3b0   : > { %v9315_v0 = vadd.f32 %v13125_v32, %v15462_v2  ;;  %v10078_v54 = vmax.f32 %v9438_v14, %v9725_v23  ;;  %v10079_v31 = vmax.f32 %v9439_v61, %v9727_v44  ;;  %v9445_v9 = vmax.f32 %v9317_v53, 0.0 }
 0x3b1   : > { %v11673_v3 = vpack.c.bf16 %v10357_v52, %v10357_v52  ;;  %v9730_v38 = vrot.slane %v9442_v57, 1  ;;  %v12996_v60 = vpop.f32.mrb[36].mxu0  ;;  %v9734_v33 = vrot.slane %v9444_v27, 1 }
 0x3b2   : > { %v9443_v56 = vmax.f32 %v9315_v0, 0.0  ;;  %10207 = vst.msk [vmem:[#allocation2 + $0xe0] sm:$0xff] %vm10178_vm4, %v10078_v54  ;;  %10208 = vst.msk [vmem:[#allocation2 + $0xe8] sm:$0xff] %vm10178_vm4, %v10079_v31  ;;  %v13126_v18 = vadd.f32 %v12996_v60, %v15347_v35  ;;  %v8780_v40 = vpop.f32.mrb[37].mxu0  ;;  %v9736_v42 = vrot.slane %v9445_v9, 1 }
 0x3b3   : > { %10367 = vst.msk [vmem:[%s15578_s13 + $0x14] sm:$0xf] %vm10325_vm5, %v11673_v3  ;;  %v9731_v25 = vsel %vm9666_vm3, %v9728_v16, %v9730_v38  ;;  %v13127_v5 = vadd.f32 %v8780_v40, %v15349_v24  ;;  %v12997_v45 = vpop.f32.mrb[38].mxu0 }
 0x3b4   : > { %v9732_v4 = vrot.slane %v9443_v56, 1  ;;  %v10081_v46 = vmax.f32 %v9441_v36, %v9731_v25  ;;  %v9320_v7 = vadd.f32 %v13126_v18, %v15462_v2  ;;  %v13128_v26 = vadd.f32 %v12997_v45, %v15352_v39  ;;  %v8783_v59 = vpop.f32.mrb[39].mxu0  ;;  %v10369_v36 = vld [vmem:[#allocation2 + $0xc0] ss:$2 sm:$0xff] }
 0x3b5   : > { %v9737_v37 = vsel %vm9666_vm3, %v9734_v33, %v9736_v42  ;;  %v9318_v14 = vadd.f32 %v13127_v5, %v15462_v2  ;;  %v13129_v39 = vadd.f32 %v8783_v59, %v15356_v43  ;;  %v10371_v55 = vld [vmem:[#allocation2 + $0xd0] ss:$2 sm:$0xff] }
 0x3b6   : > { %v9733_v10 = vsel %vm9666_vm3, %v9730_v38, %v9732_v4  ;;  %v9735_v35 = vsel %vm9666_vm3, %v9732_v4, %v9734_v33  ;;  %10210 = vst.msk [vmem:[#allocation2 + $0xf8] sm:$0xff] %vm10178_vm4, %v10081_v46  ;;  %v10084_v6 = vmax.f32 %v9444_v27, %v9737_v37  ;;  %v9448_v15 = vmax.f32 %v9320_v7, 0.0  ;;  %v16136_v27 = vld [vmem:[#allocation4_spill] sm:$0xff] }
 0x3b7   : > { %v10082_v48 = vmax.f32 %v9442_v57, %v9733_v10  ;;  %v10083_v24 = vmax.f32 %v9443_v56, %v9735_v35  ;;  %v9446_v34 = vmax.f32 %v9318_v14, 0.0  ;;  %v9321_v13 = vadd.f32 %v13128_v26, %v15462_v2  ;;  %v16138_v26 = vld [vmem:[#allocation6_spill] sm:$0xff]  ;;  %v16139_v14 = vld [vmem:[#allocation7_spill] sm:$0xff] }
 0x3b8   : > { %10213 = vst.msk [vmem:[#allocation2 + $0x110] sm:$0xff] %vm10178_vm4, %v10084_v6  ;;  %v9319_v22 = vadd.f32 %v13129_v39, %v15462_v2  ;;  %v9742_v63 = vrot.slane %v9448_v15, 1 }
 0x3b9   : > { %10211 = vst.msk [vmem:[#allocation2 + $0x100] sm:$0xff] %vm10178_vm4, %v10082_v48  ;;  %10212 = vst.msk [vmem:[#allocation2 + $0x108] sm:$0xff] %vm10178_vm4, %v10083_v24  ;;  %v10373_v58 = vld [vmem:[#allocation2 + $0xe0] ss:$2 sm:$0xff]  ;;  %v9738_v50 = vrot.slane %v9446_v34, 1  ;;  %v9449_v20 = vmax.f32 %v9321_v13, 0.0 }
 0x3ba   : > { %v13000_v51 = vpop.f32.mrb[40].mxu0  ;;  %v10376_v8 = vmax.f32 %v10369_v36, %v10373_v58  ;;  %v9447_v21 = vmax.f32 %v9319_v22, 0.0 }
 0x3bb   : > { %v13130_v16 = vadd.f32 %v13000_v51, %v15363_v47  ;;  %v8796_v61 = vpop.f32.mrb[41].mxu0  ;;  %v9739_v43 = vsel %vm9666_vm3, %v9736_v42, %v9738_v50  ;;  %v9744_v41 = vrot.slane %v9449_v20, 1  ;;  %v16137_v42 = vld [vmem:[#allocation5_spill] sm:$0xff]  ;;  %v16140_v51 = vld [vmem:[#allocation8_spill] sm:$0xff] }
 0x3bc   : > { %v13131_v62 = vadd.f32 %v8796_v61, %v15365_v49  ;;  %v13001_v30 = vpop.f32.mrb[42].mxu0  ;;  %v11674_v1 = vpack.c.bf16 %v10376_v8, %v10376_v8  ;;  %v10085_v28 = vmax.f32 %v9445_v9, %v9739_v43  ;;  %v9740_v52 = vrot.slane %v9447_v21, 1 }
 0x3bd   : > { %v9324_v12 = vadd.f32 %v13130_v16, %v15462_v2  ;;  %v13132_v17 = vadd.f32 %v13001_v30, %v16135_v11  ;;  %v8799_v29 = vpop.f32.mrb[43].mxu0  ;;  %v10375_v32 = vld [vmem:[#allocation2 + $0xf0] ss:$2 sm:$0xff]  ;;  %v9745_v47 = vsel %vm9666_vm3, %v9742_v63, %v9744_v41 }
 0x3be   : > { %v9322_v19 = vadd.f32 %v13131_v62, %v15462_v2  ;;  %v13133_v53 = vadd.f32 %v8799_v29, %v16136_v27  ;;  %10386 = vst.msk [vmem:[%s15578_s13 + $0x18] sm:$0xf] %vm10325_vm5, %v11674_v1  ;;  %v10377_v49 = vmax.f32 %v10371_v55, %v10375_v32  ;;  %v10088_v23 = vmax.f32 %v9448_v15, %v9745_v47  ;;  %v16141_v1 = vld [vmem:[#allocation9_spill] sm:$0xff]  ;;  %v16142_v55 = vld [vmem:[#allocation10_spill] sm:$0xff] }
 0x3bf   : > { %10214 = vst.msk [vmem:[#allocation2 + $0x118] sm:$0xff] %vm10178_vm4, %v10085_v28  ;;  %v9452_v44 = vmax.f32 %v9324_v12, 0.0  ;;  %v9325_v57 = vadd.f32 %v13132_v17, %v15462_v2  ;;  %v9741_v0 = vsel %vm9666_vm3, %v9738_v50, %v9740_v52  ;;  %v9743_v3 = vsel %vm9666_vm3, %v9740_v52, %v9742_v63 }
 0x3c0   : > { %v9450_v54 = vmax.f32 %v9322_v19, 0.0  ;;  %v9323_v31 = vadd.f32 %v13133_v53, %v15462_v2  ;;  %v11675_v38 = vpack.c.bf16 %v10377_v49, %v10377_v49  ;;  %10217 = vst.msk [vmem:[#allocation2 + $0x130] sm:$0xff] %vm10178_vm4, %v10088_v23  ;;  %v10086_v9 = vmax.f32 %v9446_v34, %v9741_v0  ;;  %v10389_v63 = vld [vmem:[#allocation2 + $0x100] ss:$2 sm:$0xff] }
 0x3c1   : > { %v10087_v56 = vmax.f32 %v9447_v21, %v9743_v3  ;;  %v9453_v33 = vmax.f32 %v9325_v57, 0.0  ;;  %v13004_v40 = vpop.f32.mrb[44].mxu0  ;;  %v9750_v25 = vrot.slane %v9452_v44, 1  ;;  %v16143_v53 = vld [vmem:[#allocation11_spill] sm:$0xff] }
 0x3c2   : > { %v9746_v60 = vrot.slane %v9450_v54, 1  ;;  %v9451_v18 = vmax.f32 %v9323_v31, 0.0  ;;  %10387 = vst.msk [vmem:[%s15578_s13 + $0x1c] sm:$0xf] %vm10325_vm5, %v11675_v38  ;;  %v13134_v4 = vadd.f32 %v13004_v40, %v16137_v42  ;;  %v8812_v5 = vpop.f32.mrb[45].mxu0  ;;  %v16144_v31 = vld [vmem:[#allocation12_spill] sm:$0xff] }
 0x3c3   : > { %10215 = vst.msk [vmem:[#allocation2 + $0x120] sm:$0xff] %vm10178_vm4, %v10086_v9  ;;  %10216 = vst.msk [vmem:[#allocation2 + $0x128] sm:$0xff] %vm10178_vm4, %v10087_v56  ;;  %v9752_v46 = vrot.slane %v9453_v33, 1  ;;  %v13135_v59 = vadd.f32 %v8812_v5, %v16138_v26  ;;  %v13005_v37 = vpop.f32.mrb[46].mxu0 }
 0x3c4   : > { %v9747_v45 = vsel %vm9666_vm3, %v9744_v41, %v9746_v60  ;;  %v9748_v7 = vrot.slane %v9451_v18, 1  ;;  %v9328_v35 = vadd.f32 %v13134_v4, %v15462_v2  ;;  %v13136_v6 = vadd.f32 %v13005_v37, %v16139_v14  ;;  %v8815_v48 = vpop.f32.mrb[47].mxu0 }
 0x3c5   : > { %v10089_v10 = vmax.f32 %v9449_v20, %v9747_v45  ;;  %v9753_v24 = vsel %vm9666_vm3, %v9750_v25, %v9752_v46  ;;  %v9326_v13 = vadd.f32 %v13135_v59, %v15462_v2  ;;  %v13137_v8 = vadd.f32 %v8815_v48, %v16140_v51 }
 0x3c6   : > { %v9749_v15 = vsel %vm9666_vm3, %v9746_v60, %v9748_v7  ;;  %v9751_v34 = vsel %vm9666_vm3, %v9748_v7, %v9750_v25  ;;  %v10092_v39 = vmax.f32 %v9452_v44, %v9753_v24  ;;  %v9456_v50 = vmax.f32 %v9328_v35, 0.0  ;;  %v10391_v44 = vld [vmem:[#allocation2 + $0x110] ss:$2 sm:$0xff] }
 0x3c7   : > { %10218 = vst.msk [vmem:[#allocation2 + $0x138] sm:$0xff] %vm10178_vm4, %v10089_v10  ;;  %v10090_v36 = vmax.f32 %v9450_v54, %v9749_v15  ;;  %v10091_v58 = vmax.f32 %v9451_v18, %v9751_v34  ;;  %v9454_v20 = vmax.f32 %v9326_v13, 0.0  ;;  %v9329_v22 = vadd.f32 %v13136_v6, %v15462_v2  ;;  %v16145_v10 = vld [vmem:[#allocation13_spill] sm:$0xff]  ;;  %v16146_v15 = vld [vmem:[#allocation14_spill] sm:$0xff] }
 0x3c8   : > { %10221 = vst.msk [vmem:[#allocation2 + $0x150] sm:$0xff] %vm10178_vm4, %v10092_v39  ;;  %v9327_v41 = vadd.f32 %v13137_v8, %v15462_v2  ;;  %v9758_v30 = vrot.slane %v9456_v50, 1 }
 0x3c9   : > { %10219 = vst.msk [vmem:[#allocation2 + $0x140] sm:$0xff] %vm10178_vm4, %v10090_v36  ;;  %10220 = vst.msk [vmem:[#allocation2 + $0x148] sm:$0xff] %vm10178_vm4, %v10091_v58  ;;  %v9754_v61 = vrot.slane %v9454_v20, 1  ;;  %v9457_v43 = vmax.f32 %v9329_v22, 0.0  ;;  %v13008_v21 = vpop.f32.mrb[48].mxu0  ;;  %v16147_v58 = vld [vmem:[#allocation15_spill] sm:$0xff] }
 0x3ca   : > { %v10393_v16 = vld [vmem:[#allocation2 + $0x120] ss:$2 sm:$0xff]  ;;  %v13138_v28 = vadd.f32 %v13008_v21, %v16141_v1  ;;  %v8828_v12 = vpop.f32.mrb[49].mxu0  ;;  %v9455_v29 = vmax.f32 %v9327_v41, 0.0 }
 0x3cb   : > { %v10396_v62 = vmax.f32 %v10389_v63, %v10393_v16  ;;  %v9755_v11 = vsel %vm9666_vm3, %v9752_v46, %v9754_v61  ;;  %v9760_v17 = vrot.slane %v9457_v43, 1  ;;  %v13139_v32 = vadd.f32 %v8828_v12, %v16142_v55  ;;  %v13009_v47 = vpop.f32.mrb[50].mxu0  ;;  %v16148_v1 = vld [vmem:[#allocation16_spill] sm:$0xff] }
 0x3cc   : > { %v10093_v19 = vmax.f32 %v9453_v33, %v9755_v11  ;;  %v9332_v27 = vadd.f32 %v13138_v28, %v15462_v2  ;;  %v13140_v49 = vadd.f32 %v13009_v47, %v16143_v53  ;;  %v8831_v23 = vpop.f32.mrb[51].mxu0  ;;  %v9756_v3 = vrot.slane %v9455_v29, 1 }
 0x3cd   : > { %v11676_v52 = vpack.c.bf16 %v10396_v62, %v10396_v62  ;;  %v9761_v0 = vsel %vm9666_vm3, %v9758_v30, %v9760_v17  ;;  %v9330_v54 = vadd.f32 %v13139_v32, %v15462_v2  ;;  %v13141_v38 = vadd.f32 %v8831_v23, %v16144_v31  ;;  %v15766_v62 = vld [vmem:[%s16111_s3] ss:$0 sm:$0xff] }
 0x3ce   : > { %v10395_v57 = vld [vmem:[#allocation2 + $0x130] ss:$2 sm:$0xff]  ;;  %10222 = vst.msk [vmem:[#allocation2 + $0x158] sm:$0xff] %vm10178_vm4, %v10093_v19  ;;  %v10096_v56 = vmax.f32 %v9456_v50, %v9761_v0  ;;  %v9460_v60 = vmax.f32 %v9332_v27, 0.0  ;;  %v9333_v33 = vadd.f32 %v13140_v49, %v15462_v2  ;;  %v9757_v18 = vsel %vm9666_vm3, %v9754_v61, %v9756_v3 }
 0x3cf   : > { %10406 = vst.msk [vmem:[%s15578_s13 + $0x20] sm:$0xf] %vm10325_vm5, %v11676_v52  ;;  %v10397_v9 = vmax.f32 %v10391_v44, %v10395_v57  ;;  %v9759_v40 = vsel %vm9666_vm3, %v9756_v3, %v9758_v30  ;;  %v9458_v25 = vmax.f32 %v9330_v54, 0.0  ;;  %v9331_v42 = vadd.f32 %v13141_v38, %v15462_v2  ;;  %v16149_v52 = vld [vmem:[#allocation17_spill] sm:$0xff]  ;;  %v16150_v44 = vld [vmem:[#allocation18_spill] sm:$0xff]  ;;  %v16151_v38 = vld [vmem:[#allocation19_spill] sm:$0xff] }
 0x3d0   : > { %10225 = vst.msk [vmem:[#allocation2 + $0x170] sm:$0xff] %vm10178_vm4, %v10096_v56  ;;  %v10094_v5 = vmax.f32 %v9454_v20, %v9757_v18  ;;  %v10095_v45 = vmax.f32 %v9455_v29, %v9759_v40  ;;  %v9461_v7 = vmax.f32 %v9333_v33, 0.0  ;;  %v9766_v37 = vrot.slane %v9460_v60, 1  ;;  %v10409_v12 = vld [vmem:[#allocation2 + $0x140] ss:$2 sm:$0xff] }
 0x3d1   : > { %v11677_v4 = vpack.c.bf16 %v10397_v9, %v10397_v9  ;;  %v9762_v46 = vrot.slane %v9458_v25, 1  ;;  %v9459_v26 = vmax.f32 %v9331_v42, 0.0  ;;  %v13012_v59 = vpop.f32.mrb[52].mxu0  ;;  %v16152_v42 = vld [vmem:[#allocation20_spill] sm:$0xff] }
 0x3d2   : > { %10223 = vst.msk [vmem:[#allocation2 + $0x160] sm:$0xff] %vm10178_vm4, %v10094_v5  ;;  %10224 = vst.msk [vmem:[#allocation2 + $0x168] sm:$0xff] %vm10178_vm4, %v10095_v45  ;;  %v13142_v35 = vadd.f32 %v13012_v59, %v16145_v10  ;;  %v8844_v14 = vpop.f32.mrb[53].mxu0  ;;  %v9768_v48 = vrot.slane %v9461_v7, 1 }
 0x3d3   : > { %10407 = vst.msk [vmem:[%s15578_s13 + $0x24] sm:$0xf] %vm10325_vm5, %v11677_v4  ;;  %v9763_v6 = vsel %vm9666_vm3, %v9760_v17, %v9762_v46  ;;  %v9764_v24 = vrot.slane %v9459_v26, 1  ;;  %v13143_v34 = vadd.f32 %v8844_v14, %v16146_v15  ;;  %v13013_v13 = vpop.f32.mrb[54].mxu0 }
 0x3d4   : > { %v10097_v39 = vmax.f32 %v9457_v43, %v9763_v6  ;;  %v9336_v36 = vadd.f32 %v13142_v35, %v15462_v2  ;;  %v13144_v50 = vadd.f32 %v13013_v13, %v16147_v58  ;;  %v8847_v20 = vpop.f32.mrb[55].mxu0  ;;  %v9769_v22 = vsel %vm9666_vm3, %v9766_v37, %v9768_v48 }
 0x3d5   : > { %v9765_v51 = vsel %vm9666_vm3, %v9762_v46, %v9764_v24  ;;  %v9767_v8 = vsel %vm9666_vm3, %v9764_v24, %v9766_v37  ;;  %v9334_v63 = vadd.f32 %v13143_v34, %v15462_v2  ;;  %v10100_v16 = vmax.f32 %v9460_v60, %v9769_v22  ;;  %v10411_v60 = vld [vmem:[#allocation2 + $0x150] ss:$2 sm:$0xff] }
 0x3d6   : > { %10226 = vst.msk [vmem:[#allocation2 + $0x178] sm:$0xff] %vm10178_vm4, %v10097_v39  ;;  %v10098_v61 = vmax.f32 %v9458_v25, %v9765_v51  ;;  %v10099_v41 = vmax.f32 %v9459_v26, %v9767_v8  ;;  %v9464_v21 = vmax.f32 %v9336_v36, 0.0  ;;  %v9337_v30 = vadd.f32 %v15766_v62, %v13144_v50  ;;  %v16153_v39 = vld [vmem:[#allocation21_spill] sm:$0xff]  ;;  %v16154_v51 = vld [vmem:[#allocation22_spill] sm:$0xff] }
 0x3d7   : > { %v9462_v43 = vmax.f32 %v9334_v63, 0.0  ;;  %v13145_v28 = vadd.f32 %v8847_v20, %v16148_v1  ;;  %10229 = vst.msk [vmem:[#allocation2 + $0x190] sm:$0xff] %vm10178_vm4, %v10100_v16 }
 0x3d8   : > { %10227 = vst.msk [vmem:[#allocation2 + $0x180] sm:$0xff] %vm10178_vm4, %v10098_v61  ;;  %10228 = vst.msk [vmem:[#allocation2 + $0x188] sm:$0xff] %vm10178_vm4, %v10099_v41  ;;  %v9465_v17 = vmax.f32 %v9337_v30, 0.0  ;;  %v9774_v47 = vrot.slane %v9464_v21, 1  ;;  %v16155_v41 = vld [vmem:[#allocation23_spill] sm:$0xff] }
 0x3d9   : > { %v10413_v2 = vld [vmem:[#allocation2 + $0x160] ss:$2 sm:$0xff]  ;;  %v9770_v11 = vrot.slane %v9462_v43, 1  ;;  %v9335_v29 = vadd.f32 %v15766_v62, %v13145_v28  ;;  %v13016_v55 = vpop.f32.mrb[56].mxu0 }
 0x3da   : > { %v10416_v32 = vmax.f32 %v10409_v12, %v10413_v2  ;;  %v13146_v19 = vadd.f32 %v13016_v55, %v16149_v52  ;;  %v8860_v27 = vpop.f32.mrb[57].mxu0  ;;  %v9776_v49 = vrot.slane %v9465_v17, 1 }
 0x3db   : > { %v9771_v53 = vsel %vm9666_vm3, %v9768_v48, %v9770_v11  ;;  %v9463_v23 = vmax.f32 %v9335_v29, 0.0  ;;  %v13147_v57 = vadd.f32 %v8860_v27, %v16150_v44  ;;  %v13017_v0 = vpop.f32.mrb[58].mxu0 }
 0x3dc   : > { %v11678_v3 = vpack.c.bf16 %v10416_v32, %v10416_v32  ;;  %v10101_v54 = vmax.f32 %v9461_v7, %v9771_v53  ;;  %v9340_v31 = vadd.f32 %v15766_v62, %v13146_v19  ;;  %v13148_v9 = vadd.f32 %v13017_v0, %v16151_v38  ;;  %v8863_v56 = vpop.f32.mrb[59].mxu0 }
 0x3dd   : > { %v10415_v33 = vld [vmem:[#allocation2 + $0x170] ss:$2 sm:$0xff]  ;;  %v9777_v18 = vsel %vm9666_vm3, %v9774_v47, %v9776_v49  ;;  %v9772_v40 = vrot.slane %v9463_v23, 1  ;;  %v9338_v25 = vadd.f32 %v15766_v62, %v13147_v57  ;;  %v13149_v4 = vadd.f32 %v8863_v56, %v16152_v42 }
 0x3de   : > { %10426 = vst.msk [vmem:[%s15578_s13 + $0x28] sm:$0xf] %vm10325_vm5, %v11678_v3  ;;  %v10417_v5 = vmax.f32 %v10411_v60, %v10415_v33  ;;  %v10104_v45 = vmax.f32 %v9464_v21, %v9777_v18  ;;  %v9468_v46 = vmax.f32 %v9340_v31, 0.0  ;;  %v15786_v7 = vadd.f32 %v15766_v62, %v13148_v9 }
 0x3df   : > { %10230 = vst.msk [vmem:[#allocation2 + $0x198] sm:$0xff] %vm10178_vm4, %v10101_v54  ;;  %v9773_v26 = vsel %vm9666_vm3, %v9770_v11, %v9772_v40  ;;  %v9775_v59 = vsel %vm9666_vm3, %v9772_v40, %v9774_v47  ;;  %v9466_v37 = vmax.f32 %v9338_v25, 0.0  ;;  %v9339_v10 = vadd.f32 %v15766_v62, %v13149_v4  ;;  %v16156_v47 = vld [vmem:[#allocation24_spill] sm:$0xff] }
 0x3e0   : > { %v11679_v35 = vpack.c.bf16 %v10417_v5, %v10417_v5  ;;  %10233 = vst.msk [vmem:[#allocation2 + $0x1b0] sm:$0xff] %vm10178_vm4, %v10104_v45  ;;  %v10102_v14 = vmax.f32 %v9462_v43, %v9773_v26  ;;  %v10103_v6 = vmax.f32 %v9463_v23, %v9775_v59  ;;  %v9469_v24 = vmax.f32 %v15786_v7, 0.0  ;;  %v10429_v19 = vld [vmem:[#allocation2 + $0x180] ss:$2 sm:$0xff] }
 0x3e1   : > { %v9778_v48 = vrot.slane %v9466_v37, 1  ;;  %v9467_v15 = vmax.f32 %v9339_v10, 0.0  ;;  %v13020_v34 = vpop.f32.mrb[60].mxu0  ;;  %v9782_v13 = vrot.slane %v9468_v46, 1 }
 0x3e2   : > { %10427 = vst.msk [vmem:[%s15578_s13 + $0x2c] sm:$0xf] %vm10325_vm5, %v11679_v35  ;;  %v13150_v36 = vadd.f32 %v13020_v34, %v16153_v39  ;;  %v8876_v58 = vpop.f32.mrb[61].mxu0  ;;  %v9784_v20 = vrot.slane %v9469_v24, 1 }
 0x3e3   : > { %10231 = vst.msk [vmem:[#allocation2 + $0x1a0] sm:$0xff] %vm10178_vm4, %v10102_v14  ;;  %10232 = vst.msk [vmem:[#allocation2 + $0x1a8] sm:$0xff] %vm10178_vm4, %v10103_v6  ;;  %v9779_v50 = vsel %vm9666_vm3, %v9776_v49, %v9778_v48  ;;  %v9780_v22 = vrot.slane %v9467_v15, 1  ;;  %v13151_v8 = vadd.f32 %v8876_v58, %v16154_v51  ;;  %v13021_v63 = vpop.f32.mrb[62].mxu0 }
 0x3e4   : > { %v10105_v16 = vmax.f32 %v9465_v17, %v9779_v50  ;;  %v9344_v61 = vadd.f32 %v15766_v62, %v13150_v36  ;;  %v13152_v21 = vadd.f32 %v13021_v63, %v16155_v41  ;;  %v8879_v43 = vpop.f32.mrb[63].mxu0  ;;  %v9785_v30 = vsel %vm9666_vm3, %v9782_v13, %v9784_v20 }
 0x3e5   : > { %v9781_v1 = vsel %vm9666_vm3, %v9778_v48, %v9780_v22  ;;  %v9783_v28 = vsel %vm9666_vm3, %v9780_v22, %v9782_v13  ;;  %v9342_v12 = vadd.f32 %v15766_v62, %v13151_v8  ;;  %v10108_v2 = vmax.f32 %v9468_v46, %v9785_v30 }
 0x3e6   : > { %10234 = vst.msk [vmem:[#allocation2 + $0x1b8] sm:$0xff] %vm10178_vm4, %v10105_v16  ;;  %v10106_v11 = vmax.f32 %v9466_v37, %v9781_v1  ;;  %v10107_v29 = vmax.f32 %v9467_v15, %v9783_v28  ;;  %v9472_v55 = vmax.f32 %v9344_v61, 0.0  ;;  %v15808_v32 = vadd.f32 %v15766_v62, %v13152_v21  ;;  %v10431_v7 = vld [vmem:[#allocation2 + $0x190] ss:$2 sm:$0xff] }
 0x3e7   : > { %v9470_v17 = vmax.f32 %v9342_v12, 0.0  ;;  %v13153_v52 = vadd.f32 %v8879_v43, %v16156_v47  ;;  %10237 = vst.msk [vmem:[#allocation2 + $0x1d0] sm:$0xff] %vm10178_vm4, %v10108_v2 }
 0x3e8   : > { %10235 = vst.msk [vmem:[#allocation2 + $0x1c0] sm:$0xff] %vm10178_vm4, %v10106_v11  ;;  %10236 = vst.msk [vmem:[#allocation2 + $0x1c8] sm:$0xff] %vm10178_vm4, %v10107_v29  ;;  %v9473_v23 = vmax.f32 %v15808_v32, 0.0  ;;  %v9790_v54 = vrot.slane %v9472_v55, 1 }
 0x3e9   : > { %v12628_v27 = vpop.f32.mrb[64].mxu1  ;;  %v9786_v49 = vrot.slane %v9470_v17, 1  ;;  %v9343_v44 = vadd.f32 %v15766_v62, %v13153_v52  ;;  %v13024_v57 = vpop.f32.mrb[64].mxu0 }
 0x3ea   : > { %v10433_v53 = vld [vmem:[#allocation2 + $0x1a0] ss:$2 sm:$0xff]  ;;  %v4905_v0 = vpop.f32.mrb[65].mxu1  ;;  %v13154_v31 = vadd.f32 %v13024_v57, %v12628_v27  ;;  %v8892_v38 = vpop.f32.mrb[65].mxu0  ;;  %v9792_v60 = vrot.slane %v9473_v23, 1 }
 0x3eb   : > { %v10436_v3 = vmax.f32 %v10429_v19, %v10433_v53  ;;  %v12629_v9 = vpop.f32.mrb[66].mxu1  ;;  %v9787_v56 = vsel %vm9666_vm3, %v9784_v20, %v9786_v49  ;;  %v9471_v33 = vmax.f32 %v9343_v44, 0.0  ;;  %v13155_v18 = vadd.f32 %v8892_v38, %v4905_v0  ;;  %v13025_v40 = vpop.f32.mrb[66].mxu0 }
 0x3ec   : > { %v4908_v25 = vpop.f32.mrb[67].mxu1  ;;  %v10109_v4 = vmax.f32 %v9469_v24, %v9787_v56  ;;  %v9348_v5 = vadd.f32 %v15766_v62, %v13154_v31  ;;  %v13156_v45 = vadd.f32 %v13025_v40, %v12629_v9  ;;  %v8895_v46 = vpop.f32.mrb[67].mxu0  ;;  %v9793_v59 = vsel %vm9666_vm3, %v9790_v54, %v9792_v60 }
 0x3ed   : > { %v11680_v42 = vpack.c.bf16 %v10436_v3, %v10436_v3  ;;  %v10435_v26 = vld [vmem:[#allocation2 + $0x1b0] ss:$2 sm:$0xff]  ;;  %v9788_v37 = vrot.slane %v9471_v33, 1  ;;  %v9346_v10 = vadd.f32 %v15766_v62, %v13155_v18  ;;  %v13157_v35 = vadd.f32 %v8895_v46, %v4908_v25 }
 0x3ee   : > { %v10437_v14 = vmax.f32 %v10431_v7, %v10435_v26  ;;  %10238 = vst.msk [vmem:[#allocation2 + $0x1d8] sm:$0xff] %vm10178_vm4, %v10109_v4  ;;  %v10112_v6 = vmax.f32 %v9472_v55, %v9793_v59  ;;  %v9476_v48 = vmax.f32 %v9348_v5, 0.0  ;;  %v15824_v24 = vadd.f32 %v15766_v62, %v13156_v45 }
 0x3ef   : > { %10446 = vst.msk [vmem:[%s15578_s13 + $0x30] sm:$0xf] %vm10325_vm5, %v11680_v42  ;;  %v9789_v15 = vsel %vm9666_vm3, %v9786_v49, %v9788_v37  ;;  %v9791_v34 = vsel %vm9666_vm3, %v9788_v37, %v9790_v54  ;;  %v9474_v13 = vmax.f32 %v9346_v10, 0.0  ;;  %v9347_v39 = vadd.f32 %v15766_v62, %v13157_v35  ;;  %v10449_v54 = vld [vmem:[#allocation2 + $0x1c0] ss:$2 sm:$0xff] }
 0x3f0   : > { %v11681_v36 = vpack.c.bf16 %v10437_v14, %v10437_v14  ;;  %10241 = vst.msk [vmem:[#allocation2 + $0x1f0] sm:$0xff] %vm10178_vm4, %v10112_v6  ;;  %v10110_v58 = vmax.f32 %v9470_v17, %v9789_v15  ;;  %v10111_v50 = vmax.f32 %v9471_v33, %v9791_v34  ;;  %v9477_v51 = vmax.f32 %v15824_v24, 0.0 }
 0x3f1   : > { %v12632_v20 = vpop.f32.mrb[68].mxu1  ;;  %v9794_v22 = vrot.slane %v9474_v13, 1  ;;  %v9475_v8 = vmax.f32 %v9347_v39, 0.0  ;;  %v13028_v63 = vpop.f32.mrb[68].mxu0  ;;  %v9798_v61 = vrot.slane %v9476_v48, 1 }
 0x3f2   : > { %v4921_v16 = vpop.f32.mrb[69].mxu1  ;;  %10447 = vst.msk [vmem:[%s15578_s13 + $0x34] sm:$0xf] %vm10325_vm5, %v11681_v36  ;;  %v13158_v41 = vadd.f32 %v13028_v63, %v12632_v20  ;;  %v8908_v21 = vpop.f32.mrb[69].mxu0  ;;  %v9800_v1 = vrot.slane %v9477_v51, 1 }
 0x3f3   : > { %10239 = vst.msk [vmem:[#allocation2 + $0x1e0] sm:$0xff] %vm10178_vm4, %v10110_v58  ;;  %10240 = vst.msk [vmem:[#allocation2 + $0x1e8] sm:$0xff] %vm10178_vm4, %v10111_v50  ;;  %v12633_v43 = vpop.f32.mrb[70].mxu1  ;;  %v9795_v30 = vsel %vm9666_vm3, %v9792_v60, %v9794_v22  ;;  %v9796_v28 = vrot.slane %v9475_v8, 1  ;;  %v13159_v12 = vadd.f32 %v8908_v21, %v4921_v16  ;;  %v13029_v2 = vpop.f32.mrb[70].mxu0 }
 0x3f4   : > { %v4924_v11 = vpop.f32.mrb[71].mxu1  ;;  %v10113_v29 = vmax.f32 %v9473_v23, %v9795_v30  ;;  %v9352_v55 = vadd.f32 %v15766_v62, %v13158_v41  ;;  %v13160_v17 = vadd.f32 %v13029_v2, %v12633_v43  ;;  %v8911_v32 = vpop.f32.mrb[71].mxu0  ;;  %v9801_v47 = vsel %vm9666_vm3, %v9798_v61, %v9800_v1 }
 0x3f5   : > { %v9797_v52 = vsel %vm9666_vm3, %v9794_v22, %v9796_v28  ;;  %v9799_v19 = vsel %vm9666_vm3, %v9796_v28, %v9798_v61  ;;  %v9350_v27 = vadd.f32 %v15766_v62, %v13159_v12  ;;  %v10116_v53 = vmax.f32 %v9476_v48, %v9801_v47  ;;  %v10451_v24 = vld [vmem:[#allocation2 + $0x1d0] ss:$2 sm:$0xff] }
 0x3f6   : > { %10242 = vst.msk [vmem:[#allocation2 + $0x1f8] sm:$0xff] %vm10178_vm4, %v10113_v29  ;;  %v10114_v49 = vmax.f32 %v9474_v13, %v9797_v52  ;;  %v10115_v44 = vmax.f32 %v9475_v8, %v9799_v19  ;;  %v9480_v57 = vmax.f32 %v9352_v55, 0.0  ;;  %v15843_v23 = vadd.f32 %v15766_v62, %v13160_v17 }
 0x3f7   : > { %v9478_v0 = vmax.f32 %v9350_v27, 0.0  ;;  %v13161_v3 = vadd.f32 %v8911_v32, %v4924_v11  ;;  %10245 = vst.msk [vmem:[#allocation2 + $0x210] sm:$0xff] %vm10178_vm4, %v10116_v53  ;;  %v14343_v32 = vmov 0  }
 0x3f8   : > { %10243 = vst.msk [vmem:[#allocation2 + $0x200] sm:$0xff] %vm10178_vm4, %v10114_v49  ;;  %10244 = vst.msk [vmem:[#allocation2 + $0x208] sm:$0xff] %vm10178_vm4, %v10115_v44  ;;  %v9481_v56 = vmax.f32 %v15843_v23, 0.0  ;;  %v9806_v25 = vrot.slane %v9480_v57, 1 }
 0x3f9   : > { %v12636_v31 = vpop.f32.mrb[72].mxu1  ;;  %v9802_v9 = vrot.slane %v9478_v0, 1  ;;  %v9351_v60 = vadd.f32 %v15766_v62, %v13161_v3  ;;  %v13032_v33 = vpop.f32.mrb[72].mxu0  ;;  %10628 = vst.msk [vmem:[%s15578_s13 + $0x80] sm:$0xf] %vm10325_vm5, %v14343_v32 }
 0x3fa   : > { %v10453_v38 = vld [vmem:[#allocation2 + $0x1e0] ss:$2 sm:$0xff]  ;;  %v4937_v18 = vpop.f32.mrb[73].mxu1  ;;  %v13162_v42 = vadd.f32 %v13032_v33, %v12636_v31  ;;  %v8924_v4 = vpop.f32.mrb[73].mxu0  ;;  %v9808_v46 = vrot.slane %v9481_v56, 1 }
 0x3fb   : > { %v10456_v40 = vmax.f32 %v10449_v54, %v10453_v38  ;;  %v12637_v5 = vpop.f32.mrb[74].mxu1  ;;  %v9803_v45 = vsel %vm9666_vm3, %v9800_v1, %v9802_v9  ;;  %v9479_v7 = vmax.f32 %v9351_v60, 0.0  ;;  %v13163_v26 = vadd.f32 %v8924_v4, %v4937_v18  ;;  %v13033_v59 = vpop.f32.mrb[74].mxu0 }
 0x3fc   : > { %v4940_v37 = vpop.f32.mrb[75].mxu1  ;;  %v10117_v35 = vmax.f32 %v9477_v51, %v9803_v45  ;;  %v9356_v14 = vadd.f32 %v15766_v62, %v13162_v42  ;;  %v13164_v6 = vadd.f32 %v13033_v59, %v12637_v5  ;;  %v8927_v48 = vpop.f32.mrb[75].mxu0  ;;  %v9809_v34 = vsel %vm9666_vm3, %v9806_v25, %v9808_v46 }
 0x3fd   : > { %v11682_v10 = vpack.c.bf16 %v10456_v40, %v10456_v40  ;;  %v10455_v15 = vld [vmem:[#allocation2 + $0x1f0] ss:$2 sm:$0xff]  ;;  %v9804_v13 = vrot.slane %v9479_v7, 1  ;;  %v9354_v39 = vadd.f32 %v15766_v62, %v13163_v26  ;;  %v13165_v36 = vadd.f32 %v8927_v48, %v4940_v37 }
 0x3fe   : > { %v10457_v58 = vmax.f32 %v10451_v24, %v10455_v15  ;;  %10246 = vst.msk [vmem:[#allocation2 + $0x218] sm:$0xff] %vm10178_vm4, %v10117_v35  ;;  %v10120_v50 = vmax.f32 %v9480_v57, %v9809_v34  ;;  %v9484_v20 = vmax.f32 %v9356_v14, 0.0  ;;  %v15858_v22 = vadd.f32 %v15766_v62, %v13164_v6 }
 0x3ff   : > { %10466 = vst.msk [vmem:[%s15578_s13 + $0x38] sm:$0xf] %vm10325_vm5, %v11682_v10  ;;  %v9805_v51 = vsel %vm9666_vm3, %v9802_v9, %v9804_v13  ;;  %v9807_v8 = vsel %vm9666_vm3, %v9804_v13, %v9806_v25  ;;  %v9482_v63 = vmax.f32 %v9354_v39, 0.0  ;;  %v9355_v16 = vadd.f32 %v15766_v62, %v13165_v36  ;;  %v10469_v42 = vld [vmem:[#allocation2 + $0x200] ss:$2 sm:$0xff] }
 0x400   : > { %v11683_v61 = vpack.c.bf16 %v10457_v58, %v10457_v58  ;;  %10249 = vst.msk [vmem:[#allocation2 + $0x230] sm:$0xff] %vm10178_vm4, %v10120_v50  ;;  %v10118_v41 = vmax.f32 %v9478_v0, %v9805_v51  ;;  %v10119_v21 = vmax.f32 %v9479_v7, %v9807_v8  ;;  %v9485_v1 = vmax.f32 %v15858_v22, 0.0 }
 0x401   : > { %v12640_v43 = vpop.f32.mrb[76].mxu1  ;;  %v9810_v30 = vrot.slane %v9482_v63, 1  ;;  %v9483_v28 = vmax.f32 %v9355_v16, 0.0  ;;  %v13036_v12 = vpop.f32.mrb[76].mxu0  ;;  %v9814_v11 = vrot.slane %v9484_v20, 1 }
 0x402   : > { %v4953_v2 = vpop.f32.mrb[77].mxu1  ;;  %10467 = vst.msk [vmem:[%s15578_s13 + $0x3c] sm:$0xf] %vm10325_vm5, %v11683_v61  ;;  %v13166_v29 = vadd.f32 %v13036_v12, %v12640_v43  ;;  %v8940_v55 = vpop.f32.mrb[77].mxu0  ;;  %v9816_v52 = vrot.slane %v9485_v1, 1 }
 0x403   : > { %10247 = vst.msk [vmem:[#allocation2 + $0x220] sm:$0xff] %vm10178_vm4, %v10118_v41  ;;  %10248 = vst.msk [vmem:[#allocation2 + $0x228] sm:$0xff] %vm10178_vm4, %v10119_v21  ;;  %v12641_v17 = vpop.f32.mrb[78].mxu1  ;;  %v9811_v47 = vsel %vm9666_vm3, %v9808_v46, %v9810_v30  ;;  %v9812_v19 = vrot.slane %v9483_v28, 1  ;;  %v13167_v27 = vadd.f32 %v8940_v55, %v4953_v2  ;;  %v13037_v53 = vpop.f32.mrb[78].mxu0 }
 0x404   : > { %v4956_v49 = vpop.f32.mrb[79].mxu1  ;;  %v10121_v44 = vmax.f32 %v9481_v56, %v9811_v47  ;;  %v9360_v57 = vadd.f32 %v15766_v62, %v13166_v29  ;;  %v13168_v0 = vadd.f32 %v13037_v53, %v12641_v17  ;;  %v8943_v23 = vpop.f32.mrb[79].mxu0  ;;  %v9817_v3 = vsel %vm9666_vm3, %v9814_v11, %v9816_v52 }
 0x405   : > { %v9813_v54 = vsel %vm9666_vm3, %v9810_v30, %v9812_v19  ;;  %v9815_v31 = vsel %vm9666_vm3, %v9812_v19, %v9814_v11  ;;  %v9358_v38 = vadd.f32 %v15766_v62, %v13167_v27  ;;  %v10124_v9 = vmax.f32 %v9484_v20, %v9817_v3  ;;  %v10471_v51 = vld [vmem:[#allocation2 + $0x210] ss:$2 sm:$0xff] }
 0x406   : > { %10250 = vst.msk [vmem:[#allocation2 + $0x238] sm:$0xff] %vm10178_vm4, %v10121_v44  ;;  %v10122_v60 = vmax.f32 %v9482_v63, %v9813_v54  ;;  %v10123_v33 = vmax.f32 %v9483_v28, %v9815_v31  ;;  %v9488_v18 = vmax.f32 %v9360_v57, 0.0  ;;  %v15879_v56 = vadd.f32 %v15766_v62, %v13168_v0 }
 0x407   : > { %v9486_v40 = vmax.f32 %v9358_v38, 0.0  ;;  %v13169_v25 = vadd.f32 %v8943_v23, %v4956_v49  ;;  %10253 = vst.msk [vmem:[#allocation2 + $0x250] sm:$0xff] %vm10178_vm4, %v10124_v9 }
 0x408   : > { %10251 = vst.msk [vmem:[#allocation2 + $0x240] sm:$0xff] %vm10178_vm4, %v10122_v60  ;;  %10252 = vst.msk [vmem:[#allocation2 + $0x248] sm:$0xff] %vm10178_vm4, %v10123_v33  ;;  %v9489_v46 = vmax.f32 %v15879_v56, 0.0  ;;  %v9822_v10 = vrot.slane %v9488_v18, 1 }
 0x409   : > { %v12644_v4 = vpop.f32.mrb[80].mxu1  ;;  %v9818_v45 = vrot.slane %v9486_v40, 1  ;;  %v9359_v7 = vadd.f32 %v15766_v62, %v13169_v25  ;;  %v13040_v26 = vpop.f32.mrb[80].mxu0 }
 0x40a   : > { %v10473_v5 = vld [vmem:[#allocation2 + $0x220] ss:$2 sm:$0xff]  ;;  %v4969_v59 = vpop.f32.mrb[81].mxu1  ;;  %v13170_v35 = vadd.f32 %v13040_v26, %v12644_v4  ;;  %v8956_v14 = vpop.f32.mrb[81].mxu0  ;;  %v9824_v24 = vrot.slane %v9489_v46, 1 }
 0x40b   : > { %v10476_v37 = vmax.f32 %v10469_v42, %v10473_v5  ;;  %v12645_v6 = vpop.f32.mrb[82].mxu1  ;;  %v9819_v48 = vsel %vm9666_vm3, %v9816_v52, %v9818_v45  ;;  %v9487_v15 = vmax.f32 %v9359_v7, 0.0  ;;  %v13171_v34 = vadd.f32 %v8956_v14, %v4969_v59  ;;  %v13041_v13 = vpop.f32.mrb[82].mxu0 }
 0x40c   : > { %v4972_v39 = vpop.f32.mrb[83].mxu1  ;;  %v10125_v58 = vmax.f32 %v9485_v1, %v9819_v48  ;;  %v9364_v50 = vadd.f32 %v15766_v62, %v13170_v35  ;;  %v13172_v20 = vadd.f32 %v13041_v13, %v12645_v6  ;;  %v8959_v22 = vpop.f32.mrb[83].mxu0  ;;  %v9825_v63 = vsel %vm9666_vm3, %v9822_v10, %v9824_v24 }
 0x40d   : > { %v11684_v36 = vpack.c.bf16 %v10476_v37, %v10476_v37  ;;  %v10475_v8 = vld [vmem:[#allocation2 + $0x230] ss:$2 sm:$0xff]  ;;  %v9820_v16 = vrot.slane %v9487_v15, 1  ;;  %v9362_v61 = vadd.f32 %v15766_v62, %v13171_v34  ;;  %v13173_v41 = vadd.f32 %v8959_v22, %v4972_v39 }
 0x40e   : > { %v10477_v21 = vmax.f32 %v10471_v51, %v10475_v8  ;;  %10254 = vst.msk [vmem:[#allocation2 + $0x258] sm:$0xff] %vm10178_vm4, %v10125_v58  ;;  %v10128_v43 = vmax.f32 %v9488_v18, %v9825_v63  ;;  %v9492_v30 = vmax.f32 %v9364_v50, 0.0  ;;  %v15894_v1 = vadd.f32 %v15766_v62, %v13172_v20 }
 0x40f   : > { %10486 = vst.msk [vmem:[%s15578_s13 + $0x40] sm:$0xf] %vm10325_vm5, %v11684_v36  ;;  %v9821_v28 = vsel %vm9666_vm3, %v9818_v45, %v9820_v16  ;;  %v9823_v12 = vsel %vm9666_vm3, %v9820_v16, %v9822_v10  ;;  %v9490_v2 = vmax.f32 %v9362_v61, 0.0  ;;  %v9363_v11 = vadd.f32 %v15766_v62, %v13173_v41  ;;  %v10489_v10 = vld [vmem:[#allocation2 + $0x240] ss:$2 sm:$0xff] }
 0x410   : > { %v11685_v29 = vpack.c.bf16 %v10477_v21, %v10477_v21  ;;  %10257 = vst.msk [vmem:[#allocation2 + $0x270] sm:$0xff] %vm10178_vm4, %v10128_v43  ;;  %v10126_v55 = vmax.f32 %v9486_v40, %v9821_v28  ;;  %v10127_v17 = vmax.f32 %v9487_v15, %v9823_v12  ;;  %v9493_v52 = vmax.f32 %v15894_v1, 0.0 }
 0x411   : > { %v12648_v32 = vpop.f32.mrb[84].mxu1  ;;  %v9826_v47 = vrot.slane %v9490_v2, 1  ;;  %v9491_v19 = vmax.f32 %v9363_v11, 0.0  ;;  %v13044_v27 = vpop.f32.mrb[84].mxu0  ;;  %v9830_v49 = vrot.slane %v9492_v30, 1 }
 0x412   : > { %v4985_v53 = vpop.f32.mrb[85].mxu1  ;;  %10487 = vst.msk [vmem:[%s15578_s13 + $0x44] sm:$0xf] %vm10325_vm5, %v11685_v29  ;;  %v13174_v44 = vadd.f32 %v13044_v27, %v12648_v32  ;;  %v8972_v57 = vpop.f32.mrb[85].mxu0  ;;  %v9832_v3 = vrot.slane %v9493_v52, 1 }
 0x413   : > { %10255 = vst.msk [vmem:[#allocation2 + $0x260] sm:$0xff] %vm10178_vm4, %v10126_v55  ;;  %10256 = vst.msk [vmem:[#allocation2 + $0x268] sm:$0xff] %vm10178_vm4, %v10127_v17  ;;  %v12649_v0 = vpop.f32.mrb[86].mxu1  ;;  %v9827_v23 = vsel %vm9666_vm3, %v9824_v24, %v9826_v47  ;;  %v9828_v54 = vrot.slane %v9491_v19, 1  ;;  %v13175_v31 = vadd.f32 %v8972_v57, %v4985_v53  ;;  %v13045_v38 = vpop.f32.mrb[86].mxu0 }
 0x414   : > { %v4988_v9 = vpop.f32.mrb[87].mxu1  ;;  %v10129_v60 = vmax.f32 %v9489_v46, %v9827_v23  ;;  %v9368_v33 = vadd.f32 %v15766_v62, %v13174_v44  ;;  %v13176_v18 = vadd.f32 %v13045_v38, %v12649_v0  ;;  %v8975_v40 = vpop.f32.mrb[87].mxu0  ;;  %v9833_v56 = vsel %vm9666_vm3, %v9830_v49, %v9832_v3 }
 0x415   : > { %v9829_v25 = vsel %vm9666_vm3, %v9826_v47, %v9828_v54  ;;  %v9831_v42 = vsel %vm9666_vm3, %v9828_v54, %v9830_v49  ;;  %v9366_v4 = vadd.f32 %v15766_v62, %v13175_v31  ;;  %v10132_v5 = vmax.f32 %v9492_v30, %v9833_v56  ;;  %v10491_v1 = vld [vmem:[#allocation2 + $0x250] ss:$2 sm:$0xff] }
 0x416   : > { %10258 = vst.msk [vmem:[#allocation2 + $0x278] sm:$0xff] %vm10178_vm4, %v10129_v60  ;;  %v10130_v45 = vmax.f32 %v9490_v2, %v9829_v25  ;;  %v10131_v7 = vmax.f32 %v9491_v19, %v9831_v42  ;;  %v9496_v26 = vmax.f32 %v9368_v33, 0.0  ;;  %v15913_v46 = vadd.f32 %v15766_v62, %v13176_v18 }
 0x417   : > { %v9494_v59 = vmax.f32 %v9366_v4, 0.0  ;;  %v13177_v37 = vadd.f32 %v8975_v40, %v4988_v9  ;;  %10261 = vst.msk [vmem:[#allocation2 + $0x290] sm:$0xff] %vm10178_vm4, %v10132_v5 }
 0x418   : > { %10259 = vst.msk [vmem:[#allocation2 + $0x280] sm:$0xff] %vm10178_vm4, %v10130_v45  ;;  %10260 = vst.msk [vmem:[#allocation2 + $0x288] sm:$0xff] %vm10178_vm4, %v10131_v7  ;;  %v9497_v48 = vmax.f32 %v15913_v46, 0.0  ;;  %v9838_v39 = vrot.slane %v9496_v26, 1 }
 0x419   : > { %v12652_v35 = vpop.f32.mrb[88].mxu1  ;;  %v9834_v6 = vrot.slane %v9494_v59, 1  ;;  %v9367_v24 = vadd.f32 %v15766_v62, %v13177_v37  ;;  %v13048_v15 = vpop.f32.mrb[88].mxu0 }
 0x41a   : > { %v10493_v14 = vld [vmem:[#allocation2 + $0x260] ss:$2 sm:$0xff]  ;;  %v5001_v34 = vpop.f32.mrb[89].mxu1  ;;  %v13178_v36 = vadd.f32 %v13048_v15, %v12652_v35  ;;  %v8988_v58 = vpop.f32.mrb[89].mxu0  ;;  %v9840_v22 = vrot.slane %v9497_v48, 1 }
 0x41b   : > { %v10496_v13 = vmax.f32 %v10489_v10, %v10493_v14  ;;  %v12653_v50 = vpop.f32.mrb[90].mxu1  ;;  %v9835_v20 = vsel %vm9666_vm3, %v9832_v3, %v9834_v6  ;;  %v9495_v51 = vmax.f32 %v9367_v24, 0.0  ;;  %v13179_v8 = vadd.f32 %v8988_v58, %v5001_v34  ;;  %v13049_v63 = vpop.f32.mrb[90].mxu0 }
 0x41c   : > { %v5004_v16 = vpop.f32.mrb[91].mxu1  ;;  %v10133_v41 = vmax.f32 %v9493_v52, %v9835_v20  ;;  %v9372_v21 = vadd.f32 %v15766_v62, %v13178_v36  ;;  %v13180_v43 = vadd.f32 %v13049_v63, %v12653_v50  ;;  %v8991_v30 = vpop.f32.mrb[91].mxu0  ;;  %v9841_v12 = vsel %vm9666_vm3, %v9838_v39, %v9840_v22 }
 0x41d   : > { %v11686_v61 = vpack.c.bf16 %v10496_v13, %v10496_v13  ;;  %v10495_v28 = vld [vmem:[#allocation2 + $0x270] ss:$2 sm:$0xff]  ;;  %v9836_v2 = vrot.slane %v9495_v51, 1  ;;  %v9370_v11 = vadd.f32 %v15766_v62, %v13179_v8  ;;  %v13181_v29 = vadd.f32 %v8991_v30, %v5004_v16 }
 0x41e   : > { %v10497_v55 = vmax.f32 %v10491_v1, %v10495_v28  ;;  %10262 = vst.msk [vmem:[#allocation2 + $0x298] sm:$0xff] %vm10178_vm4, %v10133_v41  ;;  %v10136_v17 = vmax.f32 %v9496_v26, %v9841_v12  ;;  %v9500_v32 = vmax.f32 %v9372_v21, 0.0  ;;  %v15928_v47 = vadd.f32 %v15766_v62, %v13180_v43 }
 0x41f   : > { %10506 = vst.msk [vmem:[%s15578_s13 + $0x48] sm:$0xf] %vm10325_vm5, %v11686_v61  ;;  %v9837_v52 = vsel %vm9666_vm3, %v9834_v6, %v9836_v2  ;;  %v9839_v19 = vsel %vm9666_vm3, %v9836_v2, %v9838_v39  ;;  %v9498_v27 = vmax.f32 %v9370_v11, 0.0  ;;  %v9371_v53 = vadd.f32 %v15766_v62, %v13181_v29  ;;  %v10509_v39 = vld [vmem:[#allocation2 + $0x280] ss:$2 sm:$0xff] }
 0x420   : > { %v11687_v49 = vpack.c.bf16 %v10497_v55, %v10497_v55  ;;  %10265 = vst.msk [vmem:[#allocation2 + $0x2b0] sm:$0xff] %vm10178_vm4, %v10136_v17  ;;  %v10134_v44 = vmax.f32 %v9494_v59, %v9837_v52  ;;  %v10135_v57 = vmax.f32 %v9495_v51, %v9839_v19  ;;  %v9501_v3 = vmax.f32 %v15928_v47, 0.0 }
 0x421   : > { %v12656_v0 = vpop.f32.mrb[92].mxu1  ;;  %v9842_v23 = vrot.slane %v9498_v27, 1  ;;  %v9499_v54 = vmax.f32 %v9371_v53, 0.0  ;;  %v13052_v31 = vpop.f32.mrb[92].mxu0  ;;  %v9846_v9 = vrot.slane %v9500_v32, 1 }
 0x422   : > { %v5017_v38 = vpop.f32.mrb[93].mxu1  ;;  %10507 = vst.msk [vmem:[%s15578_s13 + $0x4c] sm:$0xf] %vm10325_vm5, %v11687_v49  ;;  %v13182_v60 = vadd.f32 %v13052_v31, %v12656_v0  ;;  %v9004_v33 = vpop.f32.mrb[93].mxu0  ;;  %v9848_v56 = vrot.slane %v9501_v3, 1 }
 0x423   : > { %10263 = vst.msk [vmem:[#allocation2 + $0x2a0] sm:$0xff] %vm10178_vm4, %v10134_v44  ;;  %10264 = vst.msk [vmem:[#allocation2 + $0x2a8] sm:$0xff] %vm10178_vm4, %v10135_v57  ;;  %v12657_v18 = vpop.f32.mrb[94].mxu1  ;;  %v9843_v40 = vsel %vm9666_vm3, %v9840_v22, %v9842_v23  ;;  %v9844_v25 = vrot.slane %v9499_v54, 1  ;;  %v13183_v42 = vadd.f32 %v9004_v33, %v5017_v38  ;;  %v13053_v4 = vpop.f32.mrb[94].mxu0 }
 0x424   : > { %v5020_v5 = vpop.f32.mrb[95].mxu1  ;;  %v10137_v45 = vmax.f32 %v9497_v48, %v9843_v40  ;;  %v9376_v7 = vadd.f32 %v15766_v62, %v13182_v60  ;;  %v13184_v26 = vadd.f32 %v13053_v4, %v12657_v18  ;;  %v9007_v59 = vpop.f32.mrb[95].mxu0  ;;  %v9849_v46 = vsel %vm9666_vm3, %v9846_v9, %v9848_v56 }
 0x425   : > { %v9845_v37 = vsel %vm9666_vm3, %v9842_v23, %v9844_v25  ;;  %v9847_v10 = vsel %vm9666_vm3, %v9844_v25, %v9846_v9  ;;  %v9374_v35 = vadd.f32 %v15766_v62, %v13183_v42  ;;  %v10140_v14 = vmax.f32 %v9500_v32, %v9849_v46  ;;  %v10511_v47 = vld [vmem:[#allocation2 + $0x290] ss:$2 sm:$0xff] }
 0x426   : > { %10266 = vst.msk [vmem:[#allocation2 + $0x2b8] sm:$0xff] %vm10178_vm4, %v10137_v45  ;;  %v10138_v6 = vmax.f32 %v9498_v27, %v9845_v37  ;;  %v10139_v24 = vmax.f32 %v9499_v54, %v9847_v10  ;;  %v9504_v15 = vmax.f32 %v9376_v7, 0.0  ;;  %v15947_v48 = vadd.f32 %v15766_v62, %v13184_v26 }
 0x427   : > { %v9502_v34 = vmax.f32 %v9374_v35, 0.0  ;;  %v13185_v13 = vadd.f32 %v9007_v59, %v5020_v5  ;;  %10269 = vst.msk [vmem:[#allocation2 + $0x2d0] sm:$0xff] %vm10178_vm4, %v10140_v14 }
 0x428   : > { %10267 = vst.msk [vmem:[#allocation2 + $0x2c0] sm:$0xff] %vm10178_vm4, %v10138_v6  ;;  %10268 = vst.msk [vmem:[#allocation2 + $0x2c8] sm:$0xff] %vm10178_vm4, %v10139_v24  ;;  %v9505_v20 = vmax.f32 %v15947_v48, 0.0  ;;  %v9854_v16 = vrot.slane %v9504_v15, 1 }
 0x429   : > { %v12660_v36 = vpop.f32.mrb[96].mxu1  ;;  %v9850_v50 = vrot.slane %v9502_v34, 1  ;;  %v9375_v22 = vadd.f32 %v15766_v62, %v13185_v13  ;;  %v13056_v51 = vpop.f32.mrb[96].mxu0 }
 0x42a   : > { %v10513_v58 = vld [vmem:[#allocation2 + $0x2a0] ss:$2 sm:$0xff]  ;;  %v5033_v8 = vpop.f32.mrb[97].mxu1  ;;  %v13186_v61 = vadd.f32 %v13056_v51, %v12660_v36  ;;  %v9020_v41 = vpop.f32.mrb[97].mxu0  ;;  %v9856_v30 = vrot.slane %v9505_v20, 1 }
 0x42b   : > { %v10516_v63 = vmax.f32 %v10509_v39, %v10513_v58  ;;  %v12661_v21 = vpop.f32.mrb[98].mxu1  ;;  %v9851_v43 = vsel %vm9666_vm3, %v9848_v56, %v9850_v50  ;;  %v9503_v1 = vmax.f32 %v9375_v22, 0.0  ;;  %v13187_v28 = vadd.f32 %v9020_v41, %v5033_v8  ;;  %v13057_v12 = vpop.f32.mrb[98].mxu0 }
 0x42c   : > { %v5036_v2 = vpop.f32.mrb[99].mxu1  ;;  %v10141_v29 = vmax.f32 %v9501_v3, %v9851_v43  ;;  %v9380_v55 = vadd.f32 %v15766_v62, %v13186_v61  ;;  %v13188_v17 = vadd.f32 %v13057_v12, %v12661_v21  ;;  %v9023_v32 = vpop.f32.mrb[99].mxu0  ;;  %v9857_v19 = vsel %vm9666_vm3, %v9854_v16, %v9856_v30 }
 0x42d   : > { %v11688_v11 = vpack.c.bf16 %v10516_v63, %v10516_v63  ;;  %v10515_v52 = vld [vmem:[#allocation2 + $0x2b0] ss:$2 sm:$0xff]  ;;  %v9852_v27 = vrot.slane %v9503_v1, 1  ;;  %v9378_v53 = vadd.f32 %v15766_v62, %v13187_v28  ;;  %v13189_v49 = vadd.f32 %v9023_v32, %v5036_v2 }
 0x42e   : > { %v10517_v44 = vmax.f32 %v10511_v47, %v10515_v52  ;;  %10270 = vst.msk [vmem:[#allocation2 + $0x2d8] sm:$0xff] %vm10178_vm4, %v10141_v29  ;;  %v10144_v57 = vmax.f32 %v9504_v15, %v9857_v19  ;;  %v9508_v0 = vmax.f32 %v9380_v55, 0.0  ;;  %v15962_v23 = vadd.f32 %v15766_v62, %v13188_v17 }
 0x42f   : > { %10526 = vst.msk [vmem:[%s15578_s13 + $0x50] sm:$0xf] %vm10325_vm5, %v11688_v11  ;;  %v9853_v3 = vsel %vm9666_vm3, %v9850_v50, %v9852_v27  ;;  %v9855_v54 = vsel %vm9666_vm3, %v9852_v27, %v9854_v16  ;;  %v9506_v31 = vmax.f32 %v9378_v53, 0.0  ;;  %v9379_v38 = vadd.f32 %v15766_v62, %v13189_v49  ;;  %v10529_v16 = vld [vmem:[#allocation2 + $0x2c0] ss:$2 sm:$0xff] }
 0x430   : > { %v11689_v9 = vpack.c.bf16 %v10517_v44, %v10517_v44  ;;  %10273 = vst.msk [vmem:[#allocation2 + $0x2f0] sm:$0xff] %vm10178_vm4, %v10144_v57  ;;  %v10142_v60 = vmax.f32 %v9502_v34, %v9853_v3  ;;  %v10143_v33 = vmax.f32 %v9503_v1, %v9855_v54  ;;  %v9509_v56 = vmax.f32 %v15962_v23, 0.0 }
 0x431   : > { %v12664_v18 = vpop.f32.mrb[100].mxu1  ;;  %v9858_v40 = vrot.slane %v9506_v31, 1  ;;  %v9507_v25 = vmax.f32 %v9379_v38, 0.0  ;;  %v13060_v42 = vpop.f32.mrb[100].mxu0  ;;  %v9862_v5 = vrot.slane %v9508_v0, 1 }
 0x432   : > { %v5049_v4 = vpop.f32.mrb[101].mxu1  ;;  %10527 = vst.msk [vmem:[%s15578_s13 + $0x54] sm:$0xf] %vm10325_vm5, %v11689_v9  ;;  %v13190_v45 = vadd.f32 %v13060_v42, %v12664_v18  ;;  %v9036_v7 = vpop.f32.mrb[101].mxu0  ;;  %v9864_v46 = vrot.slane %v9509_v56, 1 }
 0x433   : > { %10271 = vst.msk [vmem:[#allocation2 + $0x2e0] sm:$0xff] %vm10178_vm4, %v10142_v60  ;;  %10272 = vst.msk [vmem:[#allocation2 + $0x2e8] sm:$0xff] %vm10178_vm4, %v10143_v33  ;;  %v12665_v26 = vpop.f32.mrb[102].mxu1  ;;  %v9859_v59 = vsel %vm9666_vm3, %v9856_v30, %v9858_v40  ;;  %v9860_v37 = vrot.slane %v9507_v25, 1  ;;  %v13191_v10 = vadd.f32 %v9036_v7, %v5049_v4  ;;  %v13061_v35 = vpop.f32.mrb[102].mxu0 }
 0x434   : > { %v5052_v14 = vpop.f32.mrb[103].mxu1  ;;  %v10145_v6 = vmax.f32 %v9505_v20, %v9859_v59  ;;  %v9384_v24 = vadd.f32 %v15766_v62, %v13190_v45  ;;  %v13192_v15 = vadd.f32 %v13061_v35, %v12665_v26  ;;  %v9039_v34 = vpop.f32.mrb[103].mxu0  ;;  %v9865_v48 = vsel %vm9666_vm3, %v9862_v5, %v9864_v46 }
 0x435   : > { %v9861_v13 = vsel %vm9666_vm3, %v9858_v40, %v9860_v37  ;;  %v9863_v39 = vsel %vm9666_vm3, %v9860_v37, %v9862_v5  ;;  %v9382_v36 = vadd.f32 %v15766_v62, %v13191_v10  ;;  %v10148_v58 = vmax.f32 %v9508_v0, %v9865_v48  ;;  %v10531_v23 = vld [vmem:[#allocation2 + $0x2d0] ss:$2 sm:$0xff] }
 0x436   : > { %10274 = vst.msk [vmem:[#allocation2 + $0x2f8] sm:$0xff] %vm10178_vm4, %v10145_v6  ;;  %v10146_v50 = vmax.f32 %v9506_v31, %v9861_v13  ;;  %v10147_v22 = vmax.f32 %v9507_v25, %v9863_v39  ;;  %v9512_v51 = vmax.f32 %v9384_v24, 0.0  ;;  %v15981_v20 = vadd.f32 %v15766_v62, %v13192_v15 }
 0x437   : > { %v9510_v8 = vmax.f32 %v9382_v36, 0.0  ;;  %v13193_v63 = vadd.f32 %v9039_v34, %v5052_v14  ;;  %10277 = vst.msk [vmem:[#allocation2 + $0x310] sm:$0xff] %vm10178_vm4, %v10148_v58 }
 0x438   : > { %10275 = vst.msk [vmem:[#allocation2 + $0x300] sm:$0xff] %vm10178_vm4, %v10146_v50  ;;  %10276 = vst.msk [vmem:[#allocation2 + $0x308] sm:$0xff] %vm10178_vm4, %v10147_v22  ;;  %v9513_v43 = vmax.f32 %v15981_v20, 0.0  ;;  %v9870_v2 = vrot.slane %v9512_v51, 1 }
 0x439   : > { %v12668_v61 = vpop.f32.mrb[104].mxu1  ;;  %v9866_v21 = vrot.slane %v9510_v8, 1  ;;  %v9383_v30 = vadd.f32 %v15766_v62, %v13193_v63  ;;  %v13064_v1 = vpop.f32.mrb[104].mxu0  ;;  %v15992_v62 = vld [vmem:[%s16111_s3] ss:$0 sm:$0xff] }
 0x43a   : > { %v10533_v41 = vld [vmem:[#allocation2 + $0x2e0] ss:$2 sm:$0xff]  ;;  %v5065_v28 = vpop.f32.mrb[105].mxu1  ;;  %v13194_v11 = vadd.f32 %v13064_v1, %v12668_v61  ;;  %v9052_v29 = vpop.f32.mrb[105].mxu0  ;;  %v9872_v32 = vrot.slane %v9513_v43, 1 }
 0x43b   : > { %v10536_v12 = vmax.f32 %v10529_v16, %v10533_v41  ;;  %v12669_v55 = vpop.f32.mrb[106].mxu1  ;;  %v9867_v17 = vsel %vm9666_vm3, %v9864_v46, %v9866_v21  ;;  %v9511_v47 = vmax.f32 %v9383_v30, 0.0  ;;  %v13195_v52 = vadd.f32 %v9052_v29, %v5065_v28  ;;  %v13065_v19 = vpop.f32.mrb[106].mxu0 }
 0x43c   : > { %v5068_v27 = vpop.f32.mrb[107].mxu1  ;;  %v10149_v49 = vmax.f32 %v9509_v56, %v9867_v17  ;;  %v9388_v44 = vadd.f32 %v15992_v62, %v13194_v11  ;;  %v13196_v57 = vadd.f32 %v13065_v19, %v12669_v55  ;;  %v9055_v0 = vpop.f32.mrb[107].mxu0  ;;  %v9873_v54 = vsel %vm9666_vm3, %v9870_v2, %v9872_v32 }
 0x43d   : > { %v11690_v53 = vpack.c.bf16 %v10536_v12, %v10536_v12  ;;  %v10535_v3 = vld [vmem:[#allocation2 + $0x2f0] ss:$2 sm:$0xff]  ;;  %v9868_v31 = vrot.slane %v9511_v47, 1  ;;  %v9386_v38 = vadd.f32 %v15992_v62, %v13195_v52  ;;  %v13197_v9 = vadd.f32 %v9055_v0, %v5068_v27 }
 0x43e   : > { %v10537_v60 = vmax.f32 %v10531_v23, %v10535_v3  ;;  %10278 = vst.msk [vmem:[#allocation2 + $0x318] sm:$0xff] %vm10178_vm4, %v10149_v49  ;;  %v10152_v33 = vmax.f32 %v9512_v51, %v9873_v54  ;;  %v9516_v18 = vmax.f32 %v9388_v44, 0.0  ;;  %v16001_v40 = vadd.f32 %v15992_v62, %v13196_v57 }
 0x43f   : > { %10546 = vst.msk [vmem:[%s15578_s13 + $0x58] sm:$0xf] %vm10325_vm5, %v11690_v53  ;;  %v9869_v56 = vsel %vm9666_vm3, %v9866_v21, %v9868_v31  ;;  %v9871_v25 = vsel %vm9666_vm3, %v9868_v31, %v9870_v2  ;;  %v9514_v42 = vmax.f32 %v9386_v38, 0.0  ;;  %v9387_v4 = vadd.f32 %v15992_v62, %v13197_v9  ;;  %v10549_v2 = vld [vmem:[#allocation2 + $0x300] ss:$2 sm:$0xff] }
 0x440   : > { %v11691_v5 = vpack.c.bf16 %v10537_v60, %v10537_v60  ;;  %10281 = vst.msk [vmem:[#allocation2 + $0x330] sm:$0xff] %vm10178_vm4, %v10152_v33  ;;  %v10150_v45 = vmax.f32 %v9510_v8, %v9869_v56  ;;  %v10151_v7 = vmax.f32 %v9511_v47, %v9871_v25  ;;  %v9517_v46 = vmax.f32 %v16001_v40, 0.0 }
 0x441   : > { %v12672_v26 = vpop.f32.mrb[108].mxu1  ;;  %v9874_v59 = vrot.slane %v9514_v42, 1  ;;  %v9515_v37 = vmax.f32 %v9387_v4, 0.0  ;;  %v13068_v10 = vpop.f32.mrb[108].mxu0  ;;  %v9878_v14 = vrot.slane %v9516_v18, 1 }
 0x442   : > { %v5081_v35 = vpop.f32.mrb[109].mxu1  ;;  %10547 = vst.msk [vmem:[%s15578_s13 + $0x5c] sm:$0xf] %vm10325_vm5, %v11691_v5  ;;  %v13198_v6 = vadd.f32 %v13068_v10, %v12672_v26  ;;  %v9068_v24 = vpop.f32.mrb[109].mxu0  ;;  %v9880_v48 = vrot.slane %v9517_v46, 1 }
 0x443   : > { %10279 = vst.msk [vmem:[#allocation2 + $0x320] sm:$0xff] %vm10178_vm4, %v10150_v45  ;;  %10280 = vst.msk [vmem:[#allocation2 + $0x328] sm:$0xff] %vm10178_vm4, %v10151_v7  ;;  %v12673_v15 = vpop.f32.mrb[110].mxu1  ;;  %v9875_v34 = vsel %vm9666_vm3, %v9872_v32, %v9874_v59  ;;  %v9876_v13 = vrot.slane %v9515_v37, 1  ;;  %v13199_v39 = vadd.f32 %v9068_v24, %v5081_v35  ;;  %v13069_v36 = vpop.f32.mrb[110].mxu0 }
 0x444   : > { %v5084_v58 = vpop.f32.mrb[111].mxu1  ;;  %v10153_v50 = vmax.f32 %v9513_v43, %v9875_v34  ;;  %v9392_v22 = vadd.f32 %v15992_v62, %v13198_v6  ;;  %v13200_v51 = vadd.f32 %v13069_v36, %v12673_v15  ;;  %v9071_v8 = vpop.f32.mrb[111].mxu0  ;;  %v9881_v20 = vsel %vm9666_vm3, %v9878_v14, %v9880_v48 }
 0x445   : > { %v9877_v63 = vsel %vm9666_vm3, %v9874_v59, %v9876_v13  ;;  %v9879_v16 = vsel %vm9666_vm3, %v9876_v13, %v9878_v14  ;;  %v9390_v61 = vadd.f32 %v15992_v62, %v13199_v39  ;;  %v10156_v41 = vmax.f32 %v9516_v18, %v9881_v20  ;;  %v10551_v40 = vld [vmem:[#allocation2 + $0x310] ss:$2 sm:$0xff] }
 0x446   : > { %10282 = vst.msk [vmem:[#allocation2 + $0x338] sm:$0xff] %vm10178_vm4, %v10153_v50  ;;  %v10154_v21 = vmax.f32 %v9514_v42, %v9877_v63  ;;  %v10155_v30 = vmax.f32 %v9515_v37, %v9879_v16  ;;  %v9520_v1 = vmax.f32 %v9392_v22, 0.0  ;;  %v16020_v43 = vadd.f32 %v15992_v62, %v13200_v51 }
 0x447   : > { %v9518_v28 = vmax.f32 %v9390_v61, 0.0  ;;  %v13201_v12 = vadd.f32 %v9071_v8, %v5084_v58  ;;  %10285 = vst.msk [vmem:[#allocation2 + $0x350] sm:$0xff] %vm10178_vm4, %v10156_v41 }
 0x448   : > { %10283 = vst.msk [vmem:[#allocation2 + $0x340] sm:$0xff] %vm10178_vm4, %v10154_v21  ;;  %10284 = vst.msk [vmem:[#allocation2 + $0x348] sm:$0xff] %vm10178_vm4, %v10155_v30  ;;  %v9521_v17 = vmax.f32 %v16020_v43, 0.0  ;;  %v9886_v27 = vrot.slane %v9520_v1, 1 }
 0x449   : > { %v12676_v11 = vpop.f32.mrb[112].mxu1  ;;  %v9882_v55 = vrot.slane %v9518_v28, 1  ;;  %v9391_v32 = vadd.f32 %v15992_v62, %v13201_v12  ;;  %v13072_v47 = vpop.f32.mrb[112].mxu0 }
 0x44a   : > { %v10553_v29 = vld [vmem:[#allocation2 + $0x320] ss:$2 sm:$0xff]  ;;  %v5097_v52 = vpop.f32.mrb[113].mxu1  ;;  %v13202_v53 = vadd.f32 %v13072_v47, %v12676_v11  ;;  %v9084_v49 = vpop.f32.mrb[113].mxu0  ;;  %v9888_v0 = vrot.slane %v9521_v17, 1 }
 0x44b   : > { %v10556_v19 = vmax.f32 %v10549_v2, %v10553_v29  ;;  %v12677_v44 = vpop.f32.mrb[114].mxu1  ;;  %v9883_v57 = vsel %vm9666_vm3, %v9880_v48, %v9882_v55  ;;  %v9519_v23 = vmax.f32 %v9391_v32, 0.0  ;;  %v13203_v3 = vadd.f32 %v9084_v49, %v5097_v52  ;;  %v13073_v54 = vpop.f32.mrb[114].mxu0 }
 0x44c   : > { %v5100_v31 = vpop.f32.mrb[115].mxu1  ;;  %v10157_v9 = vmax.f32 %v9517_v46, %v9883_v57  ;;  %v9396_v60 = vadd.f32 %v15992_v62, %v13202_v53  ;;  %v13204_v33 = vadd.f32 %v13073_v54, %v12677_v44  ;;  %v9087_v18 = vpop.f32.mrb[115].mxu0  ;;  %v9889_v25 = vsel %vm9666_vm3, %v9886_v27, %v9888_v0 }
 0x44d   : > { %v11692_v38 = vpack.c.bf16 %v10556_v19, %v10556_v19  ;;  %v10555_v56 = vld [vmem:[#allocation2 + $0x330] ss:$2 sm:$0xff]  ;;  %v9884_v42 = vrot.slane %v9519_v23, 1  ;;  %v9394_v4 = vadd.f32 %v15992_v62, %v13203_v3  ;;  %v13205_v5 = vadd.f32 %v9087_v18, %v5100_v31 }
 0x44e   : > { %v10557_v45 = vmax.f32 %v10551_v40, %v10555_v56  ;;  %10286 = vst.msk [vmem:[#allocation2 + $0x358] sm:$0xff] %vm10178_vm4, %v10157_v9  ;;  %v10160_v7 = vmax.f32 %v9520_v1, %v9889_v25  ;;  %v9524_v26 = vmax.f32 %v9396_v60, 0.0  ;;  %v16035_v59 = vadd.f32 %v15992_v62, %v13204_v33 }
 0x44f   : > { %10566 = vst.msk [vmem:[%s15578_s13 + $0x60] sm:$0xf] %vm10325_vm5, %v11692_v38  ;;  %v9885_v46 = vsel %vm9666_vm3, %v9882_v55, %v9884_v42  ;;  %v9887_v37 = vsel %vm9666_vm3, %v9884_v42, %v9886_v27  ;;  %v9522_v10 = vmax.f32 %v9394_v4, 0.0  ;;  %v9395_v35 = vadd.f32 %v15992_v62, %v13205_v5  ;;  %v10569_v27 = vld [vmem:[#allocation2 + $0x340] ss:$2 sm:$0xff] }
 0x450   : > { %v11693_v14 = vpack.c.bf16 %v10557_v45, %v10557_v45  ;;  %10289 = vst.msk [vmem:[#allocation2 + $0x370] sm:$0xff] %vm10178_vm4, %v10160_v7  ;;  %v10158_v6 = vmax.f32 %v9518_v28, %v9885_v46  ;;  %v10159_v24 = vmax.f32 %v9519_v23, %v9887_v37  ;;  %v9525_v48 = vmax.f32 %v16035_v59, 0.0 }
 0x451   : > { %v12680_v15 = vpop.f32.mrb[116].mxu1  ;;  %v9890_v34 = vrot.slane %v9522_v10, 1  ;;  %v9523_v13 = vmax.f32 %v9395_v35, 0.0  ;;  %v13076_v39 = vpop.f32.mrb[116].mxu0  ;;  %v9894_v58 = vrot.slane %v9524_v26, 1 }
 0x452   : > { %v5113_v36 = vpop.f32.mrb[117].mxu1  ;;  %10567 = vst.msk [vmem:[%s15578_s13 + $0x64] sm:$0xf] %vm10325_vm5, %v11693_v14  ;;  %v13206_v50 = vadd.f32 %v13076_v39, %v12680_v15  ;;  %v9100_v22 = vpop.f32.mrb[117].mxu0  ;;  %v9896_v20 = vrot.slane %v9525_v48, 1 }
 0x453   : > { %10287 = vst.msk [vmem:[#allocation2 + $0x360] sm:$0xff] %vm10178_vm4, %v10158_v6  ;;  %10288 = vst.msk [vmem:[#allocation2 + $0x368] sm:$0xff] %vm10178_vm4, %v10159_v24  ;;  %v12681_v51 = vpop.f32.mrb[118].mxu1  ;;  %v9891_v8 = vsel %vm9666_vm3, %v9888_v0, %v9890_v34  ;;  %v9892_v63 = vrot.slane %v9523_v13, 1  ;;  %v13207_v16 = vadd.f32 %v9100_v22, %v5113_v36  ;;  %v13077_v61 = vpop.f32.mrb[118].mxu0 }
 0x454   : > { %v5116_v41 = vpop.f32.mrb[119].mxu1  ;;  %v10161_v21 = vmax.f32 %v9521_v17, %v9891_v8  ;;  %v9400_v30 = vadd.f32 %v15992_v62, %v13206_v50  ;;  %v13208_v1 = vadd.f32 %v13077_v61, %v12681_v51  ;;  %v9103_v28 = vpop.f32.mrb[119].mxu0  ;;  %v9897_v43 = vsel %vm9666_vm3, %v9894_v58, %v9896_v20 }
 0x455   : > { %v9893_v12 = vsel %vm9666_vm3, %v9890_v34, %v9892_v63  ;;  %v9895_v2 = vsel %vm9666_vm3, %v9892_v63, %v9894_v58  ;;  %v9398_v11 = vadd.f32 %v15992_v62, %v13207_v16  ;;  %v10164_v29 = vmax.f32 %v9524_v26, %v9897_v43  ;;  %v10571_v59 = vld [vmem:[#allocation2 + $0x350] ss:$2 sm:$0xff] }
 0x456   : > { %10290 = vst.msk [vmem:[#allocation2 + $0x378] sm:$0xff] %vm10178_vm4, %v10161_v21  ;;  %v10162_v55 = vmax.f32 %v9522_v10, %v9893_v12  ;;  %v10163_v32 = vmax.f32 %v9523_v13, %v9895_v2  ;;  %v9528_v47 = vmax.f32 %v9400_v30, 0.0  ;;  %v16054_v17 = vadd.f32 %v15992_v62, %v13208_v1 }
 0x457   : > { %v9526_v52 = vmax.f32 %v9398_v11, 0.0  ;;  %v13209_v19 = vadd.f32 %v9103_v28, %v5116_v41  ;;  %10293 = vst.msk [vmem:[#allocation2 + $0x390] sm:$0xff] %vm10178_vm4, %v10164_v29 }
 0x458   : > { %10291 = vst.msk [vmem:[#allocation2 + $0x380] sm:$0xff] %vm10178_vm4, %v10162_v55  ;;  %10292 = vst.msk [vmem:[#allocation2 + $0x388] sm:$0xff] %vm10178_vm4, %v10163_v32  ;;  %v9529_v57 = vmax.f32 %v16054_v17, 0.0  ;;  %v9902_v31 = vrot.slane %v9528_v47, 1 }
 0x459   : > { %v12684_v53 = vpop.f32.mrb[120].mxu1  ;;  %v9898_v44 = vrot.slane %v9526_v52, 1  ;;  %v9399_v0 = vadd.f32 %v15992_v62, %v13209_v19 }
 0x45a   : > { %v10573_v49 = vld [vmem:[#allocation2 + $0x360] ss:$2 sm:$0xff]  ;;  %v13080_v23 = vpop.f32.mrb[120].mxu0  ;;  %v5129_v3 = vpop.f32.mrb[121].mxu1  ;;  %v9904_v18 = vrot.slane %v9529_v57, 1 }
 0x45b   : > { %v10576_v54 = vmax.f32 %v10569_v27, %v10573_v49  ;;  %v13210_v38 = vadd.f32 %v13080_v23, %v12684_v53  ;;  %v9116_v9 = vpop.f32.mrb[121].mxu0  ;;  %v12685_v60 = vpop.f32.mrb[122].mxu1  ;;  %v9899_v33 = vsel %vm9666_vm3, %v9896_v20, %v9898_v44  ;;  %v9527_v40 = vmax.f32 %v9399_v0, 0.0 }
 0x45c   : > { %v13211_v56 = vadd.f32 %v9116_v9, %v5129_v3  ;;  %v13081_v25 = vpop.f32.mrb[122].mxu0  ;;  %v5132_v42 = vpop.f32.mrb[123].mxu1  ;;  %v10165_v5 = vmax.f32 %v9525_v48, %v9899_v33  ;;  %v9905_v37 = vsel %vm9666_vm3, %v9902_v31, %v9904_v18 }
 0x45d   : > { %v11694_v4 = vpack.c.bf16 %v10576_v54, %v10576_v54  ;;  %v9404_v45 = vadd.f32 %v15992_v62, %v13210_v38  ;;  %v13212_v7 = vadd.f32 %v13081_v25, %v12685_v60  ;;  %v9119_v26 = vpop.f32.mrb[123].mxu0  ;;  %v10575_v46 = vld [vmem:[#allocation2 + $0x370] ss:$2 sm:$0xff]  ;;  %v9900_v10 = vrot.slane %v9527_v40, 1 }
 0x45e   : > { %v9402_v35 = vadd.f32 %v15992_v62, %v13211_v56  ;;  %v13213_v14 = vadd.f32 %v9119_v26, %v5132_v42  ;;  %v10577_v6 = vmax.f32 %v10571_v59, %v10575_v46  ;;  %10294 = vst.msk [vmem:[#allocation2 + $0x398] sm:$0xff] %vm10178_vm4, %v10165_v5  ;;  %v10168_v24 = vmax.f32 %v9528_v47, %v9905_v37 }
 0x45f   : > { %10586 = vst.msk [vmem:[%s15578_s13 + $0x68] sm:$0xf] %vm10325_vm5, %v11694_v4  ;;  %v9532_v15 = vmax.f32 %v9404_v45, 0.0  ;;  %v9405_v34 = vadd.f32 %v15992_v62, %v13212_v7  ;;  %v9901_v48 = vsel %vm9666_vm3, %v9898_v44, %v9900_v10  ;;  %v9903_v13 = vsel %vm9666_vm3, %v9900_v10, %v9902_v31  ;;  %v10589_v31 = vld [vmem:[#allocation2 + $0x380] ss:$2 sm:$0xff] }
 0x460   : > { %v9530_v39 = vmax.f32 %v9402_v35, 0.0  ;;  %v9403_v36 = vadd.f32 %v15992_v62, %v13213_v14  ;;  %v11695_v58 = vpack.c.bf16 %v10577_v6, %v10577_v6  ;;  %10297 = vst.msk [vmem:[#allocation2 + $0x3b0] sm:$0xff] %vm10178_vm4, %v10168_v24  ;;  %v10166_v50 = vmax.f32 %v9526_v52, %v9901_v48 }
 0x461   : > { %v10167_v22 = vmax.f32 %v9527_v40, %v9903_v13  ;;  %v12688_v51 = vpop.f32.mrb[124].mxu1  ;;  %v9533_v20 = vmax.f32 %v9405_v34, 0.0  ;;  %v9910_v41 = vrot.slane %v9532_v15, 1 }
 0x462   : > { %v9906_v8 = vrot.slane %v9530_v39, 1  ;;  %v9531_v63 = vmax.f32 %v9403_v36, 0.0  ;;  %v13084_v16 = vpop.f32.mrb[124].mxu0  ;;  %v5145_v61 = vpop.f32.mrb[125].mxu1  ;;  %10587 = vst.msk [vmem:[%s15578_s13 + $0x6c] sm:$0xf] %vm10325_vm5, %v11695_v58 }
 0x463   : > { %10295 = vst.msk [vmem:[#allocation2 + $0x3a0] sm:$0xff] %vm10178_vm4, %v10166_v50  ;;  %10296 = vst.msk [vmem:[#allocation2 + $0x3a8] sm:$0xff] %vm10178_vm4, %v10167_v22  ;;  %v13214_v21 = vadd.f32 %v13084_v16, %v12688_v51  ;;  %v9132_v30 = vpop.f32.mrb[125].mxu0  ;;  %v12689_v1 = vpop.f32.mrb[126].mxu1  ;;  %v9912_v43 = vrot.slane %v9533_v20, 1 }
 0x464   : > { %v9907_v28 = vsel %vm9666_vm3, %v9904_v18, %v9906_v8  ;;  %v9908_v12 = vrot.slane %v9531_v63, 1  ;;  %v13215_v2 = vadd.f32 %v9132_v30, %v5145_v61  ;;  %v13085_v11 = vpop.f32.mrb[126].mxu0  ;;  %v5148_v29 = vpop.f32.mrb[127].mxu1 }
 0x465   : > { %v10169_v55 = vmax.f32 %v9529_v57, %v9907_v28  ;;  %v9408_v32 = vadd.f32 %v15992_v62, %v13214_v21  ;;  %v13216_v47 = vadd.f32 %v13085_v11, %v12689_v1  ;;  %v9135_v52 = vpop.f32.mrb[127].mxu0  ;;  %v9913_v17 = vsel %vm9666_vm3, %v9910_v41, %v9912_v43  ;;  %v10591_v45 = vld [vmem:[#allocation2 + $0x390] ss:$2 sm:$0xff] }
 0x466   : > { %v9909_v19 = vsel %vm9666_vm3, %v9906_v8, %v9908_v12  ;;  %v9911_v27 = vsel %vm9666_vm3, %v9908_v12, %v9910_v41  ;;  %v9406_v53 = vadd.f32 %v15992_v62, %v13215_v2  ;;  %v10172_v49 = vmax.f32 %v9532_v15, %v9913_v17 }
 0x467   : > { %10298 = vst.msk [vmem:[#allocation2 + $0x3b8] sm:$0xff] %vm10178_vm4, %v10169_v55  ;;  %v10170_v44 = vmax.f32 %v9530_v39, %v9909_v19  ;;  %v10171_v0 = vmax.f32 %v9531_v63, %v9911_v27  ;;  %v9536_v23 = vmax.f32 %v9408_v32, 0.0  ;;  %v9409_v57 = vadd.f32 %v15992_v62, %v13216_v47 }
 0x468   : > { %v9534_v3 = vmax.f32 %v9406_v53, 0.0  ;;  %v13217_v54 = vadd.f32 %v9135_v52, %v5148_v29  ;;  %10301 = vst.msk [vmem:[#allocation2 + $0x3d0] sm:$0xff] %vm10178_vm4, %v10172_v49 }
 0x469   : > { %10299 = vst.msk [vmem:[#allocation2 + $0x3c0] sm:$0xff] %vm10178_vm4, %v10170_v44  ;;  %10300 = vst.msk [vmem:[#allocation2 + $0x3c8] sm:$0xff] %vm10178_vm4, %v10171_v0  ;;  %v9537_v60 = vmax.f32 %v9409_v57, 0.0  ;;  %v9918_v40 = vrot.slane %v9536_v23, 1 }
 0x46a   : > { %v10593_v38 = vld [vmem:[#allocation2 + $0x3a0] ss:$2 sm:$0xff]  ;;  %v9914_v9 = vrot.slane %v9534_v3, 1  ;;  %v9407_v33 = vadd.f32 %v15992_v62, %v13217_v54 }
 0x46b   : > { %v10596_v18 = vmax.f32 %v10589_v31, %v10593_v38  ;;  %v9920_v25 = vrot.slane %v9537_v60, 1 }
 0x46c   : > { %v9915_v56 = vsel %vm9666_vm3, %v9912_v43, %v9914_v9  ;;  %v9535_v42 = vmax.f32 %v9407_v33, 0.0 }
 0x46d   : > { %v11696_v4 = vpack.c.bf16 %v10596_v18, %v10596_v18  ;;  %v10173_v5 = vmax.f32 %v9533_v20, %v9915_v56  ;;  %v9921_v26 = vsel %vm9666_vm3, %v9918_v40, %v9920_v25  ;;  %v10177_v59 = vmax.f32 %v9537_v60, %v9920_v25 }
 0x46e   : > { %v10595_v7 = vld [vmem:[#allocation2 + $0x3b0] ss:$2 sm:$0xff]  ;;  %v9916_v46 = vrot.slane %v9535_v42, 1  ;;  %v10176_v62 = vmax.f32 %v9536_v23, %v9921_v26 }
 0x46f   : > { %10606 = vst.msk [vmem:[%s15578_s13 + $0x70] sm:$0xf] %vm10325_vm5, %v11696_v4  ;;  %v10597_v37 = vmax.f32 %v10591_v45, %v10595_v7 }
 0x470   : > { %10302 = vst.msk [vmem:[#allocation2 + $0x3d8] sm:$0xff] %vm10178_vm4, %v10173_v5  ;;  %v9917_v10 = vsel %vm9666_vm3, %v9914_v9, %v9916_v46  ;;  %v9919_v35 = vsel %vm9666_vm3, %v9916_v46, %v9918_v40  ;;  %10305 = vst.msk [vmem:[#allocation2 + $0x3f0] sm:$0xff] %vm10178_vm4, %v10176_v62  ;;  %v10609_v13 = vld [vmem:[#allocation2 + $0x3c0] ss:$2 sm:$0xff] }
 0x471   : > { %10307 = vst.msk [vmem:[#allocation2 + $0x3f8] sm:$0x7f] %vm10306_vm6, %v10177_v59  ;;  %v11697_v14 = vpack.c.bf16 %v10597_v37, %v10597_v37  ;;  %v10174_v6 = vmax.f32 %v9534_v3, %v9917_v10  ;;  %v10175_v24 = vmax.f32 %v9535_v42, %v9919_v35 }
 0x473   : > { %10607 = vst.msk [vmem:[%s15578_s13 + $0x74] sm:$0xf] %vm10325_vm5, %v11697_v14 }
 0x474   : > { %10303 = vst.msk [vmem:[#allocation2 + $0x3e0] sm:$0xff] %vm10178_vm4, %v10174_v6  ;;  %10304 = vst.msk [vmem:[#allocation2 + $0x3e8] sm:$0xff] %vm10178_vm4, %v10175_v24 }
 0x477   : > { %v10611_v15 = vld [vmem:[#allocation2 + $0x3d0] ss:$2 sm:$0xff] }
 0x478   : > { %v10615_v34 = vld [vmem:[#allocation2 + $0x3f0] ss:$2 sm:$0xff] }
 0x479   : > { %v10617_v48 = vmax.f32 %v10611_v15, %v10615_v34 }
 0x47b   : > { %v10613_v39 = vld [vmem:[#allocation2 + $0x3e0] ss:$2 sm:$0xff]  ;;  %v11699_v36 = vpack.c.bf16 %v10617_v48, %v10617_v48 }
 0x47c   : > { %v10616_v58 = vmax.f32 %v10609_v13, %v10613_v39 }
 0x47d   : > { %10627 = vst.msk [vmem:[%s15578_s13 + $0x7c] sm:$0xf] %vm10325_vm5, %v11699_v36 }
 0x47e   : > { %v11698_v50 = vpack.c.bf16 %v10616_v58, %v10616_v58 }
 0x480   : > { %10626 = vst.msk [vmem:[%s15578_s13 + $0x78] sm:$0xf] %vm10325_vm5, %v11698_v50 }
 0x481 PF: > { %s14_s15 = sadd.s32 1, %s14340_s15  }
 0x482   : > { %p11_p5 = scmp.ge.s32.totalorder %s14_s15, 4  }
 0x484   :  { %13 = sbr.rel (!%p11_p5) target bundleno = 1 (0x1), region = 138 }

</bundles_post_ra>
